<compile_context>
chip_gen: v7x
topology: tpu7x:2x2x1
jax: 0.10.0
libtpu: 0.0.40
codegen_flags: <defaults>
</compile_context>

<pallas_src>
import math
import jax
import jax.numpy as jnp
from jax.experimental import pallas as pl
from jax.experimental.pallas import tpu as pltpu

NUM_GROUPS = 32
EPS = 1e-5


# ---------------------------------------------------------------------------
# In-kernel helpers
# ---------------------------------------------------------------------------
def _swish(x):
    return x * jax.nn.sigmoid(x)


def _group_norm(x, gamma, beta, group_size):
    """GroupNorm over a (b, HW, C) activation with contiguous channel groups.

    Stats never touch the MXU: per-channel sum / sum-of-squares via a sublane
    reduction, then a log2(group_size) lane-shift doubling tree pools the
    per-channel stats into per-group stats and smears them back to every
    channel of the group (exact at group-start lanes, masked elsewhere).
    """
    b, n, c = x.shape
    s = group_size
    sums = jnp.sum(x, axis=1, keepdims=True)            # (b, 1, C) f32
    sqs = jnp.sum(x * x, axis=1, keepdims=True)         # (b, 1, C) f32

    if s > 1:
        lane = jax.lax.broadcasted_iota(jnp.int32, (1, 1, c), 2)
        is_start = (lane % s) == 0
        pow2 = (s & (s - 1)) == 0

        def shl(v, k):                                   # v[..., c] -> v[..., c+k]
            z = jnp.zeros(v.shape[:-1] + (k,), v.dtype)
            return jnp.concatenate([v[..., k:], z], axis=-1)

        def shr(v, k):                                   # v[..., c] -> v[..., c-k]
            z = jnp.zeros(v.shape[:-1] + (k,), v.dtype)
            return jnp.concatenate([z, v[..., :-k]], axis=-1)

        def group_pool(v):
            # pool: p[..., c] = sum_{j<s} v[..., c+j]   (exact at group starts)
            if pow2:
                p, k = v, 1
                while k < s:
                    p = p + shl(p, k)
                    k *= 2
            else:
                p = v
                for k in range(1, s):
                    p = p + shl(v, k)
            p = jnp.where(is_start, p, 0.0)
            # smear each group-start value across the s channels of its group
            if pow2:
                g, k = p, 1
                while k < s:
                    g = g + shr(g, k)
                    k *= 2
            else:
                g = p
                for k in range(1, s):
                    g = g + shr(p, k)
            return g

        gsum, gsq = group_pool(sums), group_pool(sqs)
    else:
        gsum, gsq = sums, sqs                            # 1 channel / group

    denom = float(n * s)
    mean = gsum / denom
    # single-pass E[x^2] - E[x]^2 in f32; clamp tiny negative variance
    var = jnp.maximum(gsq / denom - mean * mean, 0.0)
    return (x - mean) * jax.lax.rsqrt(var + EPS) * gamma + beta


def _conv3x3(h2d, w_ref, H, W):
    """3x3 'same' conv of a flat (M, Cin) activation (M = b*H*W, images stacked
    along rows) against tap-major (9*Cin, Cout) bf16 weights; returns (M, Cout)
    f32.  The +/-1 row / column taps come from pltpu.roll row-rotations plus
    edge masks: any wrapped row (across the array or across image boundaries)
    always lands on a masked out-of-image position, so no padded copy of the
    activation is ever materialized."""
    m, cin = h2d.shape
    hw = H * W
    g = jax.lax.broadcasted_iota(jnp.int32, (m, 1), 0)   # global flat row
    col = g % W                                          # pixel column
    rl = g % hw                                          # flat row within image
    not_l = col != 0
    not_r = col != (W - 1)

    def roll_rows(v, shift):
        shift = shift % m
        return v if shift == 0 else pltpu.roll(v, shift=shift, axis=0)

    def taps_for_kh(kh):                                 # -> (kw=0, kw=1, kw=2)
        c = h2d if kh == 1 else roll_rows(h2d, (1 - kh) * W)
        if kh == 0:                                      # source row i-1
            c = jnp.where(rl >= W, c, 0.0)
        elif kh == 2:                                    # source row i+1
            c = jnp.where(rl < hw - W, c, 0.0)
        left = jnp.where(not_l, roll_rows(c, 1), 0.0)    # source col j-1
        right = jnp.where(not_r, roll_rows(c, -1), 0.0)  # source col j+1
        return (left, c, right)

    def dot_bf16(a_f32, w):
        return jnp.dot(a_f32.astype(jnp.bfloat16), w,
                       preferred_element_type=jnp.float32)

    if cin < 128:
        # small K: one im2col matmul so the MXU K dim is 9*Cin.  Taps are built
        # (and lane-concatenated) in f32 for aligned slicing, cast once.
        cols = jnp.concatenate(
            [t for kh in range(3) for t in taps_for_kh(kh)], axis=1)
        return dot_bf16(cols, w_ref[...])

    if cin < 256:
        # medium K: 3 accumulated dots (K = 3*Cin) -- no 9x im2col slab.
        acc = None
        for kh in range(3):
            kcols = jnp.concatenate(taps_for_kh(kh), axis=1)
            part = dot_bf16(kcols, w_ref[3 * kh * cin:3 * (kh + 1) * cin, :])
            acc = part if acc is None else acc + part
        return acc

    # large K: 9 accumulated dots (K = Cin); taps are consumed one at a time so
    # no concatenated operand is ever materialized.
    acc = None
    for kh in range(3):
        for kw, t in enumerate(taps_for_kh(kh)):
            w_blk = w_ref[(kh * 3 + kw) * cin:(kh * 3 + kw + 1) * cin, :]
            part = dot_bf16(t, w_blk)
            acc = part if acc is None else acc + part
    return acc


# ---------------------------------------------------------------------------
# Pallas kernel
# ---------------------------------------------------------------------------
def _make_resblock_kernel(b_tile, H, W, s1, s2, has_proj):
    hw = H * W

    def _core(x_ref, tadd_ref, g1_ref, bt1_ref, w1_ref,
              g2_ref, bt2_ref, w2_ref, bias_ref, wsc_ref, out_ref):
        cout = out_ref.shape[-1]
        xf = x_ref[...].astype(jnp.float32)              # (b, HW, Cin)
        cin = xf.shape[-1]

        # block1: GroupNorm -> Swish -> Conv3x3
        h = _swish(_group_norm(xf, g1_ref[...], bt1_ref[...], s1))
        acc = _conv3x3(h.reshape(b_tile * hw, cin), w1_ref, H, W)
        # conv1 bias + temb projection, precomputed per image in the wrapper
        acc = acc.reshape(b_tile, hw, cout) + tadd_ref[...]

        # block2: GroupNorm -> Swish -> Dropout(eval: identity) -> Conv3x3
        h2 = _swish(_group_norm(acc, g2_ref[...], bt2_ref[...], s2))
        acc2 = _conv3x3(h2.reshape(b_tile * hw, cout), w2_ref, H, W)
        acc2 = acc2.reshape(b_tile, hw, cout)

        # shortcut: re-read x_ref late so no f32 copy of x lives across convs.
        if has_proj:                                     # 1x1-conv projection
            xs = x_ref[...].reshape(b_tile * hw, cin)
            if xs.dtype != jnp.bfloat16:
                xs = xs.astype(jnp.bfloat16)
            sc = jnp.dot(xs, wsc_ref[...],
                         preferred_element_type=jnp.float32)
            sc = sc.reshape(b_tile, hw, cout)
        else:                                            # identity
            sc = x_ref[...].astype(jnp.float32)

        out_ref[...] = (acc2 + bias_ref[...] + sc).astype(out_ref.dtype)

    if has_proj:
        def kernel(x_ref, tadd_ref, g1_ref, bt1_ref, w1_ref,
                   g2_ref, bt2_ref, w2_ref, bias_ref, wsc_ref, out_ref):
            _core(x_ref, tadd_ref, g1_ref, bt1_ref, w1_ref,
                  g2_ref, bt2_ref, w2_ref, bias_ref, wsc_ref, out_ref)
    else:
        def kernel(x_ref, tadd_ref, g1_ref, bt1_ref, w1_ref,
                   g2_ref, bt2_ref, w2_ref, bias_ref, out_ref):
            _core(x_ref, tadd_ref, g1_ref, bt1_ref, w1_ref,
                  g2_ref, bt2_ref, w2_ref, bias_ref, None, out_ref)
    return kernel


# ---------------------------------------------------------------------------
# Tiling / VMEM heuristics
# ---------------------------------------------------------------------------
def _pick_batch_tile(B, hw, cin, cout):
    """Images folded into one grid block: fill the MXU M dim when HW is small,
    keep >= 2 grid steps for the v7x megacore when possible, stay under a
    coarse per-block VMEM budget, and keep the (b*HW, C) reshape layout-free."""
    if hw % 8 != 0:
        return 1
    per_img = hw * (6 * cin + 8 * cout) * 4              # coarse f32 working set
    cap = max(1, min(B, (40 << 20) // max(per_img, 1)))
    if hw < 256:
        cap = min(cap, -(-512 // hw))                    # target M ~ 512
    else:
        cap = 1
    divs = [d for d in range(1, B + 1) if B % d == 0 and d <= cap]
    good = [d for d in divs if B // d >= 2 and d * hw >= 128]
    return max(good) if good else max(divs)


def _estimate_vmem_bytes(b_tile, hw, cin, cout, in_bytes, out_bytes, has_proj):
    m = b_tile * hw
    weights = 2 * (9 * cin * cout + 9 * cout * cout
                   + (cin * cout if has_proj else 0))
    io = 2 * m * (cin * in_bytes + cout * out_bytes)     # double-buffered blocks

    def conv_extra(c):
        if c < 128:
            k = 9 * c
        elif c < 256:
            k = 3 * c
        else:
            k = c
        return m * (k * 4 + k * 2 + 2 * c * 4)           # f32 taps + bf16 operand

    work = m * 4 * (2 * cin + 3 * cout)
    return int(weights + io + work + max(conv_extra(cin), conv_extra(cout)))


# ---------------------------------------------------------------------------
# Wrappers
# ---------------------------------------------------------------------------
def resblock_forward_nhwc(x_bhwc, temb, params, *,
                          input_dtype=jnp.bfloat16, out_dtype=jnp.float32):
    """Channels-last entry point: x is (B, H, W, C); returns (B, H, W, Cout)."""
    B, H, W, Cin = x_bhwc.shape
    Cout = params["b2"].shape[-1]
    assert Cin % NUM_GROUPS == 0 and Cout % NUM_GROUPS == 0, \
        "GroupNorm(32, C) requires channel counts divisible by 32"
    hw = H * W
    has_proj = params["wsc"] is not None

    # Ship x bf16 (halves input HBM traffic); upcast to f32 in-kernel for GN.
    x = x_bhwc.reshape(B, hw, Cin).astype(input_dtype)

    # temb projection (Swish + Linear) hoisted out of the kernel; fold conv1
    # bias into the same per-image (1, Cout) additive vector.
    t = temb * jax.nn.sigmoid(temb)
    tadd = (t @ params["wt"] + params["bt"] + params["b1"]).reshape(B, 1, Cout)

    # matmul weights shipped in bf16 (f32 accumulation in-kernel).
    w1 = params["w1"].astype(jnp.bfloat16)               # (9*Cin, Cout)
    w2 = params["w2"].astype(jnp.bfloat16)               # (9*Cout, Cout)
    bias_out = params["b2"] + (params["bsc"] if has_proj else 0.0)

    invariant_args = [params["gn1_gamma"], params["gn1_beta"], w1,
                      params["gn2_gamma"], params["gn2_beta"], w2, bias_out]
    if has_proj:
        invariant_args.append(params["wsc"].astype(jnp.bfloat16))  # (Cin, Cout)

    b_tile = _pick_batch_tile(B, hw, Cin, Cout)
    in_bytes = jnp.dtype(input_dtype).itemsize
    out_bytes = jnp.dtype(out_dtype).itemsize

    # Explicit scoped-VMEM budget from the live-set estimate, capped below the
    # chip's capacity (v7x: 64 MiB total; v5e/v6e: 128 MiB).
    est = _estimate_vmem_bytes(b_tile, hw, Cin, Cout, in_bytes, out_bytes,
                               has_proj)
    try:
        cap = int(pltpu.get_tpu_info().vmem_capacity_bytes)
    except Exception:
        cap = 64 << 20
    vmem_limit = int(min(max(32 << 20, int(est * 1.3)),
                         min(cap - (8 << 20), 100 << 20)))

    flops = B * 2 * hw * (9 * Cin * Cout + 9 * Cout * Cout
                          + (Cin * Cout if has_proj else 0))
    bytes_accessed = (int(x.size) * in_bytes + B * hw * Cout * out_bytes
                      + sum(int(a.size) * a.dtype.itemsize
                            for a in invariant_args)
                      + int(tadd.size) * 4)
    cost = pl.CostEstimate(flops=int(flops),
                           transcendentals=int(B * hw * (Cin + Cout)),
                           bytes_accessed=int(bytes_accessed))

    kernel = _make_resblock_kernel(b_tile, H, W, Cin // NUM_GROUPS,
                                   Cout // NUM_GROUPS, has_proj)

    def _inv_spec(a, single_buffer):
        nd = a.ndim
        idx = lambda i, _nd=nd: (0,) * _nd
        if single_buffer:
            # grid-invariant operand: single buffer (no duplicate copy in VMEM)
            return pl.BlockSpec(a.shape, idx, pipeline_mode=pl.Buffered(1))
        return pl.BlockSpec(a.shape, idx)

    def run(single_buffer):
        in_specs = ([pl.BlockSpec((b_tile, hw, Cin), lambda i: (i, 0, 0)),
                     pl.BlockSpec((b_tile, 1, Cout), lambda i: (i, 0, 0))]
                    + [_inv_spec(a, single_buffer) for a in invariant_args])
        return pl.pallas_call(
            kernel,
            out_shape=jax.ShapeDtypeStruct((B, hw, Cout), out_dtype),
            grid_spec=pltpu.PrefetchScalarGridSpec(
                num_scalar_prefetch=0,
                grid=(B // b_tile,),
                in_specs=in_specs,
                out_specs=pl.BlockSpec((b_tile, hw, Cout),
                                       lambda i: (i, 0, 0))),
            compiler_params=pltpu.CompilerParams(
                dimension_semantics=("parallel",),
                vmem_limit_bytes=vmem_limit),
            cost_estimate=cost,
        )(x, tadd, *invariant_args)

    try:
        out = run(True)
    except Exception:
        # Fallback for jax builds without BlockSpec pipeline_mode / Buffered(1)
        out = run(False)

    return out.reshape(B, H, W, Cout)


def resblock_forward(x_nchw, temb, params, **kw):
    """NCHW adapter for parity with the PyTorch module.

    NOTE: each transpose here is a full HBM round trip of the activation; keep
    the surrounding model channels-last and call resblock_forward_nhwc
    directly to avoid it.
    """
    x_bhwc = jnp.transpose(x_nchw, (0, 2, 3, 1))
    out = resblock_forward_nhwc(x_bhwc, temb, params, **kw)
    return jnp.transpose(out, (0, 3, 1, 2))


# ---------------------------------------------------------------------------
# Deterministic parameter initialization (mirrors ResBlock.initialize)
# ---------------------------------------------------------------------------
def xavier_uniform(key, shape, fan_in, fan_out, gain=1.0):
    limit = gain * math.sqrt(6.0 / (fan_in + fan_out))
    return jax.random.uniform(key, shape, jnp.float32, -limit, limit)


def init_params(key, in_ch, out_ch, tdim):
    k1, k2, k3, k4 = jax.random.split(key, 4)
    # conv1 3x3, xavier_uniform, zero bias (PyTorch OIHW)
    w1_oihw = xavier_uniform(k1, (out_ch, in_ch, 3, 3), in_ch * 9, out_ch * 9)
    # temb Linear (out, in), xavier_uniform, zero bias
    wlin = xavier_uniform(k2, (out_ch, tdim), tdim, out_ch)
    # conv2 3x3, xavier_uniform with gain=1e-5 (block2[-1] re-init), zero bias
    w2_oihw = xavier_uniform(k3, (out_ch, out_ch, 3, 3), out_ch * 9, out_ch * 9,
                             gain=1e-5)
    # shortcut 1x1 conv only if in_ch != out_ch, else identity (skipped in-kernel)
    if in_ch != out_ch:
        wsc_oihw = xavier_uniform(k4, (out_ch, in_ch, 1, 1), in_ch, out_ch)
        wsc = jnp.transpose(wsc_oihw[:, :, 0, 0])        # (Cin, Cout)
        bsc = jnp.zeros((1, out_ch), jnp.float32)
    else:
        wsc_oihw, wsc, bsc = None, None, None

    return dict(
        gn1_gamma=jnp.ones((1, in_ch), jnp.float32),
        gn1_beta=jnp.zeros((1, in_ch), jnp.float32),
        # (kh, kw, Cin, Cout) flattened tap-major to match the conv operand
        w1=jnp.transpose(w1_oihw, (2, 3, 1, 0)).reshape(9 * in_ch, out_ch),
        w1_oihw=w1_oihw,
        b1=jnp.zeros((1, out_ch), jnp.float32),
        wt=jnp.transpose(wlin),                          # (tdim, Cout)
        bt=jnp.zeros((1, out_ch), jnp.float32),
        gn2_gamma=jnp.ones((1, out_ch), jnp.float32),
        gn2_beta=jnp.zeros((1, out_ch), jnp.float32),
        w2=jnp.transpose(w2_oihw, (2, 3, 1, 0)).reshape(9 * out_ch, out_ch),
        w2_oihw=w2_oihw,
        b2=jnp.zeros((1, out_ch), jnp.float32),
        wsc=wsc, wsc_oihw=wsc_oihw, bsc=bsc)


# ---------------------------------------------------------------------------
# Pure-JAX f32 reference (for correctness check)
# ---------------------------------------------------------------------------
def ref_forward(x_nchw, temb, params, in_ch, out_ch):
    def gn(x, gamma, beta):
        B, C, H, W = x.shape
        xg = x.reshape(B, NUM_GROUPS, (C // NUM_GROUPS) * H * W)
        mean = xg.mean(-1, keepdims=True)
        var = xg.var(-1, keepdims=True)
        xn = ((xg - mean) / jnp.sqrt(var + EPS)).reshape(B, C, H, W)
        return xn * gamma.reshape(1, C, 1, 1) + beta.reshape(1, C, 1, 1)

    def swish(x):
        return x * jax.nn.sigmoid(x)

    def conv(x, w_oihw, b, pad):
        out = jax.lax.conv_general_dilated(
            x, w_oihw, (1, 1), ((pad, pad), (pad, pad)),
            dimension_numbers=("NCHW", "OIHW", "NCHW"))
        return out + b.reshape(1, -1, 1, 1)

    h = conv(swish(gn(x_nchw, params["gn1_gamma"][0], params["gn1_beta"][0])),
             params["w1_oihw"], params["b1"][0], 1)
    t = swish(temb) @ params["wt"] + params["bt"][0]
    h = h + t[:, :, None, None]
    h = conv(swish(gn(h, params["gn2_gamma"][0], params["gn2_beta"][0])),
             params["w2_oihw"], params["b2"][0], 1)
    if in_ch != out_ch:
        sc = conv(x_nchw, params["wsc_oihw"], params["bsc"][0], 0)
    else:
        sc = x_nchw
    return h + sc


# ---------------------------------------------------------------------------
if __name__ == "__main__":
    B, tdim, H, W = 2, 32, 8, 8
    key = jax.random.PRNGKey(0)
    kx, kt, kp1, kp2 = jax.random.split(key, 4)
    temb = jax.random.normal(kt, (B, tdim), jnp.float32)

    # case 1: in_ch != out_ch -> 1x1-conv projection shortcut
    in_ch, out_ch = 32, 64
    x = jax.random.normal(kx, (B, in_ch, H, W), jnp.float32)   # NCHW like PyTorch
    params = init_params(kp1, in_ch, out_ch, tdim)
    out = jax.block_until_ready(resblock_forward(x, temb, params))
    ref = jax.block_until_ready(ref_forward(x, temb, params, in_ch, out_ch))
    assert out.shape == (B, out_ch, H, W)
    assert jnp.allclose(out, ref, rtol=2e-2, atol=2e-2), \
        float(jnp.abs(out - ref).max())

    # case 2: in_ch == out_ch -> identity shortcut (1x1 matmul statically skipped)
    in_ch2 = out_ch2 = 64
    x2 = jax.random.normal(kx, (B, in_ch2, H, W), jnp.float32)
    params2 = init_params(kp2, in_ch2, out_ch2, tdim)
    out2 = jax.block_until_ready(resblock_forward(x2, temb, params2))
    ref2 = jax.block_until_ready(ref_forward(x2, temb, params2, in_ch2, out_ch2))
    assert out2.shape == (B, out_ch2, H, W)
    assert jnp.allclose(out2, ref2, rtol=2e-2, atol=2e-2), \
        float(jnp.abs(out2 - ref2).max())

    print("KERNEL_OK")
</pallas_src>

<mosaic_0001>
module attributes {stable_mosaic.version = 11 : i64} {
  func.func @kernel(%arg0: i32, %arg1: memref<2x64x32xbf16, #tpu.memory_space<vmem>>, %arg2: memref<2x1x64xf32, #tpu.memory_space<vmem>>, %arg3: memref<1x32xf32, #tpu.memory_space<vmem>>, %arg4: memref<1x32xf32, #tpu.memory_space<vmem>>, %arg5: memref<288x64xbf16, #tpu.memory_space<vmem>>, %arg6: memref<1x64xf32, #tpu.memory_space<vmem>>, %arg7: memref<1x64xf32, #tpu.memory_space<vmem>>, %arg8: memref<576x64xbf16, #tpu.memory_space<vmem>>, %arg9: memref<1x64xf32, #tpu.memory_space<vmem>>, %arg10: memref<32x64xbf16, #tpu.memory_space<vmem>>, %arg11: memref<2x64x64xf32, #tpu.memory_space<vmem>>) attributes {dimension_semantics = [#tpu.dimension_semantics<parallel>], iteration_bounds = array<i64: 1>, scalar_prefetch = 0 : i64, scratch_operands = 0 : i64, tpu.core_type = #tpu.core_type<tc>, window_params = [{transform_indices = @transform_0, window_bounds = array<i64: 2, 64, 32>}, {transform_indices = @transform_1, window_bounds = array<i64: 2, 1, 64>}, {pipeline_mode = #tpu.pipeline_mode<synchronous>, transform_indices = @transform_2, window_bounds = array<i64: 1, 32>}, {pipeline_mode = #tpu.pipeline_mode<synchronous>, transform_indices = @transform_3, window_bounds = array<i64: 1, 32>}, {pipeline_mode = #tpu.pipeline_mode<synchronous>, transform_indices = @transform_4, window_bounds = array<i64: 288, 64>}, {pipeline_mode = #tpu.pipeline_mode<synchronous>, transform_indices = @transform_5, window_bounds = array<i64: 1, 64>}, {pipeline_mode = #tpu.pipeline_mode<synchronous>, transform_indices = @transform_6, window_bounds = array<i64: 1, 64>}, {pipeline_mode = #tpu.pipeline_mode<synchronous>, transform_indices = @transform_7, window_bounds = array<i64: 576, 64>}, {pipeline_mode = #tpu.pipeline_mode<synchronous>, transform_indices = @transform_8, window_bounds = array<i64: 1, 64>}, {pipeline_mode = #tpu.pipeline_mode<synchronous>, transform_indices = @transform_9, window_bounds = array<i64: 32, 64>}, {transform_indices = @transform_10, window_bounds = array<i64: 2, 64, 64>}]} {
    %c0 = arith.constant 0 : index
    %c0_0 = arith.constant 0 : index
    %c0_1 = arith.constant 0 : index
    %0 = vector.load %arg1[%c0, %c0_0, %c0_1] : memref<2x64x32xbf16, #tpu.memory_space<vmem>>, vector<2x64x32xbf16>
    %1 = arith.extf %0 : vector<2x64x32xbf16> to vector<2x64x32xf32>
    %c0_2 = arith.constant 0 : index
    %c0_3 = arith.constant 0 : index
    %2 = vector.load %arg3[%c0_2, %c0_3] : memref<1x32xf32, #tpu.memory_space<vmem>>, vector<1x32xf32>
    %c0_4 = arith.constant 0 : index
    %c0_5 = arith.constant 0 : index
    %3 = vector.load %arg4[%c0_4, %c0_5] : memref<1x32xf32, #tpu.memory_space<vmem>>, vector<1x32xf32>
    %cst = arith.constant dense<0.000000e+00> : vector<2x32xf32>
    %4 = vector.multi_reduction <add>, %1, %cst [1] : vector<2x64x32xf32> to vector<2x32xf32>
    %5 = vector.shape_cast %4 : vector<2x32xf32> to vector<2x1x32xf32>
    %6 = arith.mulf %1, %1 : vector<2x64x32xf32>
    %cst_6 = arith.constant dense<0.000000e+00> : vector<2x32xf32>
    %7 = vector.multi_reduction <add>, %6, %cst_6 [1] : vector<2x64x32xf32> to vector<2x32xf32>
    %8 = vector.shape_cast %7 : vector<2x32xf32> to vector<2x1x32xf32>
    %cst_7 = arith.constant 6.400000e+01 : f32
    %9 = vector.broadcast %cst_7 : f32 to vector<2x1x32xf32>
    %10 = arith.divf %5, %9 : vector<2x1x32xf32>
    %cst_8 = arith.constant 6.400000e+01 : f32
    %11 = vector.broadcast %cst_8 : f32 to vector<2x1x32xf32>
    %12 = arith.divf %8, %11 : vector<2x1x32xf32>
    %13 = arith.mulf %10, %10 : vector<2x1x32xf32>
    %14 = arith.subf %12, %13 : vector<2x1x32xf32>
    %cst_9 = arith.constant 0.000000e+00 : f32
    %15 = vector.broadcast %cst_9 : f32 to vector<2x1x32xf32>
    %16 = arith.maximumf %14, %15 : vector<2x1x32xf32>
    %17 = vector.broadcast %10 : vector<2x1x32xf32> to vector<2x64x32xf32>
    %18 = arith.subf %1, %17 : vector<2x64x32xf32>
    %cst_10 = arith.constant 9.99999974E-6 : f32
    %19 = vector.broadcast %cst_10 : f32 to vector<2x1x32xf32>
    %20 = arith.addf %16, %19 : vector<2x1x32xf32>
    %21 = math.rsqrt %20 : vector<2x1x32xf32>
    %22 = vector.broadcast %21 : vector<2x1x32xf32> to vector<2x64x32xf32>
    %23 = arith.mulf %18, %22 : vector<2x64x32xf32>
    %24 = vector.shape_cast %2 : vector<1x32xf32> to vector<1x1x32xf32>
    %25 = vector.broadcast %24 : vector<1x1x32xf32> to vector<2x64x32xf32>
    %26 = arith.mulf %23, %25 : vector<2x64x32xf32>
    %27 = vector.shape_cast %3 : vector<1x32xf32> to vector<1x1x32xf32>
    %28 = vector.broadcast %27 : vector<1x1x32xf32> to vector<2x64x32xf32>
    %29 = arith.addf %26, %28 : vector<2x64x32xf32>
    %30 = arith.negf %29 : vector<2x64x32xf32>
    %31 = math.exp %30 : vector<2x64x32xf32>
    %cst_11 = arith.constant 1.000000e+00 : f32
    %32 = vector.broadcast %cst_11 : f32 to vector<2x64x32xf32>
    %33 = arith.addf %32, %31 : vector<2x64x32xf32>
    %34 = arith.divf %32, %33 : vector<2x64x32xf32>
    %35 = arith.mulf %29, %34 : vector<2x64x32xf32>
    %36 = vector.shape_cast %35 : vector<2x64x32xf32> to vector<128x32xf32>
    %37 = tpu.iota {dimensions = array<i32: 0>} : vector<128x1xi32>
    %c8_i32 = arith.constant 8 : i32
    %c0_i32 = arith.constant 0 : i32
    %38 = arith.cmpi eq, %c8_i32, %c0_i32 : i32
    %c1_i32 = arith.constant 1 : i32
    %39 = arith.select %38, %c1_i32, %c8_i32 : i32
    %40 = vector.broadcast %39 : i32 to vector<128x1xi32>
    %41 = arith.remsi %37, %40 : vector<128x1xi32>
    %c0_i32_12 = arith.constant 0 : i32
    %42 = vector.broadcast %c0_i32_12 : i32 to vector<128x1xi32>
    %43 = arith.cmpi ne, %41, %42 : vector<128x1xi32>
    %c0_i32_13 = arith.constant 0 : i32
    %44 = vector.broadcast %c0_i32_13 : i32 to vector<128x1xi32>
    %45 = arith.cmpi slt, %41, %44 : vector<128x1xi32>
    %c0_i32_14 = arith.constant 0 : i32
    %46 = arith.cmpi slt, %39, %c0_i32_14 : i32
    %47 = vector.broadcast %46 : i1 to vector<128x1xi1>
    %48 = vector.broadcast %47 : vector<128x1xi1> to vector<128x1xi1>
    %49 = arith.xori %45, %48 : vector<128x1xi1>
    %50 = arith.andi %49, %43 : vector<128x1xi1>
    %51 = vector.broadcast %39 : i32 to vector<128x1xi32>
    %52 = arith.addi %41, %51 : vector<128x1xi32>
    %53 = arith.select %50, %52, %41 : vector<128x1xi1>, vector<128x1xi32>
    %c64_i32 = arith.constant 64 : i32
    %c0_i32_15 = arith.constant 0 : i32
    %54 = arith.cmpi eq, %c64_i32, %c0_i32_15 : i32
    %c1_i32_16 = arith.constant 1 : i32
    %55 = arith.select %54, %c1_i32_16, %c64_i32 : i32
    %56 = vector.broadcast %55 : i32 to vector<128x1xi32>
    %57 = arith.remsi %37, %56 : vector<128x1xi32>
    %c0_i32_17 = arith.constant 0 : i32
    %58 = vector.broadcast %c0_i32_17 : i32 to vector<128x1xi32>
    %59 = arith.cmpi ne, %57, %58 : vector<128x1xi32>
    %c0_i32_18 = arith.constant 0 : i32
    %60 = vector.broadcast %c0_i32_18 : i32 to vector<128x1xi32>
    %61 = arith.cmpi slt, %57, %60 : vector<128x1xi32>
    %c0_i32_19 = arith.constant 0 : i32
    %62 = arith.cmpi slt, %55, %c0_i32_19 : i32
    %63 = vector.broadcast %62 : i1 to vector<128x1xi1>
    %64 = vector.broadcast %63 : vector<128x1xi1> to vector<128x1xi1>
    %65 = arith.xori %61, %64 : vector<128x1xi1>
    %66 = arith.andi %65, %59 : vector<128x1xi1>
    %67 = vector.broadcast %55 : i32 to vector<128x1xi32>
    %68 = arith.addi %57, %67 : vector<128x1xi32>
    %69 = arith.select %66, %68, %57 : vector<128x1xi1>, vector<128x1xi32>
    %c0_i32_20 = arith.constant 0 : i32
    %70 = vector.broadcast %c0_i32_20 : i32 to vector<128x1xi32>
    %71 = arith.cmpi ne, %53, %70 : vector<128x1xi32>
    %c7_i32 = arith.constant 7 : i32
    %72 = vector.broadcast %c7_i32 : i32 to vector<128x1xi32>
    %73 = arith.cmpi ne, %53, %72 : vector<128x1xi32>
    %c8_i32_21 = arith.constant 8 : i32
    %74 = tpu.dynamic_rotate %36 by %c8_i32_21 dim 0 : vector<128x32xf32>, i32 -> vector<128x32xf32>
    %c8_i32_22 = arith.constant 8 : i32
    %75 = vector.broadcast %c8_i32_22 : i32 to vector<128x1xi32>
    %76 = arith.cmpi sge, %69, %75 : vector<128x1xi32>
    %cst_23 = arith.constant 0.000000e+00 : f32
    %77 = vector.shape_cast %76 : vector<128x1xi1> to vector<128x1xi1>
    %78 = vector.broadcast %77 : vector<128x1xi1> to vector<128x32xi1>
    %79 = vector.broadcast %cst_23 : f32 to vector<128x32xf32>
    %80 = arith.select %78, %74, %79 : vector<128x32xi1>, vector<128x32xf32>
    %c1_i32_24 = arith.constant 1 : i32
    %81 = tpu.dynamic_rotate %80 by %c1_i32_24 dim 0 : vector<128x32xf32>, i32 -> vector<128x32xf32>
    %cst_25 = arith.constant 0.000000e+00 : f32
    %82 = vector.shape_cast %71 : vector<128x1xi1> to vector<128x1xi1>
    %83 = vector.broadcast %82 : vector<128x1xi1> to vector<128x32xi1>
    %84 = vector.broadcast %cst_25 : f32 to vector<128x32xf32>
    %85 = arith.select %83, %81, %84 : vector<128x32xi1>, vector<128x32xf32>
    %c127_i32 = arith.constant 127 : i32
    %86 = tpu.dynamic_rotate %80 by %c127_i32 dim 0 : vector<128x32xf32>, i32 -> vector<128x32xf32>
    %cst_26 = arith.constant 0.000000e+00 : f32
    %87 = vector.shape_cast %73 : vector<128x1xi1> to vector<128x1xi1>
    %88 = vector.broadcast %87 : vector<128x1xi1> to vector<128x32xi1>
    %89 = vector.broadcast %cst_26 : f32 to vector<128x32xf32>
    %90 = arith.select %88, %86, %89 : vector<128x32xi1>, vector<128x32xf32>
    %c1_i32_27 = arith.constant 1 : i32
    %91 = tpu.dynamic_rotate %36 by %c1_i32_27 dim 0 : vector<128x32xf32>, i32 -> vector<128x32xf32>
    %cst_28 = arith.constant 0.000000e+00 : f32
    %92 = vector.shape_cast %71 : vector<128x1xi1> to vector<128x1xi1>
    %93 = vector.broadcast %92 : vector<128x1xi1> to vector<128x32xi1>
    %94 = vector.broadcast %cst_28 : f32 to vector<128x32xf32>
    %95 = arith.select %93, %91, %94 : vector<128x32xi1>, vector<128x32xf32>
    %c127_i32_29 = arith.constant 127 : i32
    %96 = tpu.dynamic_rotate %36 by %c127_i32_29 dim 0 : vector<128x32xf32>, i32 -> vector<128x32xf32>
    %cst_30 = arith.constant 0.000000e+00 : f32
    %97 = vector.shape_cast %73 : vector<128x1xi1> to vector<128x1xi1>
    %98 = vector.broadcast %97 : vector<128x1xi1> to vector<128x32xi1>
    %99 = vector.broadcast %cst_30 : f32 to vector<128x32xf32>
    %100 = arith.select %98, %96, %99 : vector<128x32xi1>, vector<128x32xf32>
    %c120_i32 = arith.constant 120 : i32
    %101 = tpu.dynamic_rotate %36 by %c120_i32 dim 0 : vector<128x32xf32>, i32 -> vector<128x32xf32>
    %c56_i32 = arith.constant 56 : i32
    %102 = vector.broadcast %c56_i32 : i32 to vector<128x1xi32>
    %103 = arith.cmpi slt, %69, %102 : vector<128x1xi32>
    %cst_31 = arith.constant 0.000000e+00 : f32
    %104 = vector.shape_cast %103 : vector<128x1xi1> to vector<128x1xi1>
    %105 = vector.broadcast %104 : vector<128x1xi1> to vector<128x32xi1>
    %106 = vector.broadcast %cst_31 : f32 to vector<128x32xf32>
    %107 = arith.select %105, %101, %106 : vector<128x32xi1>, vector<128x32xf32>
    %c1_i32_32 = arith.constant 1 : i32
    %108 = tpu.dynamic_rotate %107 by %c1_i32_32 dim 0 : vector<128x32xf32>, i32 -> vector<128x32xf32>
    %cst_33 = arith.constant 0.000000e+00 : f32
    %109 = vector.shape_cast %71 : vector<128x1xi1> to vector<128x1xi1>
    %110 = vector.broadcast %109 : vector<128x1xi1> to vector<128x32xi1>
    %111 = vector.broadcast %cst_33 : f32 to vector<128x32xf32>
    %112 = arith.select %110, %108, %111 : vector<128x32xi1>, vector<128x32xf32>
    %c127_i32_34 = arith.constant 127 : i32
    %113 = tpu.dynamic_rotate %107 by %c127_i32_34 dim 0 : vector<128x32xf32>, i32 -> vector<128x32xf32>
    %cst_35 = arith.constant 0.000000e+00 : f32
    %114 = vector.shape_cast %73 : vector<128x1xi1> to vector<128x1xi1>
    %115 = vector.broadcast %114 : vector<128x1xi1> to vector<128x32xi1>
    %116 = vector.broadcast %cst_35 : f32 to vector<128x32xf32>
    %117 = arith.select %115, %113, %116 : vector<128x32xi1>, vector<128x32xf32>
    %118 = tpu.concatenate %85, %80, %90, %95, %36, %100, %112, %107, %117 in 1 : vector<128x32xf32>, vector<128x32xf32>, vector<128x32xf32>, vector<128x32xf32>, vector<128x32xf32>, vector<128x32xf32>, vector<128x32xf32>, vector<128x32xf32>, vector<128x32xf32> -> vector<128x288xf32>
    %c0_36 = arith.constant 0 : index
    %c0_37 = arith.constant 0 : index
    %119 = vector.load %arg5[%c0_36, %c0_37] : memref<288x64xbf16, #tpu.memory_space<vmem>>, vector<288x64xbf16>
    %120 = arith.truncf %118 : vector<128x288xf32> to vector<128x288xbf16>
    %cst_38 = arith.constant dense<0.000000e+00> : vector<128x64xf32>
    %121 = tpu.matmul %120, %119, %cst_38 {dimension_numbers = #tpu.dot_dimension_numbers<[1], [0], [0], [1], [0, 0, 1, 1], [], []>} : vector<128x288xbf16>, vector<288x64xbf16>, vector<128x64xf32> -> vector<128x64xf32>
    %122 = vector.shape_cast %121 : vector<128x64xf32> to vector<2x64x64xf32>
    %c0_39 = arith.constant 0 : index
    %c0_40 = arith.constant 0 : index
    %c0_41 = arith.constant 0 : index
    %123 = vector.load %arg2[%c0_39, %c0_40, %c0_41] : memref<2x1x64xf32, #tpu.memory_space<vmem>>, vector<2x1x64xf32>
    %124 = vector.broadcast %123 : vector<2x1x64xf32> to vector<2x64x64xf32>
    %125 = arith.addf %122, %124 : vector<2x64x64xf32>
    %c0_42 = arith.constant 0 : index
    %c0_43 = arith.constant 0 : index
    %126 = vector.load %arg6[%c0_42, %c0_43] : memref<1x64xf32, #tpu.memory_space<vmem>>, vector<1x64xf32>
    %c0_44 = arith.constant 0 : index
    %c0_45 = arith.constant 0 : index
    %127 = vector.load %arg7[%c0_44, %c0_45] : memref<1x64xf32, #tpu.memory_space<vmem>>, vector<1x64xf32>
    %cst_46 = arith.constant dense<0.000000e+00> : vector<2x64xf32>
    %128 = vector.multi_reduction <add>, %125, %cst_46 [1] : vector<2x64x64xf32> to vector<2x64xf32>
    %129 = vector.shape_cast %128 : vector<2x64xf32> to vector<2x1x64xf32>
    %130 = arith.mulf %125, %125 : vector<2x64x64xf32>
    %cst_47 = arith.constant dense<0.000000e+00> : vector<2x64xf32>
    %131 = vector.multi_reduction <add>, %130, %cst_47 [1] : vector<2x64x64xf32> to vector<2x64xf32>
    %132 = vector.shape_cast %131 : vector<2x64xf32> to vector<2x1x64xf32>
    %133 = tpu.iota {dimensions = array<i32: 2>} : vector<1x1x64xi32>
    %c2_i32 = arith.constant 2 : i32
    %c0_i32_48 = arith.constant 0 : i32
    %134 = arith.cmpi eq, %c2_i32, %c0_i32_48 : i32
    %c1_i32_49 = arith.constant 1 : i32
    %135 = arith.select %134, %c1_i32_49, %c2_i32 : i32
    %136 = vector.broadcast %135 : i32 to vector<1x1x64xi32>
    %137 = arith.remsi %133, %136 : vector<1x1x64xi32>
    %c0_i32_50 = arith.constant 0 : i32
    %138 = vector.broadcast %c0_i32_50 : i32 to vector<1x1x64xi32>
    %139 = arith.cmpi ne, %137, %138 : vector<1x1x64xi32>
    %c0_i32_51 = arith.constant 0 : i32
    %140 = vector.broadcast %c0_i32_51 : i32 to vector<1x1x64xi32>
    %141 = arith.cmpi slt, %137, %140 : vector<1x1x64xi32>
    %c0_i32_52 = arith.constant 0 : i32
    %142 = arith.cmpi slt, %135, %c0_i32_52 : i32
    %143 = vector.broadcast %142 : i1 to vector<1x1x64xi1>
    %144 = vector.broadcast %143 : vector<1x1x64xi1> to vector<1x1x64xi1>
    %145 = arith.xori %141, %144 : vector<1x1x64xi1>
    %146 = arith.andi %145, %139 : vector<1x1x64xi1>
    %147 = vector.broadcast %135 : i32 to vector<1x1x64xi32>
    %148 = arith.addi %137, %147 : vector<1x1x64xi32>
    %149 = arith.select %146, %148, %137 : vector<1x1x64xi1>, vector<1x1x64xi32>
    %c0_i32_53 = arith.constant 0 : i32
    %150 = vector.broadcast %c0_i32_53 : i32 to vector<1x1x64xi32>
    %151 = arith.cmpi eq, %149, %150 : vector<1x1x64xi32>
    %cst_54 = arith.constant 0.000000e+00 : f32
    %152 = vector.broadcast %cst_54 : f32 to vector<2x1x1xf32>
    %153 = vector.extract_strided_slice %129 {offsets = [0, 0, 1], sizes = [2, 1, 63], strides = [1, 1, 1]} : vector<2x1x64xf32> to vector<2x1x63xf32>
    %154 = tpu.concatenate %153, %152 in 2 : vector<2x1x63xf32>, vector<2x1x1xf32> -> vector<2x1x64xf32>
    %155 = arith.addf %129, %154 : vector<2x1x64xf32>
    %cst_55 = arith.constant 0.000000e+00 : f32
    %156 = vector.shape_cast %151 : vector<1x1x64xi1> to vector<1x1x64xi1>
    %157 = vector.broadcast %156 : vector<1x1x64xi1> to vector<2x1x64xi1>
    %158 = vector.broadcast %cst_55 : f32 to vector<2x1x64xf32>
    %159 = arith.select %157, %155, %158 : vector<2x1x64xi1>, vector<2x1x64xf32>
    %cst_56 = arith.constant 0.000000e+00 : f32
    %160 = vector.broadcast %cst_56 : f32 to vector<2x1x1xf32>
    %161 = vector.extract_strided_slice %159 {offsets = [0, 0, 0], sizes = [2, 1, 63], strides = [1, 1, 1]} : vector<2x1x64xf32> to vector<2x1x63xf32>
    %162 = tpu.concatenate %160, %161 in 2 : vector<2x1x1xf32>, vector<2x1x63xf32> -> vector<2x1x64xf32>
    %163 = arith.addf %159, %162 : vector<2x1x64xf32>
    %cst_57 = arith.constant 0.000000e+00 : f32
    %164 = vector.broadcast %cst_57 : f32 to vector<2x1x1xf32>
    %165 = vector.extract_strided_slice %132 {offsets = [0, 0, 1], sizes = [2, 1, 63], strides = [1, 1, 1]} : vector<2x1x64xf32> to vector<2x1x63xf32>
    %166 = tpu.concatenate %165, %164 in 2 : vector<2x1x63xf32>, vector<2x1x1xf32> -> vector<2x1x64xf32>
    %167 = arith.addf %132, %166 : vector<2x1x64xf32>
    %cst_58 = arith.constant 0.000000e+00 : f32
    %168 = vector.shape_cast %151 : vector<1x1x64xi1> to vector<1x1x64xi1>
    %169 = vector.broadcast %168 : vector<1x1x64xi1> to vector<2x1x64xi1>
    %170 = vector.broadcast %cst_58 : f32 to vector<2x1x64xf32>
    %171 = arith.select %169, %167, %170 : vector<2x1x64xi1>, vector<2x1x64xf32>
    %cst_59 = arith.constant 0.000000e+00 : f32
    %172 = vector.broadcast %cst_59 : f32 to vector<2x1x1xf32>
    %173 = vector.extract_strided_slice %171 {offsets = [0, 0, 0], sizes = [2, 1, 63], strides = [1, 1, 1]} : vector<2x1x64xf32> to vector<2x1x63xf32>
    %174 = tpu.concatenate %172, %173 in 2 : vector<2x1x1xf32>, vector<2x1x63xf32> -> vector<2x1x64xf32>
    %175 = arith.addf %171, %174 : vector<2x1x64xf32>
    %cst_60 = arith.constant 1.280000e+02 : f32
    %176 = vector.broadcast %cst_60 : f32 to vector<2x1x64xf32>
    %177 = arith.divf %163, %176 : vector<2x1x64xf32>
    %cst_61 = arith.constant 1.280000e+02 : f32
    %178 = vector.broadcast %cst_61 : f32 to vector<2x1x64xf32>
    %179 = arith.divf %175, %178 : vector<2x1x64xf32>
    %180 = arith.mulf %177, %177 : vector<2x1x64xf32>
    %181 = arith.subf %179, %180 : vector<2x1x64xf32>
    %cst_62 = arith.constant 0.000000e+00 : f32
    %182 = vector.broadcast %cst_62 : f32 to vector<2x1x64xf32>
    %183 = arith.maximumf %181, %182 : vector<2x1x64xf32>
    %184 = vector.broadcast %177 : vector<2x1x64xf32> to vector<2x64x64xf32>
    %185 = arith.subf %125, %184 : vector<2x64x64xf32>
    %cst_63 = arith.constant 9.99999974E-6 : f32
    %186 = vector.broadcast %cst_63 : f32 to vector<2x1x64xf32>
    %187 = arith.addf %183, %186 : vector<2x1x64xf32>
    %188 = math.rsqrt %187 : vector<2x1x64xf32>
    %189 = vector.broadcast %188 : vector<2x1x64xf32> to vector<2x64x64xf32>
    %190 = arith.mulf %185, %189 : vector<2x64x64xf32>
    %191 = vector.shape_cast %126 : vector<1x64xf32> to vector<1x1x64xf32>
    %192 = vector.broadcast %191 : vector<1x1x64xf32> to vector<2x64x64xf32>
    %193 = arith.mulf %190, %192 : vector<2x64x64xf32>
    %194 = vector.shape_cast %127 : vector<1x64xf32> to vector<1x1x64xf32>
    %195 = vector.broadcast %194 : vector<1x1x64xf32> to vector<2x64x64xf32>
    %196 = arith.addf %193, %195 : vector<2x64x64xf32>
    %197 = arith.negf %196 : vector<2x64x64xf32>
    %198 = math.exp %197 : vector<2x64x64xf32>
    %cst_64 = arith.constant 1.000000e+00 : f32
    %199 = vector.broadcast %cst_64 : f32 to vector<2x64x64xf32>
    %200 = arith.addf %199, %198 : vector<2x64x64xf32>
    %201 = arith.divf %199, %200 : vector<2x64x64xf32>
    %202 = arith.mulf %196, %201 : vector<2x64x64xf32>
    %203 = vector.shape_cast %202 : vector<2x64x64xf32> to vector<128x64xf32>
    %204 = tpu.iota {dimensions = array<i32: 0>} : vector<128x1xi32>
    %c8_i32_65 = arith.constant 8 : i32
    %c0_i32_66 = arith.constant 0 : i32
    %205 = arith.cmpi eq, %c8_i32_65, %c0_i32_66 : i32
    %c1_i32_67 = arith.constant 1 : i32
    %206 = arith.select %205, %c1_i32_67, %c8_i32_65 : i32
    %207 = vector.broadcast %206 : i32 to vector<128x1xi32>
    %208 = arith.remsi %204, %207 : vector<128x1xi32>
    %c0_i32_68 = arith.constant 0 : i32
    %209 = vector.broadcast %c0_i32_68 : i32 to vector<128x1xi32>
    %210 = arith.cmpi ne, %208, %209 : vector<128x1xi32>
    %c0_i32_69 = arith.constant 0 : i32
    %211 = vector.broadcast %c0_i32_69 : i32 to vector<128x1xi32>
    %212 = arith.cmpi slt, %208, %211 : vector<128x1xi32>
    %c0_i32_70 = arith.constant 0 : i32
    %213 = arith.cmpi slt, %206, %c0_i32_70 : i32
    %214 = vector.broadcast %213 : i1 to vector<128x1xi1>
    %215 = vector.broadcast %214 : vector<128x1xi1> to vector<128x1xi1>
    %216 = arith.xori %212, %215 : vector<128x1xi1>
    %217 = arith.andi %216, %210 : vector<128x1xi1>
    %218 = vector.broadcast %206 : i32 to vector<128x1xi32>
    %219 = arith.addi %208, %218 : vector<128x1xi32>
    %220 = arith.select %217, %219, %208 : vector<128x1xi1>, vector<128x1xi32>
    %c64_i32_71 = arith.constant 64 : i32
    %c0_i32_72 = arith.constant 0 : i32
    %221 = arith.cmpi eq, %c64_i32_71, %c0_i32_72 : i32
    %c1_i32_73 = arith.constant 1 : i32
    %222 = arith.select %221, %c1_i32_73, %c64_i32_71 : i32
    %223 = vector.broadcast %222 : i32 to vector<128x1xi32>
    %224 = arith.remsi %204, %223 : vector<128x1xi32>
    %c0_i32_74 = arith.constant 0 : i32
    %225 = vector.broadcast %c0_i32_74 : i32 to vector<128x1xi32>
    %226 = arith.cmpi ne, %224, %225 : vector<128x1xi32>
    %c0_i32_75 = arith.constant 0 : i32
    %227 = vector.broadcast %c0_i32_75 : i32 to vector<128x1xi32>
    %228 = arith.cmpi slt, %224, %227 : vector<128x1xi32>
    %c0_i32_76 = arith.constant 0 : i32
    %229 = arith.cmpi slt, %222, %c0_i32_76 : i32
    %230 = vector.broadcast %229 : i1 to vector<128x1xi1>
    %231 = vector.broadcast %230 : vector<128x1xi1> to vector<128x1xi1>
    %232 = arith.xori %228, %231 : vector<128x1xi1>
    %233 = arith.andi %232, %226 : vector<128x1xi1>
    %234 = vector.broadcast %222 : i32 to vector<128x1xi32>
    %235 = arith.addi %224, %234 : vector<128x1xi32>
    %236 = arith.select %233, %235, %224 : vector<128x1xi1>, vector<128x1xi32>
    %c0_i32_77 = arith.constant 0 : i32
    %237 = vector.broadcast %c0_i32_77 : i32 to vector<128x1xi32>
    %238 = arith.cmpi ne, %220, %237 : vector<128x1xi32>
    %c7_i32_78 = arith.constant 7 : i32
    %239 = vector.broadcast %c7_i32_78 : i32 to vector<128x1xi32>
    %240 = arith.cmpi ne, %220, %239 : vector<128x1xi32>
    %c8_i32_79 = arith.constant 8 : i32
    %241 = tpu.dynamic_rotate %203 by %c8_i32_79 dim 0 : vector<128x64xf32>, i32 -> vector<128x64xf32>
    %c8_i32_80 = arith.constant 8 : i32
    %242 = vector.broadcast %c8_i32_80 : i32 to vector<128x1xi32>
    %243 = arith.cmpi sge, %236, %242 : vector<128x1xi32>
    %cst_81 = arith.constant 0.000000e+00 : f32
    %244 = vector.shape_cast %243 : vector<128x1xi1> to vector<128x1xi1>
    %245 = vector.broadcast %244 : vector<128x1xi1> to vector<128x64xi1>
    %246 = vector.broadcast %cst_81 : f32 to vector<128x64xf32>
    %247 = arith.select %245, %241, %246 : vector<128x64xi1>, vector<128x64xf32>
    %c1_i32_82 = arith.constant 1 : i32
    %248 = tpu.dynamic_rotate %247 by %c1_i32_82 dim 0 : vector<128x64xf32>, i32 -> vector<128x64xf32>
    %cst_83 = arith.constant 0.000000e+00 : f32
    %249 = vector.shape_cast %238 : vector<128x1xi1> to vector<128x1xi1>
    %250 = vector.broadcast %249 : vector<128x1xi1> to vector<128x64xi1>
    %251 = vector.broadcast %cst_83 : f32 to vector<128x64xf32>
    %252 = arith.select %250, %248, %251 : vector<128x64xi1>, vector<128x64xf32>
    %c127_i32_84 = arith.constant 127 : i32
    %253 = tpu.dynamic_rotate %247 by %c127_i32_84 dim 0 : vector<128x64xf32>, i32 -> vector<128x64xf32>
    %cst_85 = arith.constant 0.000000e+00 : f32
    %254 = vector.shape_cast %240 : vector<128x1xi1> to vector<128x1xi1>
    %255 = vector.broadcast %254 : vector<128x1xi1> to vector<128x64xi1>
    %256 = vector.broadcast %cst_85 : f32 to vector<128x64xf32>
    %257 = arith.select %255, %253, %256 : vector<128x64xi1>, vector<128x64xf32>
    %c1_i32_86 = arith.constant 1 : i32
    %258 = tpu.dynamic_rotate %203 by %c1_i32_86 dim 0 : vector<128x64xf32>, i32 -> vector<128x64xf32>
    %cst_87 = arith.constant 0.000000e+00 : f32
    %259 = vector.shape_cast %238 : vector<128x1xi1> to vector<128x1xi1>
    %260 = vector.broadcast %259 : vector<128x1xi1> to vector<128x64xi1>
    %261 = vector.broadcast %cst_87 : f32 to vector<128x64xf32>
    %262 = arith.select %260, %258, %261 : vector<128x64xi1>, vector<128x64xf32>
    %c127_i32_88 = arith.constant 127 : i32
    %263 = tpu.dynamic_rotate %203 by %c127_i32_88 dim 0 : vector<128x64xf32>, i32 -> vector<128x64xf32>
    %cst_89 = arith.constant 0.000000e+00 : f32
    %264 = vector.shape_cast %240 : vector<128x1xi1> to vector<128x1xi1>
    %265 = vector.broadcast %264 : vector<128x1xi1> to vector<128x64xi1>
    %266 = vector.broadcast %cst_89 : f32 to vector<128x64xf32>
    %267 = arith.select %265, %263, %266 : vector<128x64xi1>, vector<128x64xf32>
    %c120_i32_90 = arith.constant 120 : i32
    %268 = tpu.dynamic_rotate %203 by %c120_i32_90 dim 0 : vector<128x64xf32>, i32 -> vector<128x64xf32>
    %c56_i32_91 = arith.constant 56 : i32
    %269 = vector.broadcast %c56_i32_91 : i32 to vector<128x1xi32>
    %270 = arith.cmpi slt, %236, %269 : vector<128x1xi32>
    %cst_92 = arith.constant 0.000000e+00 : f32
    %271 = vector.shape_cast %270 : vector<128x1xi1> to vector<128x1xi1>
    %272 = vector.broadcast %271 : vector<128x1xi1> to vector<128x64xi1>
    %273 = vector.broadcast %cst_92 : f32 to vector<128x64xf32>
    %274 = arith.select %272, %268, %273 : vector<128x64xi1>, vector<128x64xf32>
    %c1_i32_93 = arith.constant 1 : i32
    %275 = tpu.dynamic_rotate %274 by %c1_i32_93 dim 0 : vector<128x64xf32>, i32 -> vector<128x64xf32>
    %cst_94 = arith.constant 0.000000e+00 : f32
    %276 = vector.shape_cast %238 : vector<128x1xi1> to vector<128x1xi1>
    %277 = vector.broadcast %276 : vector<128x1xi1> to vector<128x64xi1>
    %278 = vector.broadcast %cst_94 : f32 to vector<128x64xf32>
    %279 = arith.select %277, %275, %278 : vector<128x64xi1>, vector<128x64xf32>
    %c127_i32_95 = arith.constant 127 : i32
    %280 = tpu.dynamic_rotate %274 by %c127_i32_95 dim 0 : vector<128x64xf32>, i32 -> vector<128x64xf32>
    %cst_96 = arith.constant 0.000000e+00 : f32
    %281 = vector.shape_cast %240 : vector<128x1xi1> to vector<128x1xi1>
    %282 = vector.broadcast %281 : vector<128x1xi1> to vector<128x64xi1>
    %283 = vector.broadcast %cst_96 : f32 to vector<128x64xf32>
    %284 = arith.select %282, %280, %283 : vector<128x64xi1>, vector<128x64xf32>
    %285 = tpu.concatenate %252, %247, %257, %262, %203, %267, %279, %274, %284 in 1 : vector<128x64xf32>, vector<128x64xf32>, vector<128x64xf32>, vector<128x64xf32>, vector<128x64xf32>, vector<128x64xf32>, vector<128x64xf32>, vector<128x64xf32>, vector<128x64xf32> -> vector<128x576xf32>
    %c0_97 = arith.constant 0 : index
    %c0_98 = arith.constant 0 : index
    %286 = vector.load %arg8[%c0_97, %c0_98] : memref<576x64xbf16, #tpu.memory_space<vmem>>, vector<576x64xbf16>
    %287 = arith.truncf %285 : vector<128x576xf32> to vector<128x576xbf16>
    %cst_99 = arith.constant dense<0.000000e+00> : vector<128x64xf32>
    %288 = tpu.matmul %287, %286, %cst_99 {dimension_numbers = #tpu.dot_dimension_numbers<[1], [0], [0], [1], [0, 0, 1, 1], [], []>} : vector<128x576xbf16>, vector<576x64xbf16>, vector<128x64xf32> -> vector<128x64xf32>
    %289 = vector.shape_cast %288 : vector<128x64xf32> to vector<2x64x64xf32>
    %c0_100 = arith.constant 0 : index
    %c0_101 = arith.constant 0 : index
    %c0_102 = arith.constant 0 : index
    %290 = vector.load %arg1[%c0_100, %c0_101, %c0_102] : memref<2x64x32xbf16, #tpu.memory_space<vmem>>, vector<2x64x32xbf16>
    %291 = vector.shape_cast %290 : vector<2x64x32xbf16> to vector<128x32xbf16>
    %c0_103 = arith.constant 0 : index
    %c0_104 = arith.constant 0 : index
    %292 = vector.load %arg10[%c0_103, %c0_104] : memref<32x64xbf16, #tpu.memory_space<vmem>>, vector<32x64xbf16>
    %cst_105 = arith.constant dense<0.000000e+00> : vector<128x64xf32>
    %293 = tpu.matmul %291, %292, %cst_105 {dimension_numbers = #tpu.dot_dimension_numbers<[1], [0], [0], [1], [0, 0, 1, 1], [], []>} : vector<128x32xbf16>, vector<32x64xbf16>, vector<128x64xf32> -> vector<128x64xf32>
    %294 = vector.shape_cast %293 : vector<128x64xf32> to vector<2x64x64xf32>
    %c0_106 = arith.constant 0 : index
    %c0_107 = arith.constant 0 : index
    %295 = vector.load %arg9[%c0_106, %c0_107] : memref<1x64xf32, #tpu.memory_space<vmem>>, vector<1x64xf32>
    %296 = vector.shape_cast %295 : vector<1x64xf32> to vector<1x1x64xf32>
    %297 = vector.broadcast %296 : vector<1x1x64xf32> to vector<2x64x64xf32>
    %298 = arith.addf %289, %297 : vector<2x64x64xf32>
    %299 = arith.addf %298, %294 : vector<2x64x64xf32>
    %c0_108 = arith.constant 0 : index
    %c0_109 = arith.constant 0 : index
    %c0_110 = arith.constant 0 : index
    %300 = vector.load %arg11[%c0_108, %c0_109, %c0_110] : memref<2x64x64xf32, #tpu.memory_space<vmem>>, vector<2x64x64xf32>
    tpu.vector_store %arg11[%c0_108, %c0_109, %c0_110], %299 {strides = array<i32>} : memref<2x64x64xf32, #tpu.memory_space<vmem>>, vector<2x64x64xf32>,
    return
  }
  func.func @transform_0(%arg0: i32) -> (i32, i32, i32) {
    %c0_i32 = arith.constant 0 : i32
    %c0_i32_0 = arith.constant 0 : i32
    %c0_i32_1 = arith.constant 0 : i32
    return %arg0, %c0_i32, %c0_i32_0 : i32, i32, i32
  }
  func.func @transform_1(%arg0: i32) -> (i32, i32, i32) {
    %c0_i32 = arith.constant 0 : i32
    %c0_i32_0 = arith.constant 0 : i32
    %c0_i32_1 = arith.constant 0 : i32
    return %arg0, %c0_i32, %c0_i32_0 : i32, i32, i32
  }
  func.func @transform_2(%arg0: i32) -> (i32, i32) {
    %c0_i32 = arith.constant 0 : i32
    %c0_i32_0 = arith.constant 0 : i32
    %c0_i32_1 = arith.constant 0 : i32
    return %c0_i32, %c0_i32_0 : i32, i32
  }
  func.func @transform_3(%arg0: i32) -> (i32, i32) {
    %c0_i32 = arith.constant 0 : i32
    %c0_i32_0 = arith.constant 0 : i32
    %c0_i32_1 = arith.constant 0 : i32
    return %c0_i32, %c0_i32_0 : i32, i32
  }
  func.func @transform_4(%arg0: i32) -> (i32, i32) {
    %c0_i32 = arith.constant 0 : i32
    %c0_i32_0 = arith.constant 0 : i32
    %c0_i32_1 = arith.constant 0 : i32
    return %c0_i32, %c0_i32_0 : i32, i32
  }
  func.func @transform_5(%arg0: i32) -> (i32, i32) {
    %c0_i32 = arith.constant 0 : i32
    %c0_i32_0 = arith.constant 0 : i32
    %c0_i32_1 = arith.constant 0 : i32
    return %c0_i32, %c0_i32_0 : i32, i32
  }
  func.func @transform_6(%arg0: i32) -> (i32, i32) {
    %c0_i32 = arith.constant 0 : i32
    %c0_i32_0 = arith.constant 0 : i32
    %c0_i32_1 = arith.constant 0 : i32
    return %c0_i32, %c0_i32_0 : i32, i32
  }
  func.func @transform_7(%arg0: i32) -> (i32, i32) {
    %c0_i32 = arith.constant 0 : i32
    %c0_i32_0 = arith.constant 0 : i32
    %c0_i32_1 = arith.constant 0 : i32
    return %c0_i32, %c0_i32_0 : i32, i32
  }
  func.func @transform_8(%arg0: i32) -> (i32, i32) {
    %c0_i32 = arith.constant 0 : i32
    %c0_i32_0 = arith.constant 0 : i32
    %c0_i32_1 = arith.constant 0 : i32
    return %c0_i32, %c0_i32_0 : i32, i32
  }
  func.func @transform_9(%arg0: i32) -> (i32, i32) {
    %c0_i32 = arith.constant 0 : i32
    %c0_i32_0 = arith.constant 0 : i32
    %c0_i32_1 = arith.constant 0 : i32
    return %c0_i32, %c0_i32_0 : i32, i32
  }
  func.func @transform_10(%arg0: i32) -> (i32, i32, i32) {
    %c0_i32 = arith.constant 0 : i32
    %c0_i32_0 = arith.constant 0 : i32
    %c0_i32_1 = arith.constant 0 : i32
    return %arg0, %c0_i32, %c0_i32_0 : i32, i32, i32
  }
}

module attributes {stable_mosaic.version = 11 : i64} {
  func.func @kernel(%arg0: i32, %arg1: memref<2x64x32xbf16, #tpu.memory_space<vmem>>, %arg2: memref<2x1x64xf32, #tpu.memory_space<vmem>>, %arg3: memref<1x32xf32, #tpu.memory_space<vmem>>, %arg4: memref<1x32xf32, #tpu.memory_space<vmem>>, %arg5: memref<288x64xbf16, #tpu.memory_space<vmem>>, %arg6: memref<1x64xf32, #tpu.memory_space<vmem>>, %arg7: memref<1x64xf32, #tpu.memory_space<vmem>>, %arg8: memref<576x64xbf16, #tpu.memory_space<vmem>>, %arg9: memref<1x64xf32, #tpu.memory_space<vmem>>, %arg10: memref<32x64xbf16, #tpu.memory_space<vmem>>, %arg11: memref<2x64x64xf32, #tpu.memory_space<vmem>>) attributes {dimension_semantics = [#tpu.dimension_semantics<parallel>], iteration_bounds = array<i64: 1>, scalar_prefetch = 0 : i64, scratch_operands = 0 : i64, tpu.core_type = #tpu.core_type<tc>, window_params = [{transform_indices = @transform_0, window_bounds = array<i64: 2, 64, 32>}, {transform_indices = @transform_1, window_bounds = array<i64: 2, 1, 64>}, {pipeline_mode = #tpu.pipeline_mode<synchronous>, transform_indices = @transform_2, window_bounds = array<i64: 1, 32>}, {pipeline_mode = #tpu.pipeline_mode<synchronous>, transform_indices = @transform_3, window_bounds = array<i64: 1, 32>}, {pipeline_mode = #tpu.pipeline_mode<synchronous>, transform_indices = @transform_4, window_bounds = array<i64: 288, 64>}, {pipeline_mode = #tpu.pipeline_mode<synchronous>, transform_indices = @transform_5, window_bounds = array<i64: 1, 64>}, {pipeline_mode = #tpu.pipeline_mode<synchronous>, transform_indices = @transform_6, window_bounds = array<i64: 1, 64>}, {pipeline_mode = #tpu.pipeline_mode<synchronous>, transform_indices = @transform_7, window_bounds = array<i64: 576, 64>}, {pipeline_mode = #tpu.pipeline_mode<synchronous>, transform_indices = @transform_8, window_bounds = array<i64: 1, 64>}, {pipeline_mode = #tpu.pipeline_mode<synchronous>, transform_indices = @transform_9, window_bounds = array<i64: 32, 64>}, {transform_indices = @transform_10, window_bounds = array<i64: 2, 64, 64>}]} {
    %c0 = arith.constant 0 : index
    %c0_0 = arith.constant 0 : index
    %c0_1 = arith.constant 0 : index
    %0 = vector.load %arg1[%c0, %c0_0, %c0_1] : memref<2x64x32xbf16, #tpu.memory_space<vmem>>, vector<2x64x32xbf16>
    %1 = arith.extf %0 : vector<2x64x32xbf16> to vector<2x64x32xf32>
    %c0_2 = arith.constant 0 : index
    %c0_3 = arith.constant 0 : index
    %2 = vector.load %arg3[%c0_2, %c0_3] : memref<1x32xf32, #tpu.memory_space<vmem>>, vector<1x32xf32>
    %c0_4 = arith.constant 0 : index
    %c0_5 = arith.constant 0 : index
    %3 = vector.load %arg4[%c0_4, %c0_5] : memref<1x32xf32, #tpu.memory_space<vmem>>, vector<1x32xf32>
    %cst = arith.constant dense<0.000000e+00> : vector<2x32xf32>
    %4 = vector.multi_reduction <add>, %1, %cst [1] : vector<2x64x32xf32> to vector<2x32xf32>
    %5 = vector.shape_cast %4 : vector<2x32xf32> to vector<2x1x32xf32>
    %6 = arith.mulf %1, %1 : vector<2x64x32xf32>
    %cst_6 = arith.constant dense<0.000000e+00> : vector<2x32xf32>
    %7 = vector.multi_reduction <add>, %6, %cst_6 [1] : vector<2x64x32xf32> to vector<2x32xf32>
    %8 = vector.shape_cast %7 : vector<2x32xf32> to vector<2x1x32xf32>
    %cst_7 = arith.constant 6.400000e+01 : f32
    %9 = vector.broadcast %cst_7 : f32 to vector<2x1x32xf32>
    %10 = arith.divf %5, %9 : vector<2x1x32xf32>
    %cst_8 = arith.constant 6.400000e+01 : f32
    %11 = vector.broadcast %cst_8 : f32 to vector<2x1x32xf32>
    %12 = arith.divf %8, %11 : vector<2x1x32xf32>
    %13 = arith.mulf %10, %10 : vector<2x1x32xf32>
    %14 = arith.subf %12, %13 : vector<2x1x32xf32>
    %cst_9 = arith.constant 0.000000e+00 : f32
    %15 = vector.broadcast %cst_9 : f32 to vector<2x1x32xf32>
    %16 = arith.maximumf %14, %15 : vector<2x1x32xf32>
    %17 = vector.broadcast %10 : vector<2x1x32xf32> to vector<2x64x32xf32>
    %18 = arith.subf %1, %17 : vector<2x64x32xf32>
    %cst_10 = arith.constant 9.99999974E-6 : f32
    %19 = vector.broadcast %cst_10 : f32 to vector<2x1x32xf32>
    %20 = arith.addf %16, %19 : vector<2x1x32xf32>
    %21 = math.rsqrt %20 : vector<2x1x32xf32>
    %22 = vector.broadcast %21 : vector<2x1x32xf32> to vector<2x64x32xf32>
    %23 = arith.mulf %18, %22 : vector<2x64x32xf32>
    %24 = vector.shape_cast %2 : vector<1x32xf32> to vector<1x1x32xf32>
    %25 = vector.broadcast %24 : vector<1x1x32xf32> to vector<2x64x32xf32>
    %26 = arith.mulf %23, %25 : vector<2x64x32xf32>
    %27 = vector.shape_cast %3 : vector<1x32xf32> to vector<1x1x32xf32>
    %28 = vector.broadcast %27 : vector<1x1x32xf32> to vector<2x64x32xf32>
    %29 = arith.addf %26, %28 : vector<2x64x32xf32>
    %30 = arith.negf %29 : vector<2x64x32xf32>
    %31 = math.exp %30 : vector<2x64x32xf32>
    %cst_11 = arith.constant 1.000000e+00 : f32
    %32 = vector.broadcast %cst_11 : f32 to vector<2x64x32xf32>
    %33 = arith.addf %32, %31 : vector<2x64x32xf32>
    %34 = arith.divf %32, %33 : vector<2x64x32xf32>
    %35 = arith.mulf %29, %34 : vector<2x64x32xf32>
    %36 = vector.shape_cast %35 : vector<2x64x32xf32> to vector<128x32xf32>
    %37 = tpu.iota {dimensions = array<i32: 0>} : vector<128x1xi32>
    %c8_i32 = arith.constant 8 : i32
    %c0_i32 = arith.constant 0 : i32
    %38 = arith.cmpi eq, %c8_i32, %c0_i32 : i32
    %c1_i32 = arith.constant 1 : i32
    %39 = arith.select %38, %c1_i32, %c8_i32 : i32
    %40 = vector.broadcast %39 : i32 to vector<128x1xi32>
    %41 = arith.remsi %37, %40 : vector<128x1xi32>
    %c0_i32_12 = arith.constant 0 : i32
    %42 = vector.broadcast %c0_i32_12 : i32 to vector<128x1xi32>
    %43 = arith.cmpi ne, %41, %42 : vector<128x1xi32>
    %c0_i32_13 = arith.constant 0 : i32
    %44 = vector.broadcast %c0_i32_13 : i32 to vector<128x1xi32>
    %45 = arith.cmpi slt, %41, %44 : vector<128x1xi32>
    %c0_i32_14 = arith.constant 0 : i32
    %46 = arith.cmpi slt, %39, %c0_i32_14 : i32
    %47 = vector.broadcast %46 : i1 to vector<128x1xi1>
    %48 = vector.broadcast %47 : vector<128x1xi1> to vector<128x1xi1>
    %49 = arith.xori %45, %48 : vector<128x1xi1>
    %50 = arith.andi %49, %43 : vector<128x1xi1>
    %51 = vector.broadcast %39 : i32 to vector<128x1xi32>
    %52 = arith.addi %41, %51 : vector<128x1xi32>
    %53 = arith.select %50, %52, %41 : vector<128x1xi1>, vector<128x1xi32>
    %c64_i32 = arith.constant 64 : i32
    %c0_i32_15 = arith.constant 0 : i32
    %54 = arith.cmpi eq, %c64_i32, %c0_i32_15 : i32
    %c1_i32_16 = arith.constant 1 : i32
    %55 = arith.select %54, %c1_i32_16, %c64_i32 : i32
    %56 = vector.broadcast %55 : i32 to vector<128x1xi32>
    %57 = arith.remsi %37, %56 : vector<128x1xi32>
    %c0_i32_17 = arith.constant 0 : i32
    %58 = vector.broadcast %c0_i32_17 : i32 to vector<128x1xi32>
    %59 = arith.cmpi ne, %57, %58 : vector<128x1xi32>
    %c0_i32_18 = arith.constant 0 : i32
    %60 = vector.broadcast %c0_i32_18 : i32 to vector<128x1xi32>
    %61 = arith.cmpi slt, %57, %60 : vector<128x1xi32>
    %c0_i32_19 = arith.constant 0 : i32
    %62 = arith.cmpi slt, %55, %c0_i32_19 : i32
    %63 = vector.broadcast %62 : i1 to vector<128x1xi1>
    %64 = vector.broadcast %63 : vector<128x1xi1> to vector<128x1xi1>
    %65 = arith.xori %61, %64 : vector<128x1xi1>
    %66 = arith.andi %65, %59 : vector<128x1xi1>
    %67 = vector.broadcast %55 : i32 to vector<128x1xi32>
    %68 = arith.addi %57, %67 : vector<128x1xi32>
    %69 = arith.select %66, %68, %57 : vector<128x1xi1>, vector<128x1xi32>
    %c0_i32_20 = arith.constant 0 : i32
    %70 = vector.broadcast %c0_i32_20 : i32 to vector<128x1xi32>
    %71 = arith.cmpi ne, %53, %70 : vector<128x1xi32>
    %c7_i32 = arith.constant 7 : i32
    %72 = vector.broadcast %c7_i32 : i32 to vector<128x1xi32>
    %73 = arith.cmpi ne, %53, %72 : vector<128x1xi32>
    %c8_i32_21 = arith.constant 8 : i32
    %74 = tpu.dynamic_rotate %36 by %c8_i32_21 dim 0 : vector<128x32xf32>, i32 -> vector<128x32xf32>
    %c8_i32_22 = arith.constant 8 : i32
    %75 = vector.broadcast %c8_i32_22 : i32 to vector<128x1xi32>
    %76 = arith.cmpi sge, %69, %75 : vector<128x1xi32>
    %cst_23 = arith.constant 0.000000e+00 : f32
    %77 = vector.shape_cast %76 : vector<128x1xi1> to vector<128x1xi1>
    %78 = vector.broadcast %77 : vector<128x1xi1> to vector<128x32xi1>
    %79 = vector.broadcast %cst_23 : f32 to vector<128x32xf32>
    %80 = arith.select %78, %74, %79 : vector<128x32xi1>, vector<128x32xf32>
    %c1_i32_24 = arith.constant 1 : i32
    %81 = tpu.dynamic_rotate %80 by %c1_i32_24 dim 0 : vector<128x32xf32>, i32 -> vector<128x32xf32>
    %cst_25 = arith.constant 0.000000e+00 : f32
    %82 = vector.shape_cast %71 : vector<128x1xi1> to vector<128x1xi1>
    %83 = vector.broadcast %82 : vector<128x1xi1> to vector<128x32xi1>
    %84 = vector.broadcast %cst_25 : f32 to vector<128x32xf32>
    %85 = arith.select %83, %81, %84 : vector<128x32xi1>, vector<128x32xf32>
    %c127_i32 = arith.constant 127 : i32
    %86 = tpu.dynamic_rotate %80 by %c127_i32 dim 0 : vector<128x32xf32>, i32 -> vector<128x32xf32>
    %cst_26 = arith.constant 0.000000e+00 : f32
    %87 = vector.shape_cast %73 : vector<128x1xi1> to vector<128x1xi1>
    %88 = vector.broadcast %87 : vector<128x1xi1> to vector<128x32xi1>
    %89 = vector.broadcast %cst_26 : f32 to vector<128x32xf32>
    %90 = arith.select %88, %86, %89 : vector<128x32xi1>, vector<128x32xf32>
    %c1_i32_27 = arith.constant 1 : i32
    %91 = tpu.dynamic_rotate %36 by %c1_i32_27 dim 0 : vector<128x32xf32>, i32 -> vector<128x32xf32>
    %cst_28 = arith.constant 0.000000e+00 : f32
    %92 = vector.shape_cast %71 : vector<128x1xi1> to vector<128x1xi1>
    %93 = vector.broadcast %92 : vector<128x1xi1> to vector<128x32xi1>
    %94 = vector.broadcast %cst_28 : f32 to vector<128x32xf32>
    %95 = arith.select %93, %91, %94 : vector<128x32xi1>, vector<128x32xf32>
    %c127_i32_29 = arith.constant 127 : i32
    %96 = tpu.dynamic_rotate %36 by %c127_i32_29 dim 0 : vector<128x32xf32>, i32 -> vector<128x32xf32>
    %cst_30 = arith.constant 0.000000e+00 : f32
    %97 = vector.shape_cast %73 : vector<128x1xi1> to vector<128x1xi1>
    %98 = vector.broadcast %97 : vector<128x1xi1> to vector<128x32xi1>
    %99 = vector.broadcast %cst_30 : f32 to vector<128x32xf32>
    %100 = arith.select %98, %96, %99 : vector<128x32xi1>, vector<128x32xf32>
    %c120_i32 = arith.constant 120 : i32
    %101 = tpu.dynamic_rotate %36 by %c120_i32 dim 0 : vector<128x32xf32>, i32 -> vector<128x32xf32>
    %c56_i32 = arith.constant 56 : i32
    %102 = vector.broadcast %c56_i32 : i32 to vector<128x1xi32>
    %103 = arith.cmpi slt, %69, %102 : vector<128x1xi32>
    %cst_31 = arith.constant 0.000000e+00 : f32
    %104 = vector.shape_cast %103 : vector<128x1xi1> to vector<128x1xi1>
    %105 = vector.broadcast %104 : vector<128x1xi1> to vector<128x32xi1>
    %106 = vector.broadcast %cst_31 : f32 to vector<128x32xf32>
    %107 = arith.select %105, %101, %106 : vector<128x32xi1>, vector<128x32xf32>
    %c1_i32_32 = arith.constant 1 : i32
    %108 = tpu.dynamic_rotate %107 by %c1_i32_32 dim 0 : vector<128x32xf32>, i32 -> vector<128x32xf32>
    %cst_33 = arith.constant 0.000000e+00 : f32
    %109 = vector.shape_cast %71 : vector<128x1xi1> to vector<128x1xi1>
    %110 = vector.broadcast %109 : vector<128x1xi1> to vector<128x32xi1>
    %111 = vector.broadcast %cst_33 : f32 to vector<128x32xf32>
    %112 = arith.select %110, %108, %111 : vector<128x32xi1>, vector<128x32xf32>
    %c127_i32_34 = arith.constant 127 : i32
    %113 = tpu.dynamic_rotate %107 by %c127_i32_34 dim 0 : vector<128x32xf32>, i32 -> vector<128x32xf32>
    %cst_35 = arith.constant 0.000000e+00 : f32
    %114 = vector.shape_cast %73 : vector<128x1xi1> to vector<128x1xi1>
    %115 = vector.broadcast %114 : vector<128x1xi1> to vector<128x32xi1>
    %116 = vector.broadcast %cst_35 : f32 to vector<128x32xf32>
    %117 = arith.select %115, %113, %116 : vector<128x32xi1>, vector<128x32xf32>
    %118 = tpu.concatenate %85, %80, %90, %95, %36, %100, %112, %107, %117 in 1 : vector<128x32xf32>, vector<128x32xf32>, vector<128x32xf32>, vector<128x32xf32>, vector<128x32xf32>, vector<128x32xf32>, vector<128x32xf32>, vector<128x32xf32>, vector<128x32xf32> -> vector<128x288xf32>
    %c0_36 = arith.constant 0 : index
    %c0_37 = arith.constant 0 : index
    %119 = vector.load %arg5[%c0_36, %c0_37] : memref<288x64xbf16, #tpu.memory_space<vmem>>, vector<288x64xbf16>
    %120 = arith.truncf %118 : vector<128x288xf32> to vector<128x288xbf16>
    %cst_38 = arith.constant dense<0.000000e+00> : vector<128x64xf32>
    %121 = tpu.matmul %120, %119, %cst_38 {dimension_numbers = #tpu.dot_dimension_numbers<[1], [0], [0], [1], [0, 0, 1, 1], [], []>} : vector<128x288xbf16>, vector<288x64xbf16>, vector<128x64xf32> -> vector<128x64xf32>
    %122 = vector.shape_cast %121 : vector<128x64xf32> to vector<2x64x64xf32>
    %c0_39 = arith.constant 0 : index
    %c0_40 = arith.constant 0 : index
    %c0_41 = arith.constant 0 : index
    %123 = vector.load %arg2[%c0_39, %c0_40, %c0_41] : memref<2x1x64xf32, #tpu.memory_space<vmem>>, vector<2x1x64xf32>
    %124 = vector.broadcast %123 : vector<2x1x64xf32> to vector<2x64x64xf32>
    %125 = arith.addf %122, %124 : vector<2x64x64xf32>
    %c0_42 = arith.constant 0 : index
    %c0_43 = arith.constant 0 : index
    %126 = vector.load %arg6[%c0_42, %c0_43] : memref<1x64xf32, #tpu.memory_space<vmem>>, vector<1x64xf32>
    %c0_44 = arith.constant 0 : index
    %c0_45 = arith.constant 0 : index
    %127 = vector.load %arg7[%c0_44, %c0_45] : memref<1x64xf32, #tpu.memory_space<vmem>>, vector<1x64xf32>
    %cst_46 = arith.constant dense<0.000000e+00> : vector<2x64xf32>
    %128 = vector.multi_reduction <add>, %125, %cst_46 [1] : vector<2x64x64xf32> to vector<2x64xf32>
    %129 = vector.shape_cast %128 : vector<2x64xf32> to vector<2x1x64xf32>
    %130 = arith.mulf %125, %125 : vector<2x64x64xf32>
    %cst_47 = arith.constant dense<0.000000e+00> : vector<2x64xf32>
    %131 = vector.multi_reduction <add>, %130, %cst_47 [1] : vector<2x64x64xf32> to vector<2x64xf32>
    %132 = vector.shape_cast %131 : vector<2x64xf32> to vector<2x1x64xf32>
    %133 = tpu.iota {dimensions = array<i32: 2>} : vector<1x1x64xi32>
    %c2_i32 = arith.constant 2 : i32
    %c0_i32_48 = arith.constant 0 : i32
    %134 = arith.cmpi eq, %c2_i32, %c0_i32_48 : i32
    %c1_i32_49 = arith.constant 1 : i32
    %135 = arith.select %134, %c1_i32_49, %c2_i32 : i32
    %136 = vector.broadcast %135 : i32 to vector<1x1x64xi32>
    %137 = arith.remsi %133, %136 : vector<1x1x64xi32>
    %c0_i32_50 = arith.constant 0 : i32
    %138 = vector.broadcast %c0_i32_50 : i32 to vector<1x1x64xi32>
    %139 = arith.cmpi ne, %137, %138 : vector<1x1x64xi32>
    %c0_i32_51 = arith.constant 0 : i32
    %140 = vector.broadcast %c0_i32_51 : i32 to vector<1x1x64xi32>
    %141 = arith.cmpi slt, %137, %140 : vector<1x1x64xi32>
    %c0_i32_52 = arith.constant 0 : i32
    %142 = arith.cmpi slt, %135, %c0_i32_52 : i32
    %143 = vector.broadcast %142 : i1 to vector<1x1x64xi1>
    %144 = vector.broadcast %143 : vector<1x1x64xi1> to vector<1x1x64xi1>
    %145 = arith.xori %141, %144 : vector<1x1x64xi1>
    %146 = arith.andi %145, %139 : vector<1x1x64xi1>
    %147 = vector.broadcast %135 : i32 to vector<1x1x64xi32>
    %148 = arith.addi %137, %147 : vector<1x1x64xi32>
    %149 = arith.select %146, %148, %137 : vector<1x1x64xi1>, vector<1x1x64xi32>
    %c0_i32_53 = arith.constant 0 : i32
    %150 = vector.broadcast %c0_i32_53 : i32 to vector<1x1x64xi32>
    %151 = arith.cmpi eq, %149, %150 : vector<1x1x64xi32>
    %cst_54 = arith.constant 0.000000e+00 : f32
    %152 = vector.broadcast %cst_54 : f32 to vector<2x1x1xf32>
    %153 = vector.extract_strided_slice %129 {offsets = [0, 0, 1], sizes = [2, 1, 63], strides = [1, 1, 1]} : vector<2x1x64xf32> to vector<2x1x63xf32>
    %154 = tpu.concatenate %153, %152 in 2 : vector<2x1x63xf32>, vector<2x1x1xf32> -> vector<2x1x64xf32>
    %155 = arith.addf %129, %154 : vector<2x1x64xf32>
    %cst_55 = arith.constant 0.000000e+00 : f32
    %156 = vector.shape_cast %151 : vector<1x1x64xi1> to vector<1x1x64xi1>
    %157 = vector.broadcast %156 : vector<1x1x64xi1> to vector<2x1x64xi1>
    %158 = vector.broadcast %cst_55 : f32 to vector<2x1x64xf32>
    %159 = arith.select %157, %155, %158 : vector<2x1x64xi1>, vector<2x1x64xf32>
    %cst_56 = arith.constant 0.000000e+00 : f32
    %160 = vector.broadcast %cst_56 : f32 to vector<2x1x1xf32>
    %161 = vector.extract_strided_slice %159 {offsets = [0, 0, 0], sizes = [2, 1, 63], strides = [1, 1, 1]} : vector<2x1x64xf32> to vector<2x1x63xf32>
    %162 = tpu.concatenate %160, %161 in 2 : vector<2x1x1xf32>, vector<2x1x63xf32> -> vector<2x1x64xf32>
    %163 = arith.addf %159, %162 : vector<2x1x64xf32>
    %cst_57 = arith.constant 0.000000e+00 : f32
    %164 = vector.broadcast %cst_57 : f32 to vector<2x1x1xf32>
    %165 = vector.extract_strided_slice %132 {offsets = [0, 0, 1], sizes = [2, 1, 63], strides = [1, 1, 1]} : vector<2x1x64xf32> to vector<2x1x63xf32>
    %166 = tpu.concatenate %165, %164 in 2 : vector<2x1x63xf32>, vector<2x1x1xf32> -> vector<2x1x64xf32>
    %167 = arith.addf %132, %166 : vector<2x1x64xf32>
    %cst_58 = arith.constant 0.000000e+00 : f32
    %168 = vector.shape_cast %151 : vector<1x1x64xi1> to vector<1x1x64xi1>
    %169 = vector.broadcast %168 : vector<1x1x64xi1> to vector<2x1x64xi1>
    %170 = vector.broadcast %cst_58 : f32 to vector<2x1x64xf32>
    %171 = arith.select %169, %167, %170 : vector<2x1x64xi1>, vector<2x1x64xf32>
    %cst_59 = arith.constant 0.000000e+00 : f32
    %172 = vector.broadcast %cst_59 : f32 to vector<2x1x1xf32>
    %173 = vector.extract_strided_slice %171 {offsets = [0, 0, 0], sizes = [2, 1, 63], strides = [1, 1, 1]} : vector<2x1x64xf32> to vector<2x1x63xf32>
    %174 = tpu.concatenate %172, %173 in 2 : vector<2x1x1xf32>, vector<2x1x63xf32> -> vector<2x1x64xf32>
    %175 = arith.addf %171, %174 : vector<2x1x64xf32>
    %cst_60 = arith.constant 1.280000e+02 : f32
    %176 = vector.broadcast %cst_60 : f32 to vector<2x1x64xf32>
    %177 = arith.divf %163, %176 : vector<2x1x64xf32>
    %cst_61 = arith.constant 1.280000e+02 : f32
    %178 = vector.broadcast %cst_61 : f32 to vector<2x1x64xf32>
    %179 = arith.divf %175, %178 : vector<2x1x64xf32>
    %180 = arith.mulf %177, %177 : vector<2x1x64xf32>
    %181 = arith.subf %179, %180 : vector<2x1x64xf32>
    %cst_62 = arith.constant 0.000000e+00 : f32
    %182 = vector.broadcast %cst_62 : f32 to vector<2x1x64xf32>
    %183 = arith.maximumf %181, %182 : vector<2x1x64xf32>
    %184 = vector.broadcast %177 : vector<2x1x64xf32> to vector<2x64x64xf32>
    %185 = arith.subf %125, %184 : vector<2x64x64xf32>
    %cst_63 = arith.constant 9.99999974E-6 : f32
    %186 = vector.broadcast %cst_63 : f32 to vector<2x1x64xf32>
    %187 = arith.addf %183, %186 : vector<2x1x64xf32>
    %188 = math.rsqrt %187 : vector<2x1x64xf32>
    %189 = vector.broadcast %188 : vector<2x1x64xf32> to vector<2x64x64xf32>
    %190 = arith.mulf %185, %189 : vector<2x64x64xf32>
    %191 = vector.shape_cast %126 : vector<1x64xf32> to vector<1x1x64xf32>
    %192 = vector.broadcast %191 : vector<1x1x64xf32> to vector<2x64x64xf32>
    %193 = arith.mulf %190, %192 : vector<2x64x64xf32>
    %194 = vector.shape_cast %127 : vector<1x64xf32> to vector<1x1x64xf32>
    %195 = vector.broadcast %194 : vector<1x1x64xf32> to vector<2x64x64xf32>
    %196 = arith.addf %193, %195 : vector<2x64x64xf32>
    %197 = arith.negf %196 : vector<2x64x64xf32>
    %198 = math.exp %197 : vector<2x64x64xf32>
    %cst_64 = arith.constant 1.000000e+00 : f32
    %199 = vector.broadcast %cst_64 : f32 to vector<2x64x64xf32>
    %200 = arith.addf %199, %198 : vector<2x64x64xf32>
    %201 = arith.divf %199, %200 : vector<2x64x64xf32>
    %202 = arith.mulf %196, %201 : vector<2x64x64xf32>
    %203 = vector.shape_cast %202 : vector<2x64x64xf32> to vector<128x64xf32>
    %204 = tpu.iota {dimensions = array<i32: 0>} : vector<128x1xi32>
    %c8_i32_65 = arith.constant 8 : i32
    %c0_i32_66 = arith.constant 0 : i32
    %205 = arith.cmpi eq, %c8_i32_65, %c0_i32_66 : i32
    %c1_i32_67 = arith.constant 1 : i32
    %206 = arith.select %205, %c1_i32_67, %c8_i32_65 : i32
    %207 = vector.broadcast %206 : i32 to vector<128x1xi32>
    %208 = arith.remsi %204, %207 : vector<128x1xi32>
    %c0_i32_68 = arith.constant 0 : i32
    %209 = vector.broadcast %c0_i32_68 : i32 to vector<128x1xi32>
    %210 = arith.cmpi ne, %208, %209 : vector<128x1xi32>
    %c0_i32_69 = arith.constant 0 : i32
    %211 = vector.broadcast %c0_i32_69 : i32 to vector<128x1xi32>
    %212 = arith.cmpi slt, %208, %211 : vector<128x1xi32>
    %c0_i32_70 = arith.constant 0 : i32
    %213 = arith.cmpi slt, %206, %c0_i32_70 : i32
    %214 = vector.broadcast %213 : i1 to vector<128x1xi1>
    %215 = vector.broadcast %214 : vector<128x1xi1> to vector<128x1xi1>
    %216 = arith.xori %212, %215 : vector<128x1xi1>
    %217 = arith.andi %216, %210 : vector<128x1xi1>
    %218 = vector.broadcast %206 : i32 to vector<128x1xi32>
    %219 = arith.addi %208, %218 : vector<128x1xi32>
    %220 = arith.select %217, %219, %208 : vector<128x1xi1>, vector<128x1xi32>
    %c64_i32_71 = arith.constant 64 : i32
    %c0_i32_72 = arith.constant 0 : i32
    %221 = arith.cmpi eq, %c64_i32_71, %c0_i32_72 : i32
    %c1_i32_73 = arith.constant 1 : i32
    %222 = arith.select %221, %c1_i32_73, %c64_i32_71 : i32
    %223 = vector.broadcast %222 : i32 to vector<128x1xi32>
    %224 = arith.remsi %204, %223 : vector<128x1xi32>
    %c0_i32_74 = arith.constant 0 : i32
    %225 = vector.broadcast %c0_i32_74 : i32 to vector<128x1xi32>
    %226 = arith.cmpi ne, %224, %225 : vector<128x1xi32>
    %c0_i32_75 = arith.constant 0 : i32
    %227 = vector.broadcast %c0_i32_75 : i32 to vector<128x1xi32>
    %228 = arith.cmpi slt, %224, %227 : vector<128x1xi32>
    %c0_i32_76 = arith.constant 0 : i32
    %229 = arith.cmpi slt, %222, %c0_i32_76 : i32
    %230 = vector.broadcast %229 : i1 to vector<128x1xi1>
    %231 = vector.broadcast %230 : vector<128x1xi1> to vector<128x1xi1>
    %232 = arith.xori %228, %231 : vector<128x1xi1>
    %233 = arith.andi %232, %226 : vector<128x1xi1>
    %234 = vector.broadcast %222 : i32 to vector<128x1xi32>
    %235 = arith.addi %224, %234 : vector<128x1xi32>
    %236 = arith.select %233, %235, %224 : vector<128x1xi1>, vector<128x1xi32>
    %c0_i32_77 = arith.constant 0 : i32
    %237 = vector.broadcast %c0_i32_77 : i32 to vector<128x1xi32>
    %238 = arith.cmpi ne, %220, %237 : vector<128x1xi32>
    %c7_i32_78 = arith.constant 7 : i32
    %239 = vector.broadcast %c7_i32_78 : i32 to vector<128x1xi32>
    %240 = arith.cmpi ne, %220, %239 : vector<128x1xi32>
    %c8_i32_79 = arith.constant 8 : i32
    %241 = tpu.dynamic_rotate %203 by %c8_i32_79 dim 0 : vector<128x64xf32>, i32 -> vector<128x64xf32>
    %c8_i32_80 = arith.constant 8 : i32
    %242 = vector.broadcast %c8_i32_80 : i32 to vector<128x1xi32>
    %243 = arith.cmpi sge, %236, %242 : vector<128x1xi32>
    %cst_81 = arith.constant 0.000000e+00 : f32
    %244 = vector.shape_cast %243 : vector<128x1xi1> to vector<128x1xi1>
    %245 = vector.broadcast %244 : vector<128x1xi1> to vector<128x64xi1>
    %246 = vector.broadcast %cst_81 : f32 to vector<128x64xf32>
    %247 = arith.select %245, %241, %246 : vector<128x64xi1>, vector<128x64xf32>
    %c1_i32_82 = arith.constant 1 : i32
    %248 = tpu.dynamic_rotate %247 by %c1_i32_82 dim 0 : vector<128x64xf32>, i32 -> vector<128x64xf32>
    %cst_83 = arith.constant 0.000000e+00 : f32
    %249 = vector.shape_cast %238 : vector<128x1xi1> to vector<128x1xi1>
    %250 = vector.broadcast %249 : vector<128x1xi1> to vector<128x64xi1>
    %251 = vector.broadcast %cst_83 : f32 to vector<128x64xf32>
    %252 = arith.select %250, %248, %251 : vector<128x64xi1>, vector<128x64xf32>
    %c127_i32_84 = arith.constant 127 : i32
    %253 = tpu.dynamic_rotate %247 by %c127_i32_84 dim 0 : vector<128x64xf32>, i32 -> vector<128x64xf32>
    %cst_85 = arith.constant 0.000000e+00 : f32
    %254 = vector.shape_cast %240 : vector<128x1xi1> to vector<128x1xi1>
    %255 = vector.broadcast %254 : vector<128x1xi1> to vector<128x64xi1>
    %256 = vector.broadcast %cst_85 : f32 to vector<128x64xf32>
    %257 = arith.select %255, %253, %256 : vector<128x64xi1>, vector<128x64xf32>
    %c1_i32_86 = arith.constant 1 : i32
    %258 = tpu.dynamic_rotate %203 by %c1_i32_86 dim 0 : vector<128x64xf32>, i32 -> vector<128x64xf32>
    %cst_87 = arith.constant 0.000000e+00 : f32
    %259 = vector.shape_cast %238 : vector<128x1xi1> to vector<128x1xi1>
    %260 = vector.broadcast %259 : vector<128x1xi1> to vector<128x64xi1>
    %261 = vector.broadcast %cst_87 : f32 to vector<128x64xf32>
    %262 = arith.select %260, %258, %261 : vector<128x64xi1>, vector<128x64xf32>
    %c127_i32_88 = arith.constant 127 : i32
    %263 = tpu.dynamic_rotate %203 by %c127_i32_88 dim 0 : vector<128x64xf32>, i32 -> vector<128x64xf32>
    %cst_89 = arith.constant 0.000000e+00 : f32
    %264 = vector.shape_cast %240 : vector<128x1xi1> to vector<128x1xi1>
    %265 = vector.broadcast %264 : vector<128x1xi1> to vector<128x64xi1>
    %266 = vector.broadcast %cst_89 : f32 to vector<128x64xf32>
    %267 = arith.select %265, %263, %266 : vector<128x64xi1>, vector<128x64xf32>
    %c120_i32_90 = arith.constant 120 : i32
    %268 = tpu.dynamic_rotate %203 by %c120_i32_90 dim 0 : vector<128x64xf32>, i32 -> vector<128x64xf32>
    %c56_i32_91 = arith.constant 56 : i32
    %269 = vector.broadcast %c56_i32_91 : i32 to vector<128x1xi32>
    %270 = arith.cmpi slt, %236, %269 : vector<128x1xi32>
    %cst_92 = arith.constant 0.000000e+00 : f32
    %271 = vector.shape_cast %270 : vector<128x1xi1> to vector<128x1xi1>
    %272 = vector.broadcast %271 : vector<128x1xi1> to vector<128x64xi1>
    %273 = vector.broadcast %cst_92 : f32 to vector<128x64xf32>
    %274 = arith.select %272, %268, %273 : vector<128x64xi1>, vector<128x64xf32>
    %c1_i32_93 = arith.constant 1 : i32
    %275 = tpu.dynamic_rotate %274 by %c1_i32_93 dim 0 : vector<128x64xf32>, i32 -> vector<128x64xf32>
    %cst_94 = arith.constant 0.000000e+00 : f32
    %276 = vector.shape_cast %238 : vector<128x1xi1> to vector<128x1xi1>
    %277 = vector.broadcast %276 : vector<128x1xi1> to vector<128x64xi1>
    %278 = vector.broadcast %cst_94 : f32 to vector<128x64xf32>
    %279 = arith.select %277, %275, %278 : vector<128x64xi1>, vector<128x64xf32>
    %c127_i32_95 = arith.constant 127 : i32
    %280 = tpu.dynamic_rotate %274 by %c127_i32_95 dim 0 : vector<128x64xf32>, i32 -> vector<128x64xf32>
    %cst_96 = arith.constant 0.000000e+00 : f32
    %281 = vector.shape_cast %240 : vector<128x1xi1> to vector<128x1xi1>
    %282 = vector.broadcast %281 : vector<128x1xi1> to vector<128x64xi1>
    %283 = vector.broadcast %cst_96 : f32 to vector<128x64xf32>
    %284 = arith.select %282, %280, %283 : vector<128x64xi1>, vector<128x64xf32>
    %285 = tpu.concatenate %252, %247, %257, %262, %203, %267, %279, %274, %284 in 1 : vector<128x64xf32>, vector<128x64xf32>, vector<128x64xf32>, vector<128x64xf32>, vector<128x64xf32>, vector<128x64xf32>, vector<128x64xf32>, vector<128x64xf32>, vector<128x64xf32> -> vector<128x576xf32>
    %c0_97 = arith.constant 0 : index
    %c0_98 = arith.constant 0 : index
    %286 = vector.load %arg8[%c0_97, %c0_98] : memref<576x64xbf16, #tpu.memory_space<vmem>>, vector<576x64xbf16>
    %287 = arith.truncf %285 : vector<128x576xf32> to vector<128x576xbf16>
    %cst_99 = arith.constant dense<0.000000e+00> : vector<128x64xf32>
    %288 = tpu.matmul %287, %286, %cst_99 {dimension_numbers = #tpu.dot_dimension_numbers<[1], [0], [0], [1], [0, 0, 1, 1], [], []>} : vector<128x576xbf16>, vector<576x64xbf16>, vector<128x64xf32> -> vector<128x64xf32>
    %289 = vector.shape_cast %288 : vector<128x64xf32> to vector<2x64x64xf32>
    %c0_100 = arith.constant 0 : index
    %c0_101 = arith.constant 0 : index
    %c0_102 = arith.constant 0 : index
    %290 = vector.load %arg1[%c0_100, %c0_101, %c0_102] : memref<2x64x32xbf16, #tpu.memory_space<vmem>>, vector<2x64x32xbf16>
    %291 = vector.shape_cast %290 : vector<2x64x32xbf16> to vector<128x32xbf16>
    %c0_103 = arith.constant 0 : index
    %c0_104 = arith.constant 0 : index
    %292 = vector.load %arg10[%c0_103, %c0_104] : memref<32x64xbf16, #tpu.memory_space<vmem>>, vector<32x64xbf16>
    %cst_105 = arith.constant dense<0.000000e+00> : vector<128x64xf32>
    %293 = tpu.matmul %291, %292, %cst_105 {dimension_numbers = #tpu.dot_dimension_numbers<[1], [0], [0], [1], [0, 0, 1, 1], [], []>} : vector<128x32xbf16>, vector<32x64xbf16>, vector<128x64xf32> -> vector<128x64xf32>
    %294 = vector.shape_cast %293 : vector<128x64xf32> to vector<2x64x64xf32>
    %c0_106 = arith.constant 0 : index
    %c0_107 = arith.constant 0 : index
    %295 = vector.load %arg9[%c0_106, %c0_107] : memref<1x64xf32, #tpu.memory_space<vmem>>, vector<1x64xf32>
    %296 = vector.shape_cast %295 : vector<1x64xf32> to vector<1x1x64xf32>
    %297 = vector.broadcast %296 : vector<1x1x64xf32> to vector<2x64x64xf32>
    %298 = arith.addf %289, %297 : vector<2x64x64xf32>
    %299 = arith.addf %298, %294 : vector<2x64x64xf32>
    %c0_108 = arith.constant 0 : index
    %c0_109 = arith.constant 0 : index
    %c0_110 = arith.constant 0 : index
    %300 = vector.load %arg11[%c0_108, %c0_109, %c0_110] : memref<2x64x64xf32, #tpu.memory_space<vmem>>, vector<2x64x64xf32>
    tpu.vector_store %arg11[%c0_108, %c0_109, %c0_110], %299 {strides = array<i32>} : memref<2x64x64xf32, #tpu.memory_space<vmem>>, vector<2x64x64xf32>,
    return
  }
  func.func @transform_0(%arg0: i32) -> (i32, i32, i32) {
    %c0_i32 = arith.constant 0 : i32
    %c0_i32_0 = arith.constant 0 : i32
    %c0_i32_1 = arith.constant 0 : i32
    return %arg0, %c0_i32, %c0_i32_0 : i32, i32, i32
  }
  func.func @transform_1(%arg0: i32) -> (i32, i32, i32) {
    %c0_i32 = arith.constant 0 : i32
    %c0_i32_0 = arith.constant 0 : i32
    %c0_i32_1 = arith.constant 0 : i32
    return %arg0, %c0_i32, %c0_i32_0 : i32, i32, i32
  }
  func.func @transform_2(%arg0: i32) -> (i32, i32) {
    %c0_i32 = arith.constant 0 : i32
    %c0_i32_0 = arith.constant 0 : i32
    %c0_i32_1 = arith.constant 0 : i32
    return %c0_i32, %c0_i32_0 : i32, i32
  }
  func.func @transform_3(%arg0: i32) -> (i32, i32) {
    %c0_i32 = arith.constant 0 : i32
    %c0_i32_0 = arith.constant 0 : i32
    %c0_i32_1 = arith.constant 0 : i32
    return %c0_i32, %c0_i32_0 : i32, i32
  }
  func.func @transform_4(%arg0: i32) -> (i32, i32) {
    %c0_i32 = arith.constant 0 : i32
    %c0_i32_0 = arith.constant 0 : i32
    %c0_i32_1 = arith.constant 0 : i32
    return %c0_i32, %c0_i32_0 : i32, i32
  }
  func.func @transform_5(%arg0: i32) -> (i32, i32) {
    %c0_i32 = arith.constant 0 : i32
    %c0_i32_0 = arith.constant 0 : i32
    %c0_i32_1 = arith.constant 0 : i32
    return %c0_i32, %c0_i32_0 : i32, i32
  }
  func.func @transform_6(%arg0: i32) -> (i32, i32) {
    %c0_i32 = arith.constant 0 : i32
    %c0_i32_0 = arith.constant 0 : i32
    %c0_i32_1 = arith.constant 0 : i32
    return %c0_i32, %c0_i32_0 : i32, i32
  }
  func.func @transform_7(%arg0: i32) -> (i32, i32) {
    %c0_i32 = arith.constant 0 : i32
    %c0_i32_0 = arith.constant 0 : i32
    %c0_i32_1 = arith.constant 0 : i32
    return %c0_i32, %c0_i32_0 : i32, i32
  }
  func.func @transform_8(%arg0: i32) -> (i32, i32) {
    %c0_i32 = arith.constant 0 : i32
    %c0_i32_0 = arith.constant 0 : i32
    %c0_i32_1 = arith.constant 0 : i32
    return %c0_i32, %c0_i32_0 : i32, i32
  }
  func.func @transform_9(%arg0: i32) -> (i32, i32) {
    %c0_i32 = arith.constant 0 : i32
    %c0_i32_0 = arith.constant 0 : i32
    %c0_i32_1 = arith.constant 0 : i32
    return %c0_i32, %c0_i32_0 : i32, i32
  }
  func.func @transform_10(%arg0: i32) -> (i32, i32, i32) {
    %c0_i32 = arith.constant 0 : i32
    %c0_i32_0 = arith.constant 0 : i32
    %c0_i32_1 = arith.constant 0 : i32
    return %arg0, %c0_i32, %c0_i32_0 : i32, i32, i32
  }
}

</mosaic_0001>

<bundles_post_ra>
// kernel: tpu_custom_call.1
= control target key start
LH: loop header
LB: loop body
LE: loop exit
PB: predicated region body
PF: predicated region fallthrough
CT: control target
= control target key end

     0   :  { %vm8097_vm0 = vcmask 261120   ;;  %s8082_s0 = inlined_call_operand.vmem [shape: bf16[2,64,32], index: 0, kind: input, shape index: {}]   ;;  %s8083_s1 = inlined_call_operand.vmem [shape: f32[2,1,64], index: 1, kind: input, shape index: {}]   ;;  %s8084_s2 = inlined_call_operand.vmem [shape: f32[1,32], index: 2, kind: input, shape index: {}]   ;;  %s8085_s3 = inlined_call_operand.vmem [shape: f32[1,32], index: 3, kind: input, shape index: {}]   ;;  %s8086_s4 = inlined_call_operand.vmem [shape: bf16[288,64], index: 4, kind: input, shape index: {}]   ;;  %s8087_s5 = inlined_call_operand.vmem [shape: f32[1,64], index: 5, kind: input, shape index: {}]   ;;  %s8088_s6 = inlined_call_operand.vmem [shape: f32[1,64], index: 6, kind: input, shape index: {}]   ;;  %s8089_s7 = inlined_call_operand.vmem [shape: bf16[576,64], index: 7, kind: input, shape index: {}]   ;;  %s8090_s8 = inlined_call_operand.vmem [shape: f32[1,64], index: 8, kind: input, shape index: {}]   ;;  %s8091_s9 = inlined_call_operand.vmem [shape: bf16[32,64], index: 9, kind: input, shape index: {}]   ;;  %s8092_s10 = inlined_call_operand.hbm [shape: f32[2,64,64], index: 10, kind: output, shape index: {}]  }
   0x1   :  { %v37_v0 = vld [vmem:[%s8082_s0] sm:$0xff]   ;;  %v39_v1 = vld [vmem:[%s8082_s0 + $0x8] sm:$0xff]   ;;  %v41_v2 = vld [vmem:[%s8082_s0 + $0x10] sm:$0xff]  }
   0x2   :  { %v43_v3 = vld [vmem:[%s8082_s0 + $0x18] sm:$0xff]   ;;  %v5299_v4 = vunpack.c.l.bf16 %v37_v0  ;;  %v5301_v5 = vunpack.c.h.bf16 %v37_v0  ;;  %v5303_v6 = vunpack.c.l.bf16 %v39_v1  ;;  %v5305_v7 = vunpack.c.h.bf16 %v39_v1  ;;  %v45_v26 = vld [vmem:[%s8082_s0 + $0x20] sm:$0xff]   ;;  %v47_v27 = vld [vmem:[%s8082_s0 + $0x28] sm:$0xff]  }
   0x3   :  { %v5307_v8 = vunpack.c.l.bf16 %v41_v2  ;;  %v5309_v9 = vunpack.c.h.bf16 %v41_v2  ;;  %v5311_v10 = vunpack.c.l.bf16 %v43_v3  ;;  %v5319_v14 = vunpack.c.h.bf16 %v43_v3  ;;  %v49_v38 = vld [vmem:[%s8082_s0 + $0x30] sm:$0xff]   ;;  %v51_v54 = vld [vmem:[%s8082_s0 + $0x38] sm:$0xff]  }
   0x4   :  { %v72_v11 = vsel %vm8097_vm0, %v5299_v4, 0.0  ;;  %v73_v12 = vsel %vm8097_vm0, %v5301_v5, 0.0  ;;  %v75_v13 = vsel %vm8097_vm0, %v5303_v6, 0.0  ;;  %v77_v16 = vsel %vm8097_vm0, %v5305_v7, 0.0 }
   0x5   :  { %v74_v15 = vadd.f32 %v73_v12, %v72_v11  ;;  %v79_v17 = vsel %vm8097_vm0, %v5307_v8, 0.0  ;;  %v81_v18 = vsel %vm8097_vm0, %v5309_v9, 0.0  ;;  %v114_v19 = vmul.f32 %v5299_v4, %v5299_v4 }
   0x6   :  { %v115_v20 = vmul.f32 %v5301_v5, %v5301_v5  ;;  %v116_v21 = vmul.f32 %v5303_v6, %v5303_v6  ;;  %v117_v23 = vmul.f32 %v5305_v7, %v5305_v7  ;;  %v118_v24 = vmul.f32 %v5307_v8, %v5307_v8 }
   0x7   :  { %v76_v22 = vadd.f32 %v75_v13, %v74_v15  ;;  %v119_v25 = vmul.f32 %v5309_v9, %v5309_v9  ;;  %v130_v28 = vsel %vm8097_vm0, %v114_v19, 0.0  ;;  %v83_v31 = vsel %vm8097_vm0, %v5311_v10, 0.0 }
   0x8   :  { %v131_v29 = vsel %vm8097_vm0, %v115_v20, 0.0  ;;  %v133_v33 = vsel %vm8097_vm0, %v116_v21, 0.0  ;;  %v85_v34 = vsel %vm8097_vm0, %v5319_v14, 0.0  ;;  %v120_v35 = vmul.f32 %v5311_v10, %v5311_v10 }
   0x9   :  { %v78_v30 = vadd.f32 %v77_v16, %v76_v22  ;;  %v132_v32 = vadd.f32 %v131_v29, %v130_v28  ;;  %v121_v36 = vmul.f32 %v5319_v14, %v5319_v14  ;;  %v135_v37 = vsel %vm8097_vm0, %v117_v23, 0.0 }
   0xa   :  { %v137_v41 = vsel %vm8097_vm0, %v118_v24, 0.0  ;;  %v139_v42 = vsel %vm8097_vm0, %v119_v25, 0.0  ;;  %v5362_v43 = vunpack.c.l.bf16 %v45_v26  ;;  %v5364_v44 = vunpack.c.h.bf16 %v45_v26 }
   0xb   :  { %v80_v39 = vadd.f32 %v79_v17, %v78_v30  ;;  %v134_v40 = vadd.f32 %v133_v33, %v132_v32  ;;  %v5366_v45 = vunpack.c.l.bf16 %v47_v27  ;;  %v5368_v46 = vunpack.c.h.bf16 %v47_v27 }
   0xc   :  { %v5370_v49 = vunpack.c.l.bf16 %v49_v38  ;;  %v93_v50 = vsel %vm8097_vm0, %v5362_v43, 0.0  ;;  %v94_v51 = vsel %vm8097_vm0, %v5364_v44, 0.0  ;;  %v141_v57 = vsel %vm8097_vm0, %v120_v35, 0.0 }
   0xd   :  { %v82_v47 = vadd.f32 %v81_v18, %v80_v39  ;;  %v136_v48 = vadd.f32 %v135_v37, %v134_v40  ;;  %v95_v55 = vadd.f32 %v94_v51, %v93_v50  ;;  %v96_v56 = vsel %vm8097_vm0, %v5366_v45, 0.0 }
   0xe   :  { %v143_v58 = vsel %vm8097_vm0, %v121_v36, 0.0  ;;  %v5383_v59 = vunpack.c.h.bf16 %v49_v38  ;;  %v98_v60 = vsel %vm8097_vm0, %v5368_v46, 0.0  ;;  %v100_v0 = vsel %vm8097_vm0, %v5370_v49, 0.0 }
   0xf   :  { %v84_v52 = vadd.f32 %v83_v31, %v82_v47  ;;  %v138_v53 = vadd.f32 %v137_v41, %v136_v48  ;;  %v97_v63 = vadd.f32 %v96_v56, %v95_v55  ;;  %v5389_v1 = vunpack.c.l.bf16 %v51_v54 }
  0x10   :  { %v122_v2 = vmul.f32 %v5362_v43, %v5362_v43  ;;  %v123_v3 = vmul.f32 %v5364_v44, %v5364_v44  ;;  %v124_v11 = vmul.f32 %v5366_v45, %v5366_v45  ;;  %v125_v16 = vmul.f32 %v5368_v46, %v5368_v46 }
  0x11   :  { %v86_v61 = vadd.f32 %v85_v34, %v84_v52  ;;  %v140_v62 = vadd.f32 %v139_v42, %v138_v53  ;;  %v99_v15 = vadd.f32 %v98_v60, %v97_v63  ;;  %v5399_v17 = vunpack.c.h.bf16 %v51_v54 }
  0x12   :  { %v102_v18 = vsel %vm8097_vm0, %v5383_v59, 0.0  ;;  %v126_v19 = vmul.f32 %v5370_v49, %v5370_v49  ;;  %v151_v20 = vsel %vm8097_vm0, %v122_v2, 0.0  ;;  %v152_v24 = vsel %vm8097_vm0, %v123_v3, 0.0 }
  0x13   :  { %v87_v12 = vrot.slane %v86_v61, 4  ;;  %v142_v13 = vadd.f32 %v141_v57, %v140_v62  ;;  %v101_v23 = vadd.f32 %v100_v0, %v99_v15  ;;  %v104_v25 = vsel %vm8097_vm0, %v5389_v1, 0.0 }
  0x14   :  { %v127_v26 = vmul.f32 %v5383_v59, %v5383_v59  ;;  %v153_v27 = vadd.f32 %v152_v24, %v151_v20  ;;  %v154_v28 = vsel %vm8097_vm0, %v124_v11, 0.0  ;;  %v156_v32 = vsel %vm8097_vm0, %v125_v16, 0.0 }
  0x15   :  { %v88_v21 = vadd.f32 %v87_v12, %v86_v61  ;;  %v144_v22 = vadd.f32 %v143_v58, %v142_v13  ;;  %v103_v31 = vadd.f32 %v102_v18, %v101_v23  ;;  %v106_v33 = vsel %vm8097_vm0, %v5399_v17, 0.0 }
  0x16   :  { %v155_v34 = vadd.f32 %v154_v28, %v153_v27  ;;  %v158_v35 = vsel %vm8097_vm0, %v126_v19, 0.0  ;;  %v128_v39 = vmul.f32 %v5389_v1, %v5389_v1  ;;  %v160_v48 = vsel %vm8097_vm0, %v127_v26, 0.0 }
  0x17   :  { %v89_v29 = vrot.slane %v88_v21, 2  ;;  %v145_v30 = vrot.slane %v144_v22, 4  ;;  %v105_v38 = vadd.f32 %v104_v25, %v103_v31  ;;  %v129_v50 = vmul.f32 %v5399_v17, %v5399_v17 }
  0x18   :  { %v157_v40 = vadd.f32 %v156_v32, %v155_v34  ;;  %v162_v55 = vsel %vm8097_vm0, %v128_v39, 0.0 }
  0x19   :  { %v90_v36 = vadd.f32 %v89_v29, %v88_v21  ;;  %v146_v37 = vadd.f32 %v145_v30, %v144_v22  ;;  %v107_v47 = vadd.f32 %v106_v33, %v105_v38  ;;  %v164_v62 = vsel %vm8097_vm0, %v129_v50, 0.0 }
  0x1a   :  { %v159_v51 = vadd.f32 %v158_v35, %v157_v40 }
  0x1b   :  { %v91_v41 = vrot.slane %v90_v36, 1  ;;  %v147_v42 = vrot.slane %v146_v37, 2  ;;  %v108_v54 = vrot.slane %v107_v47, 4 }
  0x1c   :  { %v161_v56 = vadd.f32 %v160_v48, %v159_v51 }
  0x1d   :  { %v92_v52 = vadd.f32 %v91_v41, %v90_v36  ;;  %v148_v53 = vadd.f32 %v147_v42, %v146_v37  ;;  %v109_v60 = vadd.f32 %v108_v54, %v107_v47  ;;  %v5437_v37 = vld [vmem:[%s8084_s2] ss:$0 sm:$0xff] }
  0x1e   :  { %v163_v61 = vadd.f32 %v162_v55, %v161_v56 }
  0x1f   :  { %v149_v57 = vrot.slane %v148_v53, 1  ;;  %v173_v58 = vmul.f32 0.015625, %v92_v52  ;;  %v110_v3 = vrot.slane %v109_v60, 2 }
  0x20   :  { %v165_v11 = vadd.f32 %v164_v62, %v163_v61 }
  0x21   :  { %v150_v63 = vadd.f32 %v149_v57, %v148_v53  ;;  %v177_v0 = vmul.f32 %v173_v58, %v173_v58  ;;  %v111_v13 = vadd.f32 %v110_v3, %v109_v60  ;;  %v184_v29 = vsub.f32 %v5301_v5, %v173_v58  ;;  %v5442_v5 = vld [vmem:[%s8085_s3] ss:$0 sm:$0xff] }
  0x22   :  { %v166_v15 = vrot.slane %v165_v11, 4  ;;  %v185_v30 = vsub.f32 %v5303_v6, %v173_v58  ;;  %v183_v31 = vsub.f32 %v5299_v4, %v173_v58  ;;  %v186_v32 = vsub.f32 %v5305_v7, %v173_v58 }
  0x23   :  { %v175_v2 = vmul.f32 0.015625, %v150_v63  ;;  %v112_v18 = vrot.slane %v111_v13, 1  ;;  %v187_v33 = vsub.f32 %v5307_v8, %v173_v58  ;;  %v188_v34 = vsub.f32 %v5309_v9, %v173_v58 }
  0x24   :  { %v167_v19 = vadd.f32 %v166_v15, %v165_v11  ;;  %v189_v35 = vsub.f32 %v5311_v10, %v173_v58  ;;  %v190_v6 = vsub.f32 %v5319_v14, %v173_v58 }
  0x25   :  { %v179_v12 = vsub.f32 %v175_v2, %v177_v0  ;;  %v113_v21 = vadd.f32 %v112_v18, %v111_v13 }
  0x26   :  { %v168_v22 = vrot.slane %v167_v19, 2 }
  0x27   :  { %v181_v16 = vmax.f32 %v179_v12, 0.0  ;;  %v5423_v24 = vmul.f32 0.015625, %v113_v21 }
  0x28   :  { %v169_v23 = vadd.f32 %v168_v22, %v167_v19 }
  0x29   :  { %v199_v20 = vadd.f32 1e-05, %v181_v16  ;;  %v178_v27 = vmul.f32 %v5423_v24, %v5423_v24  ;;  %v191_v15 = vsub.f32 %v5362_v43, %v5423_v24  ;;  %v192_v19 = vsub.f32 %v5364_v44, %v5423_v24 }
  0x2a   :  { %v170_v25 = vrot.slane %v169_v23, 1  ;;  %v194_v22 = vsub.f32 %v5368_v46, %v5423_v24 }
  0x2b   :  { %5055 = vrsqrt.f32 %v199_v20  ;;  %v193_v20 = vsub.f32 %v5366_v45, %v5423_v24 }
  0x2c   :  { %v171_v26 = vadd.f32 %v170_v25, %v169_v23  ;;  %v195_v23 = vsub.f32 %v5370_v49, %v5423_v24  ;;  %v196_v25 = vsub.f32 %v5383_v59, %v5423_v24 }
  0x2e   :  { %v176_v28 = vmul.f32 0.015625, %v171_v26 }
  0x30   :  { %v180_v36 = vsub.f32 %v176_v28, %v178_v27 }
  0x32   :  { %v182_v4 = vmax.f32 %v180_v36, 0.0 }
  0x34   :  { %v200_v42 = vadd.f32 1e-05, %v182_v4 }
  0x35   :  { %v5056_v38 = vpop.eup %5055 }
  0x36   :  { %v204_v7 = vmul.f32 %v5056_v38, %v184_v29  ;;  %v205_v8 = vmul.f32 %v5056_v38, %v185_v30  ;;  %v203_v9 = vmul.f32 %v5056_v38, %v183_v31  ;;  %v206_v39 = vmul.f32 %v5056_v38, %v186_v32 }
  0x37   :  { %v207_v10 = vmul.f32 %v5056_v38, %v187_v33  ;;  %v208_v40 = vmul.f32 %v5056_v38, %v188_v34  ;;  %v209_v41 = vmul.f32 %v5056_v38, %v189_v35  ;;  %5057 = vrsqrt.f32 %v200_v42 }
  0x38   :  { %v226_v47 = vmul.f32 %v5437_v37, %v204_v7  ;;  %v227_v48 = vmul.f32 %v5437_v37, %v205_v8  ;;  %v225_v50 = vmul.f32 %v5437_v37, %v203_v9  ;;  %v228_v51 = vmul.f32 %v5437_v37, %v206_v39 }
  0x39   :  { %v229_v52 = vmul.f32 %v5437_v37, %v207_v10  ;;  %v230_v14 = vmul.f32 %v5437_v37, %v208_v40  ;;  %v231_v53 = vmul.f32 %v5437_v37, %v209_v41  ;;  %v210_v61 = vmul.f32 %v5056_v38, %v190_v6 }
  0x3a   :  { %v5453_v54 = vadd.f32 %v5442_v5, %v226_v47  ;;  %v5456_v55 = vadd.f32 %v5442_v5, %v227_v48  ;;  %v5459_v56 = vadd.f32 %v5442_v5, %v225_v50  ;;  %v5462_v57 = vadd.f32 %v5442_v5, %v228_v51 }
  0x3b   :  { %v5465_v58 = vadd.f32 %v5442_v5, %v229_v52  ;;  %v5468_v60 = vadd.f32 %v5442_v5, %v230_v14  ;;  %v5474_v2 = vadd.f32 %v5442_v5, %v231_v53  ;;  %v232_v11 = vmul.f32 %v5437_v37, %v210_v61 }
  0x3c   :  { %v4114_v62 = vmul.f32 -1.442695, %v5453_v54  ;;  %v4115_v63 = vmul.f32 -1.442695, %v5456_v55  ;;  %v4113_v0 = vmul.f32 -1.442695, %v5459_v56 }
  0x3d   :  { %v4116_v3 = vmul.f32 -1.442695, %v5462_v57  ;;  %v4117_v12 = vmul.f32 -1.442695, %v5465_v58  ;;  %v4118_v13 = vmul.f32 -1.442695, %v5468_v60  ;;  %v5483_v16 = vadd.f32 %v5442_v5, %v232_v11 }
  0x3e   :  { %5059 = vpow2.f32 %v4114_v62  ;;  %v4119_v18 = vmul.f32 -1.442695, %v5474_v2 }
  0x3f   :  { %5061 = vpow2.f32 %v4115_v63  ;;  %v4120_v21 = vmul.f32 -1.442695, %v5483_v16 }
  0x40   :  { %5063 = vpow2.f32 %v4113_v0 }
  0x41   :  { %5065 = vpow2.f32 %v4116_v3  ;;  %v5493_v43 = vpop.eup %5057 }
  0x42   :  { %5067 = vpow2.f32 %v4117_v12  ;;  %v211_v44 = vmul.f32 %v5493_v43, %v191_v15  ;;  %v212_v45 = vmul.f32 %v5493_v43, %v192_v19  ;;  %v213_v26 = vmul.f32 %v5493_v43, %v193_v20 }
  0x43   :  { %5069 = vpow2.f32 %v4118_v13 }
  0x44   :  { %5071 = vpow2.f32 %v4119_v18 }
  0x45   :  { %15 = vsyncpa [#allocation3], 0  ;;  %5073 = vpow2.f32 %v4120_v21  ;;  %v197_v46 = vsub.f32 %v5389_v1, %v5423_v24  ;;  %v233_v27 = vmul.f32 %v5437_v37, %v211_v44  ;;  %v214_v28 = vmul.f32 %v5493_v43, %v194_v22  ;;  %s5224_s15 = smov 32   ;;  %s5225_s16 = smov 96  }
  0x46   :  { %v234_v49 = vmul.f32 %v5437_v37, %v212_v45  ;;  %v215_v59 = vmul.f32 %v5493_v43, %v195_v23  ;;  %v235_v30 = vmul.f32 %v5437_v37, %v213_v26  ;;  %v216_v31 = vmul.f32 %v5493_v43, %v196_v25  ;;  %v4983_v45 = vld [vmem:[%s8086_s4 + $0x40] sm:$0xff]   ;;  %s5228_s11 = smov 1  }
  0x47   :  { %v217_v34 = vmul.f32 %v5493_v43, %v197_v46  ;;  %v5512_v1 = vadd.f32 %v5442_v5, %v233_v27  ;;  %v236_v38 = vmul.f32 %v5437_v37, %v214_v28  ;;  %v198_v15 = vsub.f32 %v5399_v17, %v5423_v24  ;;  %4238 = vmatprep.subr.bf16.mxu0 %v4983_v45 }
  0x48   :  { %v5060_v29 = vpop.eup %5059  ;;  %v5516_v7 = vadd.f32 %v5442_v5, %v234_v49  ;;  %v237_v8 = vmul.f32 %v5437_v37, %v215_v59  ;;  %v5520_v10 = vadd.f32 %v5442_v5, %v235_v30  ;;  %v238_v40 = vmul.f32 %v5437_v37, %v216_v31 }
  0x49   :  { %v5062_v32 = vpop.eup %5061  ;;  %v312_v33 = vadd.f32 1.0, %v5060_v29  ;;  %v239_v47 = vmul.f32 %v5437_v37, %v217_v34  ;;  %v4121_v51 = vmul.f32 -1.442695, %v5512_v1  ;;  %v5526_v52 = vadd.f32 %v5442_v5, %v236_v38 }
  0x4a   :  { %v5064_v35 = vpop.eup %5063  ;;  %v313_v36 = vadd.f32 1.0, %v5062_v32  ;;  %v4122_v61 = vmul.f32 -1.442695, %v5516_v7  ;;  %v5530_v62 = vadd.f32 %v5442_v5, %v237_v8  ;;  %v4123_v63 = vmul.f32 -1.442695, %v5520_v10 }
  0x4b   :  { %v5066_v4 = vpop.eup %5065  ;;  %5075 = vrcp.f32 %v312_v33  ;;  %v311_v6 = vadd.f32 1.0, %v5064_v35  ;;  %v5534_v0 = vadd.f32 %v5442_v5, %v238_v40  ;;  %v5537_v11 = vadd.f32 %v5442_v5, %v239_v47 }
  0x4c   :  { %v5068_v9 = vpop.eup %5067  ;;  %5077 = vrcp.f32 %v313_v36  ;;  %v314_v39 = vadd.f32 1.0, %v5066_v4  ;;  %v4124_v12 = vmul.f32 -1.442695, %v5526_v52  ;;  %v4125_v13 = vmul.f32 -1.442695, %v5530_v62 }
  0x4d   :  { %v5070_v41 = vpop.eup %5069  ;;  %5079 = vrcp.f32 %v311_v6  ;;  %v315_v42 = vadd.f32 1.0, %v5068_v9  ;;  %v4126_v18 = vmul.f32 -1.442695, %v5534_v0  ;;  %v4127_v20 = vmul.f32 -1.442695, %v5537_v11  ;;  %v4985_v9 = vld [vmem:[%s8086_s4 + $0x48] sm:$0xff]  }
  0x4e   :  { %v5072_v48 = vpop.eup %5071  ;;  %5081 = vrcp.f32 %v314_v39  ;;  %v316_v50 = vadd.f32 1.0, %v5070_v41  ;;  %v218_v44 = vmul.f32 %v5493_v43, %v198_v15  ;;  %v8093_v33 = vlaneseq }
  0x4f   :  { %v5074_v14 = vpop.eup %5073  ;;  %5083 = vrcp.f32 %v315_v42  ;;  %v317_v53 = vadd.f32 1.0, %v5072_v48 }
  0x50   :  { %5085 = vrcp.f32 %v316_v50  ;;  %v318_v3 = vadd.f32 1.0, %v5074_v14  ;;  %v5590_v8 = vshrl.u32 %v8093_v33, 7  ;;  %v4987_v14 = vld [vmem:[%s8086_s4 + $0x50] sm:$0xff]  }
  0x51   :  { %5087 = vrcp.f32 %v317_v53  ;;  %v4988_v53 = vld [vmem:[%s8086_s4 + $0x10] sm:$0xff]  }
  0x52   :  { %5089 = vpow2.f32 %v4121_v51  ;;  %v377_v51 = vadd.s32 8, %v5590_v8  ;;  %vm8105_vm1 = vcmp.lt.s32.totalorder %v5590_v8, 1  ;;  %vm8099_vm2 = vcmp.lt.s32.totalorder %v5590_v8, 7 }
  0x53   :  { %5091 = vpow2.f32 %v4122_v61  ;;  %v5612_v61 = vadd.s32 16, %v5590_v8 }
  0x54   :  { %5093 = vpow2.f32 %v4123_v63 }
  0x55   :  { %v5076_v19 = vpop.eup %5075  ;;  %5095 = vrcp.f32 %v318_v3  ;;  %v396_v3 = vand.u32 7, %v5590_v8  ;;  %v410_v45 = vand.u32 7, %v5612_v61  ;;  %v8347_v61 = vmov 0 }
  0x56   :  { %v5078_v21 = vpop.eup %5077  ;;  %v5546_v22 = vmul.f32 %v5076_v19, %v5453_v54  ;;  %5097 = vpow2.f32 %v4124_v12  ;;  %v4984_v54 = vld [vmem:[%s8086_s4] sm:$0xff]   ;;  %v403_v12 = vand.u32 7, %v377_v51 }
  0x57   :  { %v5080_v23 = vpop.eup %5079  ;;  %v5549_v25 = vmul.f32 %v5078_v21, %v5456_v55  ;;  %5099 = vpow2.f32 %v4125_v13  ;;  %4239 = vmatpush3.bf16.msra.mxu0 %v4984_v54  ;;  %v4989_v13 = vld [vmem:[%s8086_s4 + $0x58] sm:$0xff]   ;;  %vm5650_vm3 = vcmp.ne.s32.totalorder %v396_v3, 0  ;;  %vm5658_vm5 = vcmp.ne.s32.totalorder %v396_v3, 7 }
  0x58   :  { %8319 = vst [vmem:[#allocation5_spill] sm:$0xff] %v5546_v22  ;;  %v5082_v17 = vpop.eup %5081  ;;  %v5553_v24 = vmul.f32 %v5080_v23, %v5459_v56  ;;  %5101 = vpow2.f32 %v4126_v18  ;;  %v8094_v56 = vmov 0.0   ;;  %4240 = vmatprep.subr.bf16.mxu0 %v4985_v9  ;;  %v4990_v21 = vld [vmem:[%s8086_s4 + $0x18] sm:$0xff]   ;;  %vm5654_vm4 = vcmp.ne.s32.totalorder %v403_v12, 0 }
  0x59   :  { %8320 = vst [vmem:[#allocation6_spill] sm:$0xff] %v5549_v25  ;;  %v5084_v26 = vpop.eup %5083  ;;  %v4593_v55 = vpack.i.bf16 %v5549_v25, %v5546_v22  ;;  %v5564_v46 = vmul.f32 %v5082_v17, %v5462_v57  ;;  %5103 = vpow2.f32 %v4127_v20  ;;  %v240_v57 = vmul.f32 %v5437_v37, %v218_v44 }
  0x5a   :  { %8321 = vst [vmem:[#allocation7_spill] sm:$0xff] %v5553_v24  ;;  %v5086_v43 = vpop.eup %5085  ;;  %v4583_v27 = vpack.i.bf16 %v5553_v24, %v8094_v56  ;;  %v5569_v28 = vmul.f32 %v5084_v26, %v5465_v58  ;;  %v5622_v18 = vrot.slane %v8094_v56, 7  ;;  %v5625_v19 = vrot.slane %v8094_v56, 1 }
  0x5b   :  { %8322 = vst [vmem:[#allocation8_spill] sm:$0xff] %v5564_v46  ;;  %v5088_v49 = vpop.eup %5087  ;;  %4594 = vrot.lane.b32.xlu1 %v4593_v55, %s5224_s15  ;;  %v5573_v59 = vmul.f32 %v5086_v43, %v5468_v60  ;;  %v5586_v38 = vadd.f32 %v5442_v5, %v240_v57  ;;  %v4986_v5 = vld [vmem:[%s8086_s4 + $0x8] sm:$0xff]   ;;  %v379_v17 = vadd.s32 24, %v5590_v8  ;;  %v5647_v26 = vrot.slane %v5546_v22, 1  ;;  %v4991_v57 = vld [vmem:[%s8086_s4 + $0x60] sm:$0xff]  }
  0x5c   :  { %8323 = vst [vmem:[#allocation9_spill] sm:$0xff] %v5569_v28  ;;  %v5090_v29 = vpop.eup %5089  ;;  %4584 = vrot.lane.b32.xlu0 %v4583_v27, %s5224_s15  ;;  %v4603_v30 = vpack.i.bf16 %v5569_v28, %v5564_v46  ;;  %v5580_v58 = vmul.f32 %v5088_v49, %v5474_v2  ;;  %4241 = vmatpush3.bf16.msra.mxu0 %v4986_v5  ;;  %8327 = vst [vmem:[#allocation13_spill] sm:$0xff] %v5622_v18  ;;  %v8331_v43 = vmov 0  ;;  %v8334_v27 = vmov 0 }
  0x5d   :  { %8324 = vst [vmem:[#allocation10_spill] sm:$0xff] %v5573_v59  ;;  %v5092_v31 = vpop.eup %5091  ;;  %v319_v32 = vadd.f32 1.0, %v5090_v29  ;;  %v4128_v47 = vmul.f32 -1.442695, %v5586_v38  ;;  %4242 = vmatprep.subr.bf16.mxu0 %v4987_v14  ;;  %8328 = vst [vmem:[#allocation14_spill] sm:$0xff] %v5625_v19  ;;  %v8332_v43 = vsel %vm5650_vm3, 4294967295, %v8331_v43 }
  0x5e   :  { %8325 = vst [vmem:[#allocation11_spill] sm:$0xff] %v5580_v58  ;;  %v5094_v34 = vpop.eup %5093  ;;  %v320_v35 = vadd.f32 1.0, %v5092_v31  ;;  %v4613_v37 = vpack.i.bf16 %v5580_v58, %v5573_v59  ;;  %8330 = vst [vmem:[#allocation16_spill] sm:$0xff] %v5647_v26  ;;  %v8335_v27 = vsel %vm5654_vm4, 4294967295, %v8334_v27  ;;  %v5663_v49 = vrot.slane %v5553_v24, 1 }
  0x5f   :  { %v5096_v36 = vpop.eup %5095  ;;  %4604 = vrot.lane.b32.xlu1 %v4603_v30, %s5224_s15  ;;  %5105 = vrcp.f32 %v319_v32  ;;  %v321_v60 = vadd.f32 1.0, %v5094_v34  ;;  %8333 = vst [vmem:[#allocation17_spill] sm:$0xff] %v8332_v43  ;;  %8336 = vst [vmem:[#allocation18_spill] sm:$0xff] %v8335_v27  ;;  %vm5674_vm6 = vcmp.ne.s32.totalorder %v403_v12, 7  ;;  %v8341_v32 = vmov 0  ;;  %v4992_v34 = vld [vmem:[%s8086_s4 + $0x20] sm:$0xff]  }
  0x60   :  { %v5098_v4 = vpop.eup %5097  ;;  %4589 = vrot.lane.b32.xlu0 %v4593_v55, %s5225_s16  ;;  %5107 = vrcp.f32 %v320_v35  ;;  %v5602_v48 = vmul.f32 %v5096_v36, %v5483_v16  ;;  %4243 = vmatpush3.bf16.msra.mxu0 %v4988_v53  ;;  %8340 = vst [vmem:[#allocation20_spill] sm:$0xff] %v5663_v49  ;;  %v8342_v32 = vsel %vm5674_vm6, 4294967295, %v8341_v32  ;;  %vm5700_vm7 = vcmp.ne.s32.totalorder %v410_v45, 7 }
  0x61   :  { %v5100_v2 = vpop.eup %5099  ;;  %5109 = vrcp.f32 %v321_v60  ;;  %v322_v6 = vadd.f32 1.0, %v5098_v4  ;;  %4244 = vmatprep.subr.bf16.mxu0 %v4989_v13  ;;  %8343 = vst [vmem:[#allocation21_spill] sm:$0xff] %v8342_v32  ;;  %v5685_v60 = vadd.s32 32, %v5590_v8  ;;  %v5688_v4 = vadd.s32 40, %v5590_v8 }
  0x62   :  { %v5102_v39 = vpop.eup %5101  ;;  %v323_v40 = vadd.f32 1.0, %v5100_v2  ;;  %8326 = vst [vmem:[#allocation12_spill] sm:$0xff] %v5602_v48  ;;  %v4618_v16 = vpack.i.bf16 %v8094_v56, %v5602_v48  ;;  %v5692_v2 = vrot.slane %v5546_v22, 7  ;;  %v8344_v9 = vmov 0 }
  0x63   :  { %v5104_v41 = vpop.eup %5103  ;;  %4614 = vrot.lane.b32.xlu1 %v4613_v37, %s5224_s15  ;;  %5111 = vrcp.f32 %v322_v6  ;;  %v324_v42 = vadd.f32 1.0, %v5102_v39  ;;  %v875_v6 = vrot.slane %v5549_v25, 7  ;;  %v8345_v9 = vsel %vm5700_vm7, 4294967295, %v8344_v9 }
  0x64   :  { %4599 = vrot.lane.b32.xlu0 %v4603_v30, %s5225_s16  ;;  %5113 = vrcp.f32 %v323_v40  ;;  %v325_v50 = vadd.f32 1.0, %v5104_v41  ;;  %4245 = vmatpush3.bf16.msra.mxu0 %v4990_v21  ;;  %8346 = vst [vmem:[#allocation22_spill] sm:$0xff] %v8345_v9  ;;  %v5710_v5 = vsel %vm8099_vm2, %v5663_v49, %v5647_v26  ;;  %v957_v41 = vrot.slane %v5564_v46, 1 }
  0x65   :  { %5115 = vrcp.f32 %v324_v42  ;;  %4246 = vmatprep.subr.bf16.mxu0 %v4991_v57  ;;  %v958_v42 = vrot.slane %v5569_v28, 1  ;;  %vm5731_vm9 = vcmp.ne.s32.totalorder %v410_v45, 0  ;;  %v424_v3 = vand.u32 7, %v5685_v60 }
  0x66   :  { %5117 = vrcp.f32 %v325_v50  ;;  %v4994_v50 = vld [vmem:[%s8086_s4 + $0x28] sm:$0xff]   ;;  %v1114_v13 = vsel %vm5658_vm5, %v5710_v5, 0.0  ;;  %v984_v60 = vsel %vm8099_vm2, %v5625_v19, %v5663_v49  ;;  %v5857_v33 = vrot.slane %v5580_v58, 7 }
  0x67   :  { %5119 = vpow2.f32 %v4128_v47  ;;  %v4993_v47 = vld [vmem:[%s8086_s4 + $0x68] sm:$0xff]   ;;  %v5771_v45 = vsel %vm8099_vm2, %v957_v41, %v958_v42  ;;  %vm5797_vm11 = vcmp.ne.s32.totalorder %v424_v3, 7  ;;  %vm5846_vm13 = vcmp.ne.s32.totalorder %v424_v3, 0 }
  0x68   :  { %4609 = vrot.lane.b32.xlu0 %v4613_v37, %s5225_s16  ;;  %v417_v37 = vand.u32 7, %v379_v17  ;;  %4247 = vmatpush3.bf16.msra.mxu0 %v4992_v34  ;;  %v4995_v17 = vld [vmem:[%s8086_s4 + $0x70] sm:$0xff]   ;;  %v5787_v34 = vadd.s32 56, %v5590_v8  ;;  %8372 = vst [vmem:[#allocation34_spill] sm:$0xff] %v5857_v33  ;;  %v8496_v32 = vld [vmem:[#allocation18_spill] sm:$0xff] }
  0x69   :  { %v5106_v63 = vpop.eup %5105  ;;  %4248 = vmatprep.subr.bf16.mxu0 %v4993_v47  ;;  %v5812_v47 = vrot.slane %v5580_v58, 1 }
  0x6a   :  { %v5108_v15 = vpop.eup %5107  ;;  %v5628_v20 = vmul.f32 %v5106_v63, %v5512_v1  ;;  %vm5727_vm8 = vcmp.ne.s32.totalorder %v417_v37, 7  ;;  %vm5735_vm10 = vcmp.ne.s32.totalorder %v417_v37, 0  ;;  %v8353_v63 = vmov 0 }
  0x6b   :  { %v5110_v23 = vpop.eup %5109  ;;  %v5635_v44 = vmul.f32 %v5108_v15, %v5516_v7  ;;  %v956_v7 = vrot.slane %v5549_v25, 1  ;;  %v8348_v61 = vsel %vm5727_vm8, 4294967295, %v8347_v61  ;;  %v8354_v63 = vsel %vm5735_vm10, 4294967295, %v8353_v63 }
  0x6c   :  { %v4623_v1 = vpack.i.bf16 %v5628_v20, %v8094_v56  ;;  %v5643_v54 = vmul.f32 %v5110_v23, %v5520_v10  ;;  %4619 = vrot.lane.b32.xlu0 %v4618_v16, %s5225_s16  ;;  %v8337_v10 = vmov 0  ;;  %8349 = vst [vmem:[#allocation23_spill] sm:$0xff] %v8348_v61  ;;  %v8350_v16 = vmov 0  ;;  %8355 = vst [vmem:[#allocation25_spill] sm:$0xff] %v8354_v63  ;;  %4249 = vmatpush3.bf16.msra.mxu0 %v4994_v50  ;;  %v4998_v50 = vld [vmem:[%s8086_s4 + $0x78] sm:$0xff]  }
  0x6d   :  { %8329 = vst [vmem:[#allocation15_spill] sm:$0xff] %v5635_v44  ;;  %v5112_v55 = vpop.eup %5111  ;;  %v8338_v10 = vsel %vm5658_vm5, 4294967295, %v8337_v10  ;;  %v8351_v16 = vsel %vm5731_vm9, 4294967295, %v8350_v16  ;;  %v5760_v21 = vsel %vm8099_vm2, %v956_v7, %v957_v41  ;;  %v431_v23 = vand.u32 7, %v5688_v4  ;;  %4250 = vmatprep.subr.bf16.mxu0 %v4995_v17  ;;  %v5000_v17 = vld [vmem:[%s8086_s4 + $0x88] sm:$0xff]  }
  0x6e   :  { %8339 = vst [vmem:[#allocation19_spill] sm:$0xff] %v8338_v10  ;;  %v5114_v29 = vpop.eup %5113  ;;  %4624 = vrot.lane.b32.xlu1 %v4623_v1, %s5224_s15  ;;  %v4633_v30 = vpack.i.bf16 %v5643_v54, %v5635_v44  ;;  %v5672_v31 = vmul.f32 %v5112_v55, %v5526_v52  ;;  %8352 = vst [vmem:[#allocation24_spill] sm:$0xff] %v8351_v16  ;;  %v876_v1 = vrot.slane %v5564_v46, 7  ;;  %v8096_v55 = vrot.slane %v5569_v28, 7 }
  0x6f   :  { %v5116_v35 = vpop.eup %5115  ;;  %v5682_v36 = vmul.f32 %v5114_v29, %v5530_v62  ;;  %v5698_v62 = vsel %vm8099_vm2, %v5647_v26, %v956_v7  ;;  %v4996_v7 = vld [vmem:[%s8086_s4 + $0x30] sm:$0xff]   ;;  %v8357_v4 = vmov 0  ;;  %v959_v41 = vrot.slane %v5573_v59, 1 }
  0x70   :  { %v5118_v52 = vpop.eup %5117  ;;  %4629 = vrot.lane.b32.xlu0 %v4633_v30, %s5225_s16  ;;  %v5722_v51 = vmul.f32 %v5116_v35, %v5534_v0  ;;  %v5744_v0 = vsel %vm8105_vm1, %v5692_v2, %v875_v6  ;;  %v1115_v15 = vsel %vm5674_vm6, %v5698_v62, 0.0  ;;  %v4997_v35 = vld [vmem:[%s8086_s4 + $0x80] sm:$0xff]   ;;  %v8358_v4 = vsel %vm5797_vm11, 4294967295, %v8357_v4  ;;  %4251 = vmatpush3.bf16.msra.mxu0 %v4996_v7 }
  0x71   :  { %v5120_v39 = vpop.eup %5119  ;;  %v4638_v40 = vpack.i.bf16 %v5682_v36, %v5672_v31  ;;  %v5725_v14 = vmul.f32 %v5118_v52, %v5537_v11  ;;  %8356 = vst [vmem:[#allocation26_spill] sm:$0xff] %v5744_v0  ;;  %v1225_v11 = vsel %vm8105_vm1, %v5622_v18, %v5692_v2  ;;  %v1227_v29 = vsel %vm5654_vm4, %v5744_v0, 0.0  ;;  %8359 = vst [vmem:[#allocation27_spill] sm:$0xff] %v8358_v4  ;;  %v8494_v4 = vld [vmem:[#allocation17_spill] sm:$0xff] }
  0x72   :  { %4634 = vrot.lane.b32.xlu1 %v4633_v30, %s5224_s15  ;;  %v326_v53 = vadd.f32 1.0, %v5120_v39  ;;  %v1226_v57 = vsel %vm5650_vm3, %v1225_v11, 0.0  ;;  %v5784_v30 = vadd.s32 48, %v5590_v8  ;;  %v4658_v37 = vpack.i.bf16 %v1115_v15, %v1114_v13  ;;  %4462 = vmatprep.subr.bf16.mxu1 %v4997_v35 }
  0x73   :  { %v4648_v12 = vpack.i.bf16 %v5725_v14, %v5722_v51  ;;  %v5802_v52 = vadd.s32 64, %v5590_v8  ;;  %v1116_v39 = vsel %vm5700_vm7, %v5760_v21, 0.0  ;;  %v5822_v11 = vsel %vm8105_vm1, %v876_v1, %v8096_v55  ;;  %4463 = vmatpush3.bf16.msra.mxu1 %v4997_v35  ;;  %4252 = vmatprep.subr.bf16.mxu0 %v4998_v50 }
  0x74   :  { %4639 = vrot.lane.b32.xlu0 %v4638_v40, %s5225_s16  ;;  %5121 = vrcp.f32 %v326_v53  ;;  %v4663_v53 = vpack.i.bf16 %v1227_v29, %v1226_v57  ;;  %8360 = vst [vmem:[#allocation28_spill] sm:$0xff] %v5822_v11  ;;  %v5826_v13 = vsel %vm8105_vm1, %v875_v6, %v876_v1  ;;  %vm5828_vm12 = vcmp.ne.s32.totalorder %v431_v23, 7  ;;  %4464 = vmatprep.subr.bf16.mxu1 %v5000_v17 }
  0x75   :  { %8361 = vst [vmem:[#allocation29_spill] sm:$0xff] %v5826_v13  ;;  %v8362_v15 = vmov 0  ;;  %v1018_v7 = vsel %vm5658_vm5, %v984_v60, 0.0  ;;  %v1019_v6 = vsel %vm5674_vm6, %v5710_v5, 0.0  ;;  %v5844_v1 = vrot.slane %v5553_v24, 7 }
  0x76   :  { %4644 = vrot.lane.b32.xlu1 %v4638_v40, %s5224_s15  ;;  %v1117_v40 = vsel %vm5727_vm8, %v5771_v45, 0.0  ;;  %v8363_v15 = vsel %vm5828_vm12, 4294967295, %v8362_v15  ;;  %v8366_v57 = vmov 0  ;;  %vm5851_vm14 = vcmp.ne.s32.totalorder %v431_v23, 0 }
  0x77   :  { %8364 = vst [vmem:[#allocation30_spill] sm:$0xff] %v8363_v15  ;;  %8365 = vst [vmem:[#allocation31_spill] sm:$0xff] %v5844_v1  ;;  %v8367_v57 = vsel %vm5846_vm13, 4294967295, %v8366_v57  ;;  %v4678_v29 = vpack.i.bf16 %v1117_v40, %v1116_v39  ;;  %v8369_v35 = vmov 0  ;;  %v878_v60 = vrot.slane %v5573_v59, 7  ;;  %4465 = vmatpush3.bf16.msra.mxu1 %v5000_v17 }
  0x78   :  { %4649 = vrot.lane.b32.xlu0 %v4648_v12, %s5225_s16  ;;  %8368 = vst [vmem:[#allocation32_spill] sm:$0xff] %v8367_v57  ;;  %v8370_v35 = vsel %vm5851_vm14, 4294967295, %v8369_v35  ;;  %v1228_v5 = vsel %vm5731_vm9, %v5826_v13, 0.0  ;;  %v1229_v3 = vsel %vm5735_vm10, %v5822_v11, 0.0  ;;  %v5868_v23 = vsel %vm8099_vm2, %v959_v41, %v5812_v47 }
  0x79   :  { %8371 = vst [vmem:[#allocation33_spill] sm:$0xff] %v8370_v35  ;;  %v4668_v40 = vpack.i.bf16 %v1019_v6, %v1018_v7  ;;  %v438_v50 = vand.u32 7, %v5784_v30  ;;  %v385_v56 = vadd.s32 72, %v5590_v8  ;;  %v4683_v30 = vpack.i.bf16 %v1229_v3, %v1228_v5 }
  0x7a   :  { %4654 = vrot.lane.b32.xlu1 %v4648_v12, %s5224_s15  ;;  %v4999_v12 = vld [vmem:[%s8086_s4 + $0x38] sm:$0xff]   ;;  %s5226_s4 = smov 64   ;;  %v8375_v17 = vrot.slane %v5569_v28, 7  ;;  %v5915_v6 = vrot.slane %v5628_v20, 1  ;;  %v8377_v3 = vmov 0  ;;  %v1021_v58 = vsel %vm5727_vm8, %v5760_v21, 0.0 }
  0x7b   :  { %4253 = vmatpush3.bf16.msra.mxu0 %v4999_v12  ;;  %v445_v12 = vand.u32 7, %v5787_v34  ;;  %vm5924_vm15 = vcmp.ne.s32.totalorder %v438_v50, 7  ;;  %v8383_v28 = vmov 0  ;;  %v6059_v24 = vadd.s32 120, %v5590_v8 }
  0x7c   :  { %4659 = vrot.lane.b32.xlu0 %v4658_v37, %s5224_s15  ;;  %v5874_v37 = vsel %vm8099_vm2, %v958_v42, %v959_v41  ;;  %v5887_v42 = vsel %vm8105_vm1, %v5844_v1, %v5692_v2  ;;  %v452_v41 = vand.u32 7, %v5802_v52  ;;  %v5903_v2 = vsel %vm8105_vm1, %v878_v60, %v5857_v33 }
  0x7d   :  { %8373 = vst [vmem:[#allocation35_spill] sm:$0xff] %v5887_v42  ;;  %v1118_v34 = vsel %vm5797_vm11, %v5874_v37, 0.0  ;;  %v5912_v7 = vsel %vm8105_vm1, %v8375_v17, %v878_v60  ;;  %v1067_v5 = vsel %vm5654_vm4, %v5887_v42, 0.0  ;;  %v8378_v3 = vsel %vm5924_vm15, 4294967295, %v8377_v3 }
  0x7e   :  { %v5122_v39 = vpop.eup %5121  ;;  %4664 = vrot.lane.b32.xlu1 %v4663_v53, %s5226_s4  ;;  %v5891_v53 = vadd.s32 80, %v5590_v8  ;;  %8376 = vst [vmem:[#allocation37_spill] sm:$0xff] %v5912_v7  ;;  %8379 = vst [vmem:[#allocation38_spill] sm:$0xff] %v8378_v3  ;;  %vm5928_vm0 = vcmp.ne.s32.totalorder %v445_v12, 7  ;;  %v459_v60 = vand.u32 7, %v385_v56  ;;  %vm5942_vm2 = vcmp.ne.s32.totalorder %v438_v50, 0 }
  0x7f   :  { %v5881_v55 = vmul.f32 %v5122_v39, %v5586_v38  ;;  %v1119_v38 = vsel %vm5828_vm12, %v5868_v23, 0.0  ;;  %v8380_v39 = vmov 0  ;;  %v8384_v28 = vsel %vm5942_vm2, 4294967295, %v8383_v28 }
  0x80   :  { %4679 = vrot.lane.b32.xlu0 %v4678_v29, %s5224_s15  ;;  %v5918_v29 = vrot.slane %v5602_v48, 1  ;;  %v8381_v39 = vsel %vm5928_vm0, 4294967295, %v8380_v39  ;;  %8385 = vst [vmem:[#allocation40_spill] sm:$0xff] %v8384_v28  ;;  %v4698_v59 = vpack.i.bf16 %v1119_v38, %v1118_v34  ;;  %v1230_v42 = vsel %vm5846_vm13, %v5912_v7, 0.0 }
  0x81   :  { %v5906_v52 = vrot.slane %v5881_v55, 7  ;;  %8382 = vst [vmem:[#allocation39_spill] sm:$0xff] %v8381_v39  ;;  %v1231_v25 = vsel %vm5851_vm14, %v5903_v2, 0.0  ;;  %v8388_v34 = vmov 0  ;;  %v5970_v38 = vrot.slane %v5602_v48, 7 }
  0x82   :  { %4669 = vrot.lane.b32.xlu1 %v4668_v40, %s5226_s4  ;;  %v1020_v40 = vsel %vm5700_vm7, %v5698_v62, 0.0  ;;  %vm5972_vm8 = vcmp.ne.s32.totalorder %v452_v41, 7  ;;  %vm5976_vm7 = vcmp.ne.s32.totalorder %v459_v60, 7  ;;  %v1069_v48 = vsel %vm5735_vm10, %v5826_v13, 0.0 }
  0x83   :  { %8374 = vst [vmem:[#allocation36_spill] sm:$0xff] %v5906_v52  ;;  %v1065_v17 = vsel %vm8105_vm1, %v5906_v52, %v5844_v1  ;;  %vm8386_vm1 = vcmp.lt.s32.totalorder %v5590_v8, 7  ;;  %v4688_v27 = vpack.i.bf16 %v1021_v58, %v1020_v40  ;;  %v4703_v43 = vpack.i.bf16 %v1231_v25, %v1230_v42 }
  0x84   :  { %v1066_v56 = vsel %vm5650_vm3, %v1065_v17, 0.0  ;;  %4684 = vrot.lane.b32.xlu0 %v4683_v30, %s5226_s4  ;;  %v1105_v50 = vsel %vm8386_vm1, %v5918_v29, %v5915_v6  ;;  %vm8387_vm4 = vmmov %vm8386_vm1  ;;  %vm5965_vm3 = vcmp.ne.s32.totalorder %v445_v12, 0  ;;  %v8394_v17 = vmov 0 }
  0x85   :  { %v4673_v46 = vpack.i.bf16 %v1067_v5, %v1066_v56  ;;  %v5963_v30 = vsel %vm8387_vm4, %v5812_v47, %v5918_v29  ;;  %v8389_v34 = vsel %vm5965_vm3, 4294967295, %v8388_v34  ;;  %v8391_v5 = vmov 0 }
  0x86   :  { %8390 = vst [vmem:[#allocation41_spill] sm:$0xff] %v8389_v34  ;;  %v8392_v5 = vsel %vm5972_vm8, 4294967295, %v8391_v5  ;;  %v8395_v17 = vsel %vm5976_vm7, 4294967295, %v8394_v17  ;;  %v387_v56 = vadd.s32 88, %v5590_v8  ;;  %v1068_v12 = vsel %vm5731_vm9, %v5744_v0, 0.0 }
  0x87   :  { %8393 = vst [vmem:[#allocation42_spill] sm:$0xff] %v8392_v5  ;;  %8396 = vst [vmem:[#allocation43_spill] sm:$0xff] %v8395_v17  ;;  %4674 = vrot.lane.b32.xlu1 %v4673_v46, %s5225_s16  ;;  %v1120_v1 = vsel %vm5924_vm15, %v5963_v30, 0.0  ;;  %v1121_v22 = vsel %vm5928_vm0, %v1105_v50, 0.0  ;;  %v5995_v46 = vrot.slane %v5635_v44, 1  ;;  %v964_v58 = vrot.slane %v5643_v54, 1 }
  0x88   :  { %4699 = vrot.lane.b32.xlu0 %v4698_v59, %s5224_s15  ;;  %vm5998_vm1 = vcmp.ne.s32.totalorder %v452_v41, 0  ;;  %v8397_v40 = vmov 0  ;;  %vm6002_vm4 = vcmp.ne.s32.totalorder %v459_v60, 0  ;;  %v8400_v25 = vmov 0 }
  0x89   :  { %v8398_v40 = vsel %vm5998_vm1, 4294967295, %v8397_v40  ;;  %v8401_v25 = vsel %vm6002_vm4, 4294967295, %v8400_v25  ;;  %v466_v59 = vand.u32 7, %v5891_v53  ;;  %v6008_v42 = vadd.s32 96, %v5590_v8 }
  0x8a   :  { %8399 = vst [vmem:[#allocation44_spill] sm:$0xff] %v8398_v40  ;;  %8402 = vst [vmem:[#allocation45_spill] sm:$0xff] %v8401_v25  ;;  %v6011_v50 = vadd.s32 104, %v5590_v8  ;;  %vm8403_vm10 = vcmp.lt.s32.totalorder %v5590_v8, 1  ;;  %v473_v13 = vand.u32 7, %v387_v56  ;;  %v6024_v53 = vadd.s32 112, %v5590_v8 }
  0x8b   :  { %v6017_v41 = vsel %vm8403_vm10, %v5857_v33, %v5970_v38  ;;  %vm8404_vm9 = vmmov %vm8403_vm10  ;;  %4689 = vrot.lane.b32.xlu1 %v4688_v27, %s5226_s4  ;;  %v4693_v63 = vpack.i.bf16 %v1069_v48, %v1068_v12  ;;  %v1022_v0 = vsel %vm5797_vm11, %v5771_v45, 0.0  ;;  %v1023_v33 = vsel %vm5828_vm12, %v5874_v37, 0.0 }
  0x8c   :  { %v1218_v60 = vsel %vm8404_vm9, %v5970_v38, %v5622_v18  ;;  %v4718_v16 = vpack.i.bf16 %v1121_v22, %v1120_v1  ;;  %4704 = vrot.lane.b32.xlu0 %v4703_v43, %s5226_s4  ;;  %vm8405_vm9 = vcmp.lt.s32.totalorder %v5590_v8, 7  ;;  %v6046_v27 = vrot.slane %v5635_v44, 7 }
  0x8d   :  { %v6037_v56 = vsel %vm8405_vm9, %v5995_v46, %v964_v58  ;;  %vm8406_vm10 = vmmov %vm8405_vm9  ;;  %v1232_v22 = vsel %vm5942_vm2, %v6017_v41, 0.0  ;;  %v1233_v43 = vsel %vm5965_vm3, %v1218_v60, 0.0  ;;  %vm6054_vm9 = vcmp.ne.s32.totalorder %v466_v59, 7 }
  0x8e   :  { %v6043_v48 = vsel %vm8406_vm10, %v5915_v6, %v5995_v46  ;;  %v8407_v1 = vmov 0  ;;  %v4708_v26 = vpack.i.bf16 %v1023_v33, %v1022_v0  ;;  %v1070_v44 = vsel %vm5846_vm13, %v5822_v11, 0.0 }
  0x8f   :  { %v8408_v1 = vsel %vm6054_vm9, 4294967295, %v8407_v1  ;;  %v1071_v12 = vsel %vm5851_vm14, %v5912_v7, 0.0  ;;  %4694 = vrot.lane.b32.xlu1 %v4693_v63, %s5225_s16  ;;  %v977_v60 = vsel %vm8406_vm10, %v5812_v47, %v5625_v19  ;;  %v1122_v33 = vsel %vm5972_vm8, %v6043_v48, 0.0 }
  0x90   :  { %8409 = vst [vmem:[#allocation46_spill] sm:$0xff] %v8408_v1  ;;  %v1123_v0 = vsel %vm5976_vm7, %v6037_v56, 0.0  ;;  %v965_v35 = vrot.slane %v5672_v31, 1  ;;  %4719 = vrot.lane.b32.xlu0 %v4718_v16, %s5224_s15  ;;  %v4723_v52 = vpack.i.bf16 %v1233_v43, %v1232_v22  ;;  %v8410_v63 = vrot.slane %v5643_v54, 7 }
  0x91   :  { %vm8411_vm14 = vcmp.lt.s32.totalorder %v5590_v8, 1  ;;  %vm6092_vm13 = vcmp.ne.s32.totalorder %v473_v13, 7  ;;  %v8413_v11 = vmov 0  ;;  %v4713_v57 = vpack.i.bf16 %v1071_v12, %v1070_v44 }
  0x92   :  { %v6086_v7 = vsel %vm8411_vm14, %v6046_v27, %v8410_v63  ;;  %vm8412_vm10 = vmmov %vm8411_vm14  ;;  %v8414_v11 = vsel %vm6092_vm13, 4294967295, %v8413_v11  ;;  %v966_v16 = vrot.slane %v5682_v36, 1  ;;  %vm6097_vm7 = vcmp.ne.s32.totalorder %v473_v13, 0 }
  0x93   :  { %v1217_v47 = vsel %vm8412_vm10, %v5622_v18, %v6046_v27  ;;  %8415 = vst [vmem:[#allocation47_spill] sm:$0xff] %v8414_v11  ;;  %v8416_v22 = vmov 0  ;;  %v1279_v63 = vsel %vm5828_vm12, %v5963_v30, 0.0  ;;  %v1024_v18 = vsel %vm5924_vm15, %v5868_v23, 0.0  ;;  %4709 = vrot.lane.b32.xlu1 %v4708_v26, %s5226_s4 }
  0x94   :  { %v8417_v22 = vsel %vm6097_vm7, 4294967295, %v8416_v22  ;;  %v1025_v49 = vsel %vm5928_vm0, %v977_v60, 0.0  ;;  %v4738_v44 = vpack.i.bf16 %v1123_v0, %v1122_v33  ;;  %vm6110_vm14 = vcmp.ne.s32.totalorder %v466_v59, 0  ;;  %4724 = vrot.lane.b32.xlu0 %v4723_v52, %s5226_s4 }
  0x95   :  { %8418 = vst [vmem:[#allocation48_spill] sm:$0xff] %v8417_v22  ;;  %v8419_v12 = vmov 0  ;;  %v1234_v13 = vsel %vm5998_vm1, %v1217_v47, 0.0  ;;  %v1235_v30 = vsel %vm6002_vm4, %v6086_v7, 0.0  ;;  %vm8422_vm10 = vcmp.lt.s32.totalorder %v5590_v8, 7 }
  0x96   :  { %v8420_v12 = vsel %vm6110_vm14, 4294967295, %v8419_v12  ;;  %v6122_v43 = vsel %vm8422_vm10, %v964_v58, %v965_v35  ;;  %v884_v60 = vrot.slane %v5672_v31, 7  ;;  %v1274_v26 = vsel %vm5658_vm5, %v5698_v62, 0.0 }
  0x97   :  { %8421 = vst [vmem:[#allocation49_spill] sm:$0xff] %v8420_v12  ;;  %v1275_v33 = vsel %vm5674_vm6, %v5760_v21, 0.0  ;;  %vm8423_vm12 = vnez %v8345_v9  ;;  %v6138_v58 = vsel %vm8422_vm10, %v965_v35, %v966_v16  ;;  %vm8424_vm4 = vnez %v8348_v61  ;;  %vm8425_vm6 = vmmov %vm8422_vm10  ;;  %4714 = vrot.lane.b32.xlu1 %v4713_v57, %s5225_s16 }
  0x98   :  { %v1276_v0 = vsel %vm8423_vm12, %v5771_v45, 0.0  ;;  %v1810_v47 = vpack.c.bf16 %v1275_v33, %v1274_v26  ;;  %v1277_v52 = vsel %vm8424_vm4, %v5874_v37, 0.0  ;;  %v1278_v62 = vsel %vm5797_vm11, %v5868_v23, 0.0  ;;  %vm8426_vm10 = vmmov %vm8425_vm6  ;;  %4739 = vrot.lane.b32.xlu0 %v4738_v44, %s5224_s15 }
  0x99   :  { %v1813_v59 = vpack.c.bf16 %v1277_v52, %v1276_v0  ;;  %v1816_v15 = vpack.c.bf16 %v1279_v63, %v1278_v62  ;;  %v1265_v21 = vsel %vm8425_vm6, %v5625_v19, %v5995_v46  ;;  %v1266_v45 = vsel %vm8426_vm10, %v5918_v29, %v5625_v19 }
  0x9a   :  { %v4728_v35 = vpack.i.bf16 %v1025_v49, %v1024_v18  ;;  %v1072_v37 = vsel %vm5942_vm2, %v5903_v2, 0.0  ;;  %v1073_v23 = vsel %vm5965_vm3, %v6017_v41, 0.0  ;;  %v6162_v63 = vrot.slane %v5628_v20, 7 }
  0x9b   :  { %vm8427_vm6 = vcmask 261120   ;;  %v4743_v46 = vpack.i.bf16 %v1235_v30, %v1234_v13  ;;  %v976_v18 = vsel %vm8426_vm10, %v5625_v19, %v5915_v6  ;;  %v1124_v49 = vsel %vm6054_vm9, %v6122_v43, 0.0 }
  0x9c   :  { %4466 = vmatprep.mubr.msk.bf16.mxu1 %vm8427_vm6, %v1810_v47  ;;  %v1125_v57 = vsel %vm6092_vm13, %v6138_v58, 0.0  ;;  %vm8428_vm11 = vmmov %vm8427_vm6  ;;  %v8429_v29 = vrot.slane %v5682_v36, 7  ;;  %vm8430_vm6 = vcmp.lt.s32.totalorder %v5590_v8, 1  ;;  %v967_v44 = vrot.slane %v5722_v51, 1  ;;  %4729 = vrot.lane.b32.xlu1 %v4728_v35, %s5226_s4 }
  0x9d   :  { %4467 = vmatmul.mubr.msk.bf16.vlgmr.msra.gmra.mrb[0].mxu1 %vm8428_vm11, %v1813_v59  ;;  %vm8431_vm5 = vmmov %vm8428_vm11  ;;  %v1280_v6 = vsel %vm5924_vm15, %v1266_v45, 0.0  ;;  %v1281_v13 = vsel %vm5928_vm0, %v1265_v21, 0.0  ;;  %v8432_v30 = vrot.slane %v5643_v54, 7  ;;  %v8434_v26 = vand.u32 7, %v6008_v42  ;;  %4744 = vrot.lane.b32.xlu0 %v4743_v46, %s5226_s4 }
  0x9e   :  { %v6181_v41 = vsel %vm8430_vm6, %v884_v60, %v8429_v29  ;;  %4470 = vmatprep.mubr.msk.bf16.mxu1 %vm8431_vm5, %v1816_v15  ;;  %vm8433_vm11 = vmmov %vm8430_vm6  ;;  %v8435_v33 = vmov 0  ;;  %v8438_v15 = vand.u32 7, %v6011_v50  ;;  %v8439_v0 = vmov 0 }
  0x9f   :  { %v6193_v59 = vsel %vm8433_vm11, %v8432_v30, %v884_v60  ;;  %vm6197_vm10 = vcmp.ne.s32.totalorder %v8434_v26, 7  ;;  %v6208_v47 = vrot.slane %v5725_v14, 1  ;;  %v4733_v52 = vpack.i.bf16 %v1073_v23, %v1072_v37  ;;  %vm8443_vm15 = vmmov %vm8433_vm11 }
  0xa0   :  { %v8436_v33 = vsel %vm6197_vm10, 4294967295, %v8435_v33  ;;  %vm6203_vm5 = vcmp.ne.s32.totalorder %v8438_v15, 7  ;;  %v1026_v60 = vsel %vm5972_vm8, %v976_v18, 0.0  ;;  %vm8442_vm6 = vnez %v8395_v17 }
  0xa1   :  { %8437 = vst [vmem:[#allocation50_spill] sm:$0xff] %v8436_v33  ;;  %v8440_v0 = vsel %vm6203_vm5, 4294967295, %v8439_v0  ;;  %v1027_v62 = vsel %vm8442_vm6, %v6043_v48, 0.0  ;;  %v6220_v21 = vsel %vm8433_vm11, %v6162_v63, %v6046_v27  ;;  %v4758_v45 = vpack.i.bf16 %v1125_v57, %v1124_v49  ;;  %4734 = vrot.lane.b32.xlu1 %v4733_v52, %s5225_s16 }
  0xa2   :  { %8441 = vst [vmem:[#allocation51_spill] sm:$0xff] %v8440_v0  ;;  %v1057_v35 = vsel %vm8443_vm15, %v5970_v38, %v6162_v63  ;;  %v1237_v37 = vsel %vm6097_vm7, %v6181_v41, 0.0  ;;  %v1819_v23 = vpack.c.bf16 %v1281_v13, %v1280_v6  ;;  %v1236_v48 = vsel %vm6110_vm14, %v6193_v59, 0.0 }
  0xa3   :  { %vm8444_vm11 = vcmp.lt.s32.totalorder %v5590_v8, 7  ;;  %v1282_v46 = vsel %vm5972_vm8, %v6037_v56, 0.0  ;;  %v1283_v38 = vsel %vm8442_vm6, %v6122_v43, 0.0  ;;  %v886_v49 = vrot.slane %v5722_v51, 7  ;;  %4759 = vrot.lane.b32.xlu0 %v4758_v45, %s5224_s15 }
  0xa4   :  { %v6235_v27 = vsel %vm8444_vm11, %v966_v16, %v967_v44  ;;  %vm8445_vm15 = vmmov %vm8444_vm11  ;;  %v6250_v57 = vrot.slane %v5725_v14, 7  ;;  %v1822_v16 = vpack.c.bf16 %v1283_v38, %v1282_v46  ;;  %v4748_v29 = vpack.i.bf16 %v1027_v62, %v1026_v60 }
  0xa5   :  { %v6246_v18 = vsel %vm8445_vm15, %v967_v44, %v6208_v47  ;;  %v8446_v6 = vmov %v8434_v26  ;;  %v8447_v13 = vmov 0  ;;  %v494_v30 = vand.u32 7, %v6024_v53 }
  0xa6   :  { %vm6255_vm11 = vcmp.ne.s32.totalorder %v8446_v6, 0  ;;  %v1074_v44 = vsel %vm5998_vm1, %v1057_v35, 0.0  ;;  %vm8450_vm15 = vnez %v8401_v25  ;;  %v4763_v15 = vpack.i.bf16 %v1237_v37, %v1236_v48  ;;  %4749 = vrot.lane.b32.xlu1 %v4748_v29, %s5226_s4 }
  0xa7   :  { %v8448_v13 = vsel %vm6255_vm11, 4294967295, %v8447_v13  ;;  %v1075_v26 = vsel %vm8450_vm15, %v6220_v21, 0.0  ;;  %v501_v52 = vand.u32 7, %v6059_v24  ;;  %vm8451_vm6 = vcmask 261120  }
  0xa8   :  { %8449 = vst [vmem:[#allocation52_spill] sm:$0xff] %v8448_v13  ;;  %4471 = vmatmul.mubr.msk.bf16.gmra.mrb[4].mxu1 %vm8451_vm6, %v1819_v23  ;;  %v1126_v42 = vsel %vm6197_vm10, %v6235_v27, 0.0  ;;  %v1127_v53 = vsel %vm6203_vm5, %v6246_v18, 0.0  ;;  %vm8452_vm8 = vmmov %vm8451_vm6  ;;  %v1284_v60 = vsel %vm6054_vm9, %v6138_v58, 0.0  ;;  %v1285_v24 = vsel %vm6092_vm13, %v6235_v27, 0.0  ;;  %4764 = vrot.lane.b32.xlu0 %v4763_v15, %s5226_s4 }
  0xa9   :  { %4474 = vmatprep.mubr.msk.bf16.mxu1 %vm8452_vm8, %v1822_v16  ;;  %v8453_v62 = vand.u32 7, %v6011_v50  ;;  %v8454_v45 = vmov 0  ;;  %vm8457_vm0 = vcmp.lt.s32.totalorder %v5590_v8, 1  ;;  %v8458_v37 = vrot.slane %v5682_v36, 7 }
  0xaa   :  { %v6290_v35 = vsel %vm8457_vm0, %v886_v49, %v6250_v57  ;;  %vm8459_vm8 = vmmov %vm8457_vm0  ;;  %v1097_v48 = vrot.slane %v5881_v55, 1  ;;  %v4753_v50 = vpack.i.bf16 %v1075_v26, %v1074_v44  ;;  %v1028_v46 = vsel %vm6054_vm9, %v6037_v56, 0.0  ;;  %v8467_v26 = vld [vmem:[#allocation20_spill] sm:$0xff] }
  0xab   :  { %vm6283_vm6 = vcmp.ne.s32.totalorder %v8453_v62, 0  ;;  %v6296_v23 = vsel %vm8459_vm8, %v8458_v37, %v886_v49  ;;  %v1029_v38 = vsel %vm6092_vm13, %v6122_v43, 0.0  ;;  %v4778_v16 = vpack.i.bf16 %v1127_v53, %v1126_v42 }
  0xac   :  { %v8455_v45 = vsel %vm6283_vm6, 4294967295, %v8454_v45  ;;  %v1825_v6 = vpack.c.bf16 %v1285_v24, %v1284_v60  ;;  %v1238_v49 = vsel %vm6255_vm11, %v6296_v23, 0.0  ;;  %v1239_v29 = vsel %vm6283_vm6, %v6290_v35, 0.0  ;;  %4754 = vrot.lane.b32.xlu1 %v4753_v50, %s5225_s16 }
  0xad   :  { %8456 = vst [vmem:[#allocation53_spill] sm:$0xff] %v8455_v45  ;;  %vm6313_vm0 = vcmp.ne.s32.totalorder %v494_v30, 7  ;;  %v8460_v44 = vmov 0  ;;  %vm6317_vm8 = vcmp.ne.s32.totalorder %v501_v52, 7  ;;  %v8463_v56 = vmov 0  ;;  %4779 = vrot.lane.b32.xlu0 %v4778_v16, %s5224_s15 }
  0xae   :  { %v8461_v44 = vsel %vm6313_vm0, 4294967295, %v8460_v44  ;;  %v8464_v56 = vsel %vm6317_vm8, 4294967295, %v8463_v56  ;;  %vm8466_vm13 = vcmp.lt.s32.totalorder %v5590_v8, 7  ;;  %v4768_v42 = vpack.i.bf16 %v1029_v38, %v1028_v46  ;;  %v8473_v46 = vld [vmem:[#allocation36_spill] sm:$0xff] }
  0xaf   :  { %8462 = vst [vmem:[#allocation54_spill] sm:$0xff] %v8461_v44  ;;  %8465 = vst [vmem:[#allocation55_spill] sm:$0xff] %v8464_v56  ;;  %v1098_v43 = vsel %vm8466_vm13, %v6208_v47, %v1097_v48  ;;  %v1076_v53 = vsel %vm6110_vm14, %v6086_v7, 0.0  ;;  %v1077_v60 = vsel %vm6097_vm7, %v6193_v59, 0.0  ;;  %v4783_v24 = vpack.i.bf16 %v1239_v29, %v1238_v49 }
  0xb0   :  { %vm8468_vm9 = vmmov %vm8466_vm13  ;;  %vm8469_vm4 = vcmask 261120   ;;  %v1128_v62 = vsel %vm6313_vm0, %v1098_v43, 0.0  ;;  %vm6340_vm13 = vcmp.ne.s32.totalorder %v494_v30, 0  ;;  %v8470_v50 = vmov 0  ;;  %4769 = vrot.lane.b32.xlu1 %v4768_v42, %s5226_s4 }
  0xb1   :  { %v1113_v15 = vsel %vm8468_vm9, %v1097_v48, %v8467_v26  ;;  %4475 = vmatmul.mubr.msk.bf16.gmra.mrb[8].mxu1 %vm8469_vm4, %v1825_v6  ;;  %v8471_v50 = vsel %vm6340_vm13, 4294967295, %v8470_v50  ;;  %vm8474_vm9 = vcmp.lt.s32.totalorder %v5590_v8, 1  ;;  %vm6348_vm12 = vcmp.ne.s32.totalorder %v501_v52, 0  ;;  %v8478_v6 = vld [vmem:[#allocation13_spill] sm:$0xff]  ;;  %4784 = vrot.lane.b32.xlu0 %v4783_v24, %s5226_s4 }
  0xb2   :  { %v1129_v37 = vsel %vm6317_vm8, %v1113_v15, 0.0  ;;  %8472 = vst [vmem:[#allocation20_spill] sm:$0xff] %v8471_v50  ;;  %v1050_v38 = vsel %vm8474_vm9, %v6250_v57, %v8473_v46  ;;  %v8475_v16 = vmov 0  ;;  %vm8479_vm4 = vmmov %vm8474_vm9  ;;  %v4773_v30 = vpack.i.bf16 %v1077_v60, %v1076_v53  ;;  %v8487_v50 = vld [vmem:[#allocation7_spill] sm:$0xff] }
  0xb3   :  { %v8476_v16 = vsel %vm6348_vm12, 4294967295, %v8475_v16  ;;  %v1210_v49 = vsel %vm8479_vm4, %v8473_v46, %v8478_v6  ;;  %v1287_v29 = vsel %vm6203_vm5, %v1098_v43, 0.0  ;;  %v1030_v52 = vsel %vm6197_vm10, %v6138_v58, 0.0  ;;  %v8481_v58 = vld [vmem:[#allocation16_spill] sm:$0xff] }
  0xb4   :  { %8477 = vst [vmem:[#allocation36_spill] sm:$0xff] %v8476_v16  ;;  %v1031_v26 = vsel %vm6203_vm5, %v6235_v27, 0.0  ;;  %v4798_v15 = vpack.i.bf16 %v1129_v37, %v1128_v62  ;;  %v1240_v46 = vsel %vm6340_vm13, %v1050_v38, 0.0  ;;  %v1241_v42 = vsel %vm6348_vm12, %v1210_v49, 0.0  ;;  %4774 = vrot.lane.b32.xlu1 %v4773_v30, %s5225_s16  ;;  %v8489_v16 = vld [vmem:[#allocation5_spill] sm:$0xff] }
  0xb5   :  { %v1286_v43 = vsel %vm6197_vm10, %v6246_v18, 0.0  ;;  %vm8480_vm9 = vcmp.lt.s32.totalorder %v5590_v8, 7  ;;  %v4788_v37 = vpack.i.bf16 %v1031_v26, %v1030_v52  ;;  %v1032_v26 = vsel %vm6313_vm0, %v6246_v18, 0.0 }
  0xb6   :  { %v1258_v53 = vsel %vm8480_vm9, %v1097_v48, %v5625_v19  ;;  %vm8482_vm4 = vmmov %vm8480_vm9  ;;  %v1828_v60 = vpack.c.bf16 %v1287_v29, %v1286_v43  ;;  %4799 = vrot.lane.b32.xlu0 %v4798_v15, %s5224_s15  ;;  %v1078_v48 = vsel %vm6255_vm11, %v6181_v41, 0.0  ;;  %v1079_v29 = vsel %vm6283_vm6, %v6296_v23, 0.0 }
  0xb7   :  { %v1273_v27 = vsel %vm8482_vm4, %v5625_v19, %v8481_v58  ;;  %v1288_v24 = vsel %vm6313_vm0, %v1258_v53, 0.0  ;;  %v4803_v43 = vpack.i.bf16 %v1241_v42, %v1240_v46  ;;  %vm8483_vm9 = vcmask 261120  }
  0xb8   :  { %v1289_v62 = vsel %vm6317_vm8, %v1273_v27, 0.0  ;;  %4478 = vmatprep.mubr.msk.bf16.mxu1 %vm8483_vm9, %v1828_v60  ;;  %v985_v30 = vsel %vm8482_vm4, %v6208_v47, %v5625_v19  ;;  %vm8484_vm10 = vmmov %vm8483_vm9  ;;  %4789 = vrot.lane.b32.xlu1 %v4788_v37, %s5226_s4  ;;  %v4793_v52 = vpack.i.bf16 %v1079_v29, %v1078_v48  ;;  %v8485_v46 = vmov 0.0  }
  0xb9   :  { %v1831_v49 = vpack.c.bf16 %v1289_v62, %v1288_v24  ;;  %v1033_v15 = vsel %vm6317_vm8, %v985_v30, 0.0  ;;  %v4808_v42 = vpack.i.bf16 %v8485_v46, %v5881_v55  ;;  %v1080_v53 = vsel %vm6340_vm13, %v6290_v35, 0.0  ;;  %vm8488_vm0 = vmmov %vm8483_vm9 }
  0xba   :  { %4804 = vrot.lane.b32.xlu0 %v4803_v43, %s5226_s4  ;;  %v4813_v47 = vpack.i.bf16 %v1033_v15, %v1032_v26  ;;  %v1081_v58 = vsel %vm6348_vm12, %v1050_v38, 0.0  ;;  %vm8218_vm4 = vcmask 523264   ;;  %vm8217_vm8 = vcmask 785408   ;;  %vm8490_vm5 = vmmov %vm8488_vm0 }
  0xbb   :  { %4479 = vmatmul.mubr.msk.bf16.gmra.mrb[12].mxu1 %vm8484_vm10, %v1831_v49  ;;  %v4818_v18 = vpack.i.bf16 %v1081_v58, %v1080_v53  ;;  %vm8486_vm10 = vmmov %vm8483_vm9 }
  0xbc   :  { %4794 = vrot.lane.b32.xlu1 %v4793_v52, %s5225_s16 }
  0xbe   :  { %4809 = vrot.lane.b32.xlu0 %v4808_v42, %s5225_s16  ;;  %v951_v42 = vsel %vm6340_vm13, %v6296_v23, 0.0 }
  0xc0   :  { %4814 = vrot.lane.b32.xlu1 %v4813_v47, %s5226_s4  ;;  %v952_v47 = vsel %vm6348_vm12, %v6290_v35, 0.0  ;;  %vm8504_vm12 = vcmask 523264  }
  0xc1   :  { %vm8505_vm13 = vmmov %vm8504_vm12 }
  0xc4   :  { %4819 = vrot.lane.b32.xlu1 %v4818_v18, %s5225_s16 }
  0xcd   :  { %v6416_v27 = vpop.permute.xlu1 %4594 }
  0xce   :  { %v4585_v60 = vpop.permute.xlu0 %4584 }
  0xcf   :  { %v4587_v5 = vunpack.i.h.bf16 %v4585_v60  ;;  %v4586_v39 = vunpack.i.l.bf16 %v4585_v60  ;;  %v8500_v60 = vld [vmem:[#allocation6_spill] sm:$0xff] }
  0xd1   :  { %v6418_v62 = vpop.permute.xlu1 %4604 }
  0xd2   :  { %v4590_v24 = vpop.permute.xlu0 %4589 }
  0xd3   :  { %v4592_v3 = vunpack.i.h.bf16 %v4590_v24  ;;  %v4591_v17 = vunpack.i.l.bf16 %v4590_v24 }
  0xd5   :  { %v6422_v49 = vpop.permute.xlu1 %4614 }
  0xd6   :  { %v6420_v37 = vpop.permute.xlu0 %4599 }
  0xda   :  { %v6424_v48 = vpop.permute.xlu0 %4609 }
  0xde   :  { %v6426_v29 = vpop.permute.xlu0 %4619 }
  0xe0   :  { %v6428_v38 = vpop.permute.xlu1 %4624 }
  0xe2   :  { %v6430_v43 = vpop.permute.xlu0 %4629 }
  0xe4   :  { %v6432_v30 = vpop.permute.xlu1 %4634 }
  0xe6   :  { %v6434_v52 = vpop.permute.xlu0 %4639 }
  0xe8   :  { %v6436_v26 = vpop.permute.xlu1 %4644 }
  0xea   :  { %v6438_v15 = vpop.permute.xlu0 %4649 }
  0xec   :  { %v4655_v53 = vpop.permute.xlu1 %4654 }
  0xed   :  { %v4657_v58 = vunpack.i.h.bf16 %v4655_v53  ;;  %v4656_v18 = vunpack.i.l.bf16 %v4655_v53 }
  0xee   :  { %v4660_v56 = vpop.permute.xlu0 %4659 }
  0xef   :  { %v6447_v44 = vsel %vm8486_vm10, %v952_v47, %v4657_v58  ;;  %v6450_v33 = vsel %vm8483_vm9, %v951_v42, %v4656_v18  ;;  %v4662_v0 = vunpack.i.h.bf16 %v4660_v56  ;;  %v4661_v19 = vunpack.i.l.bf16 %v4660_v56  ;;  %v8492_v56 = vld [vmem:[#allocation31_spill] sm:$0xff] }
  0xf0   :  { %v4665_v11 = vpop.permute.xlu1 %4664  ;;  %vm8491_vm10 = vcmp.lt.s32.totalorder %v5590_v8, 1 }
  0xf1   :  { %v4667_v23 = vunpack.i.h.bf16 %v4665_v11  ;;  %v4666_v1 = vunpack.i.l.bf16 %v4665_v11  ;;  %v1724_v35 = vsel %vm8488_vm0, %v8487_v50, %v4661_v19  ;;  %v1725_v53 = vsel %vm8490_vm5, %v8489_v16, %v4662_v0  ;;  %vm8493_vm9 = vmmov %vm8491_vm10 }
  0xf2   :  { %v4680_v47 = vpop.permute.xlu0 %4679  ;;  %v904_v42 = vsel %vm8491_vm10, %v6250_v57, %v8478_v6  ;;  %v903_v58 = vsel %vm8493_vm9, %v8478_v6, %v8492_v56  ;;  %vm8495_vm5 = vnez %v8494_v4  ;;  %vm8497_vm0 = vnez %v8496_v32 }
  0xf3   :  { %v1740_v11 = vsel %vm8218_vm4, %v1724_v35, %v4666_v1  ;;  %v1741_v19 = vsel %vm8218_vm4, %v1725_v53, %v4667_v23  ;;  %v4682_v18 = vunpack.i.h.bf16 %v4680_v47  ;;  %v4681_v0 = vunpack.i.l.bf16 %v4680_v47 }
  0xf4   :  { %v4670_v50 = vpop.permute.xlu1 %4669  ;;  %v1756_v16 = vsel %vm8217_vm8, %v1740_v11, %v4591_v17  ;;  %v1757_v24 = vsel %vm8217_vm8, %v1741_v19, %v4592_v3  ;;  %v937_v57 = vsel %vm8495_vm5, %v904_v42, 0.0  ;;  %v938_v10 = vsel %vm8497_vm0, %v903_v58, 0.0  ;;  %v8498_v11 = vld [vmem:[#allocation8_spill] sm:$0xff] }
  0xf5   :  { %v1809_v61 = vpack.c.bf16 %v1757_v24, %v1756_v16  ;;  %v4672_v1 = vunpack.i.h.bf16 %v4670_v50  ;;  %v4671_v35 = vunpack.i.l.bf16 %v4670_v50  ;;  %v4602_v47 = vunpack.i.h.bf16 %v6420_v37 }
  0xf6   :  { %v4685_v56 = vpop.permute.xlu0 %4684  ;;  %v4601_v17 = vunpack.i.l.bf16 %v6420_v37  ;;  %vm8499_vm10 = vcmask 261120   ;;  %vm8506_vm5 = vcmask 785408  }
  0xf7   :  { %v4687_v23 = vunpack.i.h.bf16 %v4685_v56  ;;  %v4686_v53 = vunpack.i.l.bf16 %v4685_v56  ;;  %v1727_v3 = vsel %vm8499_vm10, %v8498_v11, %v4682_v18  ;;  %vm8501_vm9 = vmmov %vm8499_vm10  ;;  %1996 = vmatprep.mubr.bf16.mxu0 %v1809_v61 }
  0xf8   :  { %v1726_v19 = vsel %vm8501_vm9, %v8500_v60, %v4681_v0  ;;  %vm8502_vm8 = vmmov %vm8501_vm9 }
  0xf9   :  { %v1674_v42 = vsel %vm8502_vm8, %v937_v57, %v4586_v39  ;;  %vm8503_vm4 = vmmov %vm8502_vm8  ;;  %v4675_v16 = vpop.permute.xlu1 %4674  ;;  %v1742_v50 = vsel %vm8504_vm12, %v1726_v19, %v4686_v53  ;;  %v1743_v24 = vsel %vm8505_vm13, %v1727_v3, %v4687_v23  ;;  %v4597_v23 = vunpack.i.h.bf16 %v6416_v27  ;;  %v8513_v19 = vld [vmem:[#allocation24_spill] sm:$0xff] }
  0xfa   :  { %v1675_v58 = vsel %vm8503_vm4, %v938_v10, %v4587_v5  ;;  %v4677_v56 = vunpack.i.h.bf16 %v4675_v16  ;;  %v4676_v4 = vunpack.i.l.bf16 %v4675_v16  ;;  %v4700_v32 = vpop.permute.xlu0 %4699  ;;  %v1758_v37 = vsel %vm8506_vm5, %v1742_v50, %v4601_v17  ;;  %vm8507_vm0 = vmmov %vm8506_vm5  ;;  %v8512_v17 = vld [vmem:[#allocation35_spill] sm:$0xff] }
  0xfb   :  { %v1759_v18 = vsel %vm8507_vm0, %v1743_v24, %v4602_v47  ;;  %vm8508_vm10 = vmmov %vm8504_vm12  ;;  %v4702_v0 = vunpack.i.h.bf16 %v4700_v32  ;;  %v4701_v5 = vunpack.i.l.bf16 %v4700_v32  ;;  %v4596_v53 = vunpack.i.l.bf16 %v6416_v27 }
  0xfc   :  { %v1691_v11 = vsel %vm8508_vm10, %v1674_v42, %v4671_v35  ;;  %vm8509_vm9 = vmmov %vm8508_vm10  ;;  %v1812_v57 = vpack.c.bf16 %v1759_v18, %v1758_v37  ;;  %vm8514_vm12 = vnez %v8513_v19  ;;  %v8515_v35 = vld [vmem:[#allocation26_spill] sm:$0xff]  ;;  %v8516_v42 = vld [vmem:[#allocation25_spill] sm:$0xff]  ;;  %v4612_v24 = vunpack.i.h.bf16 %v6424_v48 }
  0xfd   :  { %v1692_v61 = vsel %vm8509_vm9, %v1675_v58, %v4672_v1  ;;  %vm8510_vm8 = vmmov %vm8507_vm0  ;;  %v4690_v3 = vpop.permute.xlu1 %4689  ;;  %v939_v47 = vsel %vm8514_vm12, %v8512_v17, 0.0  ;;  %vm8517_vm13 = vnez %v8516_v42  ;;  %v4611_v27 = vunpack.i.l.bf16 %v6424_v48  ;;  %v8520_v18 = vld [vmem:[#allocation9_spill] sm:$0xff] }
  0xfe   :  { %v1708_v39 = vsel %vm8510_vm8, %v1691_v11, %v4676_v4  ;;  %vm8511_vm4 = vmmov %vm8507_vm0  ;;  %v940_v1 = vsel %vm8517_vm13, %v8515_v35, 0.0  ;;  %v4705_v58 = vpop.permute.xlu0 %4704  ;;  %v4692_v4 = vunpack.i.h.bf16 %v4690_v3  ;;  %v4691_v16 = vunpack.i.l.bf16 %v4690_v3 }
  0xff   :  { %v1709_v10 = vsel %vm8511_vm4, %v1692_v61, %v4677_v56  ;;  %v4707_v32 = vunpack.i.h.bf16 %v4705_v58  ;;  %v4706_v50 = vunpack.i.l.bf16 %v4705_v58  ;;  %v8518_v56 = vld [vmem:[#allocation10_spill] sm:$0xff]  ;;  %vm8519_vm5 = vcmask 261120  }
 0x100   :  { %v1808_v60 = vpack.c.bf16 %v1709_v10, %v1708_v39  ;;  %v1729_v37 = vsel %vm8519_vm5, %v8518_v56, %v4702_v0  ;;  %vm8521_vm0 = vmmov %vm8519_vm5  ;;  %vm8524_vm8 = vcmask 523264   ;;  %vm8526_vm13 = vcmask 785408  }
 0x101   :  { %v1728_v11 = vsel %vm8521_vm0, %v8520_v18, %v4701_v5  ;;  %vm8522_vm10 = vmmov %vm8521_vm0  ;;  %v4695_v10 = vpop.permute.xlu1 %4694 }
 0x102   :  { %1997 = vmatmul.mubr.bf16.vlgmr.msra.gmra.mrb[0].mxu0 %v1808_v60  ;;  %v1676_v61 = vsel %vm8522_vm10, %v939_v47, %v4596_v53  ;;  %vm8523_vm9 = vmmov %vm8521_vm0  ;;  %v1744_v3 = vsel %vm8524_vm8, %v1728_v11, %v4706_v50  ;;  %v4697_v17 = vunpack.i.h.bf16 %v4695_v10  ;;  %v4696_v35 = vunpack.i.l.bf16 %v4695_v10  ;;  %v4720_v58 = vpop.permute.xlu0 %4719  ;;  %v8533_v11 = vld [vmem:[#allocation32_spill] sm:$0xff] }
 0x103   :  { %2004 = vmatprep.mubr.bf16.mxu0 %v1812_v57  ;;  %v1677_v39 = vsel %vm8523_vm9, %v940_v1, %v4597_v23  ;;  %vm8525_vm4 = vmmov %vm8524_vm8  ;;  %v1760_v48 = vsel %vm8526_vm13, %v1744_v3, %v4611_v27  ;;  %v4722_v57 = vunpack.i.h.bf16 %v4720_v58  ;;  %v4721_v47 = vunpack.i.l.bf16 %v4720_v58  ;;  %v8532_v27 = vld [vmem:[#allocation29_spill] sm:$0xff]  ;;  %v8538_v58 = vld [vmem:[#allocation12_spill] sm:$0xff] }
 0x104   :  { %v1745_v60 = vsel %vm8525_vm4, %v1729_v37, %v4707_v32  ;;  %vm8527_vm12 = vmmov %vm8526_vm13  ;;  %v4607_v32 = vunpack.i.h.bf16 %v6418_v62  ;;  %v4606_v50 = vunpack.i.l.bf16 %v6418_v62  ;;  %v4621_v62 = vunpack.i.l.bf16 %v6426_v29 }
 0x105   :  { %v1761_v0 = vsel %vm8527_vm12, %v1745_v60, %v4612_v24  ;;  %vm8528_vm5 = vmmov %vm8525_vm4  ;;  %v4710_v37 = vpop.permute.xlu1 %4709  ;;  %vm8539_vm8 = vcmask 261120  }
 0x106   :  { %v1694_v56 = vsel %vm8528_vm5, %v1677_v39, %v4692_v4  ;;  %vm8529_vm0 = vmmov %vm8525_vm4  ;;  %v1815_v1 = vpack.c.bf16 %v1761_v0, %v1760_v48  ;;  %v8535_v4 = vld [vmem:[#allocation28_spill] sm:$0xff]  ;;  %v8536_v39 = vld [vmem:[#allocation33_spill] sm:$0xff]  ;;  %v4712_v10 = vunpack.i.h.bf16 %v4710_v37  ;;  %v4711_v3 = vunpack.i.l.bf16 %v4710_v37 }
 0x107   :  { %v1693_v5 = vsel %vm8529_vm0, %v1676_v61, %v4691_v16  ;;  %vm8530_vm10 = vmmov %vm8527_vm12  ;;  %vm8534_vm12 = vnez %v8533_v11  ;;  %vm8537_vm13 = vnez %v8536_v39  ;;  %v4725_v61 = vpop.permute.xlu0 %4724  ;;  %v1731_v48 = vsel %vm8539_vm8, %v8538_v58, %v4722_v57  ;;  %v8540_v0 = vld [vmem:[#allocation11_spill] sm:$0xff] }
 0x108   :  { %v1710_v53 = vsel %vm8530_vm10, %v1693_v5, %v4696_v35  ;;  %vm8531_vm9 = vmmov %vm8530_vm10  ;;  %v941_v24 = vsel %vm8534_vm12, %v8532_v27, 0.0  ;;  %v942_v16 = vsel %vm8537_vm13, %v8535_v4, 0.0  ;;  %v4727_v60 = vunpack.i.h.bf16 %v4725_v61 }
 0x109   :  { %v1711_v23 = vsel %vm8531_vm9, %v1694_v56, %v4697_v17  ;;  %v4726_v17 = vunpack.i.l.bf16 %v4725_v61  ;;  %v4622_v35 = vunpack.i.h.bf16 %v6426_v29  ;;  %vm8541_vm4 = vmmov %vm8539_vm8  ;;  %vm8544_vm10 = vcmask 523264  }
 0x10a   :  { %v1811_v18 = vpack.c.bf16 %v1711_v23, %v1710_v53  ;;  %v1730_v56 = vsel %vm8541_vm4, %v8540_v0, %v4721_v47  ;;  %vm8542_vm5 = vmmov %vm8541_vm4  ;;  %v4715_v23 = vpop.permute.xlu1 %4714  ;;  %vm8546_vm13 = vcmask 785408  }
 0x10b   :  { %v1679_v5 = vsel %vm8542_vm5, %v942_v16, %v4607_v32  ;;  %vm8543_vm0 = vmmov %vm8541_vm4  ;;  %v1746_v37 = vsel %vm8544_vm10, %v1730_v56, %v4726_v17  ;;  %v4717_v27 = vunpack.i.h.bf16 %v4715_v23  ;;  %v4716_v4 = vunpack.i.l.bf16 %v4715_v23  ;;  %v4740_v61 = vpop.permute.xlu0 %4739 }
 0x10c   :  { %2005 = vmatmul.mubr.bf16.gmra.mrb[4].mxu0 %v1811_v18  ;;  %v1678_v53 = vsel %vm8543_vm0, %v941_v24, %v4606_v50  ;;  %vm8545_vm9 = vmmov %vm8544_vm10  ;;  %v1762_v29 = vsel %vm8546_vm13, %v1746_v37, %v4621_v62  ;;  %v4741_v24 = vunpack.i.l.bf16 %v4740_v61  ;;  %v4616_v17 = vunpack.i.l.bf16 %v6422_v49  ;;  %v8552_v62 = vld [vmem:[#allocation37_spill] sm:$0xff] }
 0x10d   :  { %2012 = vmatprep.mubr.bf16.mxu0 %v1815_v1  ;;  %v1747_v18 = vsel %vm8545_vm9, %v1731_v48, %v4727_v60  ;;  %vm8547_vm12 = vmmov %vm8546_vm13  ;;  %v4742_v1 = vunpack.i.h.bf16 %v4740_v61  ;;  %v4617_v60 = vunpack.i.h.bf16 %v6422_v49  ;;  %v4632_v37 = vunpack.i.h.bf16 %v6430_v43 }
 0x10e   :  { %v1763_v57 = vsel %vm8547_vm12, %v1747_v18, %v4622_v35  ;;  %vm8548_vm8 = vmmov %vm8545_vm9  ;;  %v4730_v48 = vpop.permute.xlu1 %4729  ;;  %v943_v35 = vsel %vm5942_vm2, %v8552_v62, 0.0  ;;  %v4631_v18 = vunpack.i.l.bf16 %v6430_v43  ;;  %vm8555_vm13 = vcmask 261120  }
 0x10f   :  { %v1696_v58 = vsel %vm8548_vm8, %v1679_v5, %v4712_v10  ;;  %vm8549_vm4 = vmmov %vm8548_vm8  ;;  %v1818_v16 = vpack.c.bf16 %v1763_v57, %v1762_v29  ;;  %v944_v10 = vsel %vm5965_vm3, %v5903_v2, 0.0  ;;  %v4745_v56 = vpop.permute.xlu0 %4744  ;;  %v4732_v5 = vunpack.i.h.bf16 %v4730_v48 }
 0x110   :  { %v1695_v47 = vsel %vm8549_vm4, %v1678_v53, %v4711_v3  ;;  %vm8550_vm5 = vmmov %vm8547_vm12  ;;  %vm8553_vm12 = vcmp.lt.s32.totalorder %v5590_v8, 1  ;;  %v4731_v53 = vunpack.i.l.bf16 %v4730_v48  ;;  %v4747_v49 = vunpack.i.h.bf16 %v4745_v56  ;;  %v8561_v48 = vld [vmem:[#allocation34_spill] sm:$0xff] }
 0x111   :  { %v1712_v32 = vsel %vm8550_vm5, %v1695_v47, %v4716_v4  ;;  %vm8551_vm0 = vmmov %vm8550_vm5  ;;  %v895_v3 = vsel %vm8553_vm12, %v8478_v6, %v6162_v63  ;;  %v4746_v23 = vunpack.i.l.bf16 %v4745_v56  ;;  %v4626_v56 = vunpack.i.l.bf16 %v6428_v38 }
 0x112   :  { %v1713_v50 = vsel %vm8551_vm0, %v1696_v58, %v4717_v27  ;;  %v8554_v27 = vld [vmem:[#allocation15_spill] sm:$0xff]  ;;  %vm8556_vm10 = vmmov %vm8555_vm13 }
 0x113   :  { %v1814_v0 = vpack.c.bf16 %v1713_v50, %v1712_v32  ;;  %v1733_v4 = vsel %vm8555_vm13, %v8554_v27, %v4742_v1  ;;  %v1732_v2 = vsel %vm8556_vm10, %v5628_v20, %v4741_v24  ;;  %vm8557_vm9 = vmmov %vm8556_vm10  ;;  %v4735_v29 = vpop.permute.xlu1 %4734  ;;  %vm8562_vm13 = vcmp.lt.s32.totalorder %v5590_v8, 1 }
 0x114   :  { %v1681_v61 = vsel %vm8557_vm9, %v944_v10, %v4617_v60  ;;  %vm8558_vm8 = vmmov %vm8557_vm9  ;;  %v1748_v57 = vsel %vm8549_vm4, %v1732_v2, %v4746_v23  ;;  %v4737_v47 = vunpack.i.h.bf16 %v4735_v29  ;;  %v4736_v32 = vunpack.i.l.bf16 %v4735_v29 }
 0x115   :  { %2013 = vmatmul.mubr.bf16.gmra.mrb[8].mxu0 %v1814_v0  ;;  %v1680_v63 = vsel %vm8558_vm8, %v943_v35, %v4616_v17  ;;  %vm8559_vm5 = vmmov %vm8549_vm4  ;;  %v4760_v50 = vpop.permute.xlu0 %4759  ;;  %v1764_v43 = vsel %vm8551_vm0, %v1748_v57, %v4631_v18  ;;  %v896_v20 = vsel %vm8562_vm13, %v8561_v48, %v8478_v6  ;;  %v4627_v10 = vunpack.i.h.bf16 %v6428_v38 }
 0x116   :  { %2020 = vmatprep.mubr.bf16.mxu0 %v1818_v16  ;;  %v1749_v58 = vsel %vm8559_vm5, %v1733_v4, %v4747_v49  ;;  %vm8560_vm12 = vmmov %vm8551_vm0  ;;  %v4762_v60 = vunpack.i.h.bf16 %v4760_v50  ;;  %v4761_v62 = vunpack.i.l.bf16 %v4760_v50  ;;  %vm8567_vm5 = vcmask 261120  }
 0x117   :  { %v1765_v1 = vsel %vm8560_vm12, %v1749_v58, %v4632_v37  ;;  %vm8563_vm10 = vmmov %vm8549_vm4  ;;  %v945_v37 = vsel %vm5998_vm1, %v896_v20, 0.0 }
 0x118   :  { %v1698_v24 = vsel %vm8563_vm10, %v1681_v61, %v4732_v5  ;;  %vm8564_vm9 = vmmov %vm8549_vm4  ;;  %v1821_v35 = vpack.c.bf16 %v1765_v1, %v1764_v43  ;;  %v4750_v49 = vpop.permute.xlu1 %4749  ;;  %v946_v5 = vsel %vm8450_vm15, %v895_v3, 0.0  ;;  %v4642_v61 = vunpack.i.h.bf16 %v6434_v52 }
 0x119   :  { %v1697_v16 = vsel %vm8564_vm9, %v1680_v63, %v4731_v53  ;;  %vm8565_vm8 = vmmov %vm8551_vm0  ;;  %v4752_v18 = vunpack.i.h.bf16 %v4750_v49  ;;  %v4751_v27 = vunpack.i.l.bf16 %v4750_v49  ;;  %v4641_v63 = vunpack.i.l.bf16 %v6434_v52 }
 0x11a   :  { %v1714_v17 = vsel %vm8565_vm8, %v1697_v16, %v4736_v32  ;;  %vm8566_vm4 = vmmov %vm8551_vm0  ;;  %v4765_v53 = vpop.permute.xlu0 %4764  ;;  %v1735_v38 = vsel %vm8567_vm5, %v5672_v31, %v4762_v60  ;;  %v948_v49 = vsel %vm6097_vm7, %v6086_v7, 0.0 }
 0x11b   :  { %v1715_v0 = vsel %vm8566_vm4, %v1698_v24, %v4737_v47  ;;  %v4767_v4 = vunpack.i.h.bf16 %v4765_v53  ;;  %v4766_v2 = vunpack.i.l.bf16 %v4765_v53  ;;  %vm8568_vm0 = vmmov %vm8567_vm5 }
 0x11c   :  { %v1817_v23 = vpack.c.bf16 %v1715_v0, %v1714_v17  ;;  %v1734_v29 = vsel %vm8568_vm0, %v5643_v54, %v4761_v62  ;;  %vm8569_vm12 = vmmov %vm8568_vm0  ;;  %v4637_v0 = vunpack.i.h.bf16 %v6432_v30  ;;  %v4636_v62 = vunpack.i.l.bf16 %v6432_v30 }
 0x11d   :  { %v1683_v57 = vsel %vm8569_vm12, %v946_v5, %v4627_v10  ;;  %vm8570_vm13 = vmmov %vm8568_vm0  ;;  %v1751_v32 = vsel %vm8564_vm9, %v1735_v38, %v4767_v4  ;;  %v4651_v30 = vunpack.i.l.bf16 %v6438_v15 }
 0x11e   :  { %2021 = vmatmul.mubr.bf16.gmra.mrb[12].mxu0 %v1817_v23  ;;  %v1682_v3 = vsel %vm8570_vm13, %v945_v37, %v4626_v56  ;;  %v4755_v58 = vpop.permute.xlu1 %4754  ;;  %vm8571_vm10 = vmmov %vm8564_vm9  ;;  %v1767_v31 = vsel %vm8566_vm4, %v1751_v32, %v4642_v61  ;;  %v947_v56 = vsel %vm6110_vm14, %v6220_v21, 0.0 }
 0x11f   :  { %2028 = vmatprep.mubr.bf16.mxu0 %v1821_v35  ;;  %v1750_v47 = vsel %vm8571_vm10, %v1734_v29, %v4766_v2  ;;  %v4757_v50 = vunpack.i.h.bf16 %v4755_v58  ;;  %v4756_v43 = vunpack.i.l.bf16 %v4755_v58  ;;  %v4780_v1 = vpop.permute.xlu0 %4779  ;;  %vm8572_vm8 = vmmov %vm8566_vm4  ;;  %vm8577_vm10 = vcmask 261120  }
 0x120   :  { %v1766_v52 = vsel %vm8572_vm8, %v1750_v47, %v4641_v63  ;;  %vm8573_vm5 = vmmov %vm8564_vm9  ;;  %v4782_v20 = vunpack.i.h.bf16 %v4780_v1  ;;  %v4781_v60 = vunpack.i.l.bf16 %v4780_v1  ;;  %v4646_v1 = vunpack.i.l.bf16 %v6436_v26 }
 0x121   :  { %v1700_v48 = vsel %vm8573_vm5, %v1683_v57, %v4752_v18  ;;  %vm8574_vm0 = vmmov %vm8573_vm5  ;;  %v1824_v17 = vpack.c.bf16 %v1767_v31, %v1766_v52 }
 0x122   :  { %v1699_v54 = vsel %vm8574_vm0, %v1682_v3, %v4751_v27  ;;  %vm8575_vm12 = vmmov %vm8566_vm4  ;;  %v4770_v35 = vpop.permute.xlu1 %4769  ;;  %v4652_v27 = vunpack.i.h.bf16 %v6438_v15  ;;  %v1737_v4 = vsel %vm8577_vm10, %v5722_v51, %v4782_v20 }
 0x123   :  { %v1716_v24 = vsel %vm8575_vm12, %v1699_v54, %v4756_v43  ;;  %vm8576_vm13 = vmmov %vm8566_vm4  ;;  %v4785_v23 = vpop.permute.xlu0 %4784  ;;  %v4772_v37 = vunpack.i.h.bf16 %v4770_v35  ;;  %v4771_v5 = vunpack.i.l.bf16 %v4770_v35  ;;  %v4647_v43 = vunpack.i.h.bf16 %v6436_v26 }
 0x124   :  { %v1717_v16 = vsel %vm8576_vm13, %v1700_v48, %v4757_v50  ;;  %v4787_v53 = vunpack.i.h.bf16 %v4785_v23  ;;  %v4786_v18 = vunpack.i.l.bf16 %v4785_v23  ;;  %vm8578_vm9 = vmmov %vm8577_vm10  ;;  %v949_v48 = vsel %vm6255_vm11, %v6193_v59, 0.0 }
 0x125   :  { %v1820_v10 = vpack.c.bf16 %v1717_v16, %v1716_v24  ;;  %v1736_v21 = vsel %vm8578_vm9, %v5682_v36, %v4781_v60  ;;  %vm8579_vm8 = vmmov %vm8578_vm9  ;;  %v950_v54 = vsel %vm6283_vm6, %v6181_v41, 0.0 }
 0x126   :  { %v1685_v2 = vsel %vm8579_vm8, %v948_v49, %v4637_v0  ;;  %vm8580_vm4 = vmmov %vm8579_vm8  ;;  %v4775_v61 = vpop.permute.xlu1 %4774  ;;  %v1753_v38 = vsel %vm8574_vm0, %v1737_v4, %v4787_v53 }
 0x127   :  { %2029 = vmatmul.mubr.bf16.gmra.mrb[16].mxu0 %v1820_v10  ;;  %v1684_v7 = vsel %vm8580_vm4, %v947_v56, %v4636_v62  ;;  %vm8581_vm5 = vmmov %vm8574_vm0  ;;  %v4777_v29 = vunpack.i.h.bf16 %v4775_v61  ;;  %v4776_v57 = vunpack.i.l.bf16 %v4775_v61  ;;  %v1686_v35 = vsel %vm8580_vm4, %v949_v48, %v4646_v1 }
 0x128   :  { %2036 = vmatprep.mubr.bf16.mxu0 %v1824_v17  ;;  %v1752_v63 = vsel %vm8581_vm5, %v1736_v21, %v4786_v18  ;;  %v4800_v3 = vpop.permute.xlu0 %4799  ;;  %vm8582_vm13 = vmmov %vm8575_vm12 }
 0x129   :  { %v1768_v15 = vsel %vm8575_vm12, %v1752_v63, %v4651_v30  ;;  %v1769_v51 = vsel %vm8582_vm13, %v1753_v38, %v4652_v27  ;;  %vm8583_vm10 = vmmov %vm8574_vm0  ;;  %v4802_v20 = vunpack.i.h.bf16 %v4800_v3  ;;  %v4801_v24 = vunpack.i.l.bf16 %v4800_v3 }
 0x12a   :  { %v1702_v58 = vsel %vm8583_vm10, %v1685_v2, %v4772_v37  ;;  %vm8584_vm9 = vmmov %vm8574_vm0  ;;  %v1827_v50 = vpack.c.bf16 %v1769_v51, %v1768_v15  ;;  %v4790_v52 = vpop.permute.xlu1 %4789 }
 0x12b   :  { %v1701_v36 = vsel %vm8584_vm9, %v1684_v7, %v4771_v5  ;;  %vm8585_vm7 = vmmov %vm8575_vm12  ;;  %v4792_v60 = vunpack.i.h.bf16 %v4790_v52  ;;  %v4791_v17 = vunpack.i.l.bf16 %v4790_v52 }
 0x12c   :  { %v1718_v47 = vsel %vm8585_vm7, %v1701_v36, %v4776_v57  ;;  %vm8586_vm8 = vmmov %vm8585_vm7  ;;  %v4805_v16 = vpop.permute.xlu0 %4804 }
 0x12d   :  { %v1719_v32 = vsel %vm8586_vm8, %v1702_v58, %v4777_v29  ;;  %v4807_v0 = vunpack.i.h.bf16 %v4805_v16  ;;  %v4806_v62 = vunpack.i.l.bf16 %v4805_v16  ;;  %vm8587_vm7 = vmmov %vm8580_vm4 }
 0x12e   :  { %v1823_v31 = vpack.c.bf16 %v1719_v32, %v1718_v47  ;;  %v1687_v26 = vsel %vm8587_vm7, %v950_v54, %v4647_v43  ;;  %v4795_v10 = vpop.permute.xlu1 %4794  ;;  %vm8588_vm5 = vmmov %vm8580_vm4 }
 0x12f   :  { %v1739_v59 = vsel %vm8588_vm5, %v5881_v55, %v4802_v20  ;;  %vm8589_vm0 = vmmov %vm8580_vm4  ;;  %v4797_v56 = vunpack.i.h.bf16 %v4795_v10  ;;  %v4796_v49 = vunpack.i.l.bf16 %v4795_v10 }
 0x130   :  { %2037 = vmatmul.mubr.bf16.gmra.mrb[20].mxu0 %v1823_v31  ;;  %v1738_v41 = vsel %vm8589_vm0, %v5725_v14, %v4801_v24  ;;  %v4810_v23 = vpop.permute.xlu0 %4809  ;;  %vm8590_vm12 = vmmov %vm8584_vm9  ;;  %v1755_v30 = vsel %vm8584_vm9, %v1739_v59, %v4807_v0 }
 0x131   :  { %2044 = vmatprep.mubr.bf16.mxu0 %v1827_v50  ;;  %v1704_v37 = vsel %vm8590_vm12, %v1687_v26, %v4792_v60  ;;  %vm8591_vm13 = vmmov %vm8584_vm9  ;;  %v4812_v53 = vunpack.i.h.bf16 %v4810_v23  ;;  %v4811_v18 = vunpack.i.l.bf16 %v4810_v23  ;;  %v4155_v23 = vld [vmem:[%s8083_s1] ss:$0 sm:$0xff] }
 0x132   :  { %v1703_v5 = vsel %vm8591_vm13, %v1686_v35, %v4791_v17  ;;  %vm8592_vm10 = vmmov %vm8584_vm9  ;;  %v4815_v21 = vpop.permute.xlu1 %4814 }
 0x133   :  { %v1754_v27 = vsel %vm8592_vm10, %v1738_v41, %v4806_v62  ;;  %v1720_v4 = vsel %vm8586_vm8, %v1703_v5, %v4796_v49  ;;  %vm8593_vm7 = vmmov %vm8586_vm8  ;;  %v4817_v63 = vunpack.i.h.bf16 %v4815_v21  ;;  %v4816_v38 = vunpack.i.l.bf16 %v4815_v21 }
 0x134   :  { %v1721_v55 = vsel %vm8593_vm7, %v1704_v37, %v4797_v56  ;;  %vm8594_vm4 = vmmov %vm8593_vm7 }
 0x135   :  { %v1826_v2 = vpack.c.bf16 %v1721_v55, %v1720_v4  ;;  %v1770_v14 = vsel %vm8594_vm4, %v1754_v27, %v4811_v18  ;;  %vm8595_vm5 = vmmov %vm8594_vm4 }
 0x136   :  { %v1771_v7 = vsel %vm8595_vm5, %v1755_v30, %v4812_v53  ;;  %v4820_v29 = vpop.permute.xlu1 %4819  ;;  %vm8596_vm0 = vmmov %vm8584_vm9 }
 0x137   :  { %v1830_v61 = vpack.c.bf16 %v1771_v7, %v1770_v14  ;;  %v4822_v57 = vunpack.i.h.bf16 %v4820_v29  ;;  %v4821_v3 = vunpack.i.l.bf16 %v4820_v29  ;;  %v1706_v15 = vsel %vm8596_vm0, %v6447_v44, %v4817_v63  ;;  %vm8597_vm12 = vmmov %vm8596_vm0 }
 0x138   :  { %2045 = vmatmul.mubr.bf16.gmra.mrb[24].mxu0 %v1826_v2  ;;  %v1705_v51 = vsel %vm8597_vm12, %v6450_v33, %v4816_v38  ;;  %vm8598_vm13 = vmmov %vm8594_vm4 }
 0x139   :  { %2052 = vmatprep.mubr.bf16.mxu0 %v1830_v61  ;;  %v1722_v58 = vsel %vm8598_vm13, %v1705_v51, %v4821_v3  ;;  %vm8599_vm10 = vmmov %vm8594_vm4 }
 0x13a   :  { %v1723_v36 = vsel %vm8599_vm10, %v1706_v15, %v4822_v57  ;;  %vm8600_vm9 = vmmov %vm8596_vm0 }
 0x13b   :  { %v1829_v47 = vpack.c.bf16 %v1723_v36, %v1722_v58  ;;  %vm8601_vm8 = vmmov %vm8596_vm0 }
 0x13c   :  { %vm8602_vm7 = vmmov %vm8596_vm0 }
 0x13d   :  { %vm8603_vm4 = vmmov %vm8596_vm0 }
 0x13e   :  { %vm8604_vm5 = vmmov %vm8596_vm0 }
 0x13f   :  { %vm8605_vm12 = vmmov %vm8596_vm0 }
 0x140   :  { %2053 = vmatmul.mubr.bf16.gmra.mrb[28].mxu0 %v1829_v47  ;;  %vm8606_vm13 = vmmov %vm8596_vm0 }
 0x141   :  { %vm8607_vm10 = vmmov %vm8596_vm0 }
 0x170   :  { %v4468_v32 = vpop.f32.mrb[0].mxu1 }
 0x171   :  { %v2095_v50 = vpop.f32.mrb[1].mxu1 }
 0x172   :  { %v4469_v43 = vpop.f32.mrb[2].mxu1 }
 0x173   :  { %v2098_v1 = vpop.f32.mrb[3].mxu1 }
 0x17b   :  { %v6642_v52 = vpop.f32.mrb[4].mxu1 }
 0x17c   :  { %v2111_v31 = vpop.f32.mrb[5].mxu1 }
 0x17d   :  { %v6644_v48 = vpop.f32.mrb[6].mxu1 }
 0x17e   :  { %v2114_v54 = vpop.f32.mrb[7].mxu1 }
 0x184   :  { %v6646_v44 = vpop.f32.mrb[8].mxu1 }
 0x185   :  { %v6648_v20 = vpop.f32.mrb[9].mxu1 }
 0x186   :  { %v6650_v33 = vpop.f32.mrb[10].mxu1 }
 0x187   :  { %v6652_v24 = vpop.f32.mrb[11].mxu1 }
 0x18e   :  { %v6654_v16 = vpop.f32.mrb[12].mxu1 }
 0x18f   :  { %v6656_v60 = vpop.f32.mrb[13].mxu1 }
 0x190   :  { %v6658_v17 = vpop.f32.mrb[14].mxu1 }
 0x191   :  { %v6660_v0 = vpop.f32.mrb[15].mxu1 }
 0x1d5   :  { %v4254_v62 = vpop.f32.mrb[0].mxu0 }
 0x1d6   :  { %v4255_v26 = vpop.f32.mrb[1].mxu0 }
 0x1d7   :  { %v4256_v35 = vadd.f32 %v4255_v26, %v4254_v62  ;;  %v4257_v10 = vpop.f32.mrb[2].mxu0 }
 0x1d8   :  { %v4258_v59 = vpop.f32.mrb[3].mxu0 }
 0x1d9   :  { %v4259_v41 = vadd.f32 %v4258_v59, %v4257_v10  ;;  %v2096_v56 = vadd.f32 %v4256_v35, %v2095_v50 }
 0x1db   :  { %v2099_v49 = vadd.f32 %v4259_v41, %v2098_v1  ;;  %v6667_v30 = vadd.f32 %v4155_v23, %v2096_v56 }
 0x1dd   :  { %v6665_v53 = vadd.f32 %v4155_v23, %v2099_v49  ;;  %v2232_v61 = vmul.f32 %v6667_v30, %v6667_v30  ;;  %v2190_v15 = vsel %vm8601_vm8, %v6667_v30, 0.0  ;;  %vm8609_vm8 = vmmov %vm8596_vm0 }
 0x1df   :  { %v4260_v37 = vpop.f32.mrb[4].mxu0  ;;  %v2233_v2 = vmul.f32 %v6665_v53, %v6665_v53  ;;  %v2191_v63 = vsel %vm8600_vm9, %v6665_v53, 0.0  ;;  %vm8608_vm9 = vmmov %vm8596_vm0 }
 0x1e0   :  { %v4261_v5 = vpop.f32.mrb[5].mxu0  ;;  %v2192_v50 = vadd.f32 %v2191_v63, %v2190_v15 }
 0x1e1   :  { %v4262_v18 = vadd.f32 %v4261_v5, %v4260_v37  ;;  %v4263_v27 = vpop.f32.mrb[6].mxu0  ;;  %v2249_v51 = vsel %vm8602_vm7, %v2233_v2, 0.0  ;;  %vm8610_vm7 = vmmov %vm8596_vm0 }
 0x1e2   :  { %v4264_v4 = vpop.f32.mrb[7].mxu0 }
 0x1e3   :  { %v2104_v55 = vadd.f32 %v4468_v32, %v4262_v18  ;;  %v4265_v21 = vadd.f32 %v4264_v4, %v4263_v27  ;;  %v2248_v32 = vsel %vm8604_vm5, %v2232_v61, 0.0  ;;  %vm8612_vm5 = vmmov %vm8596_vm0 }
 0x1e4   :  { %v2250_v10 = vadd.f32 %v2249_v51, %v2248_v32 }
 0x1e5   :  { %v6671_v14 = vadd.f32 %v4155_v23, %v2104_v55  ;;  %v2107_v7 = vadd.f32 %v4469_v43, %v4265_v21 }
 0x1e7   :  { %v2234_v38 = vmul.f32 %v6671_v14, %v6671_v14  ;;  %v6679_v29 = vadd.f32 %v4155_v23, %v2107_v7  ;;  %v2193_v58 = vsel %vm8603_vm4, %v6671_v14, 0.0  ;;  %vm8611_vm4 = vmmov %vm8596_vm0 }
 0x1e8   :  { %v4266_v57 = vpop.f32.mrb[8].mxu0  ;;  %v2194_v59 = vadd.f32 %v2193_v58, %v2192_v50 }
 0x1e9   :  { %v4267_v3 = vpop.f32.mrb[9].mxu0  ;;  %v2251_v1 = vsel %vm8596_vm0, %v2234_v38, 0.0  ;;  %v2235_v62 = vmul.f32 %v6679_v29, %v6679_v29  ;;  %v2195_v41 = vsel %vm8605_vm12, %v6679_v29, 0.0  ;;  %vm8613_vm12 = vmmov %vm8596_vm0 }
 0x1ea   :  { %v4268_v36 = vadd.f32 %v4267_v3, %v4266_v57  ;;  %v4269_v47 = vpop.f32.mrb[10].mxu0  ;;  %v2252_v37 = vadd.f32 %v2251_v1, %v2250_v10  ;;  %v2196_v55 = vadd.f32 %v2195_v41, %v2194_v59 }
 0x1eb   :  { %v4270_v43 = vpop.f32.mrb[11].mxu0  ;;  %v2253_v5 = vsel %vm8606_vm13, %v2235_v62, 0.0  ;;  %vm8614_vm13 = vmmov %vm8596_vm0 }
 0x1ec   :  { %v4271_v26 = vadd.f32 %v4270_v43, %v4269_v47  ;;  %v2112_v35 = vadd.f32 %v4268_v36, %v2111_v31  ;;  %v2254_v38 = vadd.f32 %v2253_v5, %v2252_v37 }
 0x1ee   :  { %v6692_v56 = vadd.f32 %v4155_v23, %v2112_v35  ;;  %v2115_v49 = vadd.f32 %v4271_v26, %v2114_v54 }
 0x1f0   :  { %v2197_v18 = vsel %vm8607_vm10, %v6692_v56, 0.0  ;;  %v2236_v27 = vmul.f32 %v6692_v56, %v6692_v56  ;;  %v6699_v4 = vadd.f32 %v4155_v23, %v2115_v49  ;;  %vm8615_vm10 = vmmov %vm8596_vm0 }
 0x1f1   :  { %v4272_v31 = vpop.f32.mrb[12].mxu0  ;;  %v2198_v63 = vadd.f32 %v2197_v18, %v2196_v55 }
 0x1f2   :  { %v4273_v21 = vpop.f32.mrb[13].mxu0  ;;  %v2255_v2 = vsel %vm8608_vm9, %v2236_v27, 0.0  ;;  %v2237_v7 = vmul.f32 %v6699_v4, %v6699_v4  ;;  %v2199_v3 = vsel %vm8609_vm8, %v6699_v4, 0.0  ;;  %vm8616_vm9 = vmmov %vm8596_vm0 }
 0x1f3   :  { %v4274_v54 = vadd.f32 %v4273_v21, %v4272_v31  ;;  %v4275_v61 = vpop.f32.mrb[14].mxu0  ;;  %v2256_v58 = vadd.f32 %v2255_v2, %v2254_v38  ;;  %v2200_v50 = vadd.f32 %v2199_v3, %v2198_v63  ;;  %v6728_v63 = vld [vmem:[%s8083_s1 + $0x1] ss:$0 sm:$0xff]  ;;  %s5227_s1 = smov 127   ;;  %vm8617_vm8 = vmmov %vm8596_vm0 }
 0x1f4   :  { %v4276_v57 = vpop.f32.mrb[15].mxu0  ;;  %v2257_v36 = vsel %vm8610_vm7, %v2237_v7, 0.0  ;;  %vm8618_vm7 = vmmov %vm8596_vm0 }
 0x1f5   :  { %v2120_v15 = vadd.f32 %v6642_v52, %v4274_v54  ;;  %v4277_v51 = vadd.f32 %v4276_v57, %v4275_v61  ;;  %v2258_v35 = vadd.f32 %v2257_v36, %v2256_v58 }
 0x1f7   :  { %v6708_v47 = vadd.f32 %v4155_v23, %v2120_v15  ;;  %v2123_v32 = vadd.f32 %v6644_v48, %v4277_v51 }
 0x1f9   :  { %v2201_v43 = vsel %vm8611_vm4, %v6708_v47, 0.0  ;;  %v2238_v1 = vmul.f32 %v6708_v47, %v6708_v47  ;;  %v6715_v62 = vadd.f32 %v4155_v23, %v2123_v32  ;;  %vm8619_vm4 = vmmov %vm8596_vm0 }
 0x1fa   :  { %v4278_v26 = vpop.f32.mrb[16].mxu0  ;;  %v2202_v52 = vadd.f32 %v2201_v43, %v2200_v50 }
 0x1fb   :  { %v4279_v10 = vpop.f32.mrb[17].mxu0  ;;  %v2259_v59 = vsel %vm8612_vm5, %v2238_v1, 0.0  ;;  %v2203_v41 = vsel %vm8596_vm0, %v6715_v62, 0.0  ;;  %v2239_v48 = vmul.f32 %v6715_v62, %v6715_v62  ;;  %vm8620_vm5 = vmmov %vm8596_vm0 }
 0x1fc   :  { %v4280_v49 = vadd.f32 %v4279_v10, %v4278_v26  ;;  %v4281_v37 = vpop.f32.mrb[18].mxu0  ;;  %v2204_v18 = vadd.f32 %v2203_v41, %v2202_v52  ;;  %v2260_v27 = vadd.f32 %v2259_v59, %v2258_v35 }
 0x1fd   :  { %v4282_v5 = vpop.f32.mrb[19].mxu0  ;;  %v2261_v55 = vsel %vm8613_vm12, %v2239_v48, 0.0  ;;  %vm8621_vm12 = vmmov %vm8596_vm0 }
 0x1fe   :  { %v4283_v31 = vadd.f32 %v4282_v5, %v4281_v37  ;;  %v2128_v23 = vadd.f32 %v4280_v49, %v6648_v20  ;;  %v2205_v21 = vrot.slane %v2204_v18, 4  ;;  %v2262_v2 = vadd.f32 %v2261_v55, %v2260_v27 }
 0x200   :  { %v2131_v7 = vadd.f32 %v4283_v31, %v6652_v24  ;;  %v2206_v54 = vadd.f32 %v2205_v21, %v2204_v18  ;;  %v2263_v61 = vrot.slane %v2262_v2, 4  ;;  %v6734_v36 = vadd.f32 %v6728_v63, %v2128_v23 }
 0x202   :  { %v2207_v3 = vrot.slane %v2206_v54, 2  ;;  %v2264_v15 = vadd.f32 %v2263_v61, %v2262_v2  ;;  %v6731_v51 = vadd.f32 %v6728_v63, %v2131_v7  ;;  %v2240_v41 = vmul.f32 %v6734_v36, %v6734_v36 }
 0x203   :  { %v4284_v38 = vpop.f32.mrb[20].mxu0 }
 0x204   :  { %v4285_v57 = vpop.f32.mrb[21].mxu0  ;;  %v2208_v32 = vadd.f32 %v2207_v3, %v2206_v54  ;;  %v2265_v50 = vrot.slane %v2264_v15, 2  ;;  %v2241_v52 = vmul.f32 %v6731_v51, %v6731_v51  ;;  %v2269_v2 = vsel %vm8618_vm7, %v2240_v41, 0.0  ;;  %vm8626_vm7 = vmmov %vm8596_vm0 }
 0x205   :  { %v4286_v20 = vadd.f32 %v4285_v57, %v4284_v38  ;;  %v4287_v58 = vpop.f32.mrb[22].mxu0 }
 0x206   :  { %v4288_v24 = vpop.f32.mrb[23].mxu0  ;;  %v2209_v26 = vrot.slane %v2208_v32, 1  ;;  %v2266_v35 = vadd.f32 %v2265_v50, %v2264_v15  ;;  %v2270_v31 = vsel %vm8616_vm9, %v2241_v52, 0.0  ;;  %vm8624_vm9 = vmmov %vm8596_vm0 }
 0x207   :  { %v2136_v43 = vadd.f32 %v6646_v44, %v4286_v20  ;;  %v4289_v1 = vadd.f32 %v4288_v24, %v4287_v58  ;;  %v2212_v44 = vsel %vm8614_vm13, %v6731_v51, 0.0  ;;  %v2271_v20 = vadd.f32 %v2270_v31, %v2269_v2  ;;  %vm8622_vm13 = vmmov %vm8596_vm0 }
 0x208   :  { %v6745_v48 = vadd.f32 %v2209_v26, %v2208_v32  ;;  %v2267_v49 = vrot.slane %v2266_v35, 1 }
 0x209   :  { %v6740_v10 = vadd.f32 %v6728_v63, %v2136_v43  ;;  %v2139_v59 = vadd.f32 %v6650_v33, %v4289_v1  ;;  %v2211_v33 = vsel %vm8615_vm10, %v6734_v36, 0.0  ;;  %vm8623_vm10 = vmmov %vm8596_vm0 }
 0x20a   :  { %2307 = vrot.lane.b32.xlu0 %v6745_v48, %s5227_s1  ;;  %v2213_v7 = vadd.f32 %v2212_v44, %v2211_v33  ;;  %v6762_v61 = vadd.f32 %v2267_v49, %v2266_v35 }
 0x20b   :  { %v2242_v37 = vmul.f32 %v6740_v10, %v6740_v10  ;;  %v6752_v5 = vadd.f32 %v6728_v63, %v2139_v59  ;;  %v4290_v18 = vpop.f32.mrb[24].mxu0  ;;  %v2214_v23 = vsel %vm8617_vm8, %v6740_v10, 0.0  ;;  %vm8625_vm8 = vmmov %vm8596_vm0 }
 0x20c   :  { %v4291_v27 = vpop.f32.mrb[25].mxu0  ;;  %v2215_v58 = vadd.f32 %v2214_v23, %v2213_v7 }
 0x20d   :  { %v4292_v55 = vadd.f32 %v4291_v27, %v4290_v18  ;;  %v4293_v21 = vpop.f32.mrb[26].mxu0  ;;  %v2272_v38 = vsel %vm8619_vm4, %v2242_v37, 0.0  ;;  %v2243_v57 = vmul.f32 %v6752_v5, %v6752_v5  ;;  %v2216_v24 = vsel %vm8620_vm5, %v6752_v5, 0.0  ;;  %vm8627_vm4 = vmmov %vm8596_vm0 }
 0x20e   :  { %v4294_v54 = vpop.f32.mrb[27].mxu0  ;;  %2337 = vrot.lane.b32.xlu0 %v6762_v61, %s5227_s1  ;;  %v2273_v43 = vadd.f32 %v2272_v38, %v2271_v20  ;;  %v2217_v59 = vadd.f32 %v2216_v24, %v2215_v58  ;;  %vm8628_vm5 = vmmov %vm8596_vm0 }
 0x20f   :  { %v4295_v3 = vadd.f32 %v4294_v54, %v4293_v21  ;;  %v2144_v15 = vadd.f32 %v4292_v55, %v6656_v60  ;;  %v2274_v1 = vsel %vm8596_vm0, %v2243_v57, 0.0  ;;  %vm2313_vm0 = vcmask 515072  }
 0x210   :  { %v2275_v27 = vadd.f32 %v2274_v1, %v2273_v43 }
 0x211   :  { %v6773_v32 = vadd.f32 %v6728_v63, %v2144_v15  ;;  %v2147_v50 = vadd.f32 %v4295_v3, %v6660_v0 }
 0x213   :  { %v2218_v26 = vsel %vm8621_vm12, %v6773_v32, 0.0  ;;  %v2244_v60 = vmul.f32 %v6773_v32, %v6773_v32  ;;  %v6782_v35 = vadd.f32 %v6728_v63, %v2147_v50  ;;  %v4296_v52 = vpop.f32.mrb[28].mxu0 }
 0x214   :  { %v4297_v41 = vpop.f32.mrb[29].mxu0  ;;  %v2219_v18 = vadd.f32 %v2218_v26, %v2217_v59 }
 0x215   :  { %v2276_v49 = vsel %vm8622_vm13, %v2244_v60, 0.0  ;;  %v2245_v0 = vmul.f32 %v6782_v35, %v6782_v35  ;;  %v4298_v44 = vadd.f32 %v4297_v41, %v4296_v52  ;;  %v4299_v37 = vpop.f32.mrb[30].mxu0  ;;  %v2220_v31 = vsel %vm8623_vm10, %v6782_v35, 0.0 }
 0x216   :  { %v4300_v33 = vpop.f32.mrb[31].mxu0  ;;  %v2277_v21 = vadd.f32 %v2276_v49, %v2275_v27  ;;  %v2221_v38 = vadd.f32 %v2220_v31, %v2219_v18  ;;  %v8629_v31 = vlaneseq  ;;  %vm2330_vm13 = vcmask 7168  }
 0x217   :  { %v2152_v23 = vadd.f32 %v6654_v16, %v4298_v44  ;;  %v4301_v55 = vadd.f32 %v4300_v33, %v4299_v37  ;;  %v2278_v2 = vsel %vm8624_vm9, %v2245_v0, 0.0  ;;  %vm8639_vm10 = vcmp.lt.s32.totalorder %v5590_v8, 7 }
 0x218   :  { %v2279_v16 = vadd.f32 %v2278_v2, %v2277_v21  ;;  %vm8641_vm9 = vnez %v8345_v9 }
 0x219   :  { %v6792_v7 = vadd.f32 %v6728_v63, %v2152_v23  ;;  %v2155_v54 = vadd.f32 %v6658_v17, %v4301_v55  ;;  %v2291_v23 = vand.u32 127, %v8629_v31 }
 0x21b   :  { %v2222_v57 = vsel %vm8625_vm8, %v6792_v7, 0.0  ;;  %v2246_v3 = vmul.f32 %v6792_v7, %v6792_v7  ;;  %v6800_v15 = vadd.f32 %v6728_v63, %v2155_v54  ;;  %v2296_v55 = vand.u32 1, %v2291_v23  ;;  %vm8642_vm8 = vmmov %vm8639_vm10 }
 0x21c   :  { %v2223_v20 = vadd.f32 %v2222_v57, %v2221_v38 }
 0x21d   :  { %v2280_v58 = vsel %vm8626_vm7, %v2246_v3, 0.0  ;;  %v2224_v24 = vsel %vm8627_vm4, %v6800_v15, 0.0  ;;  %v2247_v17 = vmul.f32 %v6800_v15, %v6800_v15  ;;  %vm6812_vm12 = vcmp.eq.s32.totalorder %v2296_v55, 0 }
 0x21e   :  { %v2225_v50 = vadd.f32 %v2224_v24, %v2223_v20  ;;  %v2281_v43 = vadd.f32 %v2280_v58, %v2279_v16  ;;  %vm8652_vm4 = vcmp.lt.s32.totalorder %v5590_v8, 1 }
 0x21f   :  { %v2282_v1 = vsel %vm8628_vm5, %v2247_v17, 0.0  ;;  %vm8654_vm5 = vmmov %vm8652_vm4 }
 0x220   :  { %v2226_v26 = vrot.slane %v2225_v50, 4  ;;  %v2283_v60 = vadd.f32 %v2282_v1, %v2281_v43 }
 0x222   :  { %v2227_v52 = vadd.f32 %v2226_v26, %v2225_v50  ;;  %v2284_v59 = vrot.slane %v2283_v60, 4 }
 0x224   :  { %v2228_v63 = vrot.slane %v2227_v52, 2  ;;  %v2285_v41 = vadd.f32 %v2284_v59, %v2283_v60 }
 0x226   :  { %v2229_v49 = vadd.f32 %v2228_v63, %v2227_v52  ;;  %v2286_v0 = vrot.slane %v2285_v41, 2 }
 0x228   :  { %v2230_v44 = vrot.slane %v2229_v49, 1  ;;  %v2287_v37 = vadd.f32 %v2286_v0, %v2285_v41 }
 0x22a   :  { %v2231_v18 = vadd.f32 %v2230_v44, %v2229_v49  ;;  %v2288_v27 = vrot.slane %v2287_v37, 1 }
 0x22c   :  { %2309 = vrot.lane.b32.xlu1 %v2231_v18, %s5227_s1  ;;  %v2289_v33 = vadd.f32 %v2288_v27, %v2287_v37 }
 0x230   :  { %2339 = vrot.lane.b32.xlu1 %v2289_v33, %s5227_s1 }
 0x27c   :  { %v2308_v21 = vpop.permute.xlu0 %2307 }
 0x27d   :  { %v2314_v2 = vsel %vm2313_vm0, %v2308_v21, 0.0 }
 0x27e   :  { %v2316_v38 = vadd.f32 %v2314_v2, %v6745_v48 }
 0x280   :  { %v2338_v57 = vpop.permute.xlu0 %2337  ;;  %v2320_v3 = vsel %vm6812_vm12, %v2316_v38, 0.0 }
 0x281   :  { %v2343_v16 = vsel %vm2313_vm0, %v2338_v57, 0.0  ;;  %2324 = vrot.lane.b32.xlu0 %v2320_v3, %s5228_s11 }
 0x282   :  { %v2345_v20 = vadd.f32 %v2343_v16, %v6762_v61 }
 0x284   :  { %v2347_v58 = vsel %vm6812_vm12, %v2345_v20, 0.0 }
 0x285   :  { %2351 = vrot.lane.b32.xlu0 %v2347_v58, %s5228_s11 }
 0x29e   :  { %v2310_v24 = vpop.permute.xlu1 %2309 }
 0x29f   :  { %v2315_v17 = vsel %vm2313_vm0, %v2310_v24, 0.0  ;;  %v6866_v24 = vld [vmem:[%s8088_s6] ss:$0 sm:$0xff] }
 0x2a0   :  { %v2317_v50 = vadd.f32 %v2315_v17, %v2231_v18 }
 0x2a2   :  { %v2340_v43 = vpop.permute.xlu1 %2339  ;;  %v2321_v48 = vsel %vm6812_vm12, %v2317_v50, 0.0 }
 0x2a3   :  { %v2344_v1 = vsel %vm2313_vm0, %v2340_v43, 0.0  ;;  %2326 = vrot.lane.b32.xlu1 %v2321_v48, %s5228_s11  ;;  %vm8655_vm0 = vmmov %vm8652_vm4 }
 0x2a4   :  { %v2346_v26 = vadd.f32 %v2344_v1, %v2289_v33  ;;  %v6832_v33 = vsub.s32 0, %v5590_v8 }
 0x2a6   :  { %v2348_v60 = vsel %vm6812_vm12, %v2346_v26, 0.0  ;;  %vm8659_vm12 = vmmov %vm8655_vm0 }
 0x2a7   :  { %2353 = vrot.lane.b32.xlu1 %v2348_v60, %s5228_s11 }
 0x2f3   :  { %v2325_v61 = vpop.permute.xlu0 %2324 }
 0x2f4   :  { %v2331_v52 = vsel %vm2330_vm13, 0.0, %v2325_v61 }
 0x2f5   :  { %v2333_v59 = vadd.f32 %v2331_v52, %v2320_v3  ;;  %v6851_v3 = vld [vmem:[%s8087_s5] ss:$0 sm:$0xff] }
 0x2f7   :  { %v2362_v63 = vmul.f32 0.0078125, %v2333_v59  ;;  %v2352_v41 = vpop.permute.xlu0 %2351 }
 0x2f8   :  { %v2357_v49 = vsel %vm2330_vm13, 0.0, %v2352_v41 }
 0x2f9   :  { %v2359_v0 = vadd.f32 %v2357_v49, %v2347_v58  ;;  %v2366_v44 = vmul.f32 %v2362_v63, %v2362_v63  ;;  %v6835_v23 = vrot.slane %v2362_v63, %v6832_v33 }
 0x2fb   :  { %v2364_v37 = vmul.f32 0.0078125, %v2359_v0  ;;  %v2380_v21 = vsub.f32 %v6667_v30, %v6835_v23  ;;  %v2381_v54 = vsub.f32 %v6665_v53, %v6835_v23  ;;  %v2382_v38 = vsub.f32 %v6671_v14, %v6835_v23 }
 0x2fc   :  { %v2383_v57 = vsub.f32 %v6679_v29, %v6835_v23  ;;  %v2384_v30 = vsub.f32 %v6692_v56, %v6835_v23  ;;  %v2385_v16 = vsub.f32 %v6699_v4, %v6835_v23  ;;  %v2386_v53 = vsub.f32 %v6708_v47, %v6835_v23 }
 0x2fd   :  { %v2368_v18 = vsub.f32 %v2364_v37, %v2366_v44 }
 0x2ff   :  { %v2370_v27 = vmax.f32 %v2368_v18, 0.0 }
 0x301   :  { %v2396_v31 = vadd.f32 1e-05, %v2370_v27 }
 0x303   :  { %5123 = vrsqrt.f32 %v2396_v31 }
 0x30d   :  { %v5124_v55 = vpop.eup %5123 }
 0x30e   :  { %v6840_v2 = vrot.slane %v5124_v55, %v6832_v33 }
 0x310   :  { %v2408_v20 = vmul.f32 %v6840_v2, %v2380_v21  ;;  %v2409_v14 = vmul.f32 %v6840_v2, %v2381_v54  ;;  %v2410_v29 = vmul.f32 %v6840_v2, %v2382_v38  ;;  %v2411_v58 = vmul.f32 %v6840_v2, %v2383_v57 }
 0x311   :  { %v2412_v56 = vmul.f32 %v6840_v2, %v2384_v30  ;;  %v2413_v4 = vmul.f32 %v6840_v2, %v2385_v16  ;;  %v2414_v17 = vmul.f32 %v6840_v2, %v2386_v53 }
 0x312   :  { %v2430_v47 = vmul.f32 %v6851_v3, %v2408_v20  ;;  %v2431_v50 = vmul.f32 %v6851_v3, %v2409_v14  ;;  %v2432_v43 = vmul.f32 %v6851_v3, %v2410_v29  ;;  %v2433_v1 = vmul.f32 %v6851_v3, %v2411_v58 }
 0x313   :  { %v2434_v61 = vmul.f32 %v6851_v3, %v2412_v56  ;;  %v2435_v52 = vmul.f32 %v6851_v3, %v2413_v4  ;;  %v2436_v59 = vmul.f32 %v6851_v3, %v2414_v17 }
 0x314   :  { %v6880_v41 = vadd.f32 %v6866_v24, %v2430_v47  ;;  %v6883_v49 = vadd.f32 %v6866_v24, %v2431_v50  ;;  %v6886_v0 = vadd.f32 %v6866_v24, %v2432_v43  ;;  %v6889_v37 = vadd.f32 %v6866_v24, %v2433_v1 }
 0x315   :  { %v2327_v26 = vpop.permute.xlu1 %2326  ;;  %v6892_v18 = vadd.f32 %v6866_v24, %v2434_v61  ;;  %v6895_v27 = vadd.f32 %v6866_v24, %v2435_v52  ;;  %v6901_v54 = vadd.f32 %v6866_v24, %v2436_v59  ;;  %v2387_v52 = vsub.f32 %v6715_v62, %v6835_v23 }
 0x316   :  { %v2332_v63 = vsel %vm2330_vm13, 0.0, %v2327_v26  ;;  %v4159_v31 = vmul.f32 -1.442695, %v6880_v41  ;;  %v4160_v55 = vmul.f32 -1.442695, %v6883_v49 }
 0x317   :  { %v2334_v44 = vadd.f32 %v2332_v63, %v2321_v48  ;;  %v4161_v21 = vmul.f32 -1.442695, %v6886_v0  ;;  %v4162_v57 = vmul.f32 -1.442695, %v6889_v37  ;;  %v4163_v16 = vmul.f32 -1.442695, %v6892_v18 }
 0x318   :  { %5125 = vpow2.f32 %v4159_v31  ;;  %v4164_v20 = vmul.f32 -1.442695, %v6895_v27  ;;  %v4165_v14 = vmul.f32 -1.442695, %v6901_v54 }
 0x319   :  { %v2363_v38 = vmul.f32 0.0078125, %v2334_v44  ;;  %v2354_v48 = vpop.permute.xlu1 %2353  ;;  %5127 = vpow2.f32 %v4160_v55  ;;  %v2415_v55 = vmul.f32 %v6840_v2, %v2387_v52 }
 0x31a   :  { %v2358_v30 = vsel %vm2330_vm13, 0.0, %v2354_v48  ;;  %5129 = vpow2.f32 %v4161_v21 }
 0x31b   :  { %v2360_v53 = vadd.f32 %v2358_v30, %v2348_v60  ;;  %v2367_v29 = vmul.f32 %v2363_v38, %v2363_v38  ;;  %5131 = vpow2.f32 %v4162_v57  ;;  %v6912_v30 = vrot.slane %v2363_v38, %v6832_v33 }
 0x31c   :  { %5133 = vpow2.f32 %v4163_v16  ;;  %v2437_v16 = vmul.f32 %v6851_v3, %v2415_v55 }
 0x31d   :  { %v2365_v58 = vmul.f32 0.0078125, %v2360_v53  ;;  %5135 = vpow2.f32 %v4164_v20  ;;  %v2388_v53 = vsub.f32 %v6734_v36, %v6912_v30  ;;  %v2389_v2 = vsub.f32 %v6731_v51, %v6912_v30  ;;  %v5002_v36 = vld [vmem:[%s8089_s7] sm:$0xff]  }
 0x31e   :  { %5137 = vpow2.f32 %v4165_v14  ;;  %v2390_v20 = vsub.f32 %v6740_v10, %v6912_v30  ;;  %v2395_v38 = vsub.f32 %v6800_v15, %v6912_v30 }
 0x31f   :  { %v2369_v56 = vsub.f32 %v2365_v58, %v2367_v29  ;;  %v6927_v29 = vadd.f32 %v6866_v24, %v2437_v16 }
 0x321   :  { %v2371_v4 = vmax.f32 %v2369_v56, 0.0 }
 0x322   :  { %v5126_v47 = vpop.eup %5125 }
 0x323   :  { %v2397_v17 = vadd.f32 1e-05, %v2371_v4  ;;  %v5128_v50 = vpop.eup %5127  ;;  %v2516_v43 = vadd.f32 1.0, %v5126_v47 }
 0x324   :  { %v5130_v60 = vpop.eup %5129  ;;  %v2517_v1 = vadd.f32 1.0, %v5128_v50  ;;  %v2391_v50 = vsub.f32 %v6752_v5, %v6912_v30 }
 0x325   :  { %5139 = vrsqrt.f32 %v2397_v17  ;;  %v5132_v26 = vpop.eup %5131  ;;  %v2518_v61 = vadd.f32 1.0, %v5130_v60 }
 0x326   :  { %5141 = vrcp.f32 %v2516_v43  ;;  %v5134_v59 = vpop.eup %5133  ;;  %v2519_v63 = vadd.f32 1.0, %v5132_v26  ;;  %v2392_v43 = vsub.f32 %v6773_v32, %v6912_v30 }
 0x327   :  { %5143 = vrcp.f32 %v2517_v1  ;;  %v5136_v44 = vpop.eup %5135  ;;  %v2520_v31 = vadd.f32 1.0, %v5134_v59  ;;  %v4166_v59 = vmul.f32 -1.442695, %v6927_v29 }
 0x328   :  { %5145 = vrcp.f32 %v2518_v61  ;;  %v5138_v21 = vpop.eup %5137  ;;  %v2521_v48 = vadd.f32 1.0, %v5136_v44  ;;  %v5005_v44 = vld [vmem:[%s8089_s7 + $0x50] sm:$0xff]  }
 0x329   :  { %5147 = vrcp.f32 %v2519_v63  ;;  %v2522_v57 = vadd.f32 1.0, %v5138_v21  ;;  %v5003_v63 = vld [vmem:[%s8089_s7 + $0x48] sm:$0xff]  }
 0x32a   :  { %5149 = vrcp.f32 %v2520_v31 }
 0x32b   :  { %5151 = vrcp.f32 %v2521_v48 }
 0x32c   :  { %5153 = vrcp.f32 %v2522_v57 }
 0x32d   :  { %5155 = vpow2.f32 %v4166_v59 }
 0x32f   :  { %v5140_v62 = vpop.eup %5139 }
 0x330   :  { %v6916_v23 = vrot.slane %v5140_v62, %v6832_v33  ;;  %v5142_v14 = vpop.eup %5141  ;;  %v5001_v33 = vld [vmem:[%s8089_s7 + $0x40] sm:$0xff]  }
 0x331   :  { %v5144_v58 = vpop.eup %5143  ;;  %v6936_v51 = vmul.f32 %v5142_v14, %v6880_v41  ;;  %4312 = vmatprep.subr.bf16.mxu1 %v5001_v33 }
 0x332   :  { %v2416_v10 = vmul.f32 %v6916_v23, %v2388_v53  ;;  %v2417_v56 = vmul.f32 %v6916_v23, %v2389_v2  ;;  %v2418_v15 = vmul.f32 %v6916_v23, %v2390_v20  ;;  %v5146_v4 = vpop.eup %5145  ;;  %v6942_v17 = vmul.f32 %v5144_v58, %v6883_v49  ;;  %4313 = vmatpush3.bf16.msra.mxu1 %v5002_v36  ;;  %v5007_v58 = vld [vmem:[%s8089_s7 + $0x58] sm:$0xff]  }
 0x333   :  { %8632 = vst [vmem:[#allocation13_spill] sm:$0xff] %v6936_v51  ;;  %v2423_v47 = vmul.f32 %v6916_v23, %v2395_v38  ;;  %v5148_v41 = vpop.eup %5147  ;;  %v4828_v60 = vpack.i.bf16 %v6936_v51, %v8485_v46  ;;  %v6952_v1 = vmul.f32 %v5146_v4, %v6886_v0  ;;  %v2419_v32 = vmul.f32 %v6916_v23, %v2391_v50  ;;  %v5004_v0 = vld [vmem:[%s8089_s7 + $0x8] sm:$0xff]  }
 0x334   :  { %8633 = vst [vmem:[#allocation16_spill] sm:$0xff] %v6942_v17  ;;  %v2438_v26 = vmul.f32 %v6851_v3, %v2416_v10  ;;  %v2439_v49 = vmul.f32 %v6851_v3, %v2417_v56  ;;  %v5150_v61 = vpop.eup %5149  ;;  %v2440_v52 = vmul.f32 %v6851_v3, %v2418_v15  ;;  %v2420_v21 = vmul.f32 %v6916_v23, %v2392_v43 }
 0x335   :  { %8634 = vst [vmem:[#allocation7_spill] sm:$0xff] %v6952_v1  ;;  %v2445_v5 = vmul.f32 %v6851_v3, %v2423_v47  ;;  %4829 = vrot.lane.b32.xlu1 %v4828_v60, %s5226_s4  ;;  %v5152_v48 = vpop.eup %5151  ;;  %v6978_v57 = vmul.f32 %v5148_v41, %v6889_v37  ;;  %v6981_v16 = vmul.f32 %v5150_v61, %v6892_v18  ;;  %v5006_v37 = vld [vmem:[%s8089_s7 + $0x10] sm:$0xff]  }
 0x336   :  { %v6971_v31 = vadd.f32 %v6866_v24, %v2438_v26  ;;  %v6974_v55 = vadd.f32 %v6866_v24, %v2439_v49  ;;  %v6984_v62 = vadd.f32 %v6866_v24, %v2440_v52  ;;  %4314 = vmatprep.subr.bf16.mxu1 %v5003_v63  ;;  %v6991_v2 = vpack.i.bf16 %v6952_v1, %v6942_v17  ;;  %v5154_v18 = vpop.eup %5153 }
 0x337   :  { %8635 = vst [vmem:[#allocation5_spill] sm:$0xff] %v6978_v57  ;;  %8636 = vst [vmem:[#allocation31_spill] sm:$0xff] %v6981_v16  ;;  %v6987_v53 = vadd.f32 %v6866_v24, %v2445_v5  ;;  %4315 = vmatpush3.bf16.msra.mxu1 %v5004_v0  ;;  %v2441_v36 = vmul.f32 %v6851_v3, %v2419_v32  ;;  %v7007_v10 = vmul.f32 %v5152_v48, %v6895_v27  ;;  %v5010_v5 = vld [vmem:[%s8089_s7 + $0x20] sm:$0xff]   ;;  %v5012_v0 = vld [vmem:[%s8089_s7 + $0x28] sm:$0xff]  }
 0x338   :  { %v4167_v20 = vmul.f32 -1.442695, %v6971_v31  ;;  %v4168_v14 = vmul.f32 -1.442695, %v6974_v55  ;;  %v4169_v38 = vmul.f32 -1.442695, %v6984_v62  ;;  %4316 = vmatprep.subr.bf16.mxu1 %v5005_v44  ;;  %v2393_v56 = vsub.f32 %v6782_v35, %v6912_v30 }
 0x339   :  { %v4174_v33 = vmul.f32 -1.442695, %v6987_v53  ;;  %4839 = vrot.lane.b32.xlu1 %v6991_v2, %s5226_s4  ;;  %8637 = vst [vmem:[#allocation8_spill] sm:$0xff] %v7007_v10  ;;  %v2394_v15 = vsub.f32 %v6792_v7, %v6912_v30  ;;  %v7015_v4 = vpack.i.bf16 %v6981_v16, %v6978_v57  ;;  %v2442_v47 = vmul.f32 %v6851_v3, %v2420_v21  ;;  %v5008_v7 = vld [vmem:[%s8089_s7 + $0x18] sm:$0xff]  }
 0x33a   :  { %5157 = vpow2.f32 %v4167_v20  ;;  %v7019_v50 = vadd.f32 %v6866_v24, %v2441_v36  ;;  %v7022_v27 = vmul.f32 %v5154_v18, %v6901_v54  ;;  %v2421_v43 = vmul.f32 %v6916_v23, %v2393_v56  ;;  %v5009_v54 = vld [vmem:[%s8089_s7 + $0x60] sm:$0xff]   ;;  %v5013_v56 = vld [vmem:[%s8089_s7 + $0x70] sm:$0xff]  }
 0x33b   :  { %5159 = vpow2.f32 %v4168_v14  ;;  %v2422_v35 = vmul.f32 %v6916_v23, %v2394_v15  ;;  %4317 = vmatpush3.bf16.msra.mxu1 %v5006_v37  ;;  %v7030_v30 = vadd.f32 %v6866_v24, %v2442_v47  ;;  %v5014_v15 = vld [vmem:[%s8089_s7 + $0x30] sm:$0xff]  }
 0x33c   :  { %8638 = vst [vmem:[#allocation6_spill] sm:$0xff] %v7022_v27  ;;  %5161 = vpow2.f32 %v4169_v38  ;;  %v4170_v41 = vmul.f32 -1.442695, %v7019_v50  ;;  %4318 = vmatprep.subr.bf16.mxu1 %v5007_v58  ;;  %v2443_v23 = vmul.f32 %v6851_v3, %v2421_v43  ;;  %v7043_v49 = vpack.i.bf16 %v7022_v27, %v7007_v10 }
 0x33d   :  { %5163 = vpow2.f32 %v4174_v33  ;;  %4849 = vrot.lane.b32.xlu1 %v7015_v4, %s5226_s4  ;;  %v2444_v60 = vmul.f32 %v6851_v3, %v2422_v35  ;;  %v4171_v26 = vmul.f32 -1.442695, %v7030_v30  ;;  %v5011_v3 = vld [vmem:[%s8089_s7 + $0x68] sm:$0xff]   ;;  %v8226_v38 = vrot.slane %v6978_v57, 1 }
 0x33e   :  { %5165 = vpow2.f32 %v4170_v41  ;;  %v7046_v61 = vadd.f32 %v6866_v24, %v2443_v23  ;;  %v2649_v58 = vrot.slane %v6981_v16, 1 }
 0x33f   :  { %v7049_v52 = vadd.f32 %v6866_v24, %v2444_v60  ;;  %4319 = vmatpush3.bf16.msra.mxu1 %v5008_v7  ;;  %5167 = vpow2.f32 %v4171_v26  ;;  %v5156_v24 = vpop.eup %5155  ;;  %v8225_v7 = vrot.slane %v7007_v10, 1  ;;  %v8644_v26 = vld [vmem:[#allocation23_spill] sm:$0xff] }
 0x340   :  { %4320 = vmatprep.subr.bf16.mxu1 %v5009_v54  ;;  %v4172_v32 = vmul.f32 -1.442695, %v7046_v61  ;;  %v2523_v18 = vadd.f32 1.0, %v5156_v24  ;;  %v7076_v35 = vsel %vm8639_vm10, %v8226_v38, %v2649_v58  ;;  %vm8645_vm7 = vnez %v8644_v26 }
 0x341   :  { %4859 = vrot.lane.b32.xlu1 %v7043_v49, %s5226_s4  ;;  %v4173_v59 = vmul.f32 -1.442695, %v7049_v52  ;;  %8640 = vst [vmem:[#allocation35_spill] sm:$0xff] %v7076_v35  ;;  %v2886_v54 = vsel %vm8641_vm9, %v7076_v35, 0.0  ;;  %v7086_v23 = vsel %vm8642_vm8, %v2649_v58, %v8225_v7  ;;  %vm8665_vm8 = vnez %v8513_v19 }
 0x342   :  { %5169 = vpow2.f32 %v4172_v32  ;;  %8643 = vst [vmem:[#allocation24_spill] sm:$0xff] %v7086_v23 }
 0x343   :  { %4321 = vmatpush3.bf16.msra.mxu1 %v5010_v5  ;;  %5171 = vpow2.f32 %v4173_v59  ;;  %v2887_v5 = vsel %vm8645_vm7, %v7086_v23, 0.0 }
 0x344   :  { %v5158_v63 = vpop.eup %5157  ;;  %4322 = vmatprep.subr.bf16.mxu1 %v5011_v3  ;;  %v7091_v59 = vpack.c.bf16 %v2887_v5, %v2886_v54  ;;  %v2601_v5 = vrot.slane %v6981_v16, 7 }
 0x345   :  { %v5160_v44 = vpop.eup %5159  ;;  %v2524_v21 = vadd.f32 1.0, %v5158_v63  ;;  %v5015_v63 = vld [vmem:[%s8089_s7 + $0x78] sm:$0xff]  }
 0x346   :  { %v5162_v48 = vpop.eup %5161  ;;  %v2525_v20 = vadd.f32 1.0, %v5160_v44  ;;  %8646 = vst [vmem:[#allocation26_spill] sm:$0xff] %v7091_v59  ;;  %v5017_v44 = vld [vmem:[%s8089_s7 + $0x38] sm:$0xff]  }
 0x347   :  { %v5164_v14 = vpop.eup %5163  ;;  %5173 = vrcp.f32 %v2524_v21  ;;  %v2526_v37 = vadd.f32 1.0, %v5162_v48  ;;  %4323 = vmatpush3.bf16.msra.mxu1 %v5012_v0  ;;  %v5016_v0 = vld [vmem:[%s8089_s7 + $0xc0] sm:$0xff]   ;;  %v7103_v48 = vrot.slane %v6936_v51, 7 }
 0x348   :  { %5175 = vrcp.f32 %v2525_v20  ;;  %v2531_v33 = vadd.f32 1.0, %v5164_v14  ;;  %v5166_v36 = vpop.eup %5165  ;;  %4324 = vmatprep.subr.bf16.mxu1 %v5013_v56  ;;  %v7106_v20 = vrot.slane %v6942_v17, 7  ;;  %v5018_v14 = vld [vmem:[%s8089_s7 + $0x80] sm:$0xff]   ;;  %4376 = vmatprep.subr.bf16.mxu0 %v5016_v0  ;;  %v2647_v0 = vrot.slane %v6952_v1, 1 }
 0x349   :  { %5177 = vrcp.f32 %v2526_v37  ;;  %v2527_v47 = vadd.f32 1.0, %v5166_v36  ;;  %v5168_v43 = vpop.eup %5167  ;;  %v2600_v36 = vrot.slane %v6978_v57, 7  ;;  %4377 = vmatpush3.bf16.msra.mxu0 %v5018_v14 }
 0x34a   :  { %5179 = vrcp.f32 %v2531_v33  ;;  %v2528_v41 = vadd.f32 1.0, %v5168_v43  ;;  %8647 = vst [vmem:[#allocation25_spill] sm:$0xff] %v7106_v20  ;;  %v2599_v33 = vrot.slane %v6952_v1, 7  ;;  %v7131_v54 = vsel %vm8652_vm4, %v7103_v48, %v7106_v20 }
 0x34b   :  { %5181 = vrcp.f32 %v2523_v18  ;;  %4325 = vmatpush3.bf16.msra.mxu1 %v5014_v15  ;;  %vm8666_vm4 = vnez %v8516_v42 }
 0x34c   :  { %5183 = vrcp.f32 %v2527_v47  ;;  %v5170_v60 = vpop.eup %5169  ;;  %4326 = vmatprep.subr.bf16.mxu1 %v5015_v63  ;;  %v7157_v63 = vrot.slane %v6942_v17, 1 }
 0x34d   :  { %5185 = vrcp.f32 %v2528_v41  ;;  %v5172_v3 = vpop.eup %5171  ;;  %v2529_v32 = vadd.f32 1.0, %v5170_v60  ;;  %v7136_v60 = vld [vmem:[%s8089_s7 + $0x100] sm:$0xff]  }
 0x34e   :  { %v2530_v24 = vadd.f32 1.0, %v5172_v3  ;;  %8653 = vst [vmem:[#allocation12_spill] sm:$0xff] %v7136_v60  ;;  %v2602_v3 = vrot.slane %v7007_v10, 7 }
 0x34f   :  { %5187 = vrcp.f32 %v2529_v32  ;;  %4327 = vmatpush3.bf16.msra.mxu1 %v5017_v44 }
 0x350   :  { %5189 = vrcp.f32 %v2530_v24  ;;  %v7154_v24 = vrot.slane %v6936_v51, 1  ;;  %4482 = vmatprep.subr.bf16.mxu1 %v7136_v60  ;;  %v7203_v16 = vsel %vm8655_vm0, %v2601_v5, %v2602_v3 }
 0x351   :  { %v5174_v21 = vpop.eup %5173 }
 0x352   :  { %v5176_v37 = vpop.eup %5175  ;;  %v7112_v18 = vmul.f32 %v5174_v21, %v6971_v31 }
 0x353   :  { %v5178_v58 = vpop.eup %5177  ;;  %v7119_v47 = vmul.f32 %v5176_v37, %v6974_v55 }
 0x354   :  { %8648 = vst [vmem:[#allocation10_spill] sm:$0xff] %v7112_v18  ;;  %v5180_v56 = vpop.eup %5179  ;;  %v4868_v15 = vpack.i.bf16 %v7112_v18, %v8485_v46  ;;  %v7122_v31 = vmul.f32 %v5178_v58, %v6984_v62  ;;  %v7141_v62 = vsel %vm8654_vm5, %v2599_v33, %v2600_v36  ;;  %v8660_v58 = vld [vmem:[#allocation18_spill] sm:$0xff]  ;;  %vm8667_vm5 = vmmov %vm8655_vm0 }
 0x355   :  { %8649 = vst [vmem:[#allocation9_spill] sm:$0xff] %v7119_v47  ;;  %v5182_v43 = vpop.eup %5181  ;;  %v7125_v41 = vmul.f32 %v5180_v56, %v6987_v53  ;;  %v7146_v53 = vsel %vm8655_vm0, %v7106_v20, %v2599_v33  ;;  %vm8661_vm13 = vnez %v8660_v58 }
 0x356   :  { %8650 = vst [vmem:[#allocation29_spill] sm:$0xff] %v7122_v31  ;;  %v5184_v55 = vpop.eup %5183  ;;  %4869 = vrot.lane.b32.xlu1 %v4868_v15, %s5226_s4  ;;  %v7163_v21 = vpack.i.bf16 %v7122_v31, %v7119_v47  ;;  %v7169_v37 = vmul.f32 %v5182_v43, %v6927_v29  ;;  %v2725_v56 = vsel %vm8661_vm13, %v7131_v54, 0.0  ;;  %v5021_v29 = vld [vmem:[%s8089_s7 + $0x88] sm:$0xff]   ;;  %v8663_v43 = vld [vmem:[#allocation17_spill] sm:$0xff]  ;;  %v2726_v7 = vsel %vm8665_vm8, %v7146_v53, 0.0 }
 0x357   :  { %8651 = vst [vmem:[#allocation28_spill] sm:$0xff] %v7125_v41  ;;  %v7151_v32 = vrot.slane %v7125_v41, 7  ;;  %v5186_v44 = vpop.eup %5185  ;;  %v7166_v14 = vmul.f32 %v5184_v55, %v7019_v50  ;;  %v5020_v50 = vld [vmem:[%s8089_s7 + $0xc8] sm:$0xff]   ;;  %vm8664_vm10 = vnez %v8663_v43  ;;  %8669 = vst [vmem:[#allocation17_spill] sm:$0xff] %v7203_v16 }
 0x358   :  { %8658 = vst [vmem:[#allocation15_spill] sm:$0xff] %v7169_v37  ;;  %v7179_v15 = vmul.f32 %v5186_v44, %v7030_v30  ;;  %v2727_v30 = vsel %vm8666_vm4, %v7141_v62, 0.0  ;;  %v7199_v44 = vsel %vm8667_vm5, %v2600_v36, %v2601_v5  ;;  %4378 = vmatprep.subr.bf16.mxu0 %v5020_v50  ;;  %v7227_v51 = vrot.slane %v7169_v37, 7 }
 0x359   :  { %8656 = vst [vmem:[#allocation11_spill] sm:$0xff] %v7151_v32  ;;  %8657 = vst [vmem:[#allocation37_spill] sm:$0xff] %v7166_v14  ;;  %v2723_v33 = vsel %vm8659_vm12, %v7151_v32, %v7103_v48  ;;  %v5188_v38 = vpop.eup %5187  ;;  %vm8670_vm12 = vcmp.lt.s32.totalorder %v5590_v8, 7  ;;  %4379 = vmatpush3.bf16.msra.mxu0 %v5021_v29  ;;  %v4833_v50 = vpack.i.bf16 %v2727_v30, %v2726_v7  ;;  %vm8678_vm5 = vnez %v8536_v39  ;;  %v8681_v30 = vld [vmem:[#allocation21_spill] sm:$0xff]  ;;  %v5024_v39 = vld [vmem:[%s8089_s7 + $0xd8] sm:$0xff]  }
 0x35a   :  { %8662 = vst [vmem:[#allocation34_spill] sm:$0xff] %v7179_v15  ;;  %4879 = vrot.lane.b32.xlu1 %v7163_v21, %s5226_s4  ;;  %v2724_v55 = vsel %vm8664_vm10, %v2723_v33, 0.0  ;;  %8668 = vst [vmem:[#allocation18_spill] sm:$0xff] %v7199_v44  ;;  %v7208_v33 = vsel %vm8670_vm12, %v7157_v63, %v2647_v0  ;;  %v5190_v36 = vpop.eup %5189  ;;  %v7221_v5 = vmul.f32 %v5188_v38, %v7046_v61  ;;  %v5022_v61 = vld [vmem:[%s8089_s7 + $0xd0] sm:$0xff]   ;;  %vm8683_vm4 = vcmp.lt.s32.totalorder %v5590_v8, 1 }
 0x35b   :  { %v4823_v59 = vpack.i.bf16 %v2725_v56, %v2724_v55  ;;  %vm8671_vm8 = vmmov %vm8670_vm12  ;;  %v7218_v56 = vpack.i.bf16 %v7179_v15, %v7166_v14  ;;  %v7224_v55 = vrot.slane %v7022_v27, 7  ;;  %8675 = vst [vmem:[#allocation59_spill] sm:$0xff] %v7227_v51  ;;  %v7231_v17 = vmul.f32 %v5190_v36, %v7049_v52  ;;  %v5023_v38 = vld [vmem:[%s8089_s7 + $0x90] sm:$0xff]   ;;  %4380 = vmatprep.subr.bf16.mxu0 %v5022_v61  ;;  %v5025_v61 = vld [vmem:[%s8089_s7 + $0x98] sm:$0xff]  }
 0x35c   :  { %v7214_v1 = vsel %vm8671_vm8, %v7154_v24, %v7157_v63  ;;  %8673 = vst [vmem:[#allocation57_spill] sm:$0xff] %v7221_v5  ;;  %vm8677_vm8 = vnez %v8533_v11  ;;  %v2729_v52 = vsel %vm8678_vm5, %v7203_v16, 0.0  ;;  %vm8682_vm12 = vnez %v8681_v30  ;;  %vm8685_vm5 = vmmov %vm8683_vm4 }
 0x35d   :  { %8672 = vst [vmem:[#allocation56_spill] sm:$0xff] %v7214_v1  ;;  %8674 = vst [vmem:[#allocation58_spill] sm:$0xff] %v7224_v55  ;;  %4824 = vrot.lane.b32.xlu0 %v4823_v59, %s5226_s4  ;;  %v2728_v29 = vsel %vm8677_vm8, %v7199_v44, 0.0  ;;  %v8679_v59 = vld [vmem:[#allocation19_spill] sm:$0xff]  ;;  %v2773_v36 = vsel %vm8682_vm12, %v7208_v33, 0.0  ;;  %v7255_v20 = vpack.i.bf16 %v7231_v17, %v7221_v5  ;;  %v7260_v60 = vsel %vm8683_vm4, %v2602_v3, %v7224_v55 }
 0x35e   :  { %8676 = vst [vmem:[#allocation60_spill] sm:$0xff] %v7231_v17  ;;  %4889 = vrot.lane.b32.xlu1 %v7218_v56, %s5226_s4  ;;  %vm8680_vm0 = vnez %v8679_v59  ;;  %8684 = vst [vmem:[#allocation19_spill] sm:$0xff] %v7260_v60  ;;  %v7266_v16 = vsel %vm8685_vm5, %v7224_v55, %v7227_v51  ;;  %v8688_v44 = vrot.slane %v6978_v57, 1  ;;  %vm8689_vm4 = vcmp.lt.s32.totalorder %v5590_v8, 7  ;;  %4381 = vmatpush3.bf16.msra.mxu0 %v5023_v38 }
 0x35f   :  { %v2772_v7 = vsel %vm8680_vm0, %v7214_v1, 0.0  ;;  %8686 = vst [vmem:[#allocation21_spill] sm:$0xff] %v7266_v16  ;;  %v7269_v1 = vrot.slane %v7022_v27, 1  ;;  %v7282_v11 = vrot.slane %v7112_v18, 7  ;;  %v7285_v55 = vrot.slane %v7119_v47, 7  ;;  %4382 = vmatprep.subr.bf16.mxu0 %v5024_v39  ;;  %vm8693_vm5 = vmmov %vm8689_vm4 }
 0x360   :  { %v7279_v3 = vsel %vm8689_vm4, %v2647_v0, %v8688_v44  ;;  %v4908_v27 = vpack.i.bf16 %v2773_v36, %v2772_v7  ;;  %v2730_v0 = vsel %vm5942_vm2, %v7260_v60, 0.0  ;;  %v2731_v44 = vsel %vm5965_vm3, %v7266_v16, 0.0  ;;  %v8700_v60 = vld [vmem:[#allocation30_spill] sm:$0xff] }
 0x361   :  { %8687 = vst [vmem:[#allocation61_spill] sm:$0xff] %v7269_v1  ;;  %4834 = vrot.lane.b32.xlu0 %v4833_v50, %s5226_s4  ;;  %8690 = vst [vmem:[#allocation62_spill] sm:$0xff] %v7282_v11  ;;  %v4843_v50 = vpack.i.bf16 %v2729_v52, %v2728_v29  ;;  %v2774_v38 = vsel %vm8641_vm9, %v7279_v3, 0.0  ;;  %v2775_v57 = vsel %vm8645_vm7, %v7076_v35, 0.0  ;;  %v8692_v39 = vrot.slane %v7007_v10, 1  ;;  %v5027_v35 = vld [vmem:[%s8089_s7 + $0xe0] sm:$0xff]  }
 0x362   :  { %8691 = vst [vmem:[#allocation63_spill] sm:$0xff] %v7285_v55  ;;  %4894 = vrot.lane.b32.xlu1 %v7255_v20, %s5226_s4  ;;  %v7312_v52 = vrot.slane %v7112_v18, 1  ;;  %vm8695_vm4 = vcmp.lt.s32.totalorder %v5590_v8, 1  ;;  %v2607_v10 = vrot.slane %v7122_v31, 7  ;;  %4383 = vmatpush3.bf16.msra.mxu0 %v5025_v61  ;;  %v7330_v18 = vrot.slane %v7119_v47, 1 }
 0x363   :  { %v7309_v29 = vsel %vm8693_vm5, %v8692_v39, %v7269_v1  ;;  %v7319_v7 = vsel %vm8695_vm4, %v7282_v11, %v7285_v55  ;;  %vm8697_vm7 = vmmov %vm8695_vm4  ;;  %v2608_v39 = vrot.slane %v7166_v14, 7  ;;  %v2655_v16 = vrot.slane %v7122_v31, 1  ;;  %4384 = vmatprep.subr.bf16.mxu0 %v5027_v35 }
 0x364   :  { %8694 = vst [vmem:[#allocation64_spill] sm:$0xff] %v7312_v52  ;;  %8696 = vst [vmem:[#allocation65_spill] sm:$0xff] %v7319_v7  ;;  %v2715_v36 = vsel %vm8697_vm7, %v7227_v51, %v7282_v11  ;;  %v5028_v51 = vld [vmem:[%s8089_s7 + $0xa0] sm:$0xff]   ;;  %v4853_v26 = vpack.i.bf16 %v2731_v44, %v2730_v0  ;;  %v4918_v9 = vpack.i.bf16 %v2775_v57, %v2774_v38  ;;  %v7340_v61 = vrot.slane %v7169_v37, 1  ;;  %v8698_v11 = vld [vmem:[#allocation27_spill] sm:$0xff] }
 0x365   :  { %4844 = vrot.lane.b32.xlu0 %v4843_v50, %s5226_s4  ;;  %v2609_v50 = vrot.slane %v7179_v15, 7  ;;  %v2732_v47 = vsel %vm5998_vm1, %v2715_v36, 0.0  ;;  %v2733_v31 = vsel %vm8450_vm15, %v7319_v7, 0.0  ;;  %vm8699_vm7 = vnez %v8698_v11  ;;  %v5029_v0 = vld [vmem:[%s8089_s7 + $0xe8] sm:$0xff]   ;;  %vm8703_vm9 = vmmov %vm8695_vm4  ;;  %v5036_v11 = vld [vmem:[%s8089_s7 + $0x118] sm:$0xff]  }
 0x366   :  { %4909 = vrot.lane.b32.xlu1 %v4908_v27, %s5226_s4  ;;  %v2610_v27 = vrot.slane %v7221_v5, 7  ;;  %v2776_v34 = vsel %vm8699_vm7, %v7086_v23, 0.0  ;;  %vm8701_vm5 = vnez %v8700_v60  ;;  %v7360_v44 = vsel %vm8695_vm4, %v2607_v10, %v2608_v39  ;;  %4385 = vmatpush3.bf16.msra.mxu0 %v5028_v51  ;;  %v5030_v36 = vld [vmem:[%s8089_s7 + $0xa8] sm:$0xff]  }
 0x367   :  { %v2777_v57 = vsel %vm8701_vm5, %v7309_v29, 0.0  ;;  %8702 = vst [vmem:[#allocation27_spill] sm:$0xff] %v7360_v44  ;;  %v7365_v38 = vsel %vm8703_vm9, %v7285_v55, %v2607_v10  ;;  %vm8705_vm15 = vcmp.lt.s32.totalorder %v5590_v8, 7  ;;  %v7391_v55 = vrot.slane %v7231_v17, 7  ;;  %4386 = vmatprep.subr.bf16.mxu0 %v5029_v0  ;;  %v8716_v0 = vld [vmem:[#allocation42_spill] sm:$0xff] }
 0x368   :  { %8704 = vst [vmem:[#allocation66_spill] sm:$0xff] %v7365_v38  ;;  %v2763_v35 = vsel %vm8705_vm15, %v7340_v61, %v7312_v52  ;;  %vm8707_vm9 = vmmov %vm8705_vm15  ;;  %v4928_v23 = vpack.i.bf16 %v2777_v57, %v2776_v34  ;;  %v2657_v34 = vrot.slane %v7179_v15, 1  ;;  %v7431_v15 = vrot.slane %v7231_v17, 1 }
 0x369   :  { %4854 = vrot.lane.b32.xlu0 %v4853_v26, %s5226_s4  ;;  %v7377_v26 = vsel %vm8695_vm4, %v2608_v39, %v2609_v50  ;;  %v7382_v10 = vsel %vm8707_vm9, %v7330_v18, %v2655_v16  ;;  %vm8708_vm15 = vmmov %vm8707_vm9  ;;  %v2658_v17 = vrot.slane %v7221_v5, 1  ;;  %v2888_v60 = vsel %vm8699_vm7, %v7309_v29, 0.0 }
 0x36a   :  { %4919 = vrot.lane.b32.xlu1 %v4918_v9, %s5226_s4  ;;  %8706 = vst [vmem:[#allocation67_spill] sm:$0xff] %v7377_v26  ;;  %v7388_v51 = vsel %vm8708_vm15, %v7312_v52, %v7330_v18  ;;  %v4863_v9 = vpack.i.bf16 %v2733_v31, %v2732_v47  ;;  %vm8710_vm4 = vmmov %vm8707_vm9  ;;  %vm8711_vm9 = vcmp.lt.s32.totalorder %v5590_v8, 1  ;;  %v2734_v52 = vsel %vm6110_vm14, %v7365_v38, 0.0  ;;  %v8714_v31 = vld [vmem:[#allocation39_spill] sm:$0xff]  ;;  %4387 = vmatpush3.bf16.msra.mxu0 %v5030_v36 }
 0x36b   :  { %8709 = vst [vmem:[#allocation68_spill] sm:$0xff] %v7388_v51  ;;  %v2764_v39 = vsel %vm8710_vm4, %v7269_v1, %v7340_v61  ;;  %v7399_v7 = vsel %vm8711_vm9, %v2609_v50, %v2610_v27  ;;  %vm8713_vm15 = vnez %v8417_v22  ;;  %v2656_v47 = vrot.slane %v7166_v14, 1  ;;  %v8718_v22 = vld [vmem:[#allocation43_spill] sm:$0xff]  ;;  %8722 = vst [vmem:[#allocation42_spill] sm:$0xff] %v7431_v15 }
 0x36c   :  { %8712 = vst [vmem:[#allocation69_spill] sm:$0xff] %v7399_v7  ;;  %v2735_v25 = vsel %vm8713_vm15, %v7360_v44, 0.0  ;;  %vm8715_vm4 = vnez %v8714_v31  ;;  %v2736_v50 = vsel %vm6255_vm11, %v7377_v26, 0.0  ;;  %vm8717_vm9 = vnez %v8716_v0  ;;  %v5031_v36 = vld [vmem:[%s8089_s7 + $0xf0] sm:$0xff]  }
 0x36d   :  { %4864 = vrot.lane.b32.xlu0 %v4863_v9, %s5226_s4  ;;  %v2779_v57 = vsel %vm8715_vm4, %v2763_v35, 0.0  ;;  %v2780_v1 = vsel %vm8717_vm9, %v7388_v51, 0.0  ;;  %vm8719_vm15 = vnez %v8718_v22  ;;  %v2737_v9 = vsel %vm6283_vm6, %v7399_v7, 0.0  ;;  %v8723_v7 = vld [vmem:[#allocation38_spill] sm:$0xff]  ;;  %4388 = vmatprep.subr.bf16.mxu0 %v5031_v36 }
 0x36e   :  { %v2781_v44 = vsel %vm8719_vm15, %v7382_v10, 0.0  ;;  %4929 = vrot.lane.b32.xlu1 %v4928_v23, %s5226_s4  ;;  %vm8720_vm14 = vcmp.lt.s32.totalorder %v5590_v8, 1  ;;  %v2755_v14 = vrot.slane %v7125_v41, 1  ;;  %v5032_v23 = vld [vmem:[%s8089_s7 + $0xb0] sm:$0xff]   ;;  %v4873_v51 = vpack.i.bf16 %v2735_v25, %v2734_v52  ;;  %v5033_v25 = vld [vmem:[%s8089_s7 + $0xf8] sm:$0xff]  }
 0x36f   :  { %v7428_v35 = vsel %vm8720_vm14, %v2610_v27, %v7391_v55  ;;  %vm8724_vm6 = vnez %v8723_v7  ;;  %v7446_v27 = vsel %vm8720_vm14, %v7391_v55, %v7151_v32  ;;  %vm8726_vm11 = vcmp.lt.s32.totalorder %v5590_v8, 7  ;;  %4389 = vmatpush3.bf16.msra.mxu0 %v5032_v23 }
 0x370   :  { %8721 = vst [vmem:[#allocation39_spill] sm:$0xff] %v7428_v35  ;;  %v2778_v45 = vsel %vm8724_vm6, %v2764_v39, 0.0  ;;  %8725 = vst [vmem:[#allocation43_spill] sm:$0xff] %v7446_v27  ;;  %v7451_v13 = vsel %vm8726_vm11, %v2656_v47, %v2657_v34  ;;  %v2889_v52 = vsel %vm8701_vm5, %v2764_v39, 0.0  ;;  %v4883_v5 = vpack.i.bf16 %v2737_v9, %v2736_v50  ;;  %4390 = vmatprep.subr.bf16.mxu0 %v5033_v25  ;;  %v8733_v50 = vld [vmem:[#allocation46_spill] sm:$0xff]  ;;  %v8735_v9 = vld [vmem:[#allocation47_spill] sm:$0xff] }
 0x371   :  { %v4938_v26 = vpack.i.bf16 %v2779_v57, %v2778_v45  ;;  %vm8727_vm1 = vmmov %vm8726_vm11  ;;  %4874 = vrot.lane.b32.xlu0 %v4873_v51, %s5226_s4  ;;  %v4948_v45 = vpack.i.bf16 %v2781_v44, %v2780_v1  ;;  %v8728_v57 = vld [vmem:[#allocation20_spill] sm:$0xff]  ;;  %vm8732_vm14 = vcmp.lt.s32.totalorder %v5590_v8, 7  ;;  %v2884_v1 = vsel %vm8680_vm0, %v7208_v33, 0.0  ;;  %v8798_v28 = vld [vmem:[#allocation67_spill] sm:$0xff] }
 0x372   :  { %v7455_v38 = vsel %vm8727_vm1, %v2655_v16, %v2656_v47  ;;  %vm8729_vm11 = vnez %v8728_v57  ;;  %v5034_v16 = vld [vmem:[%s8089_s7 + $0xb8] sm:$0xff]   ;;  %v2756_v39 = vsel %vm8732_vm14, %v7431_v15, %v2755_v14  ;;  %v2885_v44 = vsel %vm8682_vm12, %v7279_v3, 0.0 }
 0x373   :  { %v2738_v32 = vsel %vm8729_vm11, %v7428_v35, 0.0  ;;  %4939 = vrot.lane.b32.xlu1 %v4938_v26, %s5226_s4  ;;  %v8730_v47 = vld [vmem:[#allocation36_spill] sm:$0xff]  ;;  %vm8734_vm5 = vnez %v8733_v50  ;;  %v7491_v23 = vsel %vm8732_vm14, %v2658_v17, %v7431_v15  ;;  %v7493_v25 = vpack.c.bf16 %v2885_v44, %v2884_v1  ;;  %vm8738_vm11 = vmmov %vm8732_vm14  ;;  %v8742_v1 = vld [vmem:[#allocation51_spill] sm:$0xff]  ;;  %4391 = vmatpush3.bf16.msra.mxu0 %v5034_v16 }
 0x374   :  { %vm8731_vm1 = vnez %v8730_v47  ;;  %v2782_v26 = vsel %vm8734_vm5, %v7455_v38, 0.0  ;;  %v8739_v47 = vld [vmem:[#allocation14_spill] sm:$0xff]  ;;  %vm8740_vm0 = vmmov %vm8738_vm11  ;;  %vm8743_vm12 = vnez %v8742_v1 }
 0x375   :  { %v2739_v51 = vsel %vm8731_vm1, %v7446_v27, 0.0  ;;  %vm8736_vm1 = vnez %v8735_v9  ;;  %8737 = vst [vmem:[#allocation38_spill] sm:$0xff] %v7493_v25  ;;  %v7497_v27 = vsel %vm8738_vm11, %v2657_v34, %v2658_v17  ;;  %v2875_v35 = vsel %vm8740_vm0, %v8739_v47, %v7330_v18  ;;  %vm8741_vm14 = vmmov %vm8740_vm0  ;;  %4884 = vrot.lane.b32.xlu0 %v4883_v5, %s5226_s4 }
 0x376   :  { %v2783_v36 = vsel %vm8736_vm1, %v7451_v13, 0.0  ;;  %v2876_v15 = vsel %vm8741_vm14, %v7340_v61, %v8739_v47  ;;  %v2897_v17 = vsel %vm8743_vm12, %v2756_v39, 0.0  ;;  %v7513_v34 = vpack.c.bf16 %v2889_v52, %v2888_v60  ;;  %vm8751_vm14 = vmmov %vm8738_vm11 }
 0x377   :  { %v2890_v44 = vsel %vm8724_vm6, %v2876_v15, 0.0  ;;  %v2891_v25 = vsel %vm8715_vm4, %v2875_v35, 0.0  ;;  %4949 = vrot.lane.b32.xlu1 %v4948_v45, %s5226_s4  ;;  %v2892_v5 = vsel %vm8717_vm9, %v7382_v10, 0.0  ;;  %v2893_v61 = vsel %vm8719_vm15, %v7455_v38, 0.0  ;;  %v8747_v45 = vld [vmem:[#allocation50_spill] sm:$0xff] }
 0x378   :  { %8744 = vst [vmem:[#allocation20_spill] sm:$0xff] %v7513_v34  ;;  %v7520_v18 = vpack.c.bf16 %v2891_v25, %v2890_v44  ;;  %v2894_v60 = vsel %vm8734_vm5, %v7451_v13, 0.0  ;;  %v4898_v15 = vpack.i.bf16 %v2739_v51, %v2738_v32  ;;  %v7531_v52 = vpack.c.bf16 %v2893_v61, %v2892_v5  ;;  %v8754_v61 = vld [vmem:[#allocation55_spill] sm:$0xff] }
 0x379   :  { %v2895_v35 = vsel %vm8736_vm1, %v7497_v27, 0.0  ;;  %vm8748_vm0 = vnez %v8747_v45  ;;  %v4958_v25 = vpack.i.bf16 %v2783_v36, %v2782_v26  ;;  %v2868_v34 = vsel %vm8738_vm11, %v2755_v14, %v8739_v47  ;;  %v8752_v36 = vld [vmem:[#allocation54_spill] sm:$0xff] }
 0x37a   :  { %8745 = vst [vmem:[#allocation46_spill] sm:$0xff] %v7520_v18  ;;  %8746 = vst [vmem:[#allocation47_spill] sm:$0xff] %v7531_v52  ;;  %v2896_v16 = vsel %vm8748_vm0, %v7491_v23, 0.0  ;;  %v7539_v44 = vpack.c.bf16 %v2895_v35, %v2894_v60  ;;  %4899 = vrot.lane.b32.xlu0 %v4898_v15, %s5226_s4  ;;  %v2784_v32 = vsel %vm8748_vm0, %v7497_v27, 0.0  ;;  %v2785_v51 = vsel %vm8743_vm12, %v7491_v23, 0.0 }
 0x37b   :  { %v7541_v18 = vpack.c.bf16 %v2897_v17, %v2896_v16  ;;  %v2883_v26 = vsel %vm8751_vm14, %v8739_v47, %v7157_v63  ;;  %vm8753_vm1 = vnez %v8752_v36  ;;  %4959 = vrot.lane.b32.xlu1 %v4958_v25, %s5226_s4  ;;  %v2771_v5 = vsel %vm8738_vm11, %v2755_v14, %v7154_v24 }
 0x37c   :  { %8749 = vst [vmem:[#allocation14_spill] sm:$0xff] %v7539_v44  ;;  %v2898_v17 = vsel %vm8753_vm1, %v2868_v34, 0.0  ;;  %vm8755_vm0 = vnez %v8754_v61  ;;  %v4968_v35 = vpack.i.bf16 %v2785_v51, %v2784_v32  ;;  %v2786_v63 = vsel %vm8753_vm1, %v2756_v39, 0.0 }
 0x37d   :  { %8750 = vst [vmem:[#allocation51_spill] sm:$0xff] %v7541_v18  ;;  %v2899_v60 = vsel %vm8755_vm0, %v2883_v26, 0.0  ;;  %v2787_v34 = vsel %vm8755_vm0, %v2771_v5, 0.0  ;;  %vm8757_vm14 = vcmp.lt.s32.totalorder %v5590_v8, 1  ;;  %vm8759_vm0 = vcmask 523264  }
 0x37e   :  { %v7565_v15 = vpack.c.bf16 %v2899_v60, %v2898_v17  ;;  %4904 = vrot.lane.b32.xlu0 %v6991_v2, %s5226_s4  ;;  %v4978_v16 = vpack.i.bf16 %v2787_v34, %v2786_v63  ;;  %v4933_v2 = vpack.i.bf16 %v8485_v46, %v7169_v37  ;;  %vm8758_vm11 = vmmov %vm8757_vm14  ;;  %v8783_v37 = vld [vmem:[#allocation65_spill] sm:$0xff] }
 0x37f   :  { %4969 = vrot.lane.b32.xlu1 %v4968_v35, %s5226_s4  ;;  %vm8760_vm1 = vmmov %vm8759_vm0 }
 0x380   :  { %8756 = vst [vmem:[#allocation50_spill] sm:$0xff] %v7565_v15 }
 0x382   :  { %4914 = vrot.lane.b32.xlu0 %v7015_v4, %s5226_s4  ;;  %v4973_v4 = vpack.i.bf16 %v8485_v46, %v7125_v41 }
 0x383   :  { %4979 = vrot.lane.b32.xlu1 %v4978_v16, %s5226_s4 }
 0x386   :  { %4924 = vrot.lane.b32.xlu0 %v7043_v49, %s5226_s4  ;;  %v2627_v49 = vsel %vm8757_vm14, %v7391_v55, %v8478_v6  ;;  %vm8761_vm14 = vnez %v8513_v19  ;;  %v8859_v19 = vld [vmem:[#allocation7_spill] sm:$0xff] }
 0x387   :  { %v2630_v17 = vsel %vm8761_vm14, %v7131_v54, 0.0  ;;  %v2632_v54 = vsel %vm8677_vm8, %v7141_v62, 0.0  ;;  %v2838_v43 = vsel %vm8761_vm14, %v7141_v62, 0.0 }
 0x38a   :  { %4934 = vrot.lane.b32.xlu0 %v4933_v2, %s5226_s4 }
 0x38e   :  { %4944 = vrot.lane.b32.xlu0 %v7163_v21, %s5226_s4  ;;  %v2626_v21 = vsel %vm8758_vm11, %v8478_v6, %v7103_v48  ;;  %vm8762_vm11 = vnez %v8516_v42 }
 0x38f   :  { %v2629_v46 = vsel %vm8661_vm13, %v2626_v21, 0.0  ;;  %v2631_v5 = vsel %vm8762_vm11, %v7146_v53, 0.0  ;;  %vm8763_vm13 = vmmov %vm8759_vm0  ;;  %v8766_v21 = vld [vmem:[#allocation33_spill] sm:$0xff] }
 0x390   :  { %vm8768_vm11 = vmmov %vm8759_vm0 }
 0x392   :  { %4954 = vrot.lane.b32.xlu0 %v7218_v56, %s5226_s4 }
 0x396   :  { %4964 = vrot.lane.b32.xlu0 %v7255_v20, %s5226_s4  ;;  %v2628_v20 = vsel %vm8664_vm10, %v2627_v49, 0.0  ;;  %v8765_v49 = vld [vmem:[#allocation18_spill] sm:$0xff] }
 0x39a   :  { %4974 = vrot.lane.b32.xlu0 %v4973_v4, %s5226_s4  ;;  %v8764_v4 = vld [vmem:[#allocation32_spill] sm:$0xff] }
 0x3a7   :  { %v4830_v14 = vpop.permute.xlu1 %4829 }
 0x3a8   :  { %v4832_v56 = vunpack.i.h.bf16 %v4830_v14  ;;  %v4831_v39 = vunpack.i.l.bf16 %v4830_v14 }
 0x3aa   :  { %v7604_v25 = vsel %vm8759_vm0, %v2628_v20, %v4831_v39  ;;  %v7607_v32 = vsel %vm8760_vm1, %v2629_v46, %v4832_v56  ;;  %vm8767_vm1 = vnez %v8766_v21  ;;  %v8776_v46 = vld [vmem:[#allocation58_spill] sm:$0xff]  ;;  %v8799_v21 = vld [vmem:[#allocation53_spill] sm:$0xff] }
 0x3ab   :  { %v4840_v51 = vpop.permute.xlu1 %4839  ;;  %v2633_v14 = vsel %vm8767_vm1, %v8765_v49, 0.0 }
 0x3ac   :  { %v4842_v48 = vunpack.i.h.bf16 %v4840_v51  ;;  %v4841_v26 = vunpack.i.l.bf16 %v4840_v51 }
 0x3ae   :  { %v7618_v60 = vsel %vm8763_vm13, %v2630_v17, %v4841_v26  ;;  %v7621_v35 = vsel %vm8759_vm0, %v2631_v5, %v4842_v48  ;;  %vm8769_vm13 = vmmov %vm8759_vm0  ;;  %v8770_v26 = vld [vmem:[#allocation17_spill] sm:$0xff]  ;;  %v8771_v5 = vld [vmem:[#allocation19_spill] sm:$0xff] }
 0x3af   :  { %v4850_v63 = vpop.permute.xlu1 %4849  ;;  %v2634_v17 = vsel %vm5942_vm2, %v8770_v26, 0.0  ;;  %v2635_v34 = vsel %vm5965_vm3, %v8771_v5, 0.0  ;;  %vm8781_vm3 = vcmask 523264  }
 0x3b0   :  { %v4852_v16 = vunpack.i.h.bf16 %v4850_v63  ;;  %v4851_v2 = vunpack.i.l.bf16 %v4850_v63  ;;  %vm8782_vm1 = vmmov %vm8781_vm3 }
 0x3b1   :  { %vm8803_vm8 = vmmov %vm8782_vm1 }
 0x3b2   :  { %v7632_v56 = vsel %vm8768_vm11, %v2632_v54, %v4851_v2  ;;  %v7635_v39 = vsel %vm8769_vm13, %v2633_v14, %v4852_v16  ;;  %vm8773_vm11 = vmmov %vm8759_vm0  ;;  %v8774_v14 = vld [vmem:[#allocation62_spill] sm:$0xff]  ;;  %vm8775_vm13 = vcmp.lt.s32.totalorder %v5590_v8, 1 }
 0x3b3   :  { %v4860_v20 = vpop.permute.xlu1 %4859  ;;  %vm8777_vm2 = vmmov %vm8775_vm13  ;;  %v8835_v0 = vpack.c.bf16 %v7635_v39, %v7632_v56  ;;  %v8840_v39 = vld [vmem:[#allocation42_spill] sm:$0xff] }
 0x3b4   :  { %v4862_v51 = vunpack.i.h.bf16 %v4860_v20  ;;  %v4861_v48 = vunpack.i.l.bf16 %v4860_v20  ;;  %v2618_v20 = vsel %vm8775_vm13, %v8478_v6, %v8774_v14  ;;  %v2619_v55 = vsel %vm8777_vm2, %v8776_v46, %v8478_v6 }
 0x3b5   :  { %vm8784_vm2 = vnez %v8420_v12  ;;  %vm8785_vm13 = vcmp.lt.s32.totalorder %v5590_v8, 7 }
 0x3b6   :  { %v7646_v2 = vsel %vm8759_vm0, %v2634_v17, %v4861_v48  ;;  %v7649_v16 = vsel %vm8773_vm11, %v2635_v34, %v4862_v51  ;;  %vm8778_vm0 = vnez %v8398_v40  ;;  %v8779_v51 = vld [vmem:[#allocation45_spill] sm:$0xff]  ;;  %v8791_v40 = vld [vmem:[#allocation56_spill] sm:$0xff] }
 0x3b7   :  { %v2636_v34 = vsel %vm8778_vm0, %v2619_v55, 0.0  ;;  %vm8780_vm11 = vnez %v8779_v51  ;;  %v2674_v55 = vsel %vm8785_vm13, %v8739_v47, %v7154_v24  ;;  %vm8792_vm13 = vnez %v8681_v30 }
 0x3b8   :  { %v2637_v17 = vsel %vm8780_vm11, %v2618_v20, 0.0  ;;  %v8786_v20 = vld [vmem:[#allocation66_spill] sm:$0xff]  ;;  %vm8790_vm11 = vmmov %vm8782_vm1  ;;  %v2677_v24 = vsel %vm8792_vm13, %v8791_v40, 0.0  ;;  %vm8800_vm0 = vnez %v8799_v21 }
 0x3b9   :  { %vm8801_vm13 = vmmov %vm8782_vm1 }
 0x3c8   :  { %v4870_v15 = vpop.permute.xlu1 %4869 }
 0x3c9   :  { %v4872_v41 = vunpack.i.h.bf16 %v4870_v15  ;;  %v4871_v48 = vunpack.i.l.bf16 %v4870_v15  ;;  %v2638_v15 = vsel %vm8784_vm2, %v8783_v37, 0.0  ;;  %vm8794_vm2 = vmmov %vm8782_vm1  ;;  %v2641_v37 = vsel %vm8800_vm0, %v8798_v28, 0.0 }
 0x3cb   :  { %v7666_v54 = vsel %vm8781_vm3, %v2636_v34, %v4871_v48  ;;  %v7669_v18 = vsel %vm8782_vm1, %v2637_v17, %v4872_v41  ;;  %v8787_v48 = vld [vmem:[#allocation48_spill] sm:$0xff] }
 0x3cc   :  { %v4880_v14 = vpop.permute.xlu1 %4879  ;;  %vm8788_vm3 = vnez %v8787_v48 }
 0x3cd   :  { %v4882_v46 = vunpack.i.h.bf16 %v4880_v14  ;;  %v4881_v52 = vunpack.i.l.bf16 %v4880_v14  ;;  %v2639_v41 = vsel %vm8788_vm3, %v8786_v20, 0.0  ;;  %vm8793_vm3 = vnez %v8679_v59 }
 0x3ce   :  { %v2676_v20 = vsel %vm8793_vm3, %v2674_v55, 0.0  ;;  %vm8809_vm3 = vmmov %vm8782_vm1 }
 0x3cf   :  { %v4825_v34 = vpop.permute.xlu0 %4824  ;;  %v7684_v17 = vsel %vm8782_vm1, %v2638_v15, %v4881_v52  ;;  %v7687_v44 = vsel %vm8790_vm11, %v2639_v41, %v4882_v46  ;;  %v8795_v15 = vld [vmem:[#allocation27_spill] sm:$0xff]  ;;  %v8796_v41 = vld [vmem:[#allocation52_spill] sm:$0xff] }
 0x3d0   :  { %8789 = vst [vmem:[#allocation54_spill] sm:$0xff] %v7684_v17  ;;  %v4827_v14 = vunpack.i.h.bf16 %v4825_v34  ;;  %v4826_v51 = vunpack.i.l.bf16 %v4825_v34  ;;  %v4890_v12 = vpop.permute.xlu1 %4889  ;;  %vm8797_vm11 = vnez %v8796_v41  ;;  %v8813_v41 = vld [vmem:[#allocation36_spill] sm:$0xff] }
 0x3d1   :  { %v4892_v63 = vunpack.i.h.bf16 %v4890_v12  ;;  %v4891_v48 = vunpack.i.l.bf16 %v4890_v12  ;;  %v2640_v34 = vsel %vm8797_vm11, %v8795_v15, 0.0  ;;  %vm8814_vm0 = vnez %v8813_v41 }
 0x3d2   :  { %v3172_v52 = vsel %vm8782_vm1, %v2676_v20, %v4826_v51  ;;  %v3173_v46 = vsel %vm8794_vm2, %v2677_v24, %v4827_v14  ;;  %v5026_v20 = vld [vmem:[%s8089_s7 + $0x108] sm:$0xff]   ;;  %v8810_v14 = vld [vmem:[#allocation69_spill] sm:$0xff] }
 0x3d3   :  { %v4835_v17 = vpop.permute.xlu0 %4834  ;;  %v3293_v30 = vpack.c.bf16 %v3173_v46, %v3172_v52  ;;  %v7705_v40 = vsel %vm8801_vm13, %v2640_v34, %v4891_v48  ;;  %v7708_v12 = vsel %vm8803_vm8, %v2641_v37, %v4892_v63  ;;  %v8804_v52 = vld [vmem:[#allocation22_spill] sm:$0xff]  ;;  %v8806_v63 = vld [vmem:[#allocation23_spill] sm:$0xff]  ;;  %vm8811_vm13 = vnez %v8728_v57 }
 0x3d4   :  { %8802 = vst [vmem:[#allocation55_spill] sm:$0xff] %v7705_v40  ;;  %v4837_v59 = vunpack.i.h.bf16 %v4835_v17  ;;  %v4836_v51 = vunpack.i.l.bf16 %v4835_v17  ;;  %v4895_v55 = vpop.permute.xlu1 %4894  ;;  %vm8805_vm2 = vnez %v8804_v52  ;;  %vm8807_vm8 = vnez %v8806_v63  ;;  %v8815_v52 = vld [vmem:[#allocation12_spill] sm:$0xff] }
 0x3d5   :  { %3604 = vmatprep.mubr.bf16.mxu1 %v3293_v30  ;;  %v4897_v24 = vunpack.i.h.bf16 %v4895_v55  ;;  %v4896_v21 = vunpack.i.l.bf16 %v4895_v55  ;;  %v2678_v48 = vsel %vm8805_vm2, %v7208_v33, 0.0  ;;  %v2679_v37 = vsel %vm8807_vm8, %v7279_v3, 0.0  ;;  %v8812_v55 = vld [vmem:[#allocation39_spill] sm:$0xff]  ;;  %vm8816_vm2 = vmmov %vm8782_vm1 }
 0x3d6   :  { %v8808_v17 = vpack.c.bf16 %v7607_v32, %v7604_v25  ;;  %v3174_v46 = vsel %vm8809_vm3, %v2678_v48, %v4836_v51  ;;  %v3175_v34 = vsel %vm8782_vm1, %v2679_v37, %v4837_v59  ;;  %v2642_v30 = vsel %vm8811_vm13, %v8810_v14, 0.0  ;;  %vm8818_vm8 = vmmov %vm8782_vm1  ;;  %v5035_v51 = vld [vmem:[%s8089_s7 + $0x110] sm:$0xff]  }
 0x3d7   :  { %v2643_v33 = vsel %vm8814_vm0, %v8812_v55, 0.0  ;;  %v4845_v63 = vpop.permute.xlu0 %4844  ;;  %v3298_v3 = vpack.c.bf16 %v3175_v34, %v3174_v46  ;;  %v7734_v40 = vsel %vm8816_vm2, %v2642_v30, %v4896_v21  ;;  %v8819_v37 = vld [vmem:[#allocation35_spill] sm:$0xff]  ;;  %v8820_v21 = vld [vmem:[#allocation24_spill] sm:$0xff]  ;;  %v8821_v46 = vld [vmem:[#allocation30_spill] sm:$0xff] }
 0x3d8   :  { %3605 = vmatmul.mubr.bf16.vlgmr.msra.gmra.mrb[16].mxu1 %v8808_v17  ;;  %8817 = vst [vmem:[#allocation32_spill] sm:$0xff] %v7734_v40  ;;  %v7737_v25 = vsel %vm8818_vm8, %v2643_v33, %v4897_v24  ;;  %v4847_v32 = vunpack.i.h.bf16 %v4845_v63  ;;  %v4846_v59 = vunpack.i.l.bf16 %v4845_v63  ;;  %v2680_v17 = vsel %vm8699_vm7, %v8819_v37, 0.0  ;;  %vm8823_vm2 = vmmov %vm8782_vm1  ;;  %v8824_v33 = vld [vmem:[#allocation61_spill] sm:$0xff]  ;;  %v4910_v50 = vpop.permute.xlu1 %4909 }
 0x3d9   :  { %4483 = vmatpush3.bf16.msra.mxu1 %v8815_v52  ;;  %3612 = vmatprep.mubr.bf16.mxu1 %v3298_v3  ;;  %vm8822_vm3 = vnez %v8821_v46  ;;  %vm8825_vm8 = vcmp.lt.s32.totalorder %v5590_v8, 7  ;;  %v8826_v37 = vpack.c.bf16 %v7621_v35, %v7618_v60  ;;  %vm8827_vm7 = vmmov %vm8782_vm1  ;;  %v7776_v60 = vld [vmem:[%s8091_s9] sm:$0xff]   ;;  %v8831_v35 = vld [vmem:[#allocation68_spill] sm:$0xff]  ;;  %v4912_v1 = vunpack.i.h.bf16 %v4910_v50 }
 0x3da   :  { %4484 = vmatprep.subr.bf16.mxu1 %v5026_v20  ;;  %v2681_v24 = vsel %vm8822_vm3, %v8820_v21, 0.0  ;;  %v3176_v34 = vsel %vm8782_vm1, %v2680_v17, %v4846_v59  ;;  %v2667_v52 = vsel %vm8825_vm8, %v8824_v33, %v8739_v47  ;;  %v2682_v59 = vsel %vm8724_vm6, %v7309_v29, 0.0  ;;  %vm8828_vm3 = vmmov %vm8782_vm1  ;;  %v8829_v21 = vld [vmem:[#allocation64_spill] sm:$0xff] }
 0x3db   :  { %v3177_v30 = vsel %vm8823_vm2, %v2681_v24, %v4847_v32  ;;  %v4855_v63 = vpop.permute.xlu0 %4854  ;;  %v2683_v32 = vsel %vm8715_vm4, %v2667_v52, 0.0  ;;  %vm8830_vm1 = vmmov %vm8825_vm8 }
 0x3dc   :  { %v3303_v48 = vpack.c.bf16 %v3177_v30, %v3176_v34  ;;  %v4857_v3 = vunpack.i.h.bf16 %v4855_v63  ;;  %v4856_v40 = vunpack.i.l.bf16 %v4855_v63  ;;  %v2666_v46 = vsel %vm8830_vm1, %v8739_v47, %v8829_v21  ;;  %vm8832_vm6 = vmmov %vm8823_vm2 }
 0x3dd   :  { %4485 = vmatpush3.bf16.msra.mxu1 %v5026_v20  ;;  %v2684_v34 = vsel %vm8717_vm9, %v2666_v46, 0.0  ;;  %vm8833_vm4 = vmmov %vm8823_vm2 }
 0x3de   :  { %4486 = vmatprep.subr.bf16.mxu1 %v5035_v51  ;;  %v3178_v20 = vsel %vm8827_vm7, %v2682_v59, %v4856_v40  ;;  %v3179_v17 = vsel %vm8828_vm3, %v2683_v32, %v4857_v3  ;;  %v2685_v40 = vsel %vm8719_vm15, %v8831_v35, 0.0  ;;  %v2686_v3 = vsel %vm8734_vm5, %v7382_v10, 0.0  ;;  %vm8836_vm9 = vmmov %vm8823_vm2 }
 0x3df   :  { %v4865_v24 = vpop.permute.xlu0 %4864  ;;  %v3308_v7 = vpack.c.bf16 %v3179_v17, %v3178_v20  ;;  %vm8834_vm15 = vnez %v8735_v9  ;;  %vm8837_vm5 = vnez %v8747_v45  ;;  %vm8838_vm8 = vmmov %vm8823_vm2 }
 0x3e0   :  { %3613 = vmatmul.mubr.bf16.gmra.mrb[20].mxu1 %v8826_v37  ;;  %v4867_v29 = vunpack.i.h.bf16 %v4865_v24  ;;  %v4866_v31 = vunpack.i.l.bf16 %v4865_v24  ;;  %v2687_v22 = vsel %vm8834_vm15, %v7455_v38, 0.0  ;;  %v2688_v10 = vsel %vm8837_vm5, %v7451_v13, 0.0  ;;  %vm8839_vm7 = vmmov %vm8823_vm2 }
 0x3e1   :  { %3620 = vmatprep.mubr.bf16.mxu1 %v3303_v48  ;;  %4487 = vmatpush3.bf16.msra.mxu1 %v5035_v51  ;;  %v2689_v38 = vsel %vm8743_vm12, %v7497_v27, 0.0  ;;  %vm8841_vm3 = vmmov %vm8830_vm1  ;;  %v4911_v27 = vunpack.i.l.bf16 %v4910_v50  ;;  %vm8842_vm12 = vnez %v8752_v36  ;;  %vm8843_vm1 = vnez %v8754_v61 }
 0x3e2   :  { %4488 = vmatprep.subr.bf16.mxu1 %v5036_v11  ;;  %v3180_v30 = vsel %vm8832_vm6, %v2684_v34, %v4866_v31  ;;  %v3181_v48 = vsel %vm8833_vm4, %v2685_v40, %v4867_v29  ;;  %v2675_v21 = vsel %vm8841_vm3, %v8840_v39, %v8739_v47  ;;  %v8844_v31 = vpack.c.bf16 %v7649_v16, %v7646_v2  ;;  %v8845_v47 = vld [vmem:[#allocation25_spill] sm:$0xff]  ;;  %vm8847_vm4 = vmmov %vm8823_vm2  ;;  %v8849_v2 = vld [vmem:[#allocation16_spill] sm:$0xff] }
 0x3e3   :  { %v4875_v51 = vpop.permute.xlu0 %4874  ;;  %v3313_v33 = vpack.c.bf16 %v3181_v48, %v3180_v30  ;;  %v2691_v29 = vsel %vm8843_vm1, %v2675_v21, 0.0  ;;  %vm8846_vm6 = vcmp.lt.s32.totalorder %v5590_v8, 1  ;;  %vm8848_vm15 = vmmov %vm8823_vm2  ;;  %v8851_v48 = vld [vmem:[#allocation13_spill] sm:$0xff]  ;;  %vm8852_vm5 = vnez %v8660_v58 }
 0x3e4   :  { %v4877_v52 = vunpack.i.h.bf16 %v4875_v51  ;;  %v4876_v63 = vunpack.i.l.bf16 %v4875_v51  ;;  %v2835_v35 = vsel %vm8846_vm6, %v8478_v6, %v8845_v47  ;;  %v3188_v51 = vsel %vm8823_vm2, %v8851_v48, %v4911_v27  ;;  %vm8857_vm3 = vmmov %vm8823_vm2 }
 0x3e5   :  { %4489 = vmatpush3.bf16.msra.mxu1 %v5036_v11  ;;  %v8856_v58 = vpack.c.bf16 %v7669_v18, %v7666_v54  ;;  %vm8860_vm14 = vmmov %vm8823_vm2  ;;  %vm8863_vm6 = vnez %v8764_v4  ;;  %v8864_v54 = vld [vmem:[#allocation33_spill] sm:$0xff] }
 0x3e6   :  { %4506 = vmatprep.subr.bf16.mxu1 %v7776_v60  ;;  %v3182_v59 = vsel %vm8836_vm9, %v2686_v3, %v4876_v63  ;;  %v3183_v11 = vsel %vm8823_vm2, %v2687_v22, %v4877_v52  ;;  %vm8850_vm9 = vmmov %vm8823_vm2  ;;  %v2836_v52 = vsel %vm8664_vm10, %v2835_v35, 0.0  ;;  %v2837_v63 = vsel %vm8852_vm5, %v7146_v53, 0.0  ;;  %v4920_v3 = vpop.permute.xlu1 %4919 }
 0x3e7   :  { %v4885_v32 = vpop.permute.xlu0 %4884  ;;  %v3318_v37 = vpack.c.bf16 %v3183_v11, %v3182_v59  ;;  %v3189_v16 = vsel %vm8850_vm9, %v8849_v2, %v4912_v1  ;;  %vm8855_vm10 = vnez %v8516_v42  ;;  %v8861_v42 = vld [vmem:[#allocation5_spill] sm:$0xff]  ;;  %vm8862_vm1 = vmmov %vm8823_vm2  ;;  %v2840_v18 = vsel %vm8863_vm6, %v8770_v26, 0.0 }
 0x3e8   :  { %3621 = vmatmul.mubr.bf16.gmra.mrb[24].mxu1 %v8835_v0  ;;  %v4887_v20 = vunpack.i.h.bf16 %v4885_v32  ;;  %v4886_v17 = vunpack.i.l.bf16 %v4885_v32  ;;  %v3294_v11 = vpack.c.bf16 %v3189_v16, %v3188_v51  ;;  %v2839_v53 = vsel %vm8855_vm10, %v8765_v49, 0.0  ;;  %vm8867_vm9 = vmmov %vm8862_vm1  ;;  %v8870_v26 = vld [vmem:[#allocation21_spill] sm:$0xff]  ;;  %v8875_v51 = vld [vmem:[#allocation54_spill] sm:$0xff] }
 0x3e9   :  { %3628 = vmatprep.mubr.bf16.mxu1 %v3308_v7  ;;  %v2690_v7 = vsel %vm8842_vm12, %v7491_v23, 0.0  ;;  %vm8858_vm12 = vmmov %vm8823_vm2  ;;  %v8873_v16 = vld [vmem:[#allocation41_spill] sm:$0xff] }
 0x3ea   :  { %v7804_v9 = vsel %vm8838_vm8, %v2688_v10, %v4886_v17  ;;  %v7807_v56 = vsel %vm8839_vm7, %v2689_v38, %v4887_v20  ;;  %vm8853_vm8 = vmmov %vm8823_vm2  ;;  %v4922_v17 = vunpack.i.h.bf16 %v4920_v3  ;;  %v4921_v10 = vunpack.i.l.bf16 %v4920_v3  ;;  %v4930_v1 = vpop.permute.xlu1 %4929 }
 0x3eb   :  { %v3323_v13 = vpack.c.bf16 %v7807_v56, %v7804_v9  ;;  %vm8854_vm7 = vmmov %vm8823_vm2  ;;  %vm8869_vm2 = vcmp.lt.s32.totalorder %v5590_v8, 1  ;;  %v4931_v2 = vunpack.i.l.bf16 %v4930_v1 }
 0x3ec   :  { %v4900_v46 = vpop.permute.xlu0 %4899  ;;  %v3190_v62 = vsel %vm8860_vm14, %v8859_v19, %v4921_v10  ;;  %v3191_v49 = vsel %vm8862_vm1, %v8861_v42, %v4922_v17  ;;  %vm8878_vm10 = vmmov %vm8862_vm1  ;;  %v8883_v17 = vld [vmem:[#allocation8_spill] sm:$0xff] }
 0x3ed   :  { %v4902_v45 = vunpack.i.h.bf16 %v4900_v46  ;;  %v4901_v24 = vunpack.i.l.bf16 %v4900_v46  ;;  %v3299_v4 = vpack.c.bf16 %v3191_v49, %v3190_v62  ;;  %vm8884_vm14 = vmmov %vm8862_vm1  ;;  %v8892_v49 = vld [vmem:[#allocation49_spill] sm:$0xff] }
 0x3ef   :  { %v7828_v40 = vsel %vm8847_vm4, %v2690_v7, %v4901_v24  ;;  %v7831_v34 = vsel %vm8848_vm15, %v2691_v29, %v4902_v45  ;;  %vm8865_vm4 = vnez %v8864_v54  ;;  %vm8866_vm15 = vmmov %vm8862_vm1  ;;  %v8868_v7 = vld [vmem:[#allocation59_spill] sm:$0xff]  ;;  %v8894_v54 = vld [vmem:[#allocation48_spill] sm:$0xff] }
 0x3f0   :  { %3629 = vmatmul.mubr.bf16.gmra.mrb[28].mxu1 %v8844_v31  ;;  %v4905_v36 = vpop.permute.xlu0 %4904  ;;  %v3328_v23 = vpack.c.bf16 %v7831_v34, %v7828_v40  ;;  %v2841_v24 = vsel %vm8865_vm4, %v8771_v5, 0.0  ;;  %v2828_v29 = vsel %vm8869_vm2, %v8868_v7, %v8478_v6  ;;  %v4932_v5 = vunpack.i.h.bf16 %v4930_v1  ;;  %v8896_v1 = vld [vmem:[#allocation55_spill] sm:$0xff] }
 0x3f1   :  { %3636 = vmatprep.mubr.bf16.mxu1 %v3313_v33  ;;  %v4907_v61 = vunpack.i.h.bf16 %v4905_v36  ;;  %v4906_v30 = vunpack.i.l.bf16 %v4905_v36 }
 0x3f2   :  { %v3193_v10 = vsel %vm8884_vm14, %v8883_v17, %v4932_v5  ;;  %v8909_v5 = vld [vmem:[#allocation11_spill] sm:$0xff] }
 0x3f3   :  { %v3204_v33 = vsel %vm8853_vm8, %v2836_v52, %v4906_v30  ;;  %v3205_v22 = vsel %vm8854_vm7, %v2837_v63, %v4907_v61  ;;  %v8871_v61 = vld [vmem:[#allocation40_spill] sm:$0xff]  ;;  %vm8874_vm8 = vnez %v8873_v16  ;;  %v8876_v52 = vpack.c.bf16 %v7687_v44, %v8875_v51  ;;  %vm8877_vm7 = vmmov %vm8862_vm1 }
 0x3f4   :  { %v4915_v0 = vpop.permute.xlu0 %4914  ;;  %v3295_v59 = vpack.c.bf16 %v3205_v22, %v3204_v33  ;;  %vm8872_vm5 = vnez %v8871_v61  ;;  %v2843_v48 = vsel %vm8874_vm8, %v2828_v29, 0.0  ;;  %v8879_v33 = vld [vmem:[#allocation63_spill] sm:$0xff]  ;;  %vm8890_vm4 = vmmov %vm8877_vm7  ;;  %v8905_v61 = vld [vmem:[#allocation53_spill] sm:$0xff] }
 0x3f5   :  { %v4917_v32 = vunpack.i.h.bf16 %v4915_v0  ;;  %v4916_v20 = vunpack.i.l.bf16 %v4915_v0  ;;  %v2842_v30 = vsel %vm8872_vm5, %v8870_v26, 0.0  ;;  %vm8898_vm5 = vmmov %vm8890_vm4  ;;  %v2848_v26 = vsel %vm8797_vm11, %v8810_v14, 0.0  ;;  %v8911_v14 = vld [vmem:[#allocation43_spill] sm:$0xff] }
 0x3f6   :  { %3701 = vmatprep.mubr.bf16.mxu0 %v3295_v59  ;;  %vm8899_vm8 = vmmov %vm8890_vm4 }
 0x3f7   :  { %3702 = vmatmul.mubr.bf16.vlgmr.msra.gmra.mrb[32].mxu0 %v3294_v11  ;;  %v3206_v38 = vsel %vm8857_vm3, %v2838_v43, %v4916_v20  ;;  %v3207_v50 = vsel %vm8858_vm12, %v2839_v53, %v4917_v32  ;;  %vm8880_vm3 = vmmov %vm8869_vm2  ;;  %v8881_v32 = vld [vmem:[#allocation31_spill] sm:$0xff]  ;;  %v8885_v43 = vld [vmem:[#allocation44_spill] sm:$0xff]  ;;  %vm8895_vm2 = vnez %v8894_v54 }
 0x3f8   :  { %3637 = vmatmul.mubr.bf16.gmra.mrb[32].mxu1 %v8856_v58  ;;  %v4925_v39 = vpop.permute.xlu0 %4924  ;;  %v3300_v21 = vpack.c.bf16 %v3207_v50, %v3206_v38  ;;  %v2827_v22 = vsel %vm8880_vm3, %v8478_v6, %v8879_v33  ;;  %vm8882_vm12 = vmmov %vm8862_vm1  ;;  %vm8886_vm1 = vnez %v8885_v43  ;;  %v8887_v58 = vld [vmem:[#allocation66_spill] sm:$0xff]  ;;  %v8888_v38 = vld [vmem:[#allocation45_spill] sm:$0xff]  ;;  %vm8906_vm3 = vnez %v8905_v61 }
 0x3f9   :  { %3644 = vmatprep.mubr.bf16.mxu1 %v3318_v37  ;;  %v4927_v46 = vunpack.i.h.bf16 %v4925_v39  ;;  %v4926_v45 = vunpack.i.l.bf16 %v4925_v39  ;;  %v3192_v20 = vsel %vm8882_vm12, %v8881_v32, %v4931_v2  ;;  %v2844_v53 = vsel %vm8886_vm1, %v2827_v22, 0.0  ;;  %v4940_v39 = vpop.permute.xlu1 %4939  ;;  %vm8907_vm12 = vmmov %vm8890_vm4  ;;  %v5195_v61 = vld [vmem:[%s8082_s0 + $0x20] sm:$0xff]  }
 0x3fa   :  { %3709 = vmatprep.mubr.bf16.mxu0 %v3300_v21  ;;  %vm8889_vm6 = vnez %v8888_v38  ;;  %v3304_v19 = vpack.c.bf16 %v3193_v10, %v3192_v20  ;;  %v4942_v62 = vunpack.i.h.bf16 %v4940_v39  ;;  %v4941_v42 = vunpack.i.l.bf16 %v4940_v39  ;;  %vm8908_vm14 = vmmov %vm8890_vm4  ;;  %v8919_v20 = vld [vmem:[#allocation9_spill] sm:$0xff]  ;;  %v8923_v38 = vld [vmem:[#allocation20_spill] sm:$0xff] }
 0x3fb   :  { %v3208_v37 = vsel %vm8866_vm15, %v2840_v18, %v4926_v45  ;;  %v3209_v27 = vsel %vm8867_vm9, %v2841_v24, %v4927_v46  ;;  %v2845_v50 = vsel %vm8889_vm6, %v8887_v58, 0.0  ;;  %vm8891_vm15 = vmmov %vm8890_vm4  ;;  %vm8893_vm9 = vnez %v8892_v49  ;;  %v8921_v58 = vld [vmem:[#allocation26_spill] sm:$0xff]  ;;  %v8935_v49 = vld [vmem:[#allocation57_spill] sm:$0xff] }
 0x3fc   :  { %v4935_v31 = vpop.permute.xlu0 %4934  ;;  %v3305_v47 = vpack.c.bf16 %v3209_v27, %v3208_v37  ;;  %v2846_v18 = vsel %vm8893_vm9, %v8795_v15, 0.0  ;;  %v2847_v24 = vsel %vm8895_vm2, %v8798_v28, 0.0  ;;  %v8897_v37 = vpack.c.bf16 %v7708_v12, %v8896_v1  ;;  %vm8914_vm11 = vmmov %vm8890_vm4 }
 0x3fd   :  { %v4937_v35 = vunpack.i.h.bf16 %v4935_v31  ;;  %v4936_v36 = vunpack.i.l.bf16 %v4935_v31  ;;  %v4950_v40 = vpop.permute.xlu1 %4949  ;;  %vm8910_vm1 = vcmp.lt.s32.totalorder %v5590_v8, 1  ;;  %vm8915_vm6 = vmmov %vm8890_vm4 }
 0x3fe   :  { %v2820_v2 = vsel %vm8910_vm1, %v8909_v5, %v8478_v6  ;;  %v4951_v33 = vunpack.i.l.bf16 %v4950_v40 }
 0x3ff   :  { %3710 = vmatmul.mubr.bf16.gmra.mrb[36].mxu0 %v3299_v4  ;;  %v3210_v63 = vsel %vm8877_vm7, %v2842_v30, %v4936_v36  ;;  %v3211_v3 = vsel %vm8878_vm10, %v2843_v48, %v4937_v35  ;;  %v8900_v35 = vld [vmem:[#allocation6_spill] sm:$0xff]  ;;  %vm8901_vm7 = vmmov %vm8890_vm4  ;;  %v8902_v36 = vld [vmem:[#allocation15_spill] sm:$0xff]  ;;  %v2849_v30 = vsel %vm8906_vm3, %v8812_v55, 0.0  ;;  %v4952_v55 = vunpack.i.h.bf16 %v4950_v40 }
 0x400   :  { %3645 = vmatmul.mubr.bf16.gmra.mrb[36].mxu1 %v8876_v52  ;;  %v4945_v0 = vpop.permute.xlu0 %4944  ;;  %3717 = vmatprep.mubr.bf16.mxu0 %v3305_v47  ;;  %v3310_v59 = vpack.c.bf16 %v3211_v3, %v3210_v63  ;;  %v3194_v28 = vsel %vm8901_vm7, %v8900_v35, %v4941_v42  ;;  %vm8903_vm10 = vmmov %vm8890_vm4  ;;  %v2850_v3 = vsel %vm8811_vm13, %v8911_v14, 0.0  ;;  %v2851_v22 = vsel %vm8814_vm0, %v2820_v2, 0.0  ;;  %v5191_v35 = vld [vmem:[%s8082_s0] sm:$0xff]   ;;  %v5193_v4 = vld [vmem:[%s8082_s0 + $0x10] sm:$0xff]  }
 0x401   :  { %3652 = vmatprep.mubr.bf16.mxu1 %v3323_v13  ;;  %v4947_v11 = vunpack.i.h.bf16 %v4945_v0  ;;  %v4946_v44 = vunpack.i.l.bf16 %v4945_v0  ;;  %v3195_v12 = vsel %vm8903_vm10, %v8902_v36, %v4942_v62  ;;  %v8912_v0 = vld [vmem:[#allocation32_spill] sm:$0xff]  ;;  %vm8918_vm13 = vmmov %vm8890_vm4  ;;  %v4960_v17 = vpop.permute.xlu1 %4959  ;;  %v8933_v62 = vld [vmem:[#allocation34_spill] sm:$0xff] }
 0x402   :  { %v3309_v63 = vpack.c.bf16 %v3195_v12, %v3194_v28  ;;  %v4962_v43 = vunpack.i.h.bf16 %v4960_v17  ;;  %vm8922_vm0 = vmmov %vm8890_vm4  ;;  %v8945_v36 = vld [vmem:[#allocation50_spill] sm:$0xff]  ;;  %v5197_v40 = vld [vmem:[%s8082_s0 + $0x30] sm:$0xff]  }
 0x403   :  { %v3212_v9 = vsel %vm8890_vm4, %v2844_v53, %v4946_v44  ;;  %v3213_v56 = vsel %vm8891_vm15, %v2845_v50, %v4947_v11  ;;  %v8916_v11 = vld [vmem:[#allocation38_spill] sm:$0xff]  ;;  %vm8920_vm15 = vmmov %vm8890_vm4  ;;  %v4961_v53 = vunpack.i.l.bf16 %v4960_v17  ;;  %v8925_v50 = vld [vmem:[#allocation29_spill] sm:$0xff] }
 0x404   :  { %v4955_v13 = vpop.permute.xlu0 %4954  ;;  %v3315_v21 = vpack.c.bf16 %v3213_v56, %v3212_v9  ;;  %v8917_v44 = vld [vmem:[#allocation10_spill] sm:$0xff]  ;;  %v3197_v41 = vsel %vm8920_vm15, %v8919_v20, %v4952_v55  ;;  %vm8924_vm9 = vmmov %vm8922_vm0  ;;  %v8927_v9 = vld [vmem:[#allocation37_spill] sm:$0xff] }
 0x405   :  { %v4957_v46 = vunpack.i.h.bf16 %v4955_v13  ;;  %v4956_v45 = vunpack.i.l.bf16 %v4955_v13  ;;  %v3196_v32 = vsel %vm8918_vm13, %v8917_v44, %v4951_v33  ;;  %vm8926_vm2 = vmmov %vm8922_vm0  ;;  %v4970_v13 = vpop.permute.xlu1 %4969  ;;  %v5192_v12 = vld [vmem:[%s8082_s0 + $0x8] sm:$0xff]  }
 0x406   :  { %v3314_v10 = vpack.c.bf16 %v3197_v41, %v3196_v32  ;;  %v3198_v39 = vsel %vm8926_vm2, %v8925_v50, %v4961_v53  ;;  %vm8932_vm7 = vmmov %vm8922_vm0 }
 0x407   :  { %3718 = vmatmul.mubr.bf16.gmra.mrb[40].mxu0 %v3304_v19  ;;  %v3214_v27 = vsel %vm8898_vm5, %v2846_v18, %v4956_v45  ;;  %v3215_v7 = vsel %vm8899_vm8, %v2847_v24, %v4957_v46  ;;  %vm8928_vm5 = vmmov %vm8922_vm0  ;;  %v4972_v46 = vunpack.i.h.bf16 %v4970_v13  ;;  %v4971_v45 = vunpack.i.l.bf16 %v4970_v13  ;;  %v8929_v19 = vld [vmem:[#allocation46_spill] sm:$0xff] }
 0x408   :  { %3653 = vmatmul.mubr.bf16.gmra.mrb[40].mxu1 %v8897_v37  ;;  %v4965_v29 = vpop.permute.xlu0 %4964  ;;  %3725 = vmatprep.mubr.bf16.mxu0 %v3310_v59  ;;  %v3320_v15 = vpack.c.bf16 %v3215_v7, %v3214_v27  ;;  %v8913_v59 = vpack.c.bf16 %v7737_v25, %v8912_v0  ;;  %v5038_v25 = vld [vmem:[%s8091_s9 + $0x8] sm:$0xff]   ;;  %v3199_v56 = vsel %vm8928_vm5, %v8927_v9, %v4962_v43  ;;  %vm8930_vm8 = vmmov %vm8922_vm0  ;;  %v8939_v7 = vld [vmem:[#allocation51_spill] sm:$0xff] }
 0x409   :  { %3660 = vmatprep.mubr.bf16.mxu1 %v3328_v23  ;;  %v4967_v31 = vunpack.i.h.bf16 %v4965_v29  ;;  %v4966_v47 = vunpack.i.l.bf16 %v4965_v29  ;;  %vm8934_vm10 = vmmov %vm8922_vm0  ;;  %v4980_v54 = vpop.permute.xlu1 %4979  ;;  %v8937_v27 = vld [vmem:[#allocation14_spill] sm:$0xff]  ;;  %v8941_v29 = vld [vmem:[#allocation60_spill] sm:$0xff] }
 0x40a   :  { %v3200_v42 = vsel %vm8934_vm10, %v8933_v62, %v4971_v45  ;;  %vm8936_vm3 = vmmov %vm8922_vm0  ;;  %v4982_v1 = vunpack.i.h.bf16 %v4980_v54  ;;  %v4981_v37 = vunpack.i.l.bf16 %v4980_v54 }
 0x40b   :  { %v3216_v34 = vsel %vm8907_vm12, %v2848_v26, %v4966_v47  ;;  %v3217_v23 = vsel %vm8908_vm14, %v2849_v30, %v4967_v31  ;;  %v3201_v18 = vsel %vm8936_vm3, %v8935_v49, %v4972_v46  ;;  %vm8938_vm12 = vmmov %vm8922_vm0  ;;  %v8943_v31 = vld [vmem:[#allocation28_spill] sm:$0xff]  ;;  %v5196_v30 = vld [vmem:[%s8082_s0 + $0x28] sm:$0xff]  }
 0x40c   :  { %v4975_v16 = vpop.permute.xlu0 %4974  ;;  %v3325_v48 = vpack.c.bf16 %v3217_v23, %v3216_v34  ;;  %v3324_v24 = vpack.c.bf16 %v3201_v18, %v3200_v42  ;;  %vm8940_vm14 = vmmov %vm8922_vm0  ;;  %v5194_v26 = vld [vmem:[%s8082_s0 + $0x18] sm:$0xff]  }
 0x40d   :  { %v4977_v51 = vunpack.i.h.bf16 %v4975_v16  ;;  %v4976_v52 = vunpack.i.l.bf16 %v4975_v16  ;;  %vm8942_vm1 = vmmov %vm8922_vm0  ;;  %v5198_v34 = vld [vmem:[%s8082_s0 + $0x38] sm:$0xff]  }
 0x40e   :  { %vm8956_vm10 = vmmov %vm8942_vm1 }
 0x40f   :  { %3726 = vmatmul.mubr.bf16.gmra.mrb[44].mxu0 %v3309_v63  ;;  %v3218_v8 = vsel %vm8914_vm11, %v2850_v3, %v4976_v52  ;;  %v3219_v6 = vsel %vm8915_vm6, %v2851_v22, %v4977_v51  ;;  %vm8944_vm11 = vmmov %vm8922_vm0 }
 0x410   :  { %3661 = vmatmul.mubr.bf16.gmra.mrb[44].mxu1 %v8913_v59  ;;  %3733 = vmatprep.mubr.bf16.mxu0 %v3315_v21  ;;  %v3330_v57 = vpack.c.bf16 %v3219_v6, %v3218_v8  ;;  %v3319_v21 = vpack.c.bf16 %v3199_v56, %v3198_v39  ;;  %v3203_v47 = vsel %vm8944_vm11, %v8943_v31, %v4982_v1  ;;  %vm8946_vm6 = vmmov %vm8922_vm0 }
 0x411   :  { %4490 = vmatprep.mubr.msk.bf16.mxu1 %vm8890_vm4, %v8916_v11  ;;  %vm8947_vm4 = vcmask 261120   ;;  %vm8957_vm3 = vmmov %vm8942_vm1 }
 0x412   :  { %vm8948_vm13 = vmmov %vm8947_vm4 }
 0x413   :  { %vm8949_vm15 = vmmov %vm8947_vm4 }
 0x414   :  { %vm8960_vm11 = vmmov %vm8942_vm1 }
 0x417   :  { %3734 = vmatmul.mubr.bf16.gmra.mrb[48].mxu0 %v3314_v10 }
 0x418   :  { %4491 = vmatmul.mubr.msk.bf16.vlgmr.msra.gmra.mrb[48].mxu1 %vm8922_vm0, %v8921_v58  ;;  %3741 = vmatprep.mubr.bf16.mxu0 %v3320_v15  ;;  %v3202_v15 = vsel %vm8942_vm1, %v8941_v29, %v4981_v37  ;;  %vm8950_vm0 = vmmov %vm8947_vm4 }
 0x419   :  { %4507 = vmatpush3.bf16.msra.mxu1 %v7776_v60  ;;  %4494 = vmatprep.mubr.msk.bf16.mxu1 %vm8924_vm9, %v8923_v38  ;;  %v8931_v60 = vld [vmem:[#allocation47_spill] sm:$0xff]  ;;  %v3329_v28 = vpack.c.bf16 %v3203_v47, %v3202_v15  ;;  %vm8951_vm9 = vmmov %vm8950_vm0 }
 0x41a   :  { %4508 = vmatprep.subr.bf16.mxu1 %v5038_v25  ;;  %vm8952_vm2 = vmmov %vm8950_vm0 }
 0x41b   :  { %vm8953_vm5 = vmmov %vm8950_vm0 }
 0x41d   :  { %4509 = vmatpush3.bf16.msra.mxu1 %v5038_v25 }
 0x41f   :  { %3742 = vmatmul.mubr.bf16.gmra.mrb[52].mxu0 %v3319_v21 }
 0x420   :  { %4495 = vmatmul.mubr.msk.bf16.gmra.mrb[52].mxu1 %vm8930_vm8, %v8929_v19  ;;  %3749 = vmatprep.mubr.bf16.mxu0 %v3325_v48  ;;  %vm8954_vm8 = vmmov %vm8950_vm0 }
 0x421   :  { %4498 = vmatprep.mubr.msk.bf16.mxu1 %vm8932_vm7, %v8931_v60  ;;  %vm8955_vm7 = vmmov %vm8942_vm1 }
 0x427   :  { %3750 = vmatmul.mubr.bf16.gmra.mrb[56].mxu0 %v3324_v24 }
 0x428   :  { %4499 = vmatmul.mubr.msk.bf16.gmra.mrb[56].mxu1 %vm8938_vm12, %v8937_v27  ;;  %3757 = vmatprep.mubr.bf16.mxu0 %v3330_v57  ;;  %vm8958_vm12 = vmmov %vm8942_vm1 }
 0x429   :  { %4502 = vmatprep.mubr.msk.bf16.mxu1 %vm8940_vm14, %v8939_v7  ;;  %vm8959_vm14 = vmmov %vm8942_vm1 }
 0x42f   :  { %3758 = vmatmul.mubr.bf16.gmra.mrb[60].mxu0 %v3329_v28 }
 0x430   :  { %4503 = vmatmul.mubr.msk.bf16.gmra.mrb[60].mxu1 %vm8946_vm6, %v8945_v36  ;;  %vm8961_vm6 = vmmov %vm8942_vm1 }
 0x431   :  { %4510 = vmatprep.mubr.msk.bf16.mxu1 %vm8947_vm4, %v5191_v35  ;;  %vm8962_vm4 = vmmov %vm8942_vm1 }
 0x438   :  { %4511 = vmatmul.mubr.msk.bf16.vlgmr.msra.gmra.mrb[48].mxu1 %vm8948_vm13, %v5192_v12  ;;  %vm8963_vm13 = vmmov %vm8942_vm1 }
 0x439   :  { %4514 = vmatprep.mubr.msk.bf16.mxu1 %vm8949_vm15, %v5193_v4  ;;  %vm8964_vm15 = vmmov %vm8942_vm1 }
 0x440   :  { %4515 = vmatmul.mubr.msk.bf16.gmra.mrb[52].mxu1 %vm8950_vm0, %v5194_v26  ;;  %vm8965_vm0 = vmmov %vm8942_vm1 }
 0x441   :  { %4518 = vmatprep.mubr.msk.bf16.mxu1 %vm8951_vm9, %v5195_v61  ;;  %vm8966_vm9 = vmmov %vm8965_vm0 }
 0x448   :  { %4519 = vmatmul.mubr.msk.bf16.gmra.mrb[56].mxu1 %vm8952_vm2, %v5196_v30  ;;  %vm8967_vm2 = vmmov %vm8965_vm0 }
 0x449   :  { %4522 = vmatprep.mubr.msk.bf16.mxu1 %vm8953_vm5, %v5197_v40  ;;  %vm8968_vm5 = vmmov %vm8965_vm0 }
 0x450   :  { %4523 = vmatmul.mubr.msk.bf16.gmra.mrb[60].mxu1 %vm8954_vm8, %v5198_v34  ;;  %vm8969_vm8 = vmmov %vm8965_vm0 }
 0x4ab   :  { %v4328_v23 = vpop.f32.mrb[16].mxu1 }
 0x4ac   :  { %v4329_v5 = vpop.f32.mrb[17].mxu1 }
 0x4ad   :  { %v4330_v2 = vadd.f32 %v4329_v5, %v4328_v23  ;;  %v4331_v16 = vpop.f32.mrb[18].mxu1 }
 0x4ae   :  { %v4332_v48 = vpop.f32.mrb[19].mxu1 }
 0x4af   :  { %v4333_v51 = vadd.f32 %v4332_v48, %v4331_v16 }
 0x4b3   :  { %v4334_v52 = vpop.f32.mrb[20].mxu1 }
 0x4b4   :  { %v4335_v63 = vpop.f32.mrb[21].mxu1 }
 0x4b5   :  { %v4336_v14 = vadd.f32 %v4335_v63, %v4334_v52  ;;  %v4337_v3 = vpop.f32.mrb[22].mxu1 }
 0x4b6   :  { %v4338_v55 = vpop.f32.mrb[23].mxu1 }
 0x4b7   :  { %v4339_v33 = vadd.f32 %v4338_v55, %v4337_v3 }
 0x4bb   :  { %v4340_v22 = vpop.f32.mrb[24].mxu1 }
 0x4bc   :  { %v4341_v0 = vpop.f32.mrb[25].mxu1 }
 0x4bd   :  { %v4342_v59 = vadd.f32 %v4341_v0, %v4340_v22  ;;  %v4343_v8 = vpop.f32.mrb[26].mxu1 }
 0x4be   :  { %v4344_v6 = vpop.f32.mrb[27].mxu1 }
 0x4bf   :  { %v4345_v11 = vadd.f32 %v4344_v6, %v4343_v8 }
 0x4c3   :  { %v4346_v57 = vpop.f32.mrb[28].mxu1 }
 0x4c4   :  { %v4347_v44 = vpop.f32.mrb[29].mxu1 }
 0x4c5   :  { %v4348_v32 = vadd.f32 %v4347_v44, %v4346_v57  ;;  %v4349_v20 = vpop.f32.mrb[30].mxu1 }
 0x4c6   :  { %v4350_v41 = vpop.f32.mrb[31].mxu1 }
 0x4c7   :  { %v4351_v17 = vadd.f32 %v4350_v41, %v4349_v20 }
 0x4ca   :  { %v4392_v25 = vpop.f32.mrb[32].mxu0 }
 0x4cb   :  { %v4352_v10 = vpop.f32.mrb[32].mxu1  ;;  %v4393_v53 = vpop.f32.mrb[33].mxu0 }
 0x4cc   :  { %v4353_v43 = vpop.f32.mrb[33].mxu1  ;;  %v4394_v38 = vadd.f32 %v4393_v53, %v4392_v25  ;;  %v4395_v39 = vpop.f32.mrb[34].mxu0 }
 0x4cd   :  { %v4354_v58 = vadd.f32 %v4353_v43, %v4352_v10  ;;  %v4355_v50 = vpop.f32.mrb[34].mxu1  ;;  %v4396_v56 = vpop.f32.mrb[35].mxu0 }
 0x4ce   :  { %v4356_v9 = vpop.f32.mrb[35].mxu1  ;;  %v4397_v21 = vadd.f32 %v4396_v56, %v4395_v39  ;;  %v8009_v46 = vadd.f32 %v4394_v38, %v4330_v2 }
 0x4cf   :  { %v4357_v13 = vadd.f32 %v4356_v9, %v4355_v50 }
 0x4d0   :  { %v8011_v45 = vadd.f32 %v4397_v21, %v4333_v51 }
 0x4d2   :  { %v4398_v60 = vpop.f32.mrb[36].mxu0 }
 0x4d3   :  { %v4358_v19 = vpop.f32.mrb[36].mxu1  ;;  %v4399_v42 = vpop.f32.mrb[37].mxu0 }
 0x4d4   :  { %v4359_v62 = vpop.f32.mrb[37].mxu1  ;;  %v4400_v18 = vadd.f32 %v4399_v42, %v4398_v60  ;;  %v4401_v24 = vpop.f32.mrb[38].mxu0 }
 0x4d5   :  { %v4360_v49 = vadd.f32 %v4359_v62, %v4358_v19  ;;  %v4361_v54 = vpop.f32.mrb[38].mxu1  ;;  %v4402_v37 = vpop.f32.mrb[39].mxu0 }
 0x4d6   :  { %v4362_v1 = vpop.f32.mrb[39].mxu1  ;;  %v4403_v7 = vadd.f32 %v4402_v37, %v4401_v24  ;;  %v8013_v29 = vadd.f32 %v4400_v18, %v4336_v14 }
 0x4d7   :  { %v4363_v27 = vadd.f32 %v4362_v1, %v4361_v54 }
 0x4d8   :  { %v8015_v15 = vadd.f32 %v4403_v7, %v4339_v33 }
 0x4da   :  { %v4404_v47 = vpop.f32.mrb[40].mxu0 }
 0x4db   :  { %v4364_v31 = vpop.f32.mrb[40].mxu1  ;;  %v4405_v28 = vpop.f32.mrb[41].mxu0 }
 0x4dc   :  { %v4365_v35 = vpop.f32.mrb[41].mxu1  ;;  %v4406_v12 = vadd.f32 %v4405_v28, %v4404_v47  ;;  %v4407_v26 = vpop.f32.mrb[42].mxu0 }
 0x4dd   :  { %v4366_v36 = vadd.f32 %v4365_v35, %v4364_v31  ;;  %v4367_v4 = vpop.f32.mrb[42].mxu1  ;;  %v4408_v30 = vpop.f32.mrb[43].mxu0 }
 0x4de   :  { %v4368_v61 = vpop.f32.mrb[43].mxu1  ;;  %v4409_v34 = vadd.f32 %v4408_v30, %v4407_v26  ;;  %v8017_v23 = vadd.f32 %v4406_v12, %v4342_v59 }
 0x4df   :  { %v4369_v40 = vadd.f32 %v4368_v61, %v4367_v4 }
 0x4e0   :  { %v8019_v5 = vadd.f32 %v4409_v34, %v4345_v11 }
 0x4e2   :  { %v4410_v16 = vpop.f32.mrb[44].mxu0 }
 0x4e3   :  { %v4370_v2 = vpop.f32.mrb[44].mxu1  ;;  %v4411_v51 = vpop.f32.mrb[45].mxu0 }
 0x4e4   :  { %v4371_v48 = vpop.f32.mrb[45].mxu1  ;;  %v4412_v63 = vadd.f32 %v4411_v51, %v4410_v16  ;;  %v4413_v3 = vpop.f32.mrb[46].mxu0 }
 0x4e5   :  { %v4372_v52 = vadd.f32 %v4371_v48, %v4370_v2  ;;  %v4373_v14 = vpop.f32.mrb[46].mxu1  ;;  %v4414_v33 = vpop.f32.mrb[47].mxu0 }
 0x4e6   :  { %v4374_v55 = vpop.f32.mrb[47].mxu1  ;;  %v4415_v0 = vadd.f32 %v4414_v33, %v4413_v3  ;;  %v3728_v8 = vadd.f32 %v4412_v63, %v4348_v32 }
 0x4e7   :  { %v4375_v22 = vadd.f32 %v4374_v55, %v4373_v14 }
 0x4e8   :  { %v3731_v6 = vadd.f32 %v4415_v0, %v4351_v17 }
 0x4ea   :  { %v4416_v57 = vpop.f32.mrb[48].mxu0 }
 0x4eb   :  { %v4417_v44 = vpop.f32.mrb[49].mxu0 }
 0x4ec   :  { %v4418_v59 = vadd.f32 %v4417_v44, %v4416_v57  ;;  %v4419_v20 = vpop.f32.mrb[50].mxu0 }
 0x4ed   :  { %v4420_v11 = vpop.f32.mrb[51].mxu0 }
 0x4ee   :  { %v4421_v41 = vadd.f32 %v4420_v11, %v4419_v20  ;;  %v3736_v10 = vadd.f32 %v4418_v59, %v4354_v58 }
 0x4f0   :  { %v8021_v25 = vadd.f32 %v4421_v41, %v4357_v13 }
 0x4f2   :  { %v4422_v43 = vpop.f32.mrb[52].mxu0 }
 0x4f3   :  { %v4423_v53 = vpop.f32.mrb[53].mxu0 }
 0x4f4   :  { %v4424_v38 = vadd.f32 %v4423_v53, %v4422_v43  ;;  %v4425_v50 = vpop.f32.mrb[54].mxu0 }
 0x4f5   :  { %v4426_v39 = vpop.f32.mrb[55].mxu0 }
 0x4f6   :  { %v4427_v9 = vadd.f32 %v4426_v39, %v4425_v50  ;;  %v3744_v56 = vadd.f32 %v4424_v38, %v4360_v49  ;;  %v8028_v49 = vld [vmem:[%s8090_s8] ss:$0 sm:$0xff]  ;;  %s5229_s8 = smov [#allocation2]  }
 0x4f7   :  { %s4100_s15 = sshll.u32 %s5229_s8, 4  ;;  %s4101_s15 = int_to_ptr.vmem [resolvable:$true] %s4100_s15 }
 0x4f8   :  { %v3747_v21 = vadd.f32 %v4427_v9, %v4363_v27  ;;  %s5199_s4 = scalar_lea.vmem %s4101_s15, 2048  ;;  %p5204_p1 = scmp.lt.s32.totalorder %s4101_s15, %s4101_s15 }
 0x4f9   :  { %p5200_p0 = scmp.ne.s32.totalorder %s4101_s15, %s5199_s4  ;;  %p5205_p2 = scmp.lt.s32.totalorder %s5199_s4, %s5199_s4 }
 0x4fa   :  { %v4428_v19 = vpop.f32.mrb[56].mxu0 }
 0x4fb   :  { %v4429_v32 = vpop.f32.mrb[57].mxu0  ;;  %p5206_p3 = por %p5205_p2, %p5204_p1 }
 0x4fc   :  { %v4430_v17 = vadd.f32 %v4429_v32, %v4428_v19  ;;  %v4431_v60 = vpop.f32.mrb[58].mxu0 }
 0x4fd   :  { %v4432_v62 = vpop.f32.mrb[59].mxu0  ;;  %p5207_p4 = pnand %p5206_p3, %p5200_p0 }
 0x4fe   :  { %v4433_v42 = vadd.f32 %v4432_v62, %v4431_v60  ;;  %v3752_v18 = vadd.f32 %v4430_v17, %v4366_v36 }
 0x500   :  { %v8023_v54 = vadd.f32 %v4433_v42, %v4369_v40 }
 0x502   :  { %v4434_v58 = vpop.f32.mrb[60].mxu0 }
 0x503   :  { %v4435_v13 = vpop.f32.mrb[61].mxu0 }
 0x504   :  { %v4436_v24 = vadd.f32 %v4435_v13, %v4434_v58  ;;  %v4437_v1 = vpop.f32.mrb[62].mxu0 }
 0x505   :  { %v4438_v37 = vpop.f32.mrb[63].mxu0 }
 0x506   :  { %v4439_v7 = vadd.f32 %v4438_v37, %v4437_v1  ;;  %v3760_v31 = vadd.f32 %v4436_v24, %v4372_v52 }
 0x508   :  { %v3763_v47 = vadd.f32 %v4439_v7, %v4375_v22 }
 0x50b   :  { %v4512_v35 = vpop.f32.mrb[48].mxu1 }
 0x50c   :  { %v4526_v27 = vadd.f32 %v4512_v35, %v8013_v29  ;;  %v3977_v28 = vpop.f32.mrb[49].mxu1 }
 0x50d   :  { %v4528_v36 = vadd.f32 %v3977_v28, %v8009_v46  ;;  %v4513_v12 = vpop.f32.mrb[50].mxu1 }
 0x50e   :  { %v4527_v4 = vadd.f32 %v4526_v27, %v8028_v49  ;;  %v4530_v26 = vadd.f32 %v4513_v12, %v8015_v15  ;;  %v3980_v61 = vpop.f32.mrb[51].mxu1 }
 0x50f   :  { %v4529_v30 = vadd.f32 %v4528_v36, %v8028_v49  ;;  %v4532_v40 = vadd.f32 %v3980_v61, %v8011_v45 }
 0x510   :  { %4081 = vst.msk [vmem:[#allocation2 + $0x10] sm:$0xff] %vm8955_vm7, %v4527_v4  ;;  %v4531_v34 = vadd.f32 %v4530_v26, %v8028_v49 }
 0x511   :  { %4079 = vst.msk [vmem:[#allocation2] sm:$0xff] %vm8956_vm10, %v4529_v30  ;;  %v4533_v29 = vadd.f32 %v4532_v40, %v8028_v49 }
 0x512   :  { %4082 = vst.msk [vmem:[#allocation2 + $0x18] sm:$0xff] %vm8957_vm3, %v4531_v34 }
 0x513   :  { %4080 = vst.msk [vmem:[#allocation2 + $0x8] sm:$0xff] %vm8958_vm12, %v4533_v29  ;;  %v4516_v46 = vpop.f32.mrb[52].mxu1 }
 0x514   :  { %v4534_v2 = vadd.f32 %v4516_v46, %v3728_v8  ;;  %v3993_v15 = vpop.f32.mrb[53].mxu1 }
 0x515   :  { %v4536_v16 = vadd.f32 %v3993_v15, %v8017_v23  ;;  %v4517_v48 = vpop.f32.mrb[54].mxu1 }
 0x516   :  { %v4535_v45 = vadd.f32 %v4534_v2, %v8028_v49  ;;  %v4538_v51 = vadd.f32 %v4517_v48, %v3731_v6  ;;  %v3996_v52 = vpop.f32.mrb[55].mxu1 }
 0x517   :  { %v4537_v63 = vadd.f32 %v4536_v16, %v8028_v49  ;;  %v4540_v14 = vadd.f32 %v3996_v52, %v8019_v5 }
 0x518   :  { %4085 = vst.msk [vmem:[#allocation2 + $0x30] sm:$0xff] %vm8959_vm14, %v4535_v45  ;;  %v4539_v3 = vadd.f32 %v4538_v51, %v8028_v49 }
 0x519   :  { %4083 = vst.msk [vmem:[#allocation2 + $0x20] sm:$0xff] %vm8942_vm1, %v4537_v63  ;;  %v4541_v55 = vadd.f32 %v4540_v14, %v8028_v49 }
 0x51a   :  { %4086 = vst.msk [vmem:[#allocation2 + $0x38] sm:$0xff] %vm8960_vm11, %v4539_v3 }
 0x51b   :  { %4084 = vst.msk [vmem:[#allocation2 + $0x28] sm:$0xff] %vm8961_vm6, %v4541_v55  ;;  %v4520_v23 = vpop.f32.mrb[56].mxu1 }
 0x51c   :  { %v4542_v33 = vadd.f32 %v4520_v23, %v3744_v56  ;;  %v4009_v22 = vpop.f32.mrb[57].mxu1 }
 0x51d   :  { %v4544_v0 = vadd.f32 %v4009_v22, %v3736_v10  ;;  %v4521_v8 = vpop.f32.mrb[58].mxu1 }
 0x51e   :  { %v4543_v6 = vadd.f32 %v4542_v33, %v8028_v49  ;;  %v4546_v5 = vadd.f32 %v4521_v8, %v3747_v21  ;;  %v4012_v57 = vpop.f32.mrb[59].mxu1 }
 0x51f   :  { %v4545_v44 = vadd.f32 %v4544_v0, %v8028_v49  ;;  %v4548_v59 = vadd.f32 %v4012_v57, %v8021_v25 }
 0x520   :  { %4089 = vst.msk [vmem:[#allocation2 + $0x50] sm:$0xff] %vm8962_vm4, %v4543_v6  ;;  %v4547_v20 = vadd.f32 %v4546_v5, %v8028_v49 }
 0x521   :  { %4087 = vst.msk [vmem:[#allocation2 + $0x40] sm:$0xff] %vm8963_vm13, %v4545_v44  ;;  %v4549_v11 = vadd.f32 %v4548_v59, %v8028_v49 }
 0x522   :  { %4090 = vst.msk [vmem:[#allocation2 + $0x58] sm:$0xff] %vm8964_vm15, %v4547_v20 }
 0x523   :  { %4088 = vst.msk [vmem:[#allocation2 + $0x48] sm:$0xff] %vm8965_vm0, %v4549_v11  ;;  %v4524_v41 = vpop.f32.mrb[60].mxu1 }
 0x524   :  { %v4550_v10 = vadd.f32 %v4524_v41, %v3760_v31  ;;  %v4025_v43 = vpop.f32.mrb[61].mxu1 }
 0x525   :  { %v4552_v53 = vadd.f32 %v4025_v43, %v3752_v18  ;;  %v4525_v38 = vpop.f32.mrb[62].mxu1 }
 0x526   :  { %v4551_v50 = vadd.f32 %v4550_v10, %v8028_v49  ;;  %v4554_v25 = vadd.f32 %v4525_v38, %v3763_v47  ;;  %v4028_v39 = vpop.f32.mrb[63].mxu1 }
 0x527   :  { %v4553_v9 = vadd.f32 %v4552_v53, %v8028_v49  ;;  %v4556_v56 = vadd.f32 %v4028_v39, %v8023_v54 }
 0x528   :  { %4093 = vst.msk [vmem:[#allocation2 + $0x70] sm:$0xff] %vm8966_vm9, %v4551_v50  ;;  %v4555_v21 = vadd.f32 %v4554_v25, %v8028_v49 }
 0x529   :  { %4091 = vst.msk [vmem:[#allocation2 + $0x60] sm:$0xff] %vm8967_vm2, %v4553_v9  ;;  %v4557_v19 = vadd.f32 %v4556_v56, %v8028_v49 }
 0x52a   :  { %4094 = vst.msk [vmem:[#allocation2 + $0x78] sm:$0xff] %vm8968_vm5, %v4555_v21 }
 0x52b   :  { %4092 = vst.msk [vmem:[#allocation2 + $0x68] sm:$0xff] %vm8969_vm8, %v4557_v19 }
 0x52c   :  { %5210 = shalt.err (!%p5207_p4)
}
 0x52d   :  { %s5211_s30 = scalar_lea.hbm %s8092_s10, 2048 }
 0x52e   :  { %p5212_p5 = scmp.ne.s32.totalorder %s8092_s10, %s5211_s30  ;;  %p5215_p6 = scmp.lt.u32.totalorder %s5211_s30, %s8092_s10 }
 0x530   :  { %p5217_p7 = pnand %p5215_p6, %p5212_p5 }
 0x532   :  { %5220 = shalt.err (!%p5217_p7)
}
 0x533   :  { %s5230_s2 = smov 128   ;;  %s5231_s3 = smov 8  }
 0x534   :  { %4106 = dma.vmem_to_hbm [thread:$0]  %s4101_s15, 2048, %s8092_s10, [#allocation3], %s5230_s2, %s5230_s2, %s5231_s3  }
 0x535   :  { %5221 = dma.done.wait [#allocation3], 2048  }
 0x536   :  { %5222 = vsyncadd [#allocation3], 4294965248 }
 0x537   :  { %4110 = vsyncpa [#allocation3], 1 }

// kernel: tpu_custom_call.1
= control target key start
LH: loop header
LB: loop body
LE: loop exit
PB: predicated region body
PF: predicated region fallthrough
CT: control target
= control target key end

     0   :  { %vm8097_vm0 = vcmask 261120   ;;  %s8082_s0 = inlined_call_operand.vmem [shape: bf16[2,64,32], index: 0, kind: input, shape index: {}]   ;;  %s8083_s1 = inlined_call_operand.vmem [shape: f32[2,1,64], index: 1, kind: input, shape index: {}]   ;;  %s8084_s2 = inlined_call_operand.vmem [shape: f32[1,32], index: 2, kind: input, shape index: {}]   ;;  %s8085_s3 = inlined_call_operand.vmem [shape: f32[1,32], index: 3, kind: input, shape index: {}]   ;;  %s8086_s4 = inlined_call_operand.vmem [shape: bf16[288,64], index: 4, kind: input, shape index: {}]   ;;  %s8087_s5 = inlined_call_operand.vmem [shape: f32[1,64], index: 5, kind: input, shape index: {}]   ;;  %s8088_s6 = inlined_call_operand.vmem [shape: f32[1,64], index: 6, kind: input, shape index: {}]   ;;  %s8089_s7 = inlined_call_operand.vmem [shape: bf16[576,64], index: 7, kind: input, shape index: {}]   ;;  %s8090_s8 = inlined_call_operand.vmem [shape: f32[1,64], index: 8, kind: input, shape index: {}]   ;;  %s8091_s9 = inlined_call_operand.vmem [shape: bf16[32,64], index: 9, kind: input, shape index: {}]   ;;  %s8092_s10 = inlined_call_operand.hbm [shape: f32[2,64,64], index: 10, kind: output, shape index: {}]  }
   0x1   :  { %v37_v0 = vld [vmem:[%s8082_s0] sm:$0xff]   ;;  %v39_v1 = vld [vmem:[%s8082_s0 + $0x8] sm:$0xff]   ;;  %v41_v2 = vld [vmem:[%s8082_s0 + $0x10] sm:$0xff]  }
   0x2   :  { %v43_v3 = vld [vmem:[%s8082_s0 + $0x18] sm:$0xff]   ;;  %v5299_v4 = vunpack.c.l.bf16 %v37_v0  ;;  %v5301_v5 = vunpack.c.h.bf16 %v37_v0  ;;  %v5303_v6 = vunpack.c.l.bf16 %v39_v1  ;;  %v5305_v7 = vunpack.c.h.bf16 %v39_v1  ;;  %v45_v26 = vld [vmem:[%s8082_s0 + $0x20] sm:$0xff]   ;;  %v47_v27 = vld [vmem:[%s8082_s0 + $0x28] sm:$0xff]  }
   0x3   :  { %v5307_v8 = vunpack.c.l.bf16 %v41_v2  ;;  %v5309_v9 = vunpack.c.h.bf16 %v41_v2  ;;  %v5311_v10 = vunpack.c.l.bf16 %v43_v3  ;;  %v5319_v14 = vunpack.c.h.bf16 %v43_v3  ;;  %v49_v38 = vld [vmem:[%s8082_s0 + $0x30] sm:$0xff]   ;;  %v51_v54 = vld [vmem:[%s8082_s0 + $0x38] sm:$0xff]  }
   0x4   :  { %v72_v11 = vsel %vm8097_vm0, %v5299_v4, 0.0  ;;  %v73_v12 = vsel %vm8097_vm0, %v5301_v5, 0.0  ;;  %v75_v13 = vsel %vm8097_vm0, %v5303_v6, 0.0  ;;  %v77_v16 = vsel %vm8097_vm0, %v5305_v7, 0.0 }
   0x5   :  { %v74_v15 = vadd.f32 %v73_v12, %v72_v11  ;;  %v79_v17 = vsel %vm8097_vm0, %v5307_v8, 0.0  ;;  %v81_v18 = vsel %vm8097_vm0, %v5309_v9, 0.0  ;;  %v114_v19 = vmul.f32 %v5299_v4, %v5299_v4 }
   0x6   :  { %v115_v20 = vmul.f32 %v5301_v5, %v5301_v5  ;;  %v116_v21 = vmul.f32 %v5303_v6, %v5303_v6  ;;  %v117_v23 = vmul.f32 %v5305_v7, %v5305_v7  ;;  %v118_v24 = vmul.f32 %v5307_v8, %v5307_v8 }
   0x7   :  { %v76_v22 = vadd.f32 %v75_v13, %v74_v15  ;;  %v119_v25 = vmul.f32 %v5309_v9, %v5309_v9  ;;  %v130_v28 = vsel %vm8097_vm0, %v114_v19, 0.0  ;;  %v83_v31 = vsel %vm8097_vm0, %v5311_v10, 0.0 }
   0x8   :  { %v131_v29 = vsel %vm8097_vm0, %v115_v20, 0.0  ;;  %v133_v33 = vsel %vm8097_vm0, %v116_v21, 0.0  ;;  %v85_v34 = vsel %vm8097_vm0, %v5319_v14, 0.0  ;;  %v120_v35 = vmul.f32 %v5311_v10, %v5311_v10 }
   0x9   :  { %v78_v30 = vadd.f32 %v77_v16, %v76_v22  ;;  %v132_v32 = vadd.f32 %v131_v29, %v130_v28  ;;  %v121_v36 = vmul.f32 %v5319_v14, %v5319_v14  ;;  %v135_v37 = vsel %vm8097_vm0, %v117_v23, 0.0 }
   0xa   :  { %v137_v41 = vsel %vm8097_vm0, %v118_v24, 0.0  ;;  %v139_v42 = vsel %vm8097_vm0, %v119_v25, 0.0  ;;  %v5362_v43 = vunpack.c.l.bf16 %v45_v26  ;;  %v5364_v44 = vunpack.c.h.bf16 %v45_v26 }
   0xb   :  { %v80_v39 = vadd.f32 %v79_v17, %v78_v30  ;;  %v134_v40 = vadd.f32 %v133_v33, %v132_v32  ;;  %v5366_v45 = vunpack.c.l.bf16 %v47_v27  ;;  %v5368_v46 = vunpack.c.h.bf16 %v47_v27 }
   0xc   :  { %v5370_v49 = vunpack.c.l.bf16 %v49_v38  ;;  %v93_v50 = vsel %vm8097_vm0, %v5362_v43, 0.0  ;;  %v94_v51 = vsel %vm8097_vm0, %v5364_v44, 0.0  ;;  %v141_v57 = vsel %vm8097_vm0, %v120_v35, 0.0 }
   0xd   :  { %v82_v47 = vadd.f32 %v81_v18, %v80_v39  ;;  %v136_v48 = vadd.f32 %v135_v37, %v134_v40  ;;  %v95_v55 = vadd.f32 %v94_v51, %v93_v50  ;;  %v96_v56 = vsel %vm8097_vm0, %v5366_v45, 0.0 }
   0xe   :  { %v143_v58 = vsel %vm8097_vm0, %v121_v36, 0.0  ;;  %v5383_v59 = vunpack.c.h.bf16 %v49_v38  ;;  %v98_v60 = vsel %vm8097_vm0, %v5368_v46, 0.0  ;;  %v100_v0 = vsel %vm8097_vm0, %v5370_v49, 0.0 }
   0xf   :  { %v84_v52 = vadd.f32 %v83_v31, %v82_v47  ;;  %v138_v53 = vadd.f32 %v137_v41, %v136_v48  ;;  %v97_v63 = vadd.f32 %v96_v56, %v95_v55  ;;  %v5389_v1 = vunpack.c.l.bf16 %v51_v54 }
  0x10   :  { %v122_v2 = vmul.f32 %v5362_v43, %v5362_v43  ;;  %v123_v3 = vmul.f32 %v5364_v44, %v5364_v44  ;;  %v124_v11 = vmul.f32 %v5366_v45, %v5366_v45  ;;  %v125_v16 = vmul.f32 %v5368_v46, %v5368_v46 }
  0x11   :  { %v86_v61 = vadd.f32 %v85_v34, %v84_v52  ;;  %v140_v62 = vadd.f32 %v139_v42, %v138_v53  ;;  %v99_v15 = vadd.f32 %v98_v60, %v97_v63  ;;  %v5399_v17 = vunpack.c.h.bf16 %v51_v54 }
  0x12   :  { %v102_v18 = vsel %vm8097_vm0, %v5383_v59, 0.0  ;;  %v126_v19 = vmul.f32 %v5370_v49, %v5370_v49  ;;  %v151_v20 = vsel %vm8097_vm0, %v122_v2, 0.0  ;;  %v152_v24 = vsel %vm8097_vm0, %v123_v3, 0.0 }
  0x13   :  { %v87_v12 = vrot.slane %v86_v61, 4  ;;  %v142_v13 = vadd.f32 %v141_v57, %v140_v62  ;;  %v101_v23 = vadd.f32 %v100_v0, %v99_v15  ;;  %v104_v25 = vsel %vm8097_vm0, %v5389_v1, 0.0 }
  0x14   :  { %v127_v26 = vmul.f32 %v5383_v59, %v5383_v59  ;;  %v153_v27 = vadd.f32 %v152_v24, %v151_v20  ;;  %v154_v28 = vsel %vm8097_vm0, %v124_v11, 0.0  ;;  %v156_v32 = vsel %vm8097_vm0, %v125_v16, 0.0 }
  0x15   :  { %v88_v21 = vadd.f32 %v87_v12, %v86_v61  ;;  %v144_v22 = vadd.f32 %v143_v58, %v142_v13  ;;  %v103_v31 = vadd.f32 %v102_v18, %v101_v23  ;;  %v106_v33 = vsel %vm8097_vm0, %v5399_v17, 0.0 }
  0x16   :  { %v155_v34 = vadd.f32 %v154_v28, %v153_v27  ;;  %v158_v35 = vsel %vm8097_vm0, %v126_v19, 0.0  ;;  %v128_v39 = vmul.f32 %v5389_v1, %v5389_v1  ;;  %v160_v48 = vsel %vm8097_vm0, %v127_v26, 0.0 }
  0x17   :  { %v89_v29 = vrot.slane %v88_v21, 2  ;;  %v145_v30 = vrot.slane %v144_v22, 4  ;;  %v105_v38 = vadd.f32 %v104_v25, %v103_v31  ;;  %v129_v50 = vmul.f32 %v5399_v17, %v5399_v17 }
  0x18   :  { %v157_v40 = vadd.f32 %v156_v32, %v155_v34  ;;  %v162_v55 = vsel %vm8097_vm0, %v128_v39, 0.0 }
  0x19   :  { %v90_v36 = vadd.f32 %v89_v29, %v88_v21  ;;  %v146_v37 = vadd.f32 %v145_v30, %v144_v22  ;;  %v107_v47 = vadd.f32 %v106_v33, %v105_v38  ;;  %v164_v62 = vsel %vm8097_vm0, %v129_v50, 0.0 }
  0x1a   :  { %v159_v51 = vadd.f32 %v158_v35, %v157_v40 }
  0x1b   :  { %v91_v41 = vrot.slane %v90_v36, 1  ;;  %v147_v42 = vrot.slane %v146_v37, 2  ;;  %v108_v54 = vrot.slane %v107_v47, 4 }
  0x1c   :  { %v161_v56 = vadd.f32 %v160_v48, %v159_v51 }
  0x1d   :  { %v92_v52 = vadd.f32 %v91_v41, %v90_v36  ;;  %v148_v53 = vadd.f32 %v147_v42, %v146_v37  ;;  %v109_v60 = vadd.f32 %v108_v54, %v107_v47  ;;  %v5437_v37 = vld [vmem:[%s8084_s2] ss:$0 sm:$0xff] }
  0x1e   :  { %v163_v61 = vadd.f32 %v162_v55, %v161_v56 }
  0x1f   :  { %v149_v57 = vrot.slane %v148_v53, 1  ;;  %v173_v58 = vmul.f32 0.015625, %v92_v52  ;;  %v110_v3 = vrot.slane %v109_v60, 2 }
  0x20   :  { %v165_v11 = vadd.f32 %v164_v62, %v163_v61 }
  0x21   :  { %v150_v63 = vadd.f32 %v149_v57, %v148_v53  ;;  %v177_v0 = vmul.f32 %v173_v58, %v173_v58  ;;  %v111_v13 = vadd.f32 %v110_v3, %v109_v60  ;;  %v184_v29 = vsub.f32 %v5301_v5, %v173_v58  ;;  %v5442_v5 = vld [vmem:[%s8085_s3] ss:$0 sm:$0xff] }
  0x22   :  { %v166_v15 = vrot.slane %v165_v11, 4  ;;  %v185_v30 = vsub.f32 %v5303_v6, %v173_v58  ;;  %v183_v31 = vsub.f32 %v5299_v4, %v173_v58  ;;  %v186_v32 = vsub.f32 %v5305_v7, %v173_v58 }
  0x23   :  { %v175_v2 = vmul.f32 0.015625, %v150_v63  ;;  %v112_v18 = vrot.slane %v111_v13, 1  ;;  %v187_v33 = vsub.f32 %v5307_v8, %v173_v58  ;;  %v188_v34 = vsub.f32 %v5309_v9, %v173_v58 }
  0x24   :  { %v167_v19 = vadd.f32 %v166_v15, %v165_v11  ;;  %v189_v35 = vsub.f32 %v5311_v10, %v173_v58  ;;  %v190_v6 = vsub.f32 %v5319_v14, %v173_v58 }
  0x25   :  { %v179_v12 = vsub.f32 %v175_v2, %v177_v0  ;;  %v113_v21 = vadd.f32 %v112_v18, %v111_v13 }
  0x26   :  { %v168_v22 = vrot.slane %v167_v19, 2 }
  0x27   :  { %v181_v16 = vmax.f32 %v179_v12, 0.0  ;;  %v5423_v24 = vmul.f32 0.015625, %v113_v21 }
  0x28   :  { %v169_v23 = vadd.f32 %v168_v22, %v167_v19 }
  0x29   :  { %v199_v20 = vadd.f32 1e-05, %v181_v16  ;;  %v178_v27 = vmul.f32 %v5423_v24, %v5423_v24  ;;  %v191_v15 = vsub.f32 %v5362_v43, %v5423_v24  ;;  %v192_v19 = vsub.f32 %v5364_v44, %v5423_v24 }
  0x2a   :  { %v170_v25 = vrot.slane %v169_v23, 1  ;;  %v194_v22 = vsub.f32 %v5368_v46, %v5423_v24 }
  0x2b   :  { %5055 = vrsqrt.f32 %v199_v20  ;;  %v193_v20 = vsub.f32 %v5366_v45, %v5423_v24 }
  0x2c   :  { %v171_v26 = vadd.f32 %v170_v25, %v169_v23  ;;  %v195_v23 = vsub.f32 %v5370_v49, %v5423_v24  ;;  %v196_v25 = vsub.f32 %v5383_v59, %v5423_v24 }
  0x2e   :  { %v176_v28 = vmul.f32 0.015625, %v171_v26 }
  0x30   :  { %v180_v36 = vsub.f32 %v176_v28, %v178_v27 }
  0x32   :  { %v182_v4 = vmax.f32 %v180_v36, 0.0 }
  0x34   :  { %v200_v42 = vadd.f32 1e-05, %v182_v4 }
  0x35   :  { %v5056_v38 = vpop.eup %5055 }
  0x36   :  { %v204_v7 = vmul.f32 %v5056_v38, %v184_v29  ;;  %v205_v8 = vmul.f32 %v5056_v38, %v185_v30  ;;  %v203_v9 = vmul.f32 %v5056_v38, %v183_v31  ;;  %v206_v39 = vmul.f32 %v5056_v38, %v186_v32 }
  0x37   :  { %v207_v10 = vmul.f32 %v5056_v38, %v187_v33  ;;  %v208_v40 = vmul.f32 %v5056_v38, %v188_v34  ;;  %v209_v41 = vmul.f32 %v5056_v38, %v189_v35  ;;  %5057 = vrsqrt.f32 %v200_v42 }
  0x38   :  { %v226_v47 = vmul.f32 %v5437_v37, %v204_v7  ;;  %v227_v48 = vmul.f32 %v5437_v37, %v205_v8  ;;  %v225_v50 = vmul.f32 %v5437_v37, %v203_v9  ;;  %v228_v51 = vmul.f32 %v5437_v37, %v206_v39 }
  0x39   :  { %v229_v52 = vmul.f32 %v5437_v37, %v207_v10  ;;  %v230_v14 = vmul.f32 %v5437_v37, %v208_v40  ;;  %v231_v53 = vmul.f32 %v5437_v37, %v209_v41  ;;  %v210_v61 = vmul.f32 %v5056_v38, %v190_v6 }
  0x3a   :  { %v5453_v54 = vadd.f32 %v5442_v5, %v226_v47  ;;  %v5456_v55 = vadd.f32 %v5442_v5, %v227_v48  ;;  %v5459_v56 = vadd.f32 %v5442_v5, %v225_v50  ;;  %v5462_v57 = vadd.f32 %v5442_v5, %v228_v51 }
  0x3b   :  { %v5465_v58 = vadd.f32 %v5442_v5, %v229_v52  ;;  %v5468_v60 = vadd.f32 %v5442_v5, %v230_v14  ;;  %v5474_v2 = vadd.f32 %v5442_v5, %v231_v53  ;;  %v232_v11 = vmul.f32 %v5437_v37, %v210_v61 }
  0x3c   :  { %v4114_v62 = vmul.f32 -1.442695, %v5453_v54  ;;  %v4115_v63 = vmul.f32 -1.442695, %v5456_v55  ;;  %v4113_v0 = vmul.f32 -1.442695, %v5459_v56 }
  0x3d   :  { %v4116_v3 = vmul.f32 -1.442695, %v5462_v57  ;;  %v4117_v12 = vmul.f32 -1.442695, %v5465_v58  ;;  %v4118_v13 = vmul.f32 -1.442695, %v5468_v60  ;;  %v5483_v16 = vadd.f32 %v5442_v5, %v232_v11 }
  0x3e   :  { %5059 = vpow2.f32 %v4114_v62  ;;  %v4119_v18 = vmul.f32 -1.442695, %v5474_v2 }
  0x3f   :  { %5061 = vpow2.f32 %v4115_v63  ;;  %v4120_v21 = vmul.f32 -1.442695, %v5483_v16 }
  0x40   :  { %5063 = vpow2.f32 %v4113_v0 }
  0x41   :  { %5065 = vpow2.f32 %v4116_v3  ;;  %v5493_v43 = vpop.eup %5057 }
  0x42   :  { %5067 = vpow2.f32 %v4117_v12  ;;  %v211_v44 = vmul.f32 %v5493_v43, %v191_v15  ;;  %v212_v45 = vmul.f32 %v5493_v43, %v192_v19  ;;  %v213_v26 = vmul.f32 %v5493_v43, %v193_v20 }
  0x43   :  { %5069 = vpow2.f32 %v4118_v13 }
  0x44   :  { %5071 = vpow2.f32 %v4119_v18 }
  0x45   :  { %15 = vsyncpa [#allocation3], 0  ;;  %5073 = vpow2.f32 %v4120_v21  ;;  %v197_v46 = vsub.f32 %v5389_v1, %v5423_v24  ;;  %v233_v27 = vmul.f32 %v5437_v37, %v211_v44  ;;  %v214_v28 = vmul.f32 %v5493_v43, %v194_v22  ;;  %s5224_s15 = smov 32   ;;  %s5225_s16 = smov 96  }
  0x46   :  { %v234_v49 = vmul.f32 %v5437_v37, %v212_v45  ;;  %v215_v59 = vmul.f32 %v5493_v43, %v195_v23  ;;  %v235_v30 = vmul.f32 %v5437_v37, %v213_v26  ;;  %v216_v31 = vmul.f32 %v5493_v43, %v196_v25  ;;  %v4983_v45 = vld [vmem:[%s8086_s4 + $0x40] sm:$0xff]   ;;  %s5228_s11 = smov 1  }
  0x47   :  { %v217_v34 = vmul.f32 %v5493_v43, %v197_v46  ;;  %v5512_v1 = vadd.f32 %v5442_v5, %v233_v27  ;;  %v236_v38 = vmul.f32 %v5437_v37, %v214_v28  ;;  %v198_v15 = vsub.f32 %v5399_v17, %v5423_v24  ;;  %4238 = vmatprep.subr.bf16.mxu0 %v4983_v45 }
  0x48   :  { %v5060_v29 = vpop.eup %5059  ;;  %v5516_v7 = vadd.f32 %v5442_v5, %v234_v49  ;;  %v237_v8 = vmul.f32 %v5437_v37, %v215_v59  ;;  %v5520_v10 = vadd.f32 %v5442_v5, %v235_v30  ;;  %v238_v40 = vmul.f32 %v5437_v37, %v216_v31 }
  0x49   :  { %v5062_v32 = vpop.eup %5061  ;;  %v312_v33 = vadd.f32 1.0, %v5060_v29  ;;  %v239_v47 = vmul.f32 %v5437_v37, %v217_v34  ;;  %v4121_v51 = vmul.f32 -1.442695, %v5512_v1  ;;  %v5526_v52 = vadd.f32 %v5442_v5, %v236_v38 }
  0x4a   :  { %v5064_v35 = vpop.eup %5063  ;;  %v313_v36 = vadd.f32 1.0, %v5062_v32  ;;  %v4122_v61 = vmul.f32 -1.442695, %v5516_v7  ;;  %v5530_v62 = vadd.f32 %v5442_v5, %v237_v8  ;;  %v4123_v63 = vmul.f32 -1.442695, %v5520_v10 }
  0x4b   :  { %v5066_v4 = vpop.eup %5065  ;;  %5075 = vrcp.f32 %v312_v33  ;;  %v311_v6 = vadd.f32 1.0, %v5064_v35  ;;  %v5534_v0 = vadd.f32 %v5442_v5, %v238_v40  ;;  %v5537_v11 = vadd.f32 %v5442_v5, %v239_v47 }
  0x4c   :  { %v5068_v9 = vpop.eup %5067  ;;  %5077 = vrcp.f32 %v313_v36  ;;  %v314_v39 = vadd.f32 1.0, %v5066_v4  ;;  %v4124_v12 = vmul.f32 -1.442695, %v5526_v52  ;;  %v4125_v13 = vmul.f32 -1.442695, %v5530_v62 }
  0x4d   :  { %v5070_v41 = vpop.eup %5069  ;;  %5079 = vrcp.f32 %v311_v6  ;;  %v315_v42 = vadd.f32 1.0, %v5068_v9  ;;  %v4126_v18 = vmul.f32 -1.442695, %v5534_v0  ;;  %v4127_v20 = vmul.f32 -1.442695, %v5537_v11  ;;  %v4985_v9 = vld [vmem:[%s8086_s4 + $0x48] sm:$0xff]  }
  0x4e   :  { %v5072_v48 = vpop.eup %5071  ;;  %5081 = vrcp.f32 %v314_v39  ;;  %v316_v50 = vadd.f32 1.0, %v5070_v41  ;;  %v218_v44 = vmul.f32 %v5493_v43, %v198_v15  ;;  %v8093_v33 = vlaneseq }
  0x4f   :  { %v5074_v14 = vpop.eup %5073  ;;  %5083 = vrcp.f32 %v315_v42  ;;  %v317_v53 = vadd.f32 1.0, %v5072_v48 }
  0x50   :  { %5085 = vrcp.f32 %v316_v50  ;;  %v318_v3 = vadd.f32 1.0, %v5074_v14  ;;  %v5590_v8 = vshrl.u32 %v8093_v33, 7  ;;  %v4987_v14 = vld [vmem:[%s8086_s4 + $0x50] sm:$0xff]  }
  0x51   :  { %5087 = vrcp.f32 %v317_v53  ;;  %v4988_v53 = vld [vmem:[%s8086_s4 + $0x10] sm:$0xff]  }
  0x52   :  { %5089 = vpow2.f32 %v4121_v51  ;;  %v377_v51 = vadd.s32 8, %v5590_v8  ;;  %vm8105_vm1 = vcmp.lt.s32.totalorder %v5590_v8, 1  ;;  %vm8099_vm2 = vcmp.lt.s32.totalorder %v5590_v8, 7 }
  0x53   :  { %5091 = vpow2.f32 %v4122_v61  ;;  %v5612_v61 = vadd.s32 16, %v5590_v8 }
  0x54   :  { %5093 = vpow2.f32 %v4123_v63 }
  0x55   :  { %v5076_v19 = vpop.eup %5075  ;;  %5095 = vrcp.f32 %v318_v3  ;;  %v396_v3 = vand.u32 7, %v5590_v8  ;;  %v410_v45 = vand.u32 7, %v5612_v61  ;;  %v8347_v61 = vmov 0 }
  0x56   :  { %v5078_v21 = vpop.eup %5077  ;;  %v5546_v22 = vmul.f32 %v5076_v19, %v5453_v54  ;;  %5097 = vpow2.f32 %v4124_v12  ;;  %v4984_v54 = vld [vmem:[%s8086_s4] sm:$0xff]   ;;  %v403_v12 = vand.u32 7, %v377_v51 }
  0x57   :  { %v5080_v23 = vpop.eup %5079  ;;  %v5549_v25 = vmul.f32 %v5078_v21, %v5456_v55  ;;  %5099 = vpow2.f32 %v4125_v13  ;;  %4239 = vmatpush3.bf16.msra.mxu0 %v4984_v54  ;;  %v4989_v13 = vld [vmem:[%s8086_s4 + $0x58] sm:$0xff]   ;;  %vm5650_vm3 = vcmp.ne.s32.totalorder %v396_v3, 0  ;;  %vm5658_vm5 = vcmp.ne.s32.totalorder %v396_v3, 7 }
  0x58   :  { %8319 = vst [vmem:[#allocation5_spill] sm:$0xff] %v5546_v22  ;;  %v5082_v17 = vpop.eup %5081  ;;  %v5553_v24 = vmul.f32 %v5080_v23, %v5459_v56  ;;  %5101 = vpow2.f32 %v4126_v18  ;;  %v8094_v56 = vmov 0.0   ;;  %4240 = vmatprep.subr.bf16.mxu0 %v4985_v9  ;;  %v4990_v21 = vld [vmem:[%s8086_s4 + $0x18] sm:$0xff]   ;;  %vm5654_vm4 = vcmp.ne.s32.totalorder %v403_v12, 0 }
  0x59   :  { %8320 = vst [vmem:[#allocation6_spill] sm:$0xff] %v5549_v25  ;;  %v5084_v26 = vpop.eup %5083  ;;  %v4593_v55 = vpack.i.bf16 %v5549_v25, %v5546_v22  ;;  %v5564_v46 = vmul.f32 %v5082_v17, %v5462_v57  ;;  %5103 = vpow2.f32 %v4127_v20  ;;  %v240_v57 = vmul.f32 %v5437_v37, %v218_v44 }
  0x5a   :  { %8321 = vst [vmem:[#allocation7_spill] sm:$0xff] %v5553_v24  ;;  %v5086_v43 = vpop.eup %5085  ;;  %v4583_v27 = vpack.i.bf16 %v5553_v24, %v8094_v56  ;;  %v5569_v28 = vmul.f32 %v5084_v26, %v5465_v58  ;;  %v5622_v18 = vrot.slane %v8094_v56, 7  ;;  %v5625_v19 = vrot.slane %v8094_v56, 1 }
  0x5b   :  { %8322 = vst [vmem:[#allocation8_spill] sm:$0xff] %v5564_v46  ;;  %v5088_v49 = vpop.eup %5087  ;;  %4594 = vrot.lane.b32.xlu1 %v4593_v55, %s5224_s15  ;;  %v5573_v59 = vmul.f32 %v5086_v43, %v5468_v60  ;;  %v5586_v38 = vadd.f32 %v5442_v5, %v240_v57  ;;  %v4986_v5 = vld [vmem:[%s8086_s4 + $0x8] sm:$0xff]   ;;  %v379_v17 = vadd.s32 24, %v5590_v8  ;;  %v5647_v26 = vrot.slane %v5546_v22, 1  ;;  %v4991_v57 = vld [vmem:[%s8086_s4 + $0x60] sm:$0xff]  }
  0x5c   :  { %8323 = vst [vmem:[#allocation9_spill] sm:$0xff] %v5569_v28  ;;  %v5090_v29 = vpop.eup %5089  ;;  %4584 = vrot.lane.b32.xlu0 %v4583_v27, %s5224_s15  ;;  %v4603_v30 = vpack.i.bf16 %v5569_v28, %v5564_v46  ;;  %v5580_v58 = vmul.f32 %v5088_v49, %v5474_v2  ;;  %4241 = vmatpush3.bf16.msra.mxu0 %v4986_v5  ;;  %8327 = vst [vmem:[#allocation13_spill] sm:$0xff] %v5622_v18  ;;  %v8331_v43 = vmov 0  ;;  %v8334_v27 = vmov 0 }
  0x5d   :  { %8324 = vst [vmem:[#allocation10_spill] sm:$0xff] %v5573_v59  ;;  %v5092_v31 = vpop.eup %5091  ;;  %v319_v32 = vadd.f32 1.0, %v5090_v29  ;;  %v4128_v47 = vmul.f32 -1.442695, %v5586_v38  ;;  %4242 = vmatprep.subr.bf16.mxu0 %v4987_v14  ;;  %8328 = vst [vmem:[#allocation14_spill] sm:$0xff] %v5625_v19  ;;  %v8332_v43 = vsel %vm5650_vm3, 4294967295, %v8331_v43 }
  0x5e   :  { %8325 = vst [vmem:[#allocation11_spill] sm:$0xff] %v5580_v58  ;;  %v5094_v34 = vpop.eup %5093  ;;  %v320_v35 = vadd.f32 1.0, %v5092_v31  ;;  %v4613_v37 = vpack.i.bf16 %v5580_v58, %v5573_v59  ;;  %8330 = vst [vmem:[#allocation16_spill] sm:$0xff] %v5647_v26  ;;  %v8335_v27 = vsel %vm5654_vm4, 4294967295, %v8334_v27  ;;  %v5663_v49 = vrot.slane %v5553_v24, 1 }
  0x5f   :  { %v5096_v36 = vpop.eup %5095  ;;  %4604 = vrot.lane.b32.xlu1 %v4603_v30, %s5224_s15  ;;  %5105 = vrcp.f32 %v319_v32  ;;  %v321_v60 = vadd.f32 1.0, %v5094_v34  ;;  %8333 = vst [vmem:[#allocation17_spill] sm:$0xff] %v8332_v43  ;;  %8336 = vst [vmem:[#allocation18_spill] sm:$0xff] %v8335_v27  ;;  %vm5674_vm6 = vcmp.ne.s32.totalorder %v403_v12, 7  ;;  %v8341_v32 = vmov 0  ;;  %v4992_v34 = vld [vmem:[%s8086_s4 + $0x20] sm:$0xff]  }
  0x60   :  { %v5098_v4 = vpop.eup %5097  ;;  %4589 = vrot.lane.b32.xlu0 %v4593_v55, %s5225_s16  ;;  %5107 = vrcp.f32 %v320_v35  ;;  %v5602_v48 = vmul.f32 %v5096_v36, %v5483_v16  ;;  %4243 = vmatpush3.bf16.msra.mxu0 %v4988_v53  ;;  %8340 = vst [vmem:[#allocation20_spill] sm:$0xff] %v5663_v49  ;;  %v8342_v32 = vsel %vm5674_vm6, 4294967295, %v8341_v32  ;;  %vm5700_vm7 = vcmp.ne.s32.totalorder %v410_v45, 7 }
  0x61   :  { %v5100_v2 = vpop.eup %5099  ;;  %5109 = vrcp.f32 %v321_v60  ;;  %v322_v6 = vadd.f32 1.0, %v5098_v4  ;;  %4244 = vmatprep.subr.bf16.mxu0 %v4989_v13  ;;  %8343 = vst [vmem:[#allocation21_spill] sm:$0xff] %v8342_v32  ;;  %v5685_v60 = vadd.s32 32, %v5590_v8  ;;  %v5688_v4 = vadd.s32 40, %v5590_v8 }
  0x62   :  { %v5102_v39 = vpop.eup %5101  ;;  %v323_v40 = vadd.f32 1.0, %v5100_v2  ;;  %8326 = vst [vmem:[#allocation12_spill] sm:$0xff] %v5602_v48  ;;  %v4618_v16 = vpack.i.bf16 %v8094_v56, %v5602_v48  ;;  %v5692_v2 = vrot.slane %v5546_v22, 7  ;;  %v8344_v9 = vmov 0 }
  0x63   :  { %v5104_v41 = vpop.eup %5103  ;;  %4614 = vrot.lane.b32.xlu1 %v4613_v37, %s5224_s15  ;;  %5111 = vrcp.f32 %v322_v6  ;;  %v324_v42 = vadd.f32 1.0, %v5102_v39  ;;  %v875_v6 = vrot.slane %v5549_v25, 7  ;;  %v8345_v9 = vsel %vm5700_vm7, 4294967295, %v8344_v9 }
  0x64   :  { %4599 = vrot.lane.b32.xlu0 %v4603_v30, %s5225_s16  ;;  %5113 = vrcp.f32 %v323_v40  ;;  %v325_v50 = vadd.f32 1.0, %v5104_v41  ;;  %4245 = vmatpush3.bf16.msra.mxu0 %v4990_v21  ;;  %8346 = vst [vmem:[#allocation22_spill] sm:$0xff] %v8345_v9  ;;  %v5710_v5 = vsel %vm8099_vm2, %v5663_v49, %v5647_v26  ;;  %v957_v41 = vrot.slane %v5564_v46, 1 }
  0x65   :  { %5115 = vrcp.f32 %v324_v42  ;;  %4246 = vmatprep.subr.bf16.mxu0 %v4991_v57  ;;  %v958_v42 = vrot.slane %v5569_v28, 1  ;;  %vm5731_vm9 = vcmp.ne.s32.totalorder %v410_v45, 0  ;;  %v424_v3 = vand.u32 7, %v5685_v60 }
  0x66   :  { %5117 = vrcp.f32 %v325_v50  ;;  %v4994_v50 = vld [vmem:[%s8086_s4 + $0x28] sm:$0xff]   ;;  %v1114_v13 = vsel %vm5658_vm5, %v5710_v5, 0.0  ;;  %v984_v60 = vsel %vm8099_vm2, %v5625_v19, %v5663_v49  ;;  %v5857_v33 = vrot.slane %v5580_v58, 7 }
  0x67   :  { %5119 = vpow2.f32 %v4128_v47  ;;  %v4993_v47 = vld [vmem:[%s8086_s4 + $0x68] sm:$0xff]   ;;  %v5771_v45 = vsel %vm8099_vm2, %v957_v41, %v958_v42  ;;  %vm5797_vm11 = vcmp.ne.s32.totalorder %v424_v3, 7  ;;  %vm5846_vm13 = vcmp.ne.s32.totalorder %v424_v3, 0 }
  0x68   :  { %4609 = vrot.lane.b32.xlu0 %v4613_v37, %s5225_s16  ;;  %v417_v37 = vand.u32 7, %v379_v17  ;;  %4247 = vmatpush3.bf16.msra.mxu0 %v4992_v34  ;;  %v4995_v17 = vld [vmem:[%s8086_s4 + $0x70] sm:$0xff]   ;;  %v5787_v34 = vadd.s32 56, %v5590_v8  ;;  %8372 = vst [vmem:[#allocation34_spill] sm:$0xff] %v5857_v33  ;;  %v8496_v32 = vld [vmem:[#allocation18_spill] sm:$0xff] }
  0x69   :  { %v5106_v63 = vpop.eup %5105  ;;  %4248 = vmatprep.subr.bf16.mxu0 %v4993_v47  ;;  %v5812_v47 = vrot.slane %v5580_v58, 1 }
  0x6a   :  { %v5108_v15 = vpop.eup %5107  ;;  %v5628_v20 = vmul.f32 %v5106_v63, %v5512_v1  ;;  %vm5727_vm8 = vcmp.ne.s32.totalorder %v417_v37, 7  ;;  %vm5735_vm10 = vcmp.ne.s32.totalorder %v417_v37, 0  ;;  %v8353_v63 = vmov 0 }
  0x6b   :  { %v5110_v23 = vpop.eup %5109  ;;  %v5635_v44 = vmul.f32 %v5108_v15, %v5516_v7  ;;  %v956_v7 = vrot.slane %v5549_v25, 1  ;;  %v8348_v61 = vsel %vm5727_vm8, 4294967295, %v8347_v61  ;;  %v8354_v63 = vsel %vm5735_vm10, 4294967295, %v8353_v63 }
  0x6c   :  { %v4623_v1 = vpack.i.bf16 %v5628_v20, %v8094_v56  ;;  %v5643_v54 = vmul.f32 %v5110_v23, %v5520_v10  ;;  %4619 = vrot.lane.b32.xlu0 %v4618_v16, %s5225_s16  ;;  %v8337_v10 = vmov 0  ;;  %8349 = vst [vmem:[#allocation23_spill] sm:$0xff] %v8348_v61  ;;  %v8350_v16 = vmov 0  ;;  %8355 = vst [vmem:[#allocation25_spill] sm:$0xff] %v8354_v63  ;;  %4249 = vmatpush3.bf16.msra.mxu0 %v4994_v50  ;;  %v4998_v50 = vld [vmem:[%s8086_s4 + $0x78] sm:$0xff]  }
  0x6d   :  { %8329 = vst [vmem:[#allocation15_spill] sm:$0xff] %v5635_v44  ;;  %v5112_v55 = vpop.eup %5111  ;;  %v8338_v10 = vsel %vm5658_vm5, 4294967295, %v8337_v10  ;;  %v8351_v16 = vsel %vm5731_vm9, 4294967295, %v8350_v16  ;;  %v5760_v21 = vsel %vm8099_vm2, %v956_v7, %v957_v41  ;;  %v431_v23 = vand.u32 7, %v5688_v4  ;;  %4250 = vmatprep.subr.bf16.mxu0 %v4995_v17  ;;  %v5000_v17 = vld [vmem:[%s8086_s4 + $0x88] sm:$0xff]  }
  0x6e   :  { %8339 = vst [vmem:[#allocation19_spill] sm:$0xff] %v8338_v10  ;;  %v5114_v29 = vpop.eup %5113  ;;  %4624 = vrot.lane.b32.xlu1 %v4623_v1, %s5224_s15  ;;  %v4633_v30 = vpack.i.bf16 %v5643_v54, %v5635_v44  ;;  %v5672_v31 = vmul.f32 %v5112_v55, %v5526_v52  ;;  %8352 = vst [vmem:[#allocation24_spill] sm:$0xff] %v8351_v16  ;;  %v876_v1 = vrot.slane %v5564_v46, 7  ;;  %v8096_v55 = vrot.slane %v5569_v28, 7 }
  0x6f   :  { %v5116_v35 = vpop.eup %5115  ;;  %v5682_v36 = vmul.f32 %v5114_v29, %v5530_v62  ;;  %v5698_v62 = vsel %vm8099_vm2, %v5647_v26, %v956_v7  ;;  %v4996_v7 = vld [vmem:[%s8086_s4 + $0x30] sm:$0xff]   ;;  %v8357_v4 = vmov 0  ;;  %v959_v41 = vrot.slane %v5573_v59, 1 }
  0x70   :  { %v5118_v52 = vpop.eup %5117  ;;  %4629 = vrot.lane.b32.xlu0 %v4633_v30, %s5225_s16  ;;  %v5722_v51 = vmul.f32 %v5116_v35, %v5534_v0  ;;  %v5744_v0 = vsel %vm8105_vm1, %v5692_v2, %v875_v6  ;;  %v1115_v15 = vsel %vm5674_vm6, %v5698_v62, 0.0  ;;  %v4997_v35 = vld [vmem:[%s8086_s4 + $0x80] sm:$0xff]   ;;  %v8358_v4 = vsel %vm5797_vm11, 4294967295, %v8357_v4  ;;  %4251 = vmatpush3.bf16.msra.mxu0 %v4996_v7 }
  0x71   :  { %v5120_v39 = vpop.eup %5119  ;;  %v4638_v40 = vpack.i.bf16 %v5682_v36, %v5672_v31  ;;  %v5725_v14 = vmul.f32 %v5118_v52, %v5537_v11  ;;  %8356 = vst [vmem:[#allocation26_spill] sm:$0xff] %v5744_v0  ;;  %v1225_v11 = vsel %vm8105_vm1, %v5622_v18, %v5692_v2  ;;  %v1227_v29 = vsel %vm5654_vm4, %v5744_v0, 0.0  ;;  %8359 = vst [vmem:[#allocation27_spill] sm:$0xff] %v8358_v4  ;;  %v8494_v4 = vld [vmem:[#allocation17_spill] sm:$0xff] }
  0x72   :  { %4634 = vrot.lane.b32.xlu1 %v4633_v30, %s5224_s15  ;;  %v326_v53 = vadd.f32 1.0, %v5120_v39  ;;  %v1226_v57 = vsel %vm5650_vm3, %v1225_v11, 0.0  ;;  %v5784_v30 = vadd.s32 48, %v5590_v8  ;;  %v4658_v37 = vpack.i.bf16 %v1115_v15, %v1114_v13  ;;  %4462 = vmatprep.subr.bf16.mxu1 %v4997_v35 }
  0x73   :  { %v4648_v12 = vpack.i.bf16 %v5725_v14, %v5722_v51  ;;  %v5802_v52 = vadd.s32 64, %v5590_v8  ;;  %v1116_v39 = vsel %vm5700_vm7, %v5760_v21, 0.0  ;;  %v5822_v11 = vsel %vm8105_vm1, %v876_v1, %v8096_v55  ;;  %4463 = vmatpush3.bf16.msra.mxu1 %v4997_v35  ;;  %4252 = vmatprep.subr.bf16.mxu0 %v4998_v50 }
  0x74   :  { %4639 = vrot.lane.b32.xlu0 %v4638_v40, %s5225_s16  ;;  %5121 = vrcp.f32 %v326_v53  ;;  %v4663_v53 = vpack.i.bf16 %v1227_v29, %v1226_v57  ;;  %8360 = vst [vmem:[#allocation28_spill] sm:$0xff] %v5822_v11  ;;  %v5826_v13 = vsel %vm8105_vm1, %v875_v6, %v876_v1  ;;  %vm5828_vm12 = vcmp.ne.s32.totalorder %v431_v23, 7  ;;  %4464 = vmatprep.subr.bf16.mxu1 %v5000_v17 }
  0x75   :  { %8361 = vst [vmem:[#allocation29_spill] sm:$0xff] %v5826_v13  ;;  %v8362_v15 = vmov 0  ;;  %v1018_v7 = vsel %vm5658_vm5, %v984_v60, 0.0  ;;  %v1019_v6 = vsel %vm5674_vm6, %v5710_v5, 0.0  ;;  %v5844_v1 = vrot.slane %v5553_v24, 7 }
  0x76   :  { %4644 = vrot.lane.b32.xlu1 %v4638_v40, %s5224_s15  ;;  %v1117_v40 = vsel %vm5727_vm8, %v5771_v45, 0.0  ;;  %v8363_v15 = vsel %vm5828_vm12, 4294967295, %v8362_v15  ;;  %v8366_v57 = vmov 0  ;;  %vm5851_vm14 = vcmp.ne.s32.totalorder %v431_v23, 0 }
  0x77   :  { %8364 = vst [vmem:[#allocation30_spill] sm:$0xff] %v8363_v15  ;;  %8365 = vst [vmem:[#allocation31_spill] sm:$0xff] %v5844_v1  ;;  %v8367_v57 = vsel %vm5846_vm13, 4294967295, %v8366_v57  ;;  %v4678_v29 = vpack.i.bf16 %v1117_v40, %v1116_v39  ;;  %v8369_v35 = vmov 0  ;;  %v878_v60 = vrot.slane %v5573_v59, 7  ;;  %4465 = vmatpush3.bf16.msra.mxu1 %v5000_v17 }
  0x78   :  { %4649 = vrot.lane.b32.xlu0 %v4648_v12, %s5225_s16  ;;  %8368 = vst [vmem:[#allocation32_spill] sm:$0xff] %v8367_v57  ;;  %v8370_v35 = vsel %vm5851_vm14, 4294967295, %v8369_v35  ;;  %v1228_v5 = vsel %vm5731_vm9, %v5826_v13, 0.0  ;;  %v1229_v3 = vsel %vm5735_vm10, %v5822_v11, 0.0  ;;  %v5868_v23 = vsel %vm8099_vm2, %v959_v41, %v5812_v47 }
  0x79   :  { %8371 = vst [vmem:[#allocation33_spill] sm:$0xff] %v8370_v35  ;;  %v4668_v40 = vpack.i.bf16 %v1019_v6, %v1018_v7  ;;  %v438_v50 = vand.u32 7, %v5784_v30  ;;  %v385_v56 = vadd.s32 72, %v5590_v8  ;;  %v4683_v30 = vpack.i.bf16 %v1229_v3, %v1228_v5 }
  0x7a   :  { %4654 = vrot.lane.b32.xlu1 %v4648_v12, %s5224_s15  ;;  %v4999_v12 = vld [vmem:[%s8086_s4 + $0x38] sm:$0xff]   ;;  %s5226_s4 = smov 64   ;;  %v8375_v17 = vrot.slane %v5569_v28, 7  ;;  %v5915_v6 = vrot.slane %v5628_v20, 1  ;;  %v8377_v3 = vmov 0  ;;  %v1021_v58 = vsel %vm5727_vm8, %v5760_v21, 0.0 }
  0x7b   :  { %4253 = vmatpush3.bf16.msra.mxu0 %v4999_v12  ;;  %v445_v12 = vand.u32 7, %v5787_v34  ;;  %vm5924_vm15 = vcmp.ne.s32.totalorder %v438_v50, 7  ;;  %v8383_v28 = vmov 0  ;;  %v6059_v24 = vadd.s32 120, %v5590_v8 }
  0x7c   :  { %4659 = vrot.lane.b32.xlu0 %v4658_v37, %s5224_s15  ;;  %v5874_v37 = vsel %vm8099_vm2, %v958_v42, %v959_v41  ;;  %v5887_v42 = vsel %vm8105_vm1, %v5844_v1, %v5692_v2  ;;  %v452_v41 = vand.u32 7, %v5802_v52  ;;  %v5903_v2 = vsel %vm8105_vm1, %v878_v60, %v5857_v33 }
  0x7d   :  { %8373 = vst [vmem:[#allocation35_spill] sm:$0xff] %v5887_v42  ;;  %v1118_v34 = vsel %vm5797_vm11, %v5874_v37, 0.0  ;;  %v5912_v7 = vsel %vm8105_vm1, %v8375_v17, %v878_v60  ;;  %v1067_v5 = vsel %vm5654_vm4, %v5887_v42, 0.0  ;;  %v8378_v3 = vsel %vm5924_vm15, 4294967295, %v8377_v3 }
  0x7e   :  { %v5122_v39 = vpop.eup %5121  ;;  %4664 = vrot.lane.b32.xlu1 %v4663_v53, %s5226_s4  ;;  %v5891_v53 = vadd.s32 80, %v5590_v8  ;;  %8376 = vst [vmem:[#allocation37_spill] sm:$0xff] %v5912_v7  ;;  %8379 = vst [vmem:[#allocation38_spill] sm:$0xff] %v8378_v3  ;;  %vm5928_vm0 = vcmp.ne.s32.totalorder %v445_v12, 7  ;;  %v459_v60 = vand.u32 7, %v385_v56  ;;  %vm5942_vm2 = vcmp.ne.s32.totalorder %v438_v50, 0 }
  0x7f   :  { %v5881_v55 = vmul.f32 %v5122_v39, %v5586_v38  ;;  %v1119_v38 = vsel %vm5828_vm12, %v5868_v23, 0.0  ;;  %v8380_v39 = vmov 0  ;;  %v8384_v28 = vsel %vm5942_vm2, 4294967295, %v8383_v28 }
  0x80   :  { %4679 = vrot.lane.b32.xlu0 %v4678_v29, %s5224_s15  ;;  %v5918_v29 = vrot.slane %v5602_v48, 1  ;;  %v8381_v39 = vsel %vm5928_vm0, 4294967295, %v8380_v39  ;;  %8385 = vst [vmem:[#allocation40_spill] sm:$0xff] %v8384_v28  ;;  %v4698_v59 = vpack.i.bf16 %v1119_v38, %v1118_v34  ;;  %v1230_v42 = vsel %vm5846_vm13, %v5912_v7, 0.0 }
  0x81   :  { %v5906_v52 = vrot.slane %v5881_v55, 7  ;;  %8382 = vst [vmem:[#allocation39_spill] sm:$0xff] %v8381_v39  ;;  %v1231_v25 = vsel %vm5851_vm14, %v5903_v2, 0.0  ;;  %v8388_v34 = vmov 0  ;;  %v5970_v38 = vrot.slane %v5602_v48, 7 }
  0x82   :  { %4669 = vrot.lane.b32.xlu1 %v4668_v40, %s5226_s4  ;;  %v1020_v40 = vsel %vm5700_vm7, %v5698_v62, 0.0  ;;  %vm5972_vm8 = vcmp.ne.s32.totalorder %v452_v41, 7  ;;  %vm5976_vm7 = vcmp.ne.s32.totalorder %v459_v60, 7  ;;  %v1069_v48 = vsel %vm5735_vm10, %v5826_v13, 0.0 }
  0x83   :  { %8374 = vst [vmem:[#allocation36_spill] sm:$0xff] %v5906_v52  ;;  %v1065_v17 = vsel %vm8105_vm1, %v5906_v52, %v5844_v1  ;;  %vm8386_vm1 = vcmp.lt.s32.totalorder %v5590_v8, 7  ;;  %v4688_v27 = vpack.i.bf16 %v1021_v58, %v1020_v40  ;;  %v4703_v43 = vpack.i.bf16 %v1231_v25, %v1230_v42 }
  0x84   :  { %v1066_v56 = vsel %vm5650_vm3, %v1065_v17, 0.0  ;;  %4684 = vrot.lane.b32.xlu0 %v4683_v30, %s5226_s4  ;;  %v1105_v50 = vsel %vm8386_vm1, %v5918_v29, %v5915_v6  ;;  %vm8387_vm4 = vmmov %vm8386_vm1  ;;  %vm5965_vm3 = vcmp.ne.s32.totalorder %v445_v12, 0  ;;  %v8394_v17 = vmov 0 }
  0x85   :  { %v4673_v46 = vpack.i.bf16 %v1067_v5, %v1066_v56  ;;  %v5963_v30 = vsel %vm8387_vm4, %v5812_v47, %v5918_v29  ;;  %v8389_v34 = vsel %vm5965_vm3, 4294967295, %v8388_v34  ;;  %v8391_v5 = vmov 0 }
  0x86   :  { %8390 = vst [vmem:[#allocation41_spill] sm:$0xff] %v8389_v34  ;;  %v8392_v5 = vsel %vm5972_vm8, 4294967295, %v8391_v5  ;;  %v8395_v17 = vsel %vm5976_vm7, 4294967295, %v8394_v17  ;;  %v387_v56 = vadd.s32 88, %v5590_v8  ;;  %v1068_v12 = vsel %vm5731_vm9, %v5744_v0, 0.0 }
  0x87   :  { %8393 = vst [vmem:[#allocation42_spill] sm:$0xff] %v8392_v5  ;;  %8396 = vst [vmem:[#allocation43_spill] sm:$0xff] %v8395_v17  ;;  %4674 = vrot.lane.b32.xlu1 %v4673_v46, %s5225_s16  ;;  %v1120_v1 = vsel %vm5924_vm15, %v5963_v30, 0.0  ;;  %v1121_v22 = vsel %vm5928_vm0, %v1105_v50, 0.0  ;;  %v5995_v46 = vrot.slane %v5635_v44, 1  ;;  %v964_v58 = vrot.slane %v5643_v54, 1 }
  0x88   :  { %4699 = vrot.lane.b32.xlu0 %v4698_v59, %s5224_s15  ;;  %vm5998_vm1 = vcmp.ne.s32.totalorder %v452_v41, 0  ;;  %v8397_v40 = vmov 0  ;;  %vm6002_vm4 = vcmp.ne.s32.totalorder %v459_v60, 0  ;;  %v8400_v25 = vmov 0 }
  0x89   :  { %v8398_v40 = vsel %vm5998_vm1, 4294967295, %v8397_v40  ;;  %v8401_v25 = vsel %vm6002_vm4, 4294967295, %v8400_v25  ;;  %v466_v59 = vand.u32 7, %v5891_v53  ;;  %v6008_v42 = vadd.s32 96, %v5590_v8 }
  0x8a   :  { %8399 = vst [vmem:[#allocation44_spill] sm:$0xff] %v8398_v40  ;;  %8402 = vst [vmem:[#allocation45_spill] sm:$0xff] %v8401_v25  ;;  %v6011_v50 = vadd.s32 104, %v5590_v8  ;;  %vm8403_vm10 = vcmp.lt.s32.totalorder %v5590_v8, 1  ;;  %v473_v13 = vand.u32 7, %v387_v56  ;;  %v6024_v53 = vadd.s32 112, %v5590_v8 }
  0x8b   :  { %v6017_v41 = vsel %vm8403_vm10, %v5857_v33, %v5970_v38  ;;  %vm8404_vm9 = vmmov %vm8403_vm10  ;;  %4689 = vrot.lane.b32.xlu1 %v4688_v27, %s5226_s4  ;;  %v4693_v63 = vpack.i.bf16 %v1069_v48, %v1068_v12  ;;  %v1022_v0 = vsel %vm5797_vm11, %v5771_v45, 0.0  ;;  %v1023_v33 = vsel %vm5828_vm12, %v5874_v37, 0.0 }
  0x8c   :  { %v1218_v60 = vsel %vm8404_vm9, %v5970_v38, %v5622_v18  ;;  %v4718_v16 = vpack.i.bf16 %v1121_v22, %v1120_v1  ;;  %4704 = vrot.lane.b32.xlu0 %v4703_v43, %s5226_s4  ;;  %vm8405_vm9 = vcmp.lt.s32.totalorder %v5590_v8, 7  ;;  %v6046_v27 = vrot.slane %v5635_v44, 7 }
  0x8d   :  { %v6037_v56 = vsel %vm8405_vm9, %v5995_v46, %v964_v58  ;;  %vm8406_vm10 = vmmov %vm8405_vm9  ;;  %v1232_v22 = vsel %vm5942_vm2, %v6017_v41, 0.0  ;;  %v1233_v43 = vsel %vm5965_vm3, %v1218_v60, 0.0  ;;  %vm6054_vm9 = vcmp.ne.s32.totalorder %v466_v59, 7 }
  0x8e   :  { %v6043_v48 = vsel %vm8406_vm10, %v5915_v6, %v5995_v46  ;;  %v8407_v1 = vmov 0  ;;  %v4708_v26 = vpack.i.bf16 %v1023_v33, %v1022_v0  ;;  %v1070_v44 = vsel %vm5846_vm13, %v5822_v11, 0.0 }
  0x8f   :  { %v8408_v1 = vsel %vm6054_vm9, 4294967295, %v8407_v1  ;;  %v1071_v12 = vsel %vm5851_vm14, %v5912_v7, 0.0  ;;  %4694 = vrot.lane.b32.xlu1 %v4693_v63, %s5225_s16  ;;  %v977_v60 = vsel %vm8406_vm10, %v5812_v47, %v5625_v19  ;;  %v1122_v33 = vsel %vm5972_vm8, %v6043_v48, 0.0 }
  0x90   :  { %8409 = vst [vmem:[#allocation46_spill] sm:$0xff] %v8408_v1  ;;  %v1123_v0 = vsel %vm5976_vm7, %v6037_v56, 0.0  ;;  %v965_v35 = vrot.slane %v5672_v31, 1  ;;  %4719 = vrot.lane.b32.xlu0 %v4718_v16, %s5224_s15  ;;  %v4723_v52 = vpack.i.bf16 %v1233_v43, %v1232_v22  ;;  %v8410_v63 = vrot.slane %v5643_v54, 7 }
  0x91   :  { %vm8411_vm14 = vcmp.lt.s32.totalorder %v5590_v8, 1  ;;  %vm6092_vm13 = vcmp.ne.s32.totalorder %v473_v13, 7  ;;  %v8413_v11 = vmov 0  ;;  %v4713_v57 = vpack.i.bf16 %v1071_v12, %v1070_v44 }
  0x92   :  { %v6086_v7 = vsel %vm8411_vm14, %v6046_v27, %v8410_v63  ;;  %vm8412_vm10 = vmmov %vm8411_vm14  ;;  %v8414_v11 = vsel %vm6092_vm13, 4294967295, %v8413_v11  ;;  %v966_v16 = vrot.slane %v5682_v36, 1  ;;  %vm6097_vm7 = vcmp.ne.s32.totalorder %v473_v13, 0 }
  0x93   :  { %v1217_v47 = vsel %vm8412_vm10, %v5622_v18, %v6046_v27  ;;  %8415 = vst [vmem:[#allocation47_spill] sm:$0xff] %v8414_v11  ;;  %v8416_v22 = vmov 0  ;;  %v1279_v63 = vsel %vm5828_vm12, %v5963_v30, 0.0  ;;  %v1024_v18 = vsel %vm5924_vm15, %v5868_v23, 0.0  ;;  %4709 = vrot.lane.b32.xlu1 %v4708_v26, %s5226_s4 }
  0x94   :  { %v8417_v22 = vsel %vm6097_vm7, 4294967295, %v8416_v22  ;;  %v1025_v49 = vsel %vm5928_vm0, %v977_v60, 0.0  ;;  %v4738_v44 = vpack.i.bf16 %v1123_v0, %v1122_v33  ;;  %vm6110_vm14 = vcmp.ne.s32.totalorder %v466_v59, 0  ;;  %4724 = vrot.lane.b32.xlu0 %v4723_v52, %s5226_s4 }
  0x95   :  { %8418 = vst [vmem:[#allocation48_spill] sm:$0xff] %v8417_v22  ;;  %v8419_v12 = vmov 0  ;;  %v1234_v13 = vsel %vm5998_vm1, %v1217_v47, 0.0  ;;  %v1235_v30 = vsel %vm6002_vm4, %v6086_v7, 0.0  ;;  %vm8422_vm10 = vcmp.lt.s32.totalorder %v5590_v8, 7 }
  0x96   :  { %v8420_v12 = vsel %vm6110_vm14, 4294967295, %v8419_v12  ;;  %v6122_v43 = vsel %vm8422_vm10, %v964_v58, %v965_v35  ;;  %v884_v60 = vrot.slane %v5672_v31, 7  ;;  %v1274_v26 = vsel %vm5658_vm5, %v5698_v62, 0.0 }
  0x97   :  { %8421 = vst [vmem:[#allocation49_spill] sm:$0xff] %v8420_v12  ;;  %v1275_v33 = vsel %vm5674_vm6, %v5760_v21, 0.0  ;;  %vm8423_vm12 = vnez %v8345_v9  ;;  %v6138_v58 = vsel %vm8422_vm10, %v965_v35, %v966_v16  ;;  %vm8424_vm4 = vnez %v8348_v61  ;;  %vm8425_vm6 = vmmov %vm8422_vm10  ;;  %4714 = vrot.lane.b32.xlu1 %v4713_v57, %s5225_s16 }
  0x98   :  { %v1276_v0 = vsel %vm8423_vm12, %v5771_v45, 0.0  ;;  %v1810_v47 = vpack.c.bf16 %v1275_v33, %v1274_v26  ;;  %v1277_v52 = vsel %vm8424_vm4, %v5874_v37, 0.0  ;;  %v1278_v62 = vsel %vm5797_vm11, %v5868_v23, 0.0  ;;  %vm8426_vm10 = vmmov %vm8425_vm6  ;;  %4739 = vrot.lane.b32.xlu0 %v4738_v44, %s5224_s15 }
  0x99   :  { %v1813_v59 = vpack.c.bf16 %v1277_v52, %v1276_v0  ;;  %v1816_v15 = vpack.c.bf16 %v1279_v63, %v1278_v62  ;;  %v1265_v21 = vsel %vm8425_vm6, %v5625_v19, %v5995_v46  ;;  %v1266_v45 = vsel %vm8426_vm10, %v5918_v29, %v5625_v19 }
  0x9a   :  { %v4728_v35 = vpack.i.bf16 %v1025_v49, %v1024_v18  ;;  %v1072_v37 = vsel %vm5942_vm2, %v5903_v2, 0.0  ;;  %v1073_v23 = vsel %vm5965_vm3, %v6017_v41, 0.0  ;;  %v6162_v63 = vrot.slane %v5628_v20, 7 }
  0x9b   :  { %vm8427_vm6 = vcmask 261120   ;;  %v4743_v46 = vpack.i.bf16 %v1235_v30, %v1234_v13  ;;  %v976_v18 = vsel %vm8426_vm10, %v5625_v19, %v5915_v6  ;;  %v1124_v49 = vsel %vm6054_vm9, %v6122_v43, 0.0 }
  0x9c   :  { %4466 = vmatprep.mubr.msk.bf16.mxu1 %vm8427_vm6, %v1810_v47  ;;  %v1125_v57 = vsel %vm6092_vm13, %v6138_v58, 0.0  ;;  %vm8428_vm11 = vmmov %vm8427_vm6  ;;  %v8429_v29 = vrot.slane %v5682_v36, 7  ;;  %vm8430_vm6 = vcmp.lt.s32.totalorder %v5590_v8, 1  ;;  %v967_v44 = vrot.slane %v5722_v51, 1  ;;  %4729 = vrot.lane.b32.xlu1 %v4728_v35, %s5226_s4 }
  0x9d   :  { %4467 = vmatmul.mubr.msk.bf16.vlgmr.msra.gmra.mrb[0].mxu1 %vm8428_vm11, %v1813_v59  ;;  %vm8431_vm5 = vmmov %vm8428_vm11  ;;  %v1280_v6 = vsel %vm5924_vm15, %v1266_v45, 0.0  ;;  %v1281_v13 = vsel %vm5928_vm0, %v1265_v21, 0.0  ;;  %v8432_v30 = vrot.slane %v5643_v54, 7  ;;  %v8434_v26 = vand.u32 7, %v6008_v42  ;;  %4744 = vrot.lane.b32.xlu0 %v4743_v46, %s5226_s4 }
  0x9e   :  { %v6181_v41 = vsel %vm8430_vm6, %v884_v60, %v8429_v29  ;;  %4470 = vmatprep.mubr.msk.bf16.mxu1 %vm8431_vm5, %v1816_v15  ;;  %vm8433_vm11 = vmmov %vm8430_vm6  ;;  %v8435_v33 = vmov 0  ;;  %v8438_v15 = vand.u32 7, %v6011_v50  ;;  %v8439_v0 = vmov 0 }
  0x9f   :  { %v6193_v59 = vsel %vm8433_vm11, %v8432_v30, %v884_v60  ;;  %vm6197_vm10 = vcmp.ne.s32.totalorder %v8434_v26, 7  ;;  %v6208_v47 = vrot.slane %v5725_v14, 1  ;;  %v4733_v52 = vpack.i.bf16 %v1073_v23, %v1072_v37  ;;  %vm8443_vm15 = vmmov %vm8433_vm11 }
  0xa0   :  { %v8436_v33 = vsel %vm6197_vm10, 4294967295, %v8435_v33  ;;  %vm6203_vm5 = vcmp.ne.s32.totalorder %v8438_v15, 7  ;;  %v1026_v60 = vsel %vm5972_vm8, %v976_v18, 0.0  ;;  %vm8442_vm6 = vnez %v8395_v17 }
  0xa1   :  { %8437 = vst [vmem:[#allocation50_spill] sm:$0xff] %v8436_v33  ;;  %v8440_v0 = vsel %vm6203_vm5, 4294967295, %v8439_v0  ;;  %v1027_v62 = vsel %vm8442_vm6, %v6043_v48, 0.0  ;;  %v6220_v21 = vsel %vm8433_vm11, %v6162_v63, %v6046_v27  ;;  %v4758_v45 = vpack.i.bf16 %v1125_v57, %v1124_v49  ;;  %4734 = vrot.lane.b32.xlu1 %v4733_v52, %s5225_s16 }
  0xa2   :  { %8441 = vst [vmem:[#allocation51_spill] sm:$0xff] %v8440_v0  ;;  %v1057_v35 = vsel %vm8443_vm15, %v5970_v38, %v6162_v63  ;;  %v1237_v37 = vsel %vm6097_vm7, %v6181_v41, 0.0  ;;  %v1819_v23 = vpack.c.bf16 %v1281_v13, %v1280_v6  ;;  %v1236_v48 = vsel %vm6110_vm14, %v6193_v59, 0.0 }
  0xa3   :  { %vm8444_vm11 = vcmp.lt.s32.totalorder %v5590_v8, 7  ;;  %v1282_v46 = vsel %vm5972_vm8, %v6037_v56, 0.0  ;;  %v1283_v38 = vsel %vm8442_vm6, %v6122_v43, 0.0  ;;  %v886_v49 = vrot.slane %v5722_v51, 7  ;;  %4759 = vrot.lane.b32.xlu0 %v4758_v45, %s5224_s15 }
  0xa4   :  { %v6235_v27 = vsel %vm8444_vm11, %v966_v16, %v967_v44  ;;  %vm8445_vm15 = vmmov %vm8444_vm11  ;;  %v6250_v57 = vrot.slane %v5725_v14, 7  ;;  %v1822_v16 = vpack.c.bf16 %v1283_v38, %v1282_v46  ;;  %v4748_v29 = vpack.i.bf16 %v1027_v62, %v1026_v60 }
  0xa5   :  { %v6246_v18 = vsel %vm8445_vm15, %v967_v44, %v6208_v47  ;;  %v8446_v6 = vmov %v8434_v26  ;;  %v8447_v13 = vmov 0  ;;  %v494_v30 = vand.u32 7, %v6024_v53 }
  0xa6   :  { %vm6255_vm11 = vcmp.ne.s32.totalorder %v8446_v6, 0  ;;  %v1074_v44 = vsel %vm5998_vm1, %v1057_v35, 0.0  ;;  %vm8450_vm15 = vnez %v8401_v25  ;;  %v4763_v15 = vpack.i.bf16 %v1237_v37, %v1236_v48  ;;  %4749 = vrot.lane.b32.xlu1 %v4748_v29, %s5226_s4 }
  0xa7   :  { %v8448_v13 = vsel %vm6255_vm11, 4294967295, %v8447_v13  ;;  %v1075_v26 = vsel %vm8450_vm15, %v6220_v21, 0.0  ;;  %v501_v52 = vand.u32 7, %v6059_v24  ;;  %vm8451_vm6 = vcmask 261120  }
  0xa8   :  { %8449 = vst [vmem:[#allocation52_spill] sm:$0xff] %v8448_v13  ;;  %4471 = vmatmul.mubr.msk.bf16.gmra.mrb[4].mxu1 %vm8451_vm6, %v1819_v23  ;;  %v1126_v42 = vsel %vm6197_vm10, %v6235_v27, 0.0  ;;  %v1127_v53 = vsel %vm6203_vm5, %v6246_v18, 0.0  ;;  %vm8452_vm8 = vmmov %vm8451_vm6  ;;  %v1284_v60 = vsel %vm6054_vm9, %v6138_v58, 0.0  ;;  %v1285_v24 = vsel %vm6092_vm13, %v6235_v27, 0.0  ;;  %4764 = vrot.lane.b32.xlu0 %v4763_v15, %s5226_s4 }
  0xa9   :  { %4474 = vmatprep.mubr.msk.bf16.mxu1 %vm8452_vm8, %v1822_v16  ;;  %v8453_v62 = vand.u32 7, %v6011_v50  ;;  %v8454_v45 = vmov 0  ;;  %vm8457_vm0 = vcmp.lt.s32.totalorder %v5590_v8, 1  ;;  %v8458_v37 = vrot.slane %v5682_v36, 7 }
  0xaa   :  { %v6290_v35 = vsel %vm8457_vm0, %v886_v49, %v6250_v57  ;;  %vm8459_vm8 = vmmov %vm8457_vm0  ;;  %v1097_v48 = vrot.slane %v5881_v55, 1  ;;  %v4753_v50 = vpack.i.bf16 %v1075_v26, %v1074_v44  ;;  %v1028_v46 = vsel %vm6054_vm9, %v6037_v56, 0.0  ;;  %v8467_v26 = vld [vmem:[#allocation20_spill] sm:$0xff] }
  0xab   :  { %vm6283_vm6 = vcmp.ne.s32.totalorder %v8453_v62, 0  ;;  %v6296_v23 = vsel %vm8459_vm8, %v8458_v37, %v886_v49  ;;  %v1029_v38 = vsel %vm6092_vm13, %v6122_v43, 0.0  ;;  %v4778_v16 = vpack.i.bf16 %v1127_v53, %v1126_v42 }
  0xac   :  { %v8455_v45 = vsel %vm6283_vm6, 4294967295, %v8454_v45  ;;  %v1825_v6 = vpack.c.bf16 %v1285_v24, %v1284_v60  ;;  %v1238_v49 = vsel %vm6255_vm11, %v6296_v23, 0.0  ;;  %v1239_v29 = vsel %vm6283_vm6, %v6290_v35, 0.0  ;;  %4754 = vrot.lane.b32.xlu1 %v4753_v50, %s5225_s16 }
  0xad   :  { %8456 = vst [vmem:[#allocation53_spill] sm:$0xff] %v8455_v45  ;;  %vm6313_vm0 = vcmp.ne.s32.totalorder %v494_v30, 7  ;;  %v8460_v44 = vmov 0  ;;  %vm6317_vm8 = vcmp.ne.s32.totalorder %v501_v52, 7  ;;  %v8463_v56 = vmov 0  ;;  %4779 = vrot.lane.b32.xlu0 %v4778_v16, %s5224_s15 }
  0xae   :  { %v8461_v44 = vsel %vm6313_vm0, 4294967295, %v8460_v44  ;;  %v8464_v56 = vsel %vm6317_vm8, 4294967295, %v8463_v56  ;;  %vm8466_vm13 = vcmp.lt.s32.totalorder %v5590_v8, 7  ;;  %v4768_v42 = vpack.i.bf16 %v1029_v38, %v1028_v46  ;;  %v8473_v46 = vld [vmem:[#allocation36_spill] sm:$0xff] }
  0xaf   :  { %8462 = vst [vmem:[#allocation54_spill] sm:$0xff] %v8461_v44  ;;  %8465 = vst [vmem:[#allocation55_spill] sm:$0xff] %v8464_v56  ;;  %v1098_v43 = vsel %vm8466_vm13, %v6208_v47, %v1097_v48  ;;  %v1076_v53 = vsel %vm6110_vm14, %v6086_v7, 0.0  ;;  %v1077_v60 = vsel %vm6097_vm7, %v6193_v59, 0.0  ;;  %v4783_v24 = vpack.i.bf16 %v1239_v29, %v1238_v49 }
  0xb0   :  { %vm8468_vm9 = vmmov %vm8466_vm13  ;;  %vm8469_vm4 = vcmask 261120   ;;  %v1128_v62 = vsel %vm6313_vm0, %v1098_v43, 0.0  ;;  %vm6340_vm13 = vcmp.ne.s32.totalorder %v494_v30, 0  ;;  %v8470_v50 = vmov 0  ;;  %4769 = vrot.lane.b32.xlu1 %v4768_v42, %s5226_s4 }
  0xb1   :  { %v1113_v15 = vsel %vm8468_vm9, %v1097_v48, %v8467_v26  ;;  %4475 = vmatmul.mubr.msk.bf16.gmra.mrb[8].mxu1 %vm8469_vm4, %v1825_v6  ;;  %v8471_v50 = vsel %vm6340_vm13, 4294967295, %v8470_v50  ;;  %vm8474_vm9 = vcmp.lt.s32.totalorder %v5590_v8, 1  ;;  %vm6348_vm12 = vcmp.ne.s32.totalorder %v501_v52, 0  ;;  %v8478_v6 = vld [vmem:[#allocation13_spill] sm:$0xff]  ;;  %4784 = vrot.lane.b32.xlu0 %v4783_v24, %s5226_s4 }
  0xb2   :  { %v1129_v37 = vsel %vm6317_vm8, %v1113_v15, 0.0  ;;  %8472 = vst [vmem:[#allocation20_spill] sm:$0xff] %v8471_v50  ;;  %v1050_v38 = vsel %vm8474_vm9, %v6250_v57, %v8473_v46  ;;  %v8475_v16 = vmov 0  ;;  %vm8479_vm4 = vmmov %vm8474_vm9  ;;  %v4773_v30 = vpack.i.bf16 %v1077_v60, %v1076_v53  ;;  %v8487_v50 = vld [vmem:[#allocation7_spill] sm:$0xff] }
  0xb3   :  { %v8476_v16 = vsel %vm6348_vm12, 4294967295, %v8475_v16  ;;  %v1210_v49 = vsel %vm8479_vm4, %v8473_v46, %v8478_v6  ;;  %v1287_v29 = vsel %vm6203_vm5, %v1098_v43, 0.0  ;;  %v1030_v52 = vsel %vm6197_vm10, %v6138_v58, 0.0  ;;  %v8481_v58 = vld [vmem:[#allocation16_spill] sm:$0xff] }
  0xb4   :  { %8477 = vst [vmem:[#allocation36_spill] sm:$0xff] %v8476_v16  ;;  %v1031_v26 = vsel %vm6203_vm5, %v6235_v27, 0.0  ;;  %v4798_v15 = vpack.i.bf16 %v1129_v37, %v1128_v62  ;;  %v1240_v46 = vsel %vm6340_vm13, %v1050_v38, 0.0  ;;  %v1241_v42 = vsel %vm6348_vm12, %v1210_v49, 0.0  ;;  %4774 = vrot.lane.b32.xlu1 %v4773_v30, %s5225_s16  ;;  %v8489_v16 = vld [vmem:[#allocation5_spill] sm:$0xff] }
  0xb5   :  { %v1286_v43 = vsel %vm6197_vm10, %v6246_v18, 0.0  ;;  %vm8480_vm9 = vcmp.lt.s32.totalorder %v5590_v8, 7  ;;  %v4788_v37 = vpack.i.bf16 %v1031_v26, %v1030_v52  ;;  %v1032_v26 = vsel %vm6313_vm0, %v6246_v18, 0.0 }
  0xb6   :  { %v1258_v53 = vsel %vm8480_vm9, %v1097_v48, %v5625_v19  ;;  %vm8482_vm4 = vmmov %vm8480_vm9  ;;  %v1828_v60 = vpack.c.bf16 %v1287_v29, %v1286_v43  ;;  %4799 = vrot.lane.b32.xlu0 %v4798_v15, %s5224_s15  ;;  %v1078_v48 = vsel %vm6255_vm11, %v6181_v41, 0.0  ;;  %v1079_v29 = vsel %vm6283_vm6, %v6296_v23, 0.0 }
  0xb7   :  { %v1273_v27 = vsel %vm8482_vm4, %v5625_v19, %v8481_v58  ;;  %v1288_v24 = vsel %vm6313_vm0, %v1258_v53, 0.0  ;;  %v4803_v43 = vpack.i.bf16 %v1241_v42, %v1240_v46  ;;  %vm8483_vm9 = vcmask 261120  }
  0xb8   :  { %v1289_v62 = vsel %vm6317_vm8, %v1273_v27, 0.0  ;;  %4478 = vmatprep.mubr.msk.bf16.mxu1 %vm8483_vm9, %v1828_v60  ;;  %v985_v30 = vsel %vm8482_vm4, %v6208_v47, %v5625_v19  ;;  %vm8484_vm10 = vmmov %vm8483_vm9  ;;  %4789 = vrot.lane.b32.xlu1 %v4788_v37, %s5226_s4  ;;  %v4793_v52 = vpack.i.bf16 %v1079_v29, %v1078_v48  ;;  %v8485_v46 = vmov 0.0  }
  0xb9   :  { %v1831_v49 = vpack.c.bf16 %v1289_v62, %v1288_v24  ;;  %v1033_v15 = vsel %vm6317_vm8, %v985_v30, 0.0  ;;  %v4808_v42 = vpack.i.bf16 %v8485_v46, %v5881_v55  ;;  %v1080_v53 = vsel %vm6340_vm13, %v6290_v35, 0.0  ;;  %vm8488_vm0 = vmmov %vm8483_vm9 }
  0xba   :  { %4804 = vrot.lane.b32.xlu0 %v4803_v43, %s5226_s4  ;;  %v4813_v47 = vpack.i.bf16 %v1033_v15, %v1032_v26  ;;  %v1081_v58 = vsel %vm6348_vm12, %v1050_v38, 0.0  ;;  %vm8218_vm4 = vcmask 523264   ;;  %vm8217_vm8 = vcmask 785408   ;;  %vm8490_vm5 = vmmov %vm8488_vm0 }
  0xbb   :  { %4479 = vmatmul.mubr.msk.bf16.gmra.mrb[12].mxu1 %vm8484_vm10, %v1831_v49  ;;  %v4818_v18 = vpack.i.bf16 %v1081_v58, %v1080_v53  ;;  %vm8486_vm10 = vmmov %vm8483_vm9 }
  0xbc   :  { %4794 = vrot.lane.b32.xlu1 %v4793_v52, %s5225_s16 }
  0xbe   :  { %4809 = vrot.lane.b32.xlu0 %v4808_v42, %s5225_s16  ;;  %v951_v42 = vsel %vm6340_vm13, %v6296_v23, 0.0 }
  0xc0   :  { %4814 = vrot.lane.b32.xlu1 %v4813_v47, %s5226_s4  ;;  %v952_v47 = vsel %vm6348_vm12, %v6290_v35, 0.0  ;;  %vm8504_vm12 = vcmask 523264  }
  0xc1   :  { %vm8505_vm13 = vmmov %vm8504_vm12 }
  0xc4   :  { %4819 = vrot.lane.b32.xlu1 %v4818_v18, %s5225_s16 }
  0xcd   :  { %v6416_v27 = vpop.permute.xlu1 %4594 }
  0xce   :  { %v4585_v60 = vpop.permute.xlu0 %4584 }
  0xcf   :  { %v4587_v5 = vunpack.i.h.bf16 %v4585_v60  ;;  %v4586_v39 = vunpack.i.l.bf16 %v4585_v60  ;;  %v8500_v60 = vld [vmem:[#allocation6_spill] sm:$0xff] }
  0xd1   :  { %v6418_v62 = vpop.permute.xlu1 %4604 }
  0xd2   :  { %v4590_v24 = vpop.permute.xlu0 %4589 }
  0xd3   :  { %v4592_v3 = vunpack.i.h.bf16 %v4590_v24  ;;  %v4591_v17 = vunpack.i.l.bf16 %v4590_v24 }
  0xd5   :  { %v6422_v49 = vpop.permute.xlu1 %4614 }
  0xd6   :  { %v6420_v37 = vpop.permute.xlu0 %4599 }
  0xda   :  { %v6424_v48 = vpop.permute.xlu0 %4609 }
  0xde   :  { %v6426_v29 = vpop.permute.xlu0 %4619 }
  0xe0   :  { %v6428_v38 = vpop.permute.xlu1 %4624 }
  0xe2   :  { %v6430_v43 = vpop.permute.xlu0 %4629 }
  0xe4   :  { %v6432_v30 = vpop.permute.xlu1 %4634 }
  0xe6   :  { %v6434_v52 = vpop.permute.xlu0 %4639 }
  0xe8   :  { %v6436_v26 = vpop.permute.xlu1 %4644 }
  0xea   :  { %v6438_v15 = vpop.permute.xlu0 %4649 }
  0xec   :  { %v4655_v53 = vpop.permute.xlu1 %4654 }
  0xed   :  { %v4657_v58 = vunpack.i.h.bf16 %v4655_v53  ;;  %v4656_v18 = vunpack.i.l.bf16 %v4655_v53 }
  0xee   :  { %v4660_v56 = vpop.permute.xlu0 %4659 }
  0xef   :  { %v6447_v44 = vsel %vm8486_vm10, %v952_v47, %v4657_v58  ;;  %v6450_v33 = vsel %vm8483_vm9, %v951_v42, %v4656_v18  ;;  %v4662_v0 = vunpack.i.h.bf16 %v4660_v56  ;;  %v4661_v19 = vunpack.i.l.bf16 %v4660_v56  ;;  %v8492_v56 = vld [vmem:[#allocation31_spill] sm:$0xff] }
  0xf0   :  { %v4665_v11 = vpop.permute.xlu1 %4664  ;;  %vm8491_vm10 = vcmp.lt.s32.totalorder %v5590_v8, 1 }
  0xf1   :  { %v4667_v23 = vunpack.i.h.bf16 %v4665_v11  ;;  %v4666_v1 = vunpack.i.l.bf16 %v4665_v11  ;;  %v1724_v35 = vsel %vm8488_vm0, %v8487_v50, %v4661_v19  ;;  %v1725_v53 = vsel %vm8490_vm5, %v8489_v16, %v4662_v0  ;;  %vm8493_vm9 = vmmov %vm8491_vm10 }
  0xf2   :  { %v4680_v47 = vpop.permute.xlu0 %4679  ;;  %v904_v42 = vsel %vm8491_vm10, %v6250_v57, %v8478_v6  ;;  %v903_v58 = vsel %vm8493_vm9, %v8478_v6, %v8492_v56  ;;  %vm8495_vm5 = vnez %v8494_v4  ;;  %vm8497_vm0 = vnez %v8496_v32 }
  0xf3   :  { %v1740_v11 = vsel %vm8218_vm4, %v1724_v35, %v4666_v1  ;;  %v1741_v19 = vsel %vm8218_vm4, %v1725_v53, %v4667_v23  ;;  %v4682_v18 = vunpack.i.h.bf16 %v4680_v47  ;;  %v4681_v0 = vunpack.i.l.bf16 %v4680_v47 }
  0xf4   :  { %v4670_v50 = vpop.permute.xlu1 %4669  ;;  %v1756_v16 = vsel %vm8217_vm8, %v1740_v11, %v4591_v17  ;;  %v1757_v24 = vsel %vm8217_vm8, %v1741_v19, %v4592_v3  ;;  %v937_v57 = vsel %vm8495_vm5, %v904_v42, 0.0  ;;  %v938_v10 = vsel %vm8497_vm0, %v903_v58, 0.0  ;;  %v8498_v11 = vld [vmem:[#allocation8_spill] sm:$0xff] }
  0xf5   :  { %v1809_v61 = vpack.c.bf16 %v1757_v24, %v1756_v16  ;;  %v4672_v1 = vunpack.i.h.bf16 %v4670_v50  ;;  %v4671_v35 = vunpack.i.l.bf16 %v4670_v50  ;;  %v4602_v47 = vunpack.i.h.bf16 %v6420_v37 }
  0xf6   :  { %v4685_v56 = vpop.permute.xlu0 %4684  ;;  %v4601_v17 = vunpack.i.l.bf16 %v6420_v37  ;;  %vm8499_vm10 = vcmask 261120   ;;  %vm8506_vm5 = vcmask 785408  }
  0xf7   :  { %v4687_v23 = vunpack.i.h.bf16 %v4685_v56  ;;  %v4686_v53 = vunpack.i.l.bf16 %v4685_v56  ;;  %v1727_v3 = vsel %vm8499_vm10, %v8498_v11, %v4682_v18  ;;  %vm8501_vm9 = vmmov %vm8499_vm10  ;;  %1996 = vmatprep.mubr.bf16.mxu0 %v1809_v61 }
  0xf8   :  { %v1726_v19 = vsel %vm8501_vm9, %v8500_v60, %v4681_v0  ;;  %vm8502_vm8 = vmmov %vm8501_vm9 }
  0xf9   :  { %v1674_v42 = vsel %vm8502_vm8, %v937_v57, %v4586_v39  ;;  %vm8503_vm4 = vmmov %vm8502_vm8  ;;  %v4675_v16 = vpop.permute.xlu1 %4674  ;;  %v1742_v50 = vsel %vm8504_vm12, %v1726_v19, %v4686_v53  ;;  %v1743_v24 = vsel %vm8505_vm13, %v1727_v3, %v4687_v23  ;;  %v4597_v23 = vunpack.i.h.bf16 %v6416_v27  ;;  %v8513_v19 = vld [vmem:[#allocation24_spill] sm:$0xff] }
  0xfa   :  { %v1675_v58 = vsel %vm8503_vm4, %v938_v10, %v4587_v5  ;;  %v4677_v56 = vunpack.i.h.bf16 %v4675_v16  ;;  %v4676_v4 = vunpack.i.l.bf16 %v4675_v16  ;;  %v4700_v32 = vpop.permute.xlu0 %4699  ;;  %v1758_v37 = vsel %vm8506_vm5, %v1742_v50, %v4601_v17  ;;  %vm8507_vm0 = vmmov %vm8506_vm5  ;;  %v8512_v17 = vld [vmem:[#allocation35_spill] sm:$0xff] }
  0xfb   :  { %v1759_v18 = vsel %vm8507_vm0, %v1743_v24, %v4602_v47  ;;  %vm8508_vm10 = vmmov %vm8504_vm12  ;;  %v4702_v0 = vunpack.i.h.bf16 %v4700_v32  ;;  %v4701_v5 = vunpack.i.l.bf16 %v4700_v32  ;;  %v4596_v53 = vunpack.i.l.bf16 %v6416_v27 }
  0xfc   :  { %v1691_v11 = vsel %vm8508_vm10, %v1674_v42, %v4671_v35  ;;  %vm8509_vm9 = vmmov %vm8508_vm10  ;;  %v1812_v57 = vpack.c.bf16 %v1759_v18, %v1758_v37  ;;  %vm8514_vm12 = vnez %v8513_v19  ;;  %v8515_v35 = vld [vmem:[#allocation26_spill] sm:$0xff]  ;;  %v8516_v42 = vld [vmem:[#allocation25_spill] sm:$0xff]  ;;  %v4612_v24 = vunpack.i.h.bf16 %v6424_v48 }
  0xfd   :  { %v1692_v61 = vsel %vm8509_vm9, %v1675_v58, %v4672_v1  ;;  %vm8510_vm8 = vmmov %vm8507_vm0  ;;  %v4690_v3 = vpop.permute.xlu1 %4689  ;;  %v939_v47 = vsel %vm8514_vm12, %v8512_v17, 0.0  ;;  %vm8517_vm13 = vnez %v8516_v42  ;;  %v4611_v27 = vunpack.i.l.bf16 %v6424_v48  ;;  %v8520_v18 = vld [vmem:[#allocation9_spill] sm:$0xff] }
  0xfe   :  { %v1708_v39 = vsel %vm8510_vm8, %v1691_v11, %v4676_v4  ;;  %vm8511_vm4 = vmmov %vm8507_vm0  ;;  %v940_v1 = vsel %vm8517_vm13, %v8515_v35, 0.0  ;;  %v4705_v58 = vpop.permute.xlu0 %4704  ;;  %v4692_v4 = vunpack.i.h.bf16 %v4690_v3  ;;  %v4691_v16 = vunpack.i.l.bf16 %v4690_v3 }
  0xff   :  { %v1709_v10 = vsel %vm8511_vm4, %v1692_v61, %v4677_v56  ;;  %v4707_v32 = vunpack.i.h.bf16 %v4705_v58  ;;  %v4706_v50 = vunpack.i.l.bf16 %v4705_v58  ;;  %v8518_v56 = vld [vmem:[#allocation10_spill] sm:$0xff]  ;;  %vm8519_vm5 = vcmask 261120  }
 0x100   :  { %v1808_v60 = vpack.c.bf16 %v1709_v10, %v1708_v39  ;;  %v1729_v37 = vsel %vm8519_vm5, %v8518_v56, %v4702_v0  ;;  %vm8521_vm0 = vmmov %vm8519_vm5  ;;  %vm8524_vm8 = vcmask 523264   ;;  %vm8526_vm13 = vcmask 785408  }
 0x101   :  { %v1728_v11 = vsel %vm8521_vm0, %v8520_v18, %v4701_v5  ;;  %vm8522_vm10 = vmmov %vm8521_vm0  ;;  %v4695_v10 = vpop.permute.xlu1 %4694 }
 0x102   :  { %1997 = vmatmul.mubr.bf16.vlgmr.msra.gmra.mrb[0].mxu0 %v1808_v60  ;;  %v1676_v61 = vsel %vm8522_vm10, %v939_v47, %v4596_v53  ;;  %vm8523_vm9 = vmmov %vm8521_vm0  ;;  %v1744_v3 = vsel %vm8524_vm8, %v1728_v11, %v4706_v50  ;;  %v4697_v17 = vunpack.i.h.bf16 %v4695_v10  ;;  %v4696_v35 = vunpack.i.l.bf16 %v4695_v10  ;;  %v4720_v58 = vpop.permute.xlu0 %4719  ;;  %v8533_v11 = vld [vmem:[#allocation32_spill] sm:$0xff] }
 0x103   :  { %2004 = vmatprep.mubr.bf16.mxu0 %v1812_v57  ;;  %v1677_v39 = vsel %vm8523_vm9, %v940_v1, %v4597_v23  ;;  %vm8525_vm4 = vmmov %vm8524_vm8  ;;  %v1760_v48 = vsel %vm8526_vm13, %v1744_v3, %v4611_v27  ;;  %v4722_v57 = vunpack.i.h.bf16 %v4720_v58  ;;  %v4721_v47 = vunpack.i.l.bf16 %v4720_v58  ;;  %v8532_v27 = vld [vmem:[#allocation29_spill] sm:$0xff]  ;;  %v8538_v58 = vld [vmem:[#allocation12_spill] sm:$0xff] }
 0x104   :  { %v1745_v60 = vsel %vm8525_vm4, %v1729_v37, %v4707_v32  ;;  %vm8527_vm12 = vmmov %vm8526_vm13  ;;  %v4607_v32 = vunpack.i.h.bf16 %v6418_v62  ;;  %v4606_v50 = vunpack.i.l.bf16 %v6418_v62  ;;  %v4621_v62 = vunpack.i.l.bf16 %v6426_v29 }
 0x105   :  { %v1761_v0 = vsel %vm8527_vm12, %v1745_v60, %v4612_v24  ;;  %vm8528_vm5 = vmmov %vm8525_vm4  ;;  %v4710_v37 = vpop.permute.xlu1 %4709  ;;  %vm8539_vm8 = vcmask 261120  }
 0x106   :  { %v1694_v56 = vsel %vm8528_vm5, %v1677_v39, %v4692_v4  ;;  %vm8529_vm0 = vmmov %vm8525_vm4  ;;  %v1815_v1 = vpack.c.bf16 %v1761_v0, %v1760_v48  ;;  %v8535_v4 = vld [vmem:[#allocation28_spill] sm:$0xff]  ;;  %v8536_v39 = vld [vmem:[#allocation33_spill] sm:$0xff]  ;;  %v4712_v10 = vunpack.i.h.bf16 %v4710_v37  ;;  %v4711_v3 = vunpack.i.l.bf16 %v4710_v37 }
 0x107   :  { %v1693_v5 = vsel %vm8529_vm0, %v1676_v61, %v4691_v16  ;;  %vm8530_vm10 = vmmov %vm8527_vm12  ;;  %vm8534_vm12 = vnez %v8533_v11  ;;  %vm8537_vm13 = vnez %v8536_v39  ;;  %v4725_v61 = vpop.permute.xlu0 %4724  ;;  %v1731_v48 = vsel %vm8539_vm8, %v8538_v58, %v4722_v57  ;;  %v8540_v0 = vld [vmem:[#allocation11_spill] sm:$0xff] }
 0x108   :  { %v1710_v53 = vsel %vm8530_vm10, %v1693_v5, %v4696_v35  ;;  %vm8531_vm9 = vmmov %vm8530_vm10  ;;  %v941_v24 = vsel %vm8534_vm12, %v8532_v27, 0.0  ;;  %v942_v16 = vsel %vm8537_vm13, %v8535_v4, 0.0  ;;  %v4727_v60 = vunpack.i.h.bf16 %v4725_v61 }
 0x109   :  { %v1711_v23 = vsel %vm8531_vm9, %v1694_v56, %v4697_v17  ;;  %v4726_v17 = vunpack.i.l.bf16 %v4725_v61  ;;  %v4622_v35 = vunpack.i.h.bf16 %v6426_v29  ;;  %vm8541_vm4 = vmmov %vm8539_vm8  ;;  %vm8544_vm10 = vcmask 523264  }
 0x10a   :  { %v1811_v18 = vpack.c.bf16 %v1711_v23, %v1710_v53  ;;  %v1730_v56 = vsel %vm8541_vm4, %v8540_v0, %v4721_v47  ;;  %vm8542_vm5 = vmmov %vm8541_vm4  ;;  %v4715_v23 = vpop.permute.xlu1 %4714  ;;  %vm8546_vm13 = vcmask 785408  }
 0x10b   :  { %v1679_v5 = vsel %vm8542_vm5, %v942_v16, %v4607_v32  ;;  %vm8543_vm0 = vmmov %vm8541_vm4  ;;  %v1746_v37 = vsel %vm8544_vm10, %v1730_v56, %v4726_v17  ;;  %v4717_v27 = vunpack.i.h.bf16 %v4715_v23  ;;  %v4716_v4 = vunpack.i.l.bf16 %v4715_v23  ;;  %v4740_v61 = vpop.permute.xlu0 %4739 }
 0x10c   :  { %2005 = vmatmul.mubr.bf16.gmra.mrb[4].mxu0 %v1811_v18  ;;  %v1678_v53 = vsel %vm8543_vm0, %v941_v24, %v4606_v50  ;;  %vm8545_vm9 = vmmov %vm8544_vm10  ;;  %v1762_v29 = vsel %vm8546_vm13, %v1746_v37, %v4621_v62  ;;  %v4741_v24 = vunpack.i.l.bf16 %v4740_v61  ;;  %v4616_v17 = vunpack.i.l.bf16 %v6422_v49  ;;  %v8552_v62 = vld [vmem:[#allocation37_spill] sm:$0xff] }
 0x10d   :  { %2012 = vmatprep.mubr.bf16.mxu0 %v1815_v1  ;;  %v1747_v18 = vsel %vm8545_vm9, %v1731_v48, %v4727_v60  ;;  %vm8547_vm12 = vmmov %vm8546_vm13  ;;  %v4742_v1 = vunpack.i.h.bf16 %v4740_v61  ;;  %v4617_v60 = vunpack.i.h.bf16 %v6422_v49  ;;  %v4632_v37 = vunpack.i.h.bf16 %v6430_v43 }
 0x10e   :  { %v1763_v57 = vsel %vm8547_vm12, %v1747_v18, %v4622_v35  ;;  %vm8548_vm8 = vmmov %vm8545_vm9  ;;  %v4730_v48 = vpop.permute.xlu1 %4729  ;;  %v943_v35 = vsel %vm5942_vm2, %v8552_v62, 0.0  ;;  %v4631_v18 = vunpack.i.l.bf16 %v6430_v43  ;;  %vm8555_vm13 = vcmask 261120  }
 0x10f   :  { %v1696_v58 = vsel %vm8548_vm8, %v1679_v5, %v4712_v10  ;;  %vm8549_vm4 = vmmov %vm8548_vm8  ;;  %v1818_v16 = vpack.c.bf16 %v1763_v57, %v1762_v29  ;;  %v944_v10 = vsel %vm5965_vm3, %v5903_v2, 0.0  ;;  %v4745_v56 = vpop.permute.xlu0 %4744  ;;  %v4732_v5 = vunpack.i.h.bf16 %v4730_v48 }
 0x110   :  { %v1695_v47 = vsel %vm8549_vm4, %v1678_v53, %v4711_v3  ;;  %vm8550_vm5 = vmmov %vm8547_vm12  ;;  %vm8553_vm12 = vcmp.lt.s32.totalorder %v5590_v8, 1  ;;  %v4731_v53 = vunpack.i.l.bf16 %v4730_v48  ;;  %v4747_v49 = vunpack.i.h.bf16 %v4745_v56  ;;  %v8561_v48 = vld [vmem:[#allocation34_spill] sm:$0xff] }
 0x111   :  { %v1712_v32 = vsel %vm8550_vm5, %v1695_v47, %v4716_v4  ;;  %vm8551_vm0 = vmmov %vm8550_vm5  ;;  %v895_v3 = vsel %vm8553_vm12, %v8478_v6, %v6162_v63  ;;  %v4746_v23 = vunpack.i.l.bf16 %v4745_v56  ;;  %v4626_v56 = vunpack.i.l.bf16 %v6428_v38 }
 0x112   :  { %v1713_v50 = vsel %vm8551_vm0, %v1696_v58, %v4717_v27  ;;  %v8554_v27 = vld [vmem:[#allocation15_spill] sm:$0xff]  ;;  %vm8556_vm10 = vmmov %vm8555_vm13 }
 0x113   :  { %v1814_v0 = vpack.c.bf16 %v1713_v50, %v1712_v32  ;;  %v1733_v4 = vsel %vm8555_vm13, %v8554_v27, %v4742_v1  ;;  %v1732_v2 = vsel %vm8556_vm10, %v5628_v20, %v4741_v24  ;;  %vm8557_vm9 = vmmov %vm8556_vm10  ;;  %v4735_v29 = vpop.permute.xlu1 %4734  ;;  %vm8562_vm13 = vcmp.lt.s32.totalorder %v5590_v8, 1 }
 0x114   :  { %v1681_v61 = vsel %vm8557_vm9, %v944_v10, %v4617_v60  ;;  %vm8558_vm8 = vmmov %vm8557_vm9  ;;  %v1748_v57 = vsel %vm8549_vm4, %v1732_v2, %v4746_v23  ;;  %v4737_v47 = vunpack.i.h.bf16 %v4735_v29  ;;  %v4736_v32 = vunpack.i.l.bf16 %v4735_v29 }
 0x115   :  { %2013 = vmatmul.mubr.bf16.gmra.mrb[8].mxu0 %v1814_v0  ;;  %v1680_v63 = vsel %vm8558_vm8, %v943_v35, %v4616_v17  ;;  %vm8559_vm5 = vmmov %vm8549_vm4  ;;  %v4760_v50 = vpop.permute.xlu0 %4759  ;;  %v1764_v43 = vsel %vm8551_vm0, %v1748_v57, %v4631_v18  ;;  %v896_v20 = vsel %vm8562_vm13, %v8561_v48, %v8478_v6  ;;  %v4627_v10 = vunpack.i.h.bf16 %v6428_v38 }
 0x116   :  { %2020 = vmatprep.mubr.bf16.mxu0 %v1818_v16  ;;  %v1749_v58 = vsel %vm8559_vm5, %v1733_v4, %v4747_v49  ;;  %vm8560_vm12 = vmmov %vm8551_vm0  ;;  %v4762_v60 = vunpack.i.h.bf16 %v4760_v50  ;;  %v4761_v62 = vunpack.i.l.bf16 %v4760_v50  ;;  %vm8567_vm5 = vcmask 261120  }
 0x117   :  { %v1765_v1 = vsel %vm8560_vm12, %v1749_v58, %v4632_v37  ;;  %vm8563_vm10 = vmmov %vm8549_vm4  ;;  %v945_v37 = vsel %vm5998_vm1, %v896_v20, 0.0 }
 0x118   :  { %v1698_v24 = vsel %vm8563_vm10, %v1681_v61, %v4732_v5  ;;  %vm8564_vm9 = vmmov %vm8549_vm4  ;;  %v1821_v35 = vpack.c.bf16 %v1765_v1, %v1764_v43  ;;  %v4750_v49 = vpop.permute.xlu1 %4749  ;;  %v946_v5 = vsel %vm8450_vm15, %v895_v3, 0.0  ;;  %v4642_v61 = vunpack.i.h.bf16 %v6434_v52 }
 0x119   :  { %v1697_v16 = vsel %vm8564_vm9, %v1680_v63, %v4731_v53  ;;  %vm8565_vm8 = vmmov %vm8551_vm0  ;;  %v4752_v18 = vunpack.i.h.bf16 %v4750_v49  ;;  %v4751_v27 = vunpack.i.l.bf16 %v4750_v49  ;;  %v4641_v63 = vunpack.i.l.bf16 %v6434_v52 }
 0x11a   :  { %v1714_v17 = vsel %vm8565_vm8, %v1697_v16, %v4736_v32  ;;  %vm8566_vm4 = vmmov %vm8551_vm0  ;;  %v4765_v53 = vpop.permute.xlu0 %4764  ;;  %v1735_v38 = vsel %vm8567_vm5, %v5672_v31, %v4762_v60  ;;  %v948_v49 = vsel %vm6097_vm7, %v6086_v7, 0.0 }
 0x11b   :  { %v1715_v0 = vsel %vm8566_vm4, %v1698_v24, %v4737_v47  ;;  %v4767_v4 = vunpack.i.h.bf16 %v4765_v53  ;;  %v4766_v2 = vunpack.i.l.bf16 %v4765_v53  ;;  %vm8568_vm0 = vmmov %vm8567_vm5 }
 0x11c   :  { %v1817_v23 = vpack.c.bf16 %v1715_v0, %v1714_v17  ;;  %v1734_v29 = vsel %vm8568_vm0, %v5643_v54, %v4761_v62  ;;  %vm8569_vm12 = vmmov %vm8568_vm0  ;;  %v4637_v0 = vunpack.i.h.bf16 %v6432_v30  ;;  %v4636_v62 = vunpack.i.l.bf16 %v6432_v30 }
 0x11d   :  { %v1683_v57 = vsel %vm8569_vm12, %v946_v5, %v4627_v10  ;;  %vm8570_vm13 = vmmov %vm8568_vm0  ;;  %v1751_v32 = vsel %vm8564_vm9, %v1735_v38, %v4767_v4  ;;  %v4651_v30 = vunpack.i.l.bf16 %v6438_v15 }
 0x11e   :  { %2021 = vmatmul.mubr.bf16.gmra.mrb[12].mxu0 %v1817_v23  ;;  %v1682_v3 = vsel %vm8570_vm13, %v945_v37, %v4626_v56  ;;  %v4755_v58 = vpop.permute.xlu1 %4754  ;;  %vm8571_vm10 = vmmov %vm8564_vm9  ;;  %v1767_v31 = vsel %vm8566_vm4, %v1751_v32, %v4642_v61  ;;  %v947_v56 = vsel %vm6110_vm14, %v6220_v21, 0.0 }
 0x11f   :  { %2028 = vmatprep.mubr.bf16.mxu0 %v1821_v35  ;;  %v1750_v47 = vsel %vm8571_vm10, %v1734_v29, %v4766_v2  ;;  %v4757_v50 = vunpack.i.h.bf16 %v4755_v58  ;;  %v4756_v43 = vunpack.i.l.bf16 %v4755_v58  ;;  %v4780_v1 = vpop.permute.xlu0 %4779  ;;  %vm8572_vm8 = vmmov %vm8566_vm4  ;;  %vm8577_vm10 = vcmask 261120  }
 0x120   :  { %v1766_v52 = vsel %vm8572_vm8, %v1750_v47, %v4641_v63  ;;  %vm8573_vm5 = vmmov %vm8564_vm9  ;;  %v4782_v20 = vunpack.i.h.bf16 %v4780_v1  ;;  %v4781_v60 = vunpack.i.l.bf16 %v4780_v1  ;;  %v4646_v1 = vunpack.i.l.bf16 %v6436_v26 }
 0x121   :  { %v1700_v48 = vsel %vm8573_vm5, %v1683_v57, %v4752_v18  ;;  %vm8574_vm0 = vmmov %vm8573_vm5  ;;  %v1824_v17 = vpack.c.bf16 %v1767_v31, %v1766_v52 }
 0x122   :  { %v1699_v54 = vsel %vm8574_vm0, %v1682_v3, %v4751_v27  ;;  %vm8575_vm12 = vmmov %vm8566_vm4  ;;  %v4770_v35 = vpop.permute.xlu1 %4769  ;;  %v4652_v27 = vunpack.i.h.bf16 %v6438_v15  ;;  %v1737_v4 = vsel %vm8577_vm10, %v5722_v51, %v4782_v20 }
 0x123   :  { %v1716_v24 = vsel %vm8575_vm12, %v1699_v54, %v4756_v43  ;;  %vm8576_vm13 = vmmov %vm8566_vm4  ;;  %v4785_v23 = vpop.permute.xlu0 %4784  ;;  %v4772_v37 = vunpack.i.h.bf16 %v4770_v35  ;;  %v4771_v5 = vunpack.i.l.bf16 %v4770_v35  ;;  %v4647_v43 = vunpack.i.h.bf16 %v6436_v26 }
 0x124   :  { %v1717_v16 = vsel %vm8576_vm13, %v1700_v48, %v4757_v50  ;;  %v4787_v53 = vunpack.i.h.bf16 %v4785_v23  ;;  %v4786_v18 = vunpack.i.l.bf16 %v4785_v23  ;;  %vm8578_vm9 = vmmov %vm8577_vm10  ;;  %v949_v48 = vsel %vm6255_vm11, %v6193_v59, 0.0 }
 0x125   :  { %v1820_v10 = vpack.c.bf16 %v1717_v16, %v1716_v24  ;;  %v1736_v21 = vsel %vm8578_vm9, %v5682_v36, %v4781_v60  ;;  %vm8579_vm8 = vmmov %vm8578_vm9  ;;  %v950_v54 = vsel %vm6283_vm6, %v6181_v41, 0.0 }
 0x126   :  { %v1685_v2 = vsel %vm8579_vm8, %v948_v49, %v4637_v0  ;;  %vm8580_vm4 = vmmov %vm8579_vm8  ;;  %v4775_v61 = vpop.permute.xlu1 %4774  ;;  %v1753_v38 = vsel %vm8574_vm0, %v1737_v4, %v4787_v53 }
 0x127   :  { %2029 = vmatmul.mubr.bf16.gmra.mrb[16].mxu0 %v1820_v10  ;;  %v1684_v7 = vsel %vm8580_vm4, %v947_v56, %v4636_v62  ;;  %vm8581_vm5 = vmmov %vm8574_vm0  ;;  %v4777_v29 = vunpack.i.h.bf16 %v4775_v61  ;;  %v4776_v57 = vunpack.i.l.bf16 %v4775_v61  ;;  %v1686_v35 = vsel %vm8580_vm4, %v949_v48, %v4646_v1 }
 0x128   :  { %2036 = vmatprep.mubr.bf16.mxu0 %v1824_v17  ;;  %v1752_v63 = vsel %vm8581_vm5, %v1736_v21, %v4786_v18  ;;  %v4800_v3 = vpop.permute.xlu0 %4799  ;;  %vm8582_vm13 = vmmov %vm8575_vm12 }
 0x129   :  { %v1768_v15 = vsel %vm8575_vm12, %v1752_v63, %v4651_v30  ;;  %v1769_v51 = vsel %vm8582_vm13, %v1753_v38, %v4652_v27  ;;  %vm8583_vm10 = vmmov %vm8574_vm0  ;;  %v4802_v20 = vunpack.i.h.bf16 %v4800_v3  ;;  %v4801_v24 = vunpack.i.l.bf16 %v4800_v3 }
 0x12a   :  { %v1702_v58 = vsel %vm8583_vm10, %v1685_v2, %v4772_v37  ;;  %vm8584_vm9 = vmmov %vm8574_vm0  ;;  %v1827_v50 = vpack.c.bf16 %v1769_v51, %v1768_v15  ;;  %v4790_v52 = vpop.permute.xlu1 %4789 }
 0x12b   :  { %v1701_v36 = vsel %vm8584_vm9, %v1684_v7, %v4771_v5  ;;  %vm8585_vm7 = vmmov %vm8575_vm12  ;;  %v4792_v60 = vunpack.i.h.bf16 %v4790_v52  ;;  %v4791_v17 = vunpack.i.l.bf16 %v4790_v52 }
 0x12c   :  { %v1718_v47 = vsel %vm8585_vm7, %v1701_v36, %v4776_v57  ;;  %vm8586_vm8 = vmmov %vm8585_vm7  ;;  %v4805_v16 = vpop.permute.xlu0 %4804 }
 0x12d   :  { %v1719_v32 = vsel %vm8586_vm8, %v1702_v58, %v4777_v29  ;;  %v4807_v0 = vunpack.i.h.bf16 %v4805_v16  ;;  %v4806_v62 = vunpack.i.l.bf16 %v4805_v16  ;;  %vm8587_vm7 = vmmov %vm8580_vm4 }
 0x12e   :  { %v1823_v31 = vpack.c.bf16 %v1719_v32, %v1718_v47  ;;  %v1687_v26 = vsel %vm8587_vm7, %v950_v54, %v4647_v43  ;;  %v4795_v10 = vpop.permute.xlu1 %4794  ;;  %vm8588_vm5 = vmmov %vm8580_vm4 }
 0x12f   :  { %v1739_v59 = vsel %vm8588_vm5, %v5881_v55, %v4802_v20  ;;  %vm8589_vm0 = vmmov %vm8580_vm4  ;;  %v4797_v56 = vunpack.i.h.bf16 %v4795_v10  ;;  %v4796_v49 = vunpack.i.l.bf16 %v4795_v10 }
 0x130   :  { %2037 = vmatmul.mubr.bf16.gmra.mrb[20].mxu0 %v1823_v31  ;;  %v1738_v41 = vsel %vm8589_vm0, %v5725_v14, %v4801_v24  ;;  %v4810_v23 = vpop.permute.xlu0 %4809  ;;  %vm8590_vm12 = vmmov %vm8584_vm9  ;;  %v1755_v30 = vsel %vm8584_vm9, %v1739_v59, %v4807_v0 }
 0x131   :  { %2044 = vmatprep.mubr.bf16.mxu0 %v1827_v50  ;;  %v1704_v37 = vsel %vm8590_vm12, %v1687_v26, %v4792_v60  ;;  %vm8591_vm13 = vmmov %vm8584_vm9  ;;  %v4812_v53 = vunpack.i.h.bf16 %v4810_v23  ;;  %v4811_v18 = vunpack.i.l.bf16 %v4810_v23  ;;  %v4155_v23 = vld [vmem:[%s8083_s1] ss:$0 sm:$0xff] }
 0x132   :  { %v1703_v5 = vsel %vm8591_vm13, %v1686_v35, %v4791_v17  ;;  %vm8592_vm10 = vmmov %vm8584_vm9  ;;  %v4815_v21 = vpop.permute.xlu1 %4814 }
 0x133   :  { %v1754_v27 = vsel %vm8592_vm10, %v1738_v41, %v4806_v62  ;;  %v1720_v4 = vsel %vm8586_vm8, %v1703_v5, %v4796_v49  ;;  %vm8593_vm7 = vmmov %vm8586_vm8  ;;  %v4817_v63 = vunpack.i.h.bf16 %v4815_v21  ;;  %v4816_v38 = vunpack.i.l.bf16 %v4815_v21 }
 0x134   :  { %v1721_v55 = vsel %vm8593_vm7, %v1704_v37, %v4797_v56  ;;  %vm8594_vm4 = vmmov %vm8593_vm7 }
 0x135   :  { %v1826_v2 = vpack.c.bf16 %v1721_v55, %v1720_v4  ;;  %v1770_v14 = vsel %vm8594_vm4, %v1754_v27, %v4811_v18  ;;  %vm8595_vm5 = vmmov %vm8594_vm4 }
 0x136   :  { %v1771_v7 = vsel %vm8595_vm5, %v1755_v30, %v4812_v53  ;;  %v4820_v29 = vpop.permute.xlu1 %4819  ;;  %vm8596_vm0 = vmmov %vm8584_vm9 }
 0x137   :  { %v1830_v61 = vpack.c.bf16 %v1771_v7, %v1770_v14  ;;  %v4822_v57 = vunpack.i.h.bf16 %v4820_v29  ;;  %v4821_v3 = vunpack.i.l.bf16 %v4820_v29  ;;  %v1706_v15 = vsel %vm8596_vm0, %v6447_v44, %v4817_v63  ;;  %vm8597_vm12 = vmmov %vm8596_vm0 }
 0x138   :  { %2045 = vmatmul.mubr.bf16.gmra.mrb[24].mxu0 %v1826_v2  ;;  %v1705_v51 = vsel %vm8597_vm12, %v6450_v33, %v4816_v38  ;;  %vm8598_vm13 = vmmov %vm8594_vm4 }
 0x139   :  { %2052 = vmatprep.mubr.bf16.mxu0 %v1830_v61  ;;  %v1722_v58 = vsel %vm8598_vm13, %v1705_v51, %v4821_v3  ;;  %vm8599_vm10 = vmmov %vm8594_vm4 }
 0x13a   :  { %v1723_v36 = vsel %vm8599_vm10, %v1706_v15, %v4822_v57  ;;  %vm8600_vm9 = vmmov %vm8596_vm0 }
 0x13b   :  { %v1829_v47 = vpack.c.bf16 %v1723_v36, %v1722_v58  ;;  %vm8601_vm8 = vmmov %vm8596_vm0 }
 0x13c   :  { %vm8602_vm7 = vmmov %vm8596_vm0 }
 0x13d   :  { %vm8603_vm4 = vmmov %vm8596_vm0 }
 0x13e   :  { %vm8604_vm5 = vmmov %vm8596_vm0 }
 0x13f   :  { %vm8605_vm12 = vmmov %vm8596_vm0 }
 0x140   :  { %2053 = vmatmul.mubr.bf16.gmra.mrb[28].mxu0 %v1829_v47  ;;  %vm8606_vm13 = vmmov %vm8596_vm0 }
 0x141   :  { %vm8607_vm10 = vmmov %vm8596_vm0 }
 0x170   :  { %v4468_v32 = vpop.f32.mrb[0].mxu1 }
 0x171   :  { %v2095_v50 = vpop.f32.mrb[1].mxu1 }
 0x172   :  { %v4469_v43 = vpop.f32.mrb[2].mxu1 }
 0x173   :  { %v2098_v1 = vpop.f32.mrb[3].mxu1 }
 0x17b   :  { %v6642_v52 = vpop.f32.mrb[4].mxu1 }
 0x17c   :  { %v2111_v31 = vpop.f32.mrb[5].mxu1 }
 0x17d   :  { %v6644_v48 = vpop.f32.mrb[6].mxu1 }
 0x17e   :  { %v2114_v54 = vpop.f32.mrb[7].mxu1 }
 0x184   :  { %v6646_v44 = vpop.f32.mrb[8].mxu1 }
 0x185   :  { %v6648_v20 = vpop.f32.mrb[9].mxu1 }
 0x186   :  { %v6650_v33 = vpop.f32.mrb[10].mxu1 }
 0x187   :  { %v6652_v24 = vpop.f32.mrb[11].mxu1 }
 0x18e   :  { %v6654_v16 = vpop.f32.mrb[12].mxu1 }
 0x18f   :  { %v6656_v60 = vpop.f32.mrb[13].mxu1 }
 0x190   :  { %v6658_v17 = vpop.f32.mrb[14].mxu1 }
 0x191   :  { %v6660_v0 = vpop.f32.mrb[15].mxu1 }
 0x1d5   :  { %v4254_v62 = vpop.f32.mrb[0].mxu0 }
 0x1d6   :  { %v4255_v26 = vpop.f32.mrb[1].mxu0 }
 0x1d7   :  { %v4256_v35 = vadd.f32 %v4255_v26, %v4254_v62  ;;  %v4257_v10 = vpop.f32.mrb[2].mxu0 }
 0x1d8   :  { %v4258_v59 = vpop.f32.mrb[3].mxu0 }
 0x1d9   :  { %v4259_v41 = vadd.f32 %v4258_v59, %v4257_v10  ;;  %v2096_v56 = vadd.f32 %v4256_v35, %v2095_v50 }
 0x1db   :  { %v2099_v49 = vadd.f32 %v4259_v41, %v2098_v1  ;;  %v6667_v30 = vadd.f32 %v4155_v23, %v2096_v56 }
 0x1dd   :  { %v6665_v53 = vadd.f32 %v4155_v23, %v2099_v49  ;;  %v2232_v61 = vmul.f32 %v6667_v30, %v6667_v30  ;;  %v2190_v15 = vsel %vm8601_vm8, %v6667_v30, 0.0  ;;  %vm8609_vm8 = vmmov %vm8596_vm0 }
 0x1df   :  { %v4260_v37 = vpop.f32.mrb[4].mxu0  ;;  %v2233_v2 = vmul.f32 %v6665_v53, %v6665_v53  ;;  %v2191_v63 = vsel %vm8600_vm9, %v6665_v53, 0.0  ;;  %vm8608_vm9 = vmmov %vm8596_vm0 }
 0x1e0   :  { %v4261_v5 = vpop.f32.mrb[5].mxu0  ;;  %v2192_v50 = vadd.f32 %v2191_v63, %v2190_v15 }
 0x1e1   :  { %v4262_v18 = vadd.f32 %v4261_v5, %v4260_v37  ;;  %v4263_v27 = vpop.f32.mrb[6].mxu0  ;;  %v2249_v51 = vsel %vm8602_vm7, %v2233_v2, 0.0  ;;  %vm8610_vm7 = vmmov %vm8596_vm0 }
 0x1e2   :  { %v4264_v4 = vpop.f32.mrb[7].mxu0 }
 0x1e3   :  { %v2104_v55 = vadd.f32 %v4468_v32, %v4262_v18  ;;  %v4265_v21 = vadd.f32 %v4264_v4, %v4263_v27  ;;  %v2248_v32 = vsel %vm8604_vm5, %v2232_v61, 0.0  ;;  %vm8612_vm5 = vmmov %vm8596_vm0 }
 0x1e4   :  { %v2250_v10 = vadd.f32 %v2249_v51, %v2248_v32 }
 0x1e5   :  { %v6671_v14 = vadd.f32 %v4155_v23, %v2104_v55  ;;  %v2107_v7 = vadd.f32 %v4469_v43, %v4265_v21 }
 0x1e7   :  { %v2234_v38 = vmul.f32 %v6671_v14, %v6671_v14  ;;  %v6679_v29 = vadd.f32 %v4155_v23, %v2107_v7  ;;  %v2193_v58 = vsel %vm8603_vm4, %v6671_v14, 0.0  ;;  %vm8611_vm4 = vmmov %vm8596_vm0 }
 0x1e8   :  { %v4266_v57 = vpop.f32.mrb[8].mxu0  ;;  %v2194_v59 = vadd.f32 %v2193_v58, %v2192_v50 }
 0x1e9   :  { %v4267_v3 = vpop.f32.mrb[9].mxu0  ;;  %v2251_v1 = vsel %vm8596_vm0, %v2234_v38, 0.0  ;;  %v2235_v62 = vmul.f32 %v6679_v29, %v6679_v29  ;;  %v2195_v41 = vsel %vm8605_vm12, %v6679_v29, 0.0  ;;  %vm8613_vm12 = vmmov %vm8596_vm0 }
 0x1ea   :  { %v4268_v36 = vadd.f32 %v4267_v3, %v4266_v57  ;;  %v4269_v47 = vpop.f32.mrb[10].mxu0  ;;  %v2252_v37 = vadd.f32 %v2251_v1, %v2250_v10  ;;  %v2196_v55 = vadd.f32 %v2195_v41, %v2194_v59 }
 0x1eb   :  { %v4270_v43 = vpop.f32.mrb[11].mxu0  ;;  %v2253_v5 = vsel %vm8606_vm13, %v2235_v62, 0.0  ;;  %vm8614_vm13 = vmmov %vm8596_vm0 }
 0x1ec   :  { %v4271_v26 = vadd.f32 %v4270_v43, %v4269_v47  ;;  %v2112_v35 = vadd.f32 %v4268_v36, %v2111_v31  ;;  %v2254_v38 = vadd.f32 %v2253_v5, %v2252_v37 }
 0x1ee   :  { %v6692_v56 = vadd.f32 %v4155_v23, %v2112_v35  ;;  %v2115_v49 = vadd.f32 %v4271_v26, %v2114_v54 }
 0x1f0   :  { %v2197_v18 = vsel %vm8607_vm10, %v6692_v56, 0.0  ;;  %v2236_v27 = vmul.f32 %v6692_v56, %v6692_v56  ;;  %v6699_v4 = vadd.f32 %v4155_v23, %v2115_v49  ;;  %vm8615_vm10 = vmmov %vm8596_vm0 }
 0x1f1   :  { %v4272_v31 = vpop.f32.mrb[12].mxu0  ;;  %v2198_v63 = vadd.f32 %v2197_v18, %v2196_v55 }
 0x1f2   :  { %v4273_v21 = vpop.f32.mrb[13].mxu0  ;;  %v2255_v2 = vsel %vm8608_vm9, %v2236_v27, 0.0  ;;  %v2237_v7 = vmul.f32 %v6699_v4, %v6699_v4  ;;  %v2199_v3 = vsel %vm8609_vm8, %v6699_v4, 0.0  ;;  %vm8616_vm9 = vmmov %vm8596_vm0 }
 0x1f3   :  { %v4274_v54 = vadd.f32 %v4273_v21, %v4272_v31  ;;  %v4275_v61 = vpop.f32.mrb[14].mxu0  ;;  %v2256_v58 = vadd.f32 %v2255_v2, %v2254_v38  ;;  %v2200_v50 = vadd.f32 %v2199_v3, %v2198_v63  ;;  %v6728_v63 = vld [vmem:[%s8083_s1 + $0x1] ss:$0 sm:$0xff]  ;;  %s5227_s1 = smov 127   ;;  %vm8617_vm8 = vmmov %vm8596_vm0 }
 0x1f4   :  { %v4276_v57 = vpop.f32.mrb[15].mxu0  ;;  %v2257_v36 = vsel %vm8610_vm7, %v2237_v7, 0.0  ;;  %vm8618_vm7 = vmmov %vm8596_vm0 }
 0x1f5   :  { %v2120_v15 = vadd.f32 %v6642_v52, %v4274_v54  ;;  %v4277_v51 = vadd.f32 %v4276_v57, %v4275_v61  ;;  %v2258_v35 = vadd.f32 %v2257_v36, %v2256_v58 }
 0x1f7   :  { %v6708_v47 = vadd.f32 %v4155_v23, %v2120_v15  ;;  %v2123_v32 = vadd.f32 %v6644_v48, %v4277_v51 }
 0x1f9   :  { %v2201_v43 = vsel %vm8611_vm4, %v6708_v47, 0.0  ;;  %v2238_v1 = vmul.f32 %v6708_v47, %v6708_v47  ;;  %v6715_v62 = vadd.f32 %v4155_v23, %v2123_v32  ;;  %vm8619_vm4 = vmmov %vm8596_vm0 }
 0x1fa   :  { %v4278_v26 = vpop.f32.mrb[16].mxu0  ;;  %v2202_v52 = vadd.f32 %v2201_v43, %v2200_v50 }
 0x1fb   :  { %v4279_v10 = vpop.f32.mrb[17].mxu0  ;;  %v2259_v59 = vsel %vm8612_vm5, %v2238_v1, 0.0  ;;  %v2203_v41 = vsel %vm8596_vm0, %v6715_v62, 0.0  ;;  %v2239_v48 = vmul.f32 %v6715_v62, %v6715_v62  ;;  %vm8620_vm5 = vmmov %vm8596_vm0 }
 0x1fc   :  { %v4280_v49 = vadd.f32 %v4279_v10, %v4278_v26  ;;  %v4281_v37 = vpop.f32.mrb[18].mxu0  ;;  %v2204_v18 = vadd.f32 %v2203_v41, %v2202_v52  ;;  %v2260_v27 = vadd.f32 %v2259_v59, %v2258_v35 }
 0x1fd   :  { %v4282_v5 = vpop.f32.mrb[19].mxu0  ;;  %v2261_v55 = vsel %vm8613_vm12, %v2239_v48, 0.0  ;;  %vm8621_vm12 = vmmov %vm8596_vm0 }
 0x1fe   :  { %v4283_v31 = vadd.f32 %v4282_v5, %v4281_v37  ;;  %v2128_v23 = vadd.f32 %v4280_v49, %v6648_v20  ;;  %v2205_v21 = vrot.slane %v2204_v18, 4  ;;  %v2262_v2 = vadd.f32 %v2261_v55, %v2260_v27 }
 0x200   :  { %v2131_v7 = vadd.f32 %v4283_v31, %v6652_v24  ;;  %v2206_v54 = vadd.f32 %v2205_v21, %v2204_v18  ;;  %v2263_v61 = vrot.slane %v2262_v2, 4  ;;  %v6734_v36 = vadd.f32 %v6728_v63, %v2128_v23 }
 0x202   :  { %v2207_v3 = vrot.slane %v2206_v54, 2  ;;  %v2264_v15 = vadd.f32 %v2263_v61, %v2262_v2  ;;  %v6731_v51 = vadd.f32 %v6728_v63, %v2131_v7  ;;  %v2240_v41 = vmul.f32 %v6734_v36, %v6734_v36 }
 0x203   :  { %v4284_v38 = vpop.f32.mrb[20].mxu0 }
 0x204   :  { %v4285_v57 = vpop.f32.mrb[21].mxu0  ;;  %v2208_v32 = vadd.f32 %v2207_v3, %v2206_v54  ;;  %v2265_v50 = vrot.slane %v2264_v15, 2  ;;  %v2241_v52 = vmul.f32 %v6731_v51, %v6731_v51  ;;  %v2269_v2 = vsel %vm8618_vm7, %v2240_v41, 0.0  ;;  %vm8626_vm7 = vmmov %vm8596_vm0 }
 0x205   :  { %v4286_v20 = vadd.f32 %v4285_v57, %v4284_v38  ;;  %v4287_v58 = vpop.f32.mrb[22].mxu0 }
 0x206   :  { %v4288_v24 = vpop.f32.mrb[23].mxu0  ;;  %v2209_v26 = vrot.slane %v2208_v32, 1  ;;  %v2266_v35 = vadd.f32 %v2265_v50, %v2264_v15  ;;  %v2270_v31 = vsel %vm8616_vm9, %v2241_v52, 0.0  ;;  %vm8624_vm9 = vmmov %vm8596_vm0 }
 0x207   :  { %v2136_v43 = vadd.f32 %v6646_v44, %v4286_v20  ;;  %v4289_v1 = vadd.f32 %v4288_v24, %v4287_v58  ;;  %v2212_v44 = vsel %vm8614_vm13, %v6731_v51, 0.0  ;;  %v2271_v20 = vadd.f32 %v2270_v31, %v2269_v2  ;;  %vm8622_vm13 = vmmov %vm8596_vm0 }
 0x208   :  { %v6745_v48 = vadd.f32 %v2209_v26, %v2208_v32  ;;  %v2267_v49 = vrot.slane %v2266_v35, 1 }
 0x209   :  { %v6740_v10 = vadd.f32 %v6728_v63, %v2136_v43  ;;  %v2139_v59 = vadd.f32 %v6650_v33, %v4289_v1  ;;  %v2211_v33 = vsel %vm8615_vm10, %v6734_v36, 0.0  ;;  %vm8623_vm10 = vmmov %vm8596_vm0 }
 0x20a   :  { %2307 = vrot.lane.b32.xlu0 %v6745_v48, %s5227_s1  ;;  %v2213_v7 = vadd.f32 %v2212_v44, %v2211_v33  ;;  %v6762_v61 = vadd.f32 %v2267_v49, %v2266_v35 }
 0x20b   :  { %v2242_v37 = vmul.f32 %v6740_v10, %v6740_v10  ;;  %v6752_v5 = vadd.f32 %v6728_v63, %v2139_v59  ;;  %v4290_v18 = vpop.f32.mrb[24].mxu0  ;;  %v2214_v23 = vsel %vm8617_vm8, %v6740_v10, 0.0  ;;  %vm8625_vm8 = vmmov %vm8596_vm0 }
 0x20c   :  { %v4291_v27 = vpop.f32.mrb[25].mxu0  ;;  %v2215_v58 = vadd.f32 %v2214_v23, %v2213_v7 }
 0x20d   :  { %v4292_v55 = vadd.f32 %v4291_v27, %v4290_v18  ;;  %v4293_v21 = vpop.f32.mrb[26].mxu0  ;;  %v2272_v38 = vsel %vm8619_vm4, %v2242_v37, 0.0  ;;  %v2243_v57 = vmul.f32 %v6752_v5, %v6752_v5  ;;  %v2216_v24 = vsel %vm8620_vm5, %v6752_v5, 0.0  ;;  %vm8627_vm4 = vmmov %vm8596_vm0 }
 0x20e   :  { %v4294_v54 = vpop.f32.mrb[27].mxu0  ;;  %2337 = vrot.lane.b32.xlu0 %v6762_v61, %s5227_s1  ;;  %v2273_v43 = vadd.f32 %v2272_v38, %v2271_v20  ;;  %v2217_v59 = vadd.f32 %v2216_v24, %v2215_v58  ;;  %vm8628_vm5 = vmmov %vm8596_vm0 }
 0x20f   :  { %v4295_v3 = vadd.f32 %v4294_v54, %v4293_v21  ;;  %v2144_v15 = vadd.f32 %v4292_v55, %v6656_v60  ;;  %v2274_v1 = vsel %vm8596_vm0, %v2243_v57, 0.0  ;;  %vm2313_vm0 = vcmask 515072  }
 0x210   :  { %v2275_v27 = vadd.f32 %v2274_v1, %v2273_v43 }
 0x211   :  { %v6773_v32 = vadd.f32 %v6728_v63, %v2144_v15  ;;  %v2147_v50 = vadd.f32 %v4295_v3, %v6660_v0 }
 0x213   :  { %v2218_v26 = vsel %vm8621_vm12, %v6773_v32, 0.0  ;;  %v2244_v60 = vmul.f32 %v6773_v32, %v6773_v32  ;;  %v6782_v35 = vadd.f32 %v6728_v63, %v2147_v50  ;;  %v4296_v52 = vpop.f32.mrb[28].mxu0 }
 0x214   :  { %v4297_v41 = vpop.f32.mrb[29].mxu0  ;;  %v2219_v18 = vadd.f32 %v2218_v26, %v2217_v59 }
 0x215   :  { %v2276_v49 = vsel %vm8622_vm13, %v2244_v60, 0.0  ;;  %v2245_v0 = vmul.f32 %v6782_v35, %v6782_v35  ;;  %v4298_v44 = vadd.f32 %v4297_v41, %v4296_v52  ;;  %v4299_v37 = vpop.f32.mrb[30].mxu0  ;;  %v2220_v31 = vsel %vm8623_vm10, %v6782_v35, 0.0 }
 0x216   :  { %v4300_v33 = vpop.f32.mrb[31].mxu0  ;;  %v2277_v21 = vadd.f32 %v2276_v49, %v2275_v27  ;;  %v2221_v38 = vadd.f32 %v2220_v31, %v2219_v18  ;;  %v8629_v31 = vlaneseq  ;;  %vm2330_vm13 = vcmask 7168  }
 0x217   :  { %v2152_v23 = vadd.f32 %v6654_v16, %v4298_v44  ;;  %v4301_v55 = vadd.f32 %v4300_v33, %v4299_v37  ;;  %v2278_v2 = vsel %vm8624_vm9, %v2245_v0, 0.0  ;;  %vm8639_vm10 = vcmp.lt.s32.totalorder %v5590_v8, 7 }
 0x218   :  { %v2279_v16 = vadd.f32 %v2278_v2, %v2277_v21  ;;  %vm8641_vm9 = vnez %v8345_v9 }
 0x219   :  { %v6792_v7 = vadd.f32 %v6728_v63, %v2152_v23  ;;  %v2155_v54 = vadd.f32 %v6658_v17, %v4301_v55  ;;  %v2291_v23 = vand.u32 127, %v8629_v31 }
 0x21b   :  { %v2222_v57 = vsel %vm8625_vm8, %v6792_v7, 0.0  ;;  %v2246_v3 = vmul.f32 %v6792_v7, %v6792_v7  ;;  %v6800_v15 = vadd.f32 %v6728_v63, %v2155_v54  ;;  %v2296_v55 = vand.u32 1, %v2291_v23  ;;  %vm8642_vm8 = vmmov %vm8639_vm10 }
 0x21c   :  { %v2223_v20 = vadd.f32 %v2222_v57, %v2221_v38 }
 0x21d   :  { %v2280_v58 = vsel %vm8626_vm7, %v2246_v3, 0.0  ;;  %v2224_v24 = vsel %vm8627_vm4, %v6800_v15, 0.0  ;;  %v2247_v17 = vmul.f32 %v6800_v15, %v6800_v15  ;;  %vm6812_vm12 = vcmp.eq.s32.totalorder %v2296_v55, 0 }
 0x21e   :  { %v2225_v50 = vadd.f32 %v2224_v24, %v2223_v20  ;;  %v2281_v43 = vadd.f32 %v2280_v58, %v2279_v16  ;;  %vm8652_vm4 = vcmp.lt.s32.totalorder %v5590_v8, 1 }
 0x21f   :  { %v2282_v1 = vsel %vm8628_vm5, %v2247_v17, 0.0  ;;  %vm8654_vm5 = vmmov %vm8652_vm4 }
 0x220   :  { %v2226_v26 = vrot.slane %v2225_v50, 4  ;;  %v2283_v60 = vadd.f32 %v2282_v1, %v2281_v43 }
 0x222   :  { %v2227_v52 = vadd.f32 %v2226_v26, %v2225_v50  ;;  %v2284_v59 = vrot.slane %v2283_v60, 4 }
 0x224   :  { %v2228_v63 = vrot.slane %v2227_v52, 2  ;;  %v2285_v41 = vadd.f32 %v2284_v59, %v2283_v60 }
 0x226   :  { %v2229_v49 = vadd.f32 %v2228_v63, %v2227_v52  ;;  %v2286_v0 = vrot.slane %v2285_v41, 2 }
 0x228   :  { %v2230_v44 = vrot.slane %v2229_v49, 1  ;;  %v2287_v37 = vadd.f32 %v2286_v0, %v2285_v41 }
 0x22a   :  { %v2231_v18 = vadd.f32 %v2230_v44, %v2229_v49  ;;  %v2288_v27 = vrot.slane %v2287_v37, 1 }
 0x22c   :  { %2309 = vrot.lane.b32.xlu1 %v2231_v18, %s5227_s1  ;;  %v2289_v33 = vadd.f32 %v2288_v27, %v2287_v37 }
 0x230   :  { %2339 = vrot.lane.b32.xlu1 %v2289_v33, %s5227_s1 }
 0x27c   :  { %v2308_v21 = vpop.permute.xlu0 %2307 }
 0x27d   :  { %v2314_v2 = vsel %vm2313_vm0, %v2308_v21, 0.0 }
 0x27e   :  { %v2316_v38 = vadd.f32 %v2314_v2, %v6745_v48 }
 0x280   :  { %v2338_v57 = vpop.permute.xlu0 %2337  ;;  %v2320_v3 = vsel %vm6812_vm12, %v2316_v38, 0.0 }
 0x281   :  { %v2343_v16 = vsel %vm2313_vm0, %v2338_v57, 0.0  ;;  %2324 = vrot.lane.b32.xlu0 %v2320_v3, %s5228_s11 }
 0x282   :  { %v2345_v20 = vadd.f32 %v2343_v16, %v6762_v61 }
 0x284   :  { %v2347_v58 = vsel %vm6812_vm12, %v2345_v20, 0.0 }
 0x285   :  { %2351 = vrot.lane.b32.xlu0 %v2347_v58, %s5228_s11 }
 0x29e   :  { %v2310_v24 = vpop.permute.xlu1 %2309 }
 0x29f   :  { %v2315_v17 = vsel %vm2313_vm0, %v2310_v24, 0.0  ;;  %v6866_v24 = vld [vmem:[%s8088_s6] ss:$0 sm:$0xff] }
 0x2a0   :  { %v2317_v50 = vadd.f32 %v2315_v17, %v2231_v18 }
 0x2a2   :  { %v2340_v43 = vpop.permute.xlu1 %2339  ;;  %v2321_v48 = vsel %vm6812_vm12, %v2317_v50, 0.0 }
 0x2a3   :  { %v2344_v1 = vsel %vm2313_vm0, %v2340_v43, 0.0  ;;  %2326 = vrot.lane.b32.xlu1 %v2321_v48, %s5228_s11  ;;  %vm8655_vm0 = vmmov %vm8652_vm4 }
 0x2a4   :  { %v2346_v26 = vadd.f32 %v2344_v1, %v2289_v33  ;;  %v6832_v33 = vsub.s32 0, %v5590_v8 }
 0x2a6   :  { %v2348_v60 = vsel %vm6812_vm12, %v2346_v26, 0.0  ;;  %vm8659_vm12 = vmmov %vm8655_vm0 }
 0x2a7   :  { %2353 = vrot.lane.b32.xlu1 %v2348_v60, %s5228_s11 }
 0x2f3   :  { %v2325_v61 = vpop.permute.xlu0 %2324 }
 0x2f4   :  { %v2331_v52 = vsel %vm2330_vm13, 0.0, %v2325_v61 }
 0x2f5   :  { %v2333_v59 = vadd.f32 %v2331_v52, %v2320_v3  ;;  %v6851_v3 = vld [vmem:[%s8087_s5] ss:$0 sm:$0xff] }
 0x2f7   :  { %v2362_v63 = vmul.f32 0.0078125, %v2333_v59  ;;  %v2352_v41 = vpop.permute.xlu0 %2351 }
 0x2f8   :  { %v2357_v49 = vsel %vm2330_vm13, 0.0, %v2352_v41 }
 0x2f9   :  { %v2359_v0 = vadd.f32 %v2357_v49, %v2347_v58  ;;  %v2366_v44 = vmul.f32 %v2362_v63, %v2362_v63  ;;  %v6835_v23 = vrot.slane %v2362_v63, %v6832_v33 }
 0x2fb   :  { %v2364_v37 = vmul.f32 0.0078125, %v2359_v0  ;;  %v2380_v21 = vsub.f32 %v6667_v30, %v6835_v23  ;;  %v2381_v54 = vsub.f32 %v6665_v53, %v6835_v23  ;;  %v2382_v38 = vsub.f32 %v6671_v14, %v6835_v23 }
 0x2fc   :  { %v2383_v57 = vsub.f32 %v6679_v29, %v6835_v23  ;;  %v2384_v30 = vsub.f32 %v6692_v56, %v6835_v23  ;;  %v2385_v16 = vsub.f32 %v6699_v4, %v6835_v23  ;;  %v2386_v53 = vsub.f32 %v6708_v47, %v6835_v23 }
 0x2fd   :  { %v2368_v18 = vsub.f32 %v2364_v37, %v2366_v44 }
 0x2ff   :  { %v2370_v27 = vmax.f32 %v2368_v18, 0.0 }
 0x301   :  { %v2396_v31 = vadd.f32 1e-05, %v2370_v27 }
 0x303   :  { %5123 = vrsqrt.f32 %v2396_v31 }
 0x30d   :  { %v5124_v55 = vpop.eup %5123 }
 0x30e   :  { %v6840_v2 = vrot.slane %v5124_v55, %v6832_v33 }
 0x310   :  { %v2408_v20 = vmul.f32 %v6840_v2, %v2380_v21  ;;  %v2409_v14 = vmul.f32 %v6840_v2, %v2381_v54  ;;  %v2410_v29 = vmul.f32 %v6840_v2, %v2382_v38  ;;  %v2411_v58 = vmul.f32 %v6840_v2, %v2383_v57 }
 0x311   :  { %v2412_v56 = vmul.f32 %v6840_v2, %v2384_v30  ;;  %v2413_v4 = vmul.f32 %v6840_v2, %v2385_v16  ;;  %v2414_v17 = vmul.f32 %v6840_v2, %v2386_v53 }
 0x312   :  { %v2430_v47 = vmul.f32 %v6851_v3, %v2408_v20  ;;  %v2431_v50 = vmul.f32 %v6851_v3, %v2409_v14  ;;  %v2432_v43 = vmul.f32 %v6851_v3, %v2410_v29  ;;  %v2433_v1 = vmul.f32 %v6851_v3, %v2411_v58 }
 0x313   :  { %v2434_v61 = vmul.f32 %v6851_v3, %v2412_v56  ;;  %v2435_v52 = vmul.f32 %v6851_v3, %v2413_v4  ;;  %v2436_v59 = vmul.f32 %v6851_v3, %v2414_v17 }
 0x314   :  { %v6880_v41 = vadd.f32 %v6866_v24, %v2430_v47  ;;  %v6883_v49 = vadd.f32 %v6866_v24, %v2431_v50  ;;  %v6886_v0 = vadd.f32 %v6866_v24, %v2432_v43  ;;  %v6889_v37 = vadd.f32 %v6866_v24, %v2433_v1 }
 0x315   :  { %v2327_v26 = vpop.permute.xlu1 %2326  ;;  %v6892_v18 = vadd.f32 %v6866_v24, %v2434_v61  ;;  %v6895_v27 = vadd.f32 %v6866_v24, %v2435_v52  ;;  %v6901_v54 = vadd.f32 %v6866_v24, %v2436_v59  ;;  %v2387_v52 = vsub.f32 %v6715_v62, %v6835_v23 }
 0x316   :  { %v2332_v63 = vsel %vm2330_vm13, 0.0, %v2327_v26  ;;  %v4159_v31 = vmul.f32 -1.442695, %v6880_v41  ;;  %v4160_v55 = vmul.f32 -1.442695, %v6883_v49 }
 0x317   :  { %v2334_v44 = vadd.f32 %v2332_v63, %v2321_v48  ;;  %v4161_v21 = vmul.f32 -1.442695, %v6886_v0  ;;  %v4162_v57 = vmul.f32 -1.442695, %v6889_v37  ;;  %v4163_v16 = vmul.f32 -1.442695, %v6892_v18 }
 0x318   :  { %5125 = vpow2.f32 %v4159_v31  ;;  %v4164_v20 = vmul.f32 -1.442695, %v6895_v27  ;;  %v4165_v14 = vmul.f32 -1.442695, %v6901_v54 }
 0x319   :  { %v2363_v38 = vmul.f32 0.0078125, %v2334_v44  ;;  %v2354_v48 = vpop.permute.xlu1 %2353  ;;  %5127 = vpow2.f32 %v4160_v55  ;;  %v2415_v55 = vmul.f32 %v6840_v2, %v2387_v52 }
 0x31a   :  { %v2358_v30 = vsel %vm2330_vm13, 0.0, %v2354_v48  ;;  %5129 = vpow2.f32 %v4161_v21 }
 0x31b   :  { %v2360_v53 = vadd.f32 %v2358_v30, %v2348_v60  ;;  %v2367_v29 = vmul.f32 %v2363_v38, %v2363_v38  ;;  %5131 = vpow2.f32 %v4162_v57  ;;  %v6912_v30 = vrot.slane %v2363_v38, %v6832_v33 }
 0x31c   :  { %5133 = vpow2.f32 %v4163_v16  ;;  %v2437_v16 = vmul.f32 %v6851_v3, %v2415_v55 }
 0x31d   :  { %v2365_v58 = vmul.f32 0.0078125, %v2360_v53  ;;  %5135 = vpow2.f32 %v4164_v20  ;;  %v2388_v53 = vsub.f32 %v6734_v36, %v6912_v30  ;;  %v2389_v2 = vsub.f32 %v6731_v51, %v6912_v30  ;;  %v5002_v36 = vld [vmem:[%s8089_s7] sm:$0xff]  }
 0x31e   :  { %5137 = vpow2.f32 %v4165_v14  ;;  %v2390_v20 = vsub.f32 %v6740_v10, %v6912_v30  ;;  %v2395_v38 = vsub.f32 %v6800_v15, %v6912_v30 }
 0x31f   :  { %v2369_v56 = vsub.f32 %v2365_v58, %v2367_v29  ;;  %v6927_v29 = vadd.f32 %v6866_v24, %v2437_v16 }
 0x321   :  { %v2371_v4 = vmax.f32 %v2369_v56, 0.0 }
 0x322   :  { %v5126_v47 = vpop.eup %5125 }
 0x323   :  { %v2397_v17 = vadd.f32 1e-05, %v2371_v4  ;;  %v5128_v50 = vpop.eup %5127  ;;  %v2516_v43 = vadd.f32 1.0, %v5126_v47 }
 0x324   :  { %v5130_v60 = vpop.eup %5129  ;;  %v2517_v1 = vadd.f32 1.0, %v5128_v50  ;;  %v2391_v50 = vsub.f32 %v6752_v5, %v6912_v30 }
 0x325   :  { %5139 = vrsqrt.f32 %v2397_v17  ;;  %v5132_v26 = vpop.eup %5131  ;;  %v2518_v61 = vadd.f32 1.0, %v5130_v60 }
 0x326   :  { %5141 = vrcp.f32 %v2516_v43  ;;  %v5134_v59 = vpop.eup %5133  ;;  %v2519_v63 = vadd.f32 1.0, %v5132_v26  ;;  %v2392_v43 = vsub.f32 %v6773_v32, %v6912_v30 }
 0x327   :  { %5143 = vrcp.f32 %v2517_v1  ;;  %v5136_v44 = vpop.eup %5135  ;;  %v2520_v31 = vadd.f32 1.0, %v5134_v59  ;;  %v4166_v59 = vmul.f32 -1.442695, %v6927_v29 }
 0x328   :  { %5145 = vrcp.f32 %v2518_v61  ;;  %v5138_v21 = vpop.eup %5137  ;;  %v2521_v48 = vadd.f32 1.0, %v5136_v44  ;;  %v5005_v44 = vld [vmem:[%s8089_s7 + $0x50] sm:$0xff]  }
 0x329   :  { %5147 = vrcp.f32 %v2519_v63  ;;  %v2522_v57 = vadd.f32 1.0, %v5138_v21  ;;  %v5003_v63 = vld [vmem:[%s8089_s7 + $0x48] sm:$0xff]  }
 0x32a   :  { %5149 = vrcp.f32 %v2520_v31 }
 0x32b   :  { %5151 = vrcp.f32 %v2521_v48 }
 0x32c   :  { %5153 = vrcp.f32 %v2522_v57 }
 0x32d   :  { %5155 = vpow2.f32 %v4166_v59 }
 0x32f   :  { %v5140_v62 = vpop.eup %5139 }
 0x330   :  { %v6916_v23 = vrot.slane %v5140_v62, %v6832_v33  ;;  %v5142_v14 = vpop.eup %5141  ;;  %v5001_v33 = vld [vmem:[%s8089_s7 + $0x40] sm:$0xff]  }
 0x331   :  { %v5144_v58 = vpop.eup %5143  ;;  %v6936_v51 = vmul.f32 %v5142_v14, %v6880_v41  ;;  %4312 = vmatprep.subr.bf16.mxu1 %v5001_v33 }
 0x332   :  { %v2416_v10 = vmul.f32 %v6916_v23, %v2388_v53  ;;  %v2417_v56 = vmul.f32 %v6916_v23, %v2389_v2  ;;  %v2418_v15 = vmul.f32 %v6916_v23, %v2390_v20  ;;  %v5146_v4 = vpop.eup %5145  ;;  %v6942_v17 = vmul.f32 %v5144_v58, %v6883_v49  ;;  %4313 = vmatpush3.bf16.msra.mxu1 %v5002_v36  ;;  %v5007_v58 = vld [vmem:[%s8089_s7 + $0x58] sm:$0xff]  }
 0x333   :  { %8632 = vst [vmem:[#allocation13_spill] sm:$0xff] %v6936_v51  ;;  %v2423_v47 = vmul.f32 %v6916_v23, %v2395_v38  ;;  %v5148_v41 = vpop.eup %5147  ;;  %v4828_v60 = vpack.i.bf16 %v6936_v51, %v8485_v46  ;;  %v6952_v1 = vmul.f32 %v5146_v4, %v6886_v0  ;;  %v2419_v32 = vmul.f32 %v6916_v23, %v2391_v50  ;;  %v5004_v0 = vld [vmem:[%s8089_s7 + $0x8] sm:$0xff]  }
 0x334   :  { %8633 = vst [vmem:[#allocation16_spill] sm:$0xff] %v6942_v17  ;;  %v2438_v26 = vmul.f32 %v6851_v3, %v2416_v10  ;;  %v2439_v49 = vmul.f32 %v6851_v3, %v2417_v56  ;;  %v5150_v61 = vpop.eup %5149  ;;  %v2440_v52 = vmul.f32 %v6851_v3, %v2418_v15  ;;  %v2420_v21 = vmul.f32 %v6916_v23, %v2392_v43 }
 0x335   :  { %8634 = vst [vmem:[#allocation7_spill] sm:$0xff] %v6952_v1  ;;  %v2445_v5 = vmul.f32 %v6851_v3, %v2423_v47  ;;  %4829 = vrot.lane.b32.xlu1 %v4828_v60, %s5226_s4  ;;  %v5152_v48 = vpop.eup %5151  ;;  %v6978_v57 = vmul.f32 %v5148_v41, %v6889_v37  ;;  %v6981_v16 = vmul.f32 %v5150_v61, %v6892_v18  ;;  %v5006_v37 = vld [vmem:[%s8089_s7 + $0x10] sm:$0xff]  }
 0x336   :  { %v6971_v31 = vadd.f32 %v6866_v24, %v2438_v26  ;;  %v6974_v55 = vadd.f32 %v6866_v24, %v2439_v49  ;;  %v6984_v62 = vadd.f32 %v6866_v24, %v2440_v52  ;;  %4314 = vmatprep.subr.bf16.mxu1 %v5003_v63  ;;  %v6991_v2 = vpack.i.bf16 %v6952_v1, %v6942_v17  ;;  %v5154_v18 = vpop.eup %5153 }
 0x337   :  { %8635 = vst [vmem:[#allocation5_spill] sm:$0xff] %v6978_v57  ;;  %8636 = vst [vmem:[#allocation31_spill] sm:$0xff] %v6981_v16  ;;  %v6987_v53 = vadd.f32 %v6866_v24, %v2445_v5  ;;  %4315 = vmatpush3.bf16.msra.mxu1 %v5004_v0  ;;  %v2441_v36 = vmul.f32 %v6851_v3, %v2419_v32  ;;  %v7007_v10 = vmul.f32 %v5152_v48, %v6895_v27  ;;  %v5010_v5 = vld [vmem:[%s8089_s7 + $0x20] sm:$0xff]   ;;  %v5012_v0 = vld [vmem:[%s8089_s7 + $0x28] sm:$0xff]  }
 0x338   :  { %v4167_v20 = vmul.f32 -1.442695, %v6971_v31  ;;  %v4168_v14 = vmul.f32 -1.442695, %v6974_v55  ;;  %v4169_v38 = vmul.f32 -1.442695, %v6984_v62  ;;  %4316 = vmatprep.subr.bf16.mxu1 %v5005_v44  ;;  %v2393_v56 = vsub.f32 %v6782_v35, %v6912_v30 }
 0x339   :  { %v4174_v33 = vmul.f32 -1.442695, %v6987_v53  ;;  %4839 = vrot.lane.b32.xlu1 %v6991_v2, %s5226_s4  ;;  %8637 = vst [vmem:[#allocation8_spill] sm:$0xff] %v7007_v10  ;;  %v2394_v15 = vsub.f32 %v6792_v7, %v6912_v30  ;;  %v7015_v4 = vpack.i.bf16 %v6981_v16, %v6978_v57  ;;  %v2442_v47 = vmul.f32 %v6851_v3, %v2420_v21  ;;  %v5008_v7 = vld [vmem:[%s8089_s7 + $0x18] sm:$0xff]  }
 0x33a   :  { %5157 = vpow2.f32 %v4167_v20  ;;  %v7019_v50 = vadd.f32 %v6866_v24, %v2441_v36  ;;  %v7022_v27 = vmul.f32 %v5154_v18, %v6901_v54  ;;  %v2421_v43 = vmul.f32 %v6916_v23, %v2393_v56  ;;  %v5009_v54 = vld [vmem:[%s8089_s7 + $0x60] sm:$0xff]   ;;  %v5013_v56 = vld [vmem:[%s8089_s7 + $0x70] sm:$0xff]  }
 0x33b   :  { %5159 = vpow2.f32 %v4168_v14  ;;  %v2422_v35 = vmul.f32 %v6916_v23, %v2394_v15  ;;  %4317 = vmatpush3.bf16.msra.mxu1 %v5006_v37  ;;  %v7030_v30 = vadd.f32 %v6866_v24, %v2442_v47  ;;  %v5014_v15 = vld [vmem:[%s8089_s7 + $0x30] sm:$0xff]  }
 0x33c   :  { %8638 = vst [vmem:[#allocation6_spill] sm:$0xff] %v7022_v27  ;;  %5161 = vpow2.f32 %v4169_v38  ;;  %v4170_v41 = vmul.f32 -1.442695, %v7019_v50  ;;  %4318 = vmatprep.subr.bf16.mxu1 %v5007_v58  ;;  %v2443_v23 = vmul.f32 %v6851_v3, %v2421_v43  ;;  %v7043_v49 = vpack.i.bf16 %v7022_v27, %v7007_v10 }
 0x33d   :  { %5163 = vpow2.f32 %v4174_v33  ;;  %4849 = vrot.lane.b32.xlu1 %v7015_v4, %s5226_s4  ;;  %v2444_v60 = vmul.f32 %v6851_v3, %v2422_v35  ;;  %v4171_v26 = vmul.f32 -1.442695, %v7030_v30  ;;  %v5011_v3 = vld [vmem:[%s8089_s7 + $0x68] sm:$0xff]   ;;  %v8226_v38 = vrot.slane %v6978_v57, 1 }
 0x33e   :  { %5165 = vpow2.f32 %v4170_v41  ;;  %v7046_v61 = vadd.f32 %v6866_v24, %v2443_v23  ;;  %v2649_v58 = vrot.slane %v6981_v16, 1 }
 0x33f   :  { %v7049_v52 = vadd.f32 %v6866_v24, %v2444_v60  ;;  %4319 = vmatpush3.bf16.msra.mxu1 %v5008_v7  ;;  %5167 = vpow2.f32 %v4171_v26  ;;  %v5156_v24 = vpop.eup %5155  ;;  %v8225_v7 = vrot.slane %v7007_v10, 1  ;;  %v8644_v26 = vld [vmem:[#allocation23_spill] sm:$0xff] }
 0x340   :  { %4320 = vmatprep.subr.bf16.mxu1 %v5009_v54  ;;  %v4172_v32 = vmul.f32 -1.442695, %v7046_v61  ;;  %v2523_v18 = vadd.f32 1.0, %v5156_v24  ;;  %v7076_v35 = vsel %vm8639_vm10, %v8226_v38, %v2649_v58  ;;  %vm8645_vm7 = vnez %v8644_v26 }
 0x341   :  { %4859 = vrot.lane.b32.xlu1 %v7043_v49, %s5226_s4  ;;  %v4173_v59 = vmul.f32 -1.442695, %v7049_v52  ;;  %8640 = vst [vmem:[#allocation35_spill] sm:$0xff] %v7076_v35  ;;  %v2886_v54 = vsel %vm8641_vm9, %v7076_v35, 0.0  ;;  %v7086_v23 = vsel %vm8642_vm8, %v2649_v58, %v8225_v7  ;;  %vm8665_vm8 = vnez %v8513_v19 }
 0x342   :  { %5169 = vpow2.f32 %v4172_v32  ;;  %8643 = vst [vmem:[#allocation24_spill] sm:$0xff] %v7086_v23 }
 0x343   :  { %4321 = vmatpush3.bf16.msra.mxu1 %v5010_v5  ;;  %5171 = vpow2.f32 %v4173_v59  ;;  %v2887_v5 = vsel %vm8645_vm7, %v7086_v23, 0.0 }
 0x344   :  { %v5158_v63 = vpop.eup %5157  ;;  %4322 = vmatprep.subr.bf16.mxu1 %v5011_v3  ;;  %v7091_v59 = vpack.c.bf16 %v2887_v5, %v2886_v54  ;;  %v2601_v5 = vrot.slane %v6981_v16, 7 }
 0x345   :  { %v5160_v44 = vpop.eup %5159  ;;  %v2524_v21 = vadd.f32 1.0, %v5158_v63  ;;  %v5015_v63 = vld [vmem:[%s8089_s7 + $0x78] sm:$0xff]  }
 0x346   :  { %v5162_v48 = vpop.eup %5161  ;;  %v2525_v20 = vadd.f32 1.0, %v5160_v44  ;;  %8646 = vst [vmem:[#allocation26_spill] sm:$0xff] %v7091_v59  ;;  %v5017_v44 = vld [vmem:[%s8089_s7 + $0x38] sm:$0xff]  }
 0x347   :  { %v5164_v14 = vpop.eup %5163  ;;  %5173 = vrcp.f32 %v2524_v21  ;;  %v2526_v37 = vadd.f32 1.0, %v5162_v48  ;;  %4323 = vmatpush3.bf16.msra.mxu1 %v5012_v0  ;;  %v5016_v0 = vld [vmem:[%s8089_s7 + $0xc0] sm:$0xff]   ;;  %v7103_v48 = vrot.slane %v6936_v51, 7 }
 0x348   :  { %5175 = vrcp.f32 %v2525_v20  ;;  %v2531_v33 = vadd.f32 1.0, %v5164_v14  ;;  %v5166_v36 = vpop.eup %5165  ;;  %4324 = vmatprep.subr.bf16.mxu1 %v5013_v56  ;;  %v7106_v20 = vrot.slane %v6942_v17, 7  ;;  %v5018_v14 = vld [vmem:[%s8089_s7 + $0x80] sm:$0xff]   ;;  %4376 = vmatprep.subr.bf16.mxu0 %v5016_v0  ;;  %v2647_v0 = vrot.slane %v6952_v1, 1 }
 0x349   :  { %5177 = vrcp.f32 %v2526_v37  ;;  %v2527_v47 = vadd.f32 1.0, %v5166_v36  ;;  %v5168_v43 = vpop.eup %5167  ;;  %v2600_v36 = vrot.slane %v6978_v57, 7  ;;  %4377 = vmatpush3.bf16.msra.mxu0 %v5018_v14 }
 0x34a   :  { %5179 = vrcp.f32 %v2531_v33  ;;  %v2528_v41 = vadd.f32 1.0, %v5168_v43  ;;  %8647 = vst [vmem:[#allocation25_spill] sm:$0xff] %v7106_v20  ;;  %v2599_v33 = vrot.slane %v6952_v1, 7  ;;  %v7131_v54 = vsel %vm8652_vm4, %v7103_v48, %v7106_v20 }
 0x34b   :  { %5181 = vrcp.f32 %v2523_v18  ;;  %4325 = vmatpush3.bf16.msra.mxu1 %v5014_v15  ;;  %vm8666_vm4 = vnez %v8516_v42 }
 0x34c   :  { %5183 = vrcp.f32 %v2527_v47  ;;  %v5170_v60 = vpop.eup %5169  ;;  %4326 = vmatprep.subr.bf16.mxu1 %v5015_v63  ;;  %v7157_v63 = vrot.slane %v6942_v17, 1 }
 0x34d   :  { %5185 = vrcp.f32 %v2528_v41  ;;  %v5172_v3 = vpop.eup %5171  ;;  %v2529_v32 = vadd.f32 1.0, %v5170_v60  ;;  %v7136_v60 = vld [vmem:[%s8089_s7 + $0x100] sm:$0xff]  }
 0x34e   :  { %v2530_v24 = vadd.f32 1.0, %v5172_v3  ;;  %8653 = vst [vmem:[#allocation12_spill] sm:$0xff] %v7136_v60  ;;  %v2602_v3 = vrot.slane %v7007_v10, 7 }
 0x34f   :  { %5187 = vrcp.f32 %v2529_v32  ;;  %4327 = vmatpush3.bf16.msra.mxu1 %v5017_v44 }
 0x350   :  { %5189 = vrcp.f32 %v2530_v24  ;;  %v7154_v24 = vrot.slane %v6936_v51, 1  ;;  %4482 = vmatprep.subr.bf16.mxu1 %v7136_v60  ;;  %v7203_v16 = vsel %vm8655_vm0, %v2601_v5, %v2602_v3 }
 0x351   :  { %v5174_v21 = vpop.eup %5173 }
 0x352   :  { %v5176_v37 = vpop.eup %5175  ;;  %v7112_v18 = vmul.f32 %v5174_v21, %v6971_v31 }
 0x353   :  { %v5178_v58 = vpop.eup %5177  ;;  %v7119_v47 = vmul.f32 %v5176_v37, %v6974_v55 }
 0x354   :  { %8648 = vst [vmem:[#allocation10_spill] sm:$0xff] %v7112_v18  ;;  %v5180_v56 = vpop.eup %5179  ;;  %v4868_v15 = vpack.i.bf16 %v7112_v18, %v8485_v46  ;;  %v7122_v31 = vmul.f32 %v5178_v58, %v6984_v62  ;;  %v7141_v62 = vsel %vm8654_vm5, %v2599_v33, %v2600_v36  ;;  %v8660_v58 = vld [vmem:[#allocation18_spill] sm:$0xff]  ;;  %vm8667_vm5 = vmmov %vm8655_vm0 }
 0x355   :  { %8649 = vst [vmem:[#allocation9_spill] sm:$0xff] %v7119_v47  ;;  %v5182_v43 = vpop.eup %5181  ;;  %v7125_v41 = vmul.f32 %v5180_v56, %v6987_v53  ;;  %v7146_v53 = vsel %vm8655_vm0, %v7106_v20, %v2599_v33  ;;  %vm8661_vm13 = vnez %v8660_v58 }
 0x356   :  { %8650 = vst [vmem:[#allocation29_spill] sm:$0xff] %v7122_v31  ;;  %v5184_v55 = vpop.eup %5183  ;;  %4869 = vrot.lane.b32.xlu1 %v4868_v15, %s5226_s4  ;;  %v7163_v21 = vpack.i.bf16 %v7122_v31, %v7119_v47  ;;  %v7169_v37 = vmul.f32 %v5182_v43, %v6927_v29  ;;  %v2725_v56 = vsel %vm8661_vm13, %v7131_v54, 0.0  ;;  %v5021_v29 = vld [vmem:[%s8089_s7 + $0x88] sm:$0xff]   ;;  %v8663_v43 = vld [vmem:[#allocation17_spill] sm:$0xff]  ;;  %v2726_v7 = vsel %vm8665_vm8, %v7146_v53, 0.0 }
 0x357   :  { %8651 = vst [vmem:[#allocation28_spill] sm:$0xff] %v7125_v41  ;;  %v7151_v32 = vrot.slane %v7125_v41, 7  ;;  %v5186_v44 = vpop.eup %5185  ;;  %v7166_v14 = vmul.f32 %v5184_v55, %v7019_v50  ;;  %v5020_v50 = vld [vmem:[%s8089_s7 + $0xc8] sm:$0xff]   ;;  %vm8664_vm10 = vnez %v8663_v43  ;;  %8669 = vst [vmem:[#allocation17_spill] sm:$0xff] %v7203_v16 }
 0x358   :  { %8658 = vst [vmem:[#allocation15_spill] sm:$0xff] %v7169_v37  ;;  %v7179_v15 = vmul.f32 %v5186_v44, %v7030_v30  ;;  %v2727_v30 = vsel %vm8666_vm4, %v7141_v62, 0.0  ;;  %v7199_v44 = vsel %vm8667_vm5, %v2600_v36, %v2601_v5  ;;  %4378 = vmatprep.subr.bf16.mxu0 %v5020_v50  ;;  %v7227_v51 = vrot.slane %v7169_v37, 7 }
 0x359   :  { %8656 = vst [vmem:[#allocation11_spill] sm:$0xff] %v7151_v32  ;;  %8657 = vst [vmem:[#allocation37_spill] sm:$0xff] %v7166_v14  ;;  %v2723_v33 = vsel %vm8659_vm12, %v7151_v32, %v7103_v48  ;;  %v5188_v38 = vpop.eup %5187  ;;  %vm8670_vm12 = vcmp.lt.s32.totalorder %v5590_v8, 7  ;;  %4379 = vmatpush3.bf16.msra.mxu0 %v5021_v29  ;;  %v4833_v50 = vpack.i.bf16 %v2727_v30, %v2726_v7  ;;  %vm8678_vm5 = vnez %v8536_v39  ;;  %v8681_v30 = vld [vmem:[#allocation21_spill] sm:$0xff]  ;;  %v5024_v39 = vld [vmem:[%s8089_s7 + $0xd8] sm:$0xff]  }
 0x35a   :  { %8662 = vst [vmem:[#allocation34_spill] sm:$0xff] %v7179_v15  ;;  %4879 = vrot.lane.b32.xlu1 %v7163_v21, %s5226_s4  ;;  %v2724_v55 = vsel %vm8664_vm10, %v2723_v33, 0.0  ;;  %8668 = vst [vmem:[#allocation18_spill] sm:$0xff] %v7199_v44  ;;  %v7208_v33 = vsel %vm8670_vm12, %v7157_v63, %v2647_v0  ;;  %v5190_v36 = vpop.eup %5189  ;;  %v7221_v5 = vmul.f32 %v5188_v38, %v7046_v61  ;;  %v5022_v61 = vld [vmem:[%s8089_s7 + $0xd0] sm:$0xff]   ;;  %vm8683_vm4 = vcmp.lt.s32.totalorder %v5590_v8, 1 }
 0x35b   :  { %v4823_v59 = vpack.i.bf16 %v2725_v56, %v2724_v55  ;;  %vm8671_vm8 = vmmov %vm8670_vm12  ;;  %v7218_v56 = vpack.i.bf16 %v7179_v15, %v7166_v14  ;;  %v7224_v55 = vrot.slane %v7022_v27, 7  ;;  %8675 = vst [vmem:[#allocation59_spill] sm:$0xff] %v7227_v51  ;;  %v7231_v17 = vmul.f32 %v5190_v36, %v7049_v52  ;;  %v5023_v38 = vld [vmem:[%s8089_s7 + $0x90] sm:$0xff]   ;;  %4380 = vmatprep.subr.bf16.mxu0 %v5022_v61  ;;  %v5025_v61 = vld [vmem:[%s8089_s7 + $0x98] sm:$0xff]  }
 0x35c   :  { %v7214_v1 = vsel %vm8671_vm8, %v7154_v24, %v7157_v63  ;;  %8673 = vst [vmem:[#allocation57_spill] sm:$0xff] %v7221_v5  ;;  %vm8677_vm8 = vnez %v8533_v11  ;;  %v2729_v52 = vsel %vm8678_vm5, %v7203_v16, 0.0  ;;  %vm8682_vm12 = vnez %v8681_v30  ;;  %vm8685_vm5 = vmmov %vm8683_vm4 }
 0x35d   :  { %8672 = vst [vmem:[#allocation56_spill] sm:$0xff] %v7214_v1  ;;  %8674 = vst [vmem:[#allocation58_spill] sm:$0xff] %v7224_v55  ;;  %4824 = vrot.lane.b32.xlu0 %v4823_v59, %s5226_s4  ;;  %v2728_v29 = vsel %vm8677_vm8, %v7199_v44, 0.0  ;;  %v8679_v59 = vld [vmem:[#allocation19_spill] sm:$0xff]  ;;  %v2773_v36 = vsel %vm8682_vm12, %v7208_v33, 0.0  ;;  %v7255_v20 = vpack.i.bf16 %v7231_v17, %v7221_v5  ;;  %v7260_v60 = vsel %vm8683_vm4, %v2602_v3, %v7224_v55 }
 0x35e   :  { %8676 = vst [vmem:[#allocation60_spill] sm:$0xff] %v7231_v17  ;;  %4889 = vrot.lane.b32.xlu1 %v7218_v56, %s5226_s4  ;;  %vm8680_vm0 = vnez %v8679_v59  ;;  %8684 = vst [vmem:[#allocation19_spill] sm:$0xff] %v7260_v60  ;;  %v7266_v16 = vsel %vm8685_vm5, %v7224_v55, %v7227_v51  ;;  %v8688_v44 = vrot.slane %v6978_v57, 1  ;;  %vm8689_vm4 = vcmp.lt.s32.totalorder %v5590_v8, 7  ;;  %4381 = vmatpush3.bf16.msra.mxu0 %v5023_v38 }
 0x35f   :  { %v2772_v7 = vsel %vm8680_vm0, %v7214_v1, 0.0  ;;  %8686 = vst [vmem:[#allocation21_spill] sm:$0xff] %v7266_v16  ;;  %v7269_v1 = vrot.slane %v7022_v27, 1  ;;  %v7282_v11 = vrot.slane %v7112_v18, 7  ;;  %v7285_v55 = vrot.slane %v7119_v47, 7  ;;  %4382 = vmatprep.subr.bf16.mxu0 %v5024_v39  ;;  %vm8693_vm5 = vmmov %vm8689_vm4 }
 0x360   :  { %v7279_v3 = vsel %vm8689_vm4, %v2647_v0, %v8688_v44  ;;  %v4908_v27 = vpack.i.bf16 %v2773_v36, %v2772_v7  ;;  %v2730_v0 = vsel %vm5942_vm2, %v7260_v60, 0.0  ;;  %v2731_v44 = vsel %vm5965_vm3, %v7266_v16, 0.0  ;;  %v8700_v60 = vld [vmem:[#allocation30_spill] sm:$0xff] }
 0x361   :  { %8687 = vst [vmem:[#allocation61_spill] sm:$0xff] %v7269_v1  ;;  %4834 = vrot.lane.b32.xlu0 %v4833_v50, %s5226_s4  ;;  %8690 = vst [vmem:[#allocation62_spill] sm:$0xff] %v7282_v11  ;;  %v4843_v50 = vpack.i.bf16 %v2729_v52, %v2728_v29  ;;  %v2774_v38 = vsel %vm8641_vm9, %v7279_v3, 0.0  ;;  %v2775_v57 = vsel %vm8645_vm7, %v7076_v35, 0.0  ;;  %v8692_v39 = vrot.slane %v7007_v10, 1  ;;  %v5027_v35 = vld [vmem:[%s8089_s7 + $0xe0] sm:$0xff]  }
 0x362   :  { %8691 = vst [vmem:[#allocation63_spill] sm:$0xff] %v7285_v55  ;;  %4894 = vrot.lane.b32.xlu1 %v7255_v20, %s5226_s4  ;;  %v7312_v52 = vrot.slane %v7112_v18, 1  ;;  %vm8695_vm4 = vcmp.lt.s32.totalorder %v5590_v8, 1  ;;  %v2607_v10 = vrot.slane %v7122_v31, 7  ;;  %4383 = vmatpush3.bf16.msra.mxu0 %v5025_v61  ;;  %v7330_v18 = vrot.slane %v7119_v47, 1 }
 0x363   :  { %v7309_v29 = vsel %vm8693_vm5, %v8692_v39, %v7269_v1  ;;  %v7319_v7 = vsel %vm8695_vm4, %v7282_v11, %v7285_v55  ;;  %vm8697_vm7 = vmmov %vm8695_vm4  ;;  %v2608_v39 = vrot.slane %v7166_v14, 7  ;;  %v2655_v16 = vrot.slane %v7122_v31, 1  ;;  %4384 = vmatprep.subr.bf16.mxu0 %v5027_v35 }
 0x364   :  { %8694 = vst [vmem:[#allocation64_spill] sm:$0xff] %v7312_v52  ;;  %8696 = vst [vmem:[#allocation65_spill] sm:$0xff] %v7319_v7  ;;  %v2715_v36 = vsel %vm8697_vm7, %v7227_v51, %v7282_v11  ;;  %v5028_v51 = vld [vmem:[%s8089_s7 + $0xa0] sm:$0xff]   ;;  %v4853_v26 = vpack.i.bf16 %v2731_v44, %v2730_v0  ;;  %v4918_v9 = vpack.i.bf16 %v2775_v57, %v2774_v38  ;;  %v7340_v61 = vrot.slane %v7169_v37, 1  ;;  %v8698_v11 = vld [vmem:[#allocation27_spill] sm:$0xff] }
 0x365   :  { %4844 = vrot.lane.b32.xlu0 %v4843_v50, %s5226_s4  ;;  %v2609_v50 = vrot.slane %v7179_v15, 7  ;;  %v2732_v47 = vsel %vm5998_vm1, %v2715_v36, 0.0  ;;  %v2733_v31 = vsel %vm8450_vm15, %v7319_v7, 0.0  ;;  %vm8699_vm7 = vnez %v8698_v11  ;;  %v5029_v0 = vld [vmem:[%s8089_s7 + $0xe8] sm:$0xff]   ;;  %vm8703_vm9 = vmmov %vm8695_vm4  ;;  %v5036_v11 = vld [vmem:[%s8089_s7 + $0x118] sm:$0xff]  }
 0x366   :  { %4909 = vrot.lane.b32.xlu1 %v4908_v27, %s5226_s4  ;;  %v2610_v27 = vrot.slane %v7221_v5, 7  ;;  %v2776_v34 = vsel %vm8699_vm7, %v7086_v23, 0.0  ;;  %vm8701_vm5 = vnez %v8700_v60  ;;  %v7360_v44 = vsel %vm8695_vm4, %v2607_v10, %v2608_v39  ;;  %4385 = vmatpush3.bf16.msra.mxu0 %v5028_v51  ;;  %v5030_v36 = vld [vmem:[%s8089_s7 + $0xa8] sm:$0xff]  }
 0x367   :  { %v2777_v57 = vsel %vm8701_vm5, %v7309_v29, 0.0  ;;  %8702 = vst [vmem:[#allocation27_spill] sm:$0xff] %v7360_v44  ;;  %v7365_v38 = vsel %vm8703_vm9, %v7285_v55, %v2607_v10  ;;  %vm8705_vm15 = vcmp.lt.s32.totalorder %v5590_v8, 7  ;;  %v7391_v55 = vrot.slane %v7231_v17, 7  ;;  %4386 = vmatprep.subr.bf16.mxu0 %v5029_v0  ;;  %v8716_v0 = vld [vmem:[#allocation42_spill] sm:$0xff] }
 0x368   :  { %8704 = vst [vmem:[#allocation66_spill] sm:$0xff] %v7365_v38  ;;  %v2763_v35 = vsel %vm8705_vm15, %v7340_v61, %v7312_v52  ;;  %vm8707_vm9 = vmmov %vm8705_vm15  ;;  %v4928_v23 = vpack.i.bf16 %v2777_v57, %v2776_v34  ;;  %v2657_v34 = vrot.slane %v7179_v15, 1  ;;  %v7431_v15 = vrot.slane %v7231_v17, 1 }
 0x369   :  { %4854 = vrot.lane.b32.xlu0 %v4853_v26, %s5226_s4  ;;  %v7377_v26 = vsel %vm8695_vm4, %v2608_v39, %v2609_v50  ;;  %v7382_v10 = vsel %vm8707_vm9, %v7330_v18, %v2655_v16  ;;  %vm8708_vm15 = vmmov %vm8707_vm9  ;;  %v2658_v17 = vrot.slane %v7221_v5, 1  ;;  %v2888_v60 = vsel %vm8699_vm7, %v7309_v29, 0.0 }
 0x36a   :  { %4919 = vrot.lane.b32.xlu1 %v4918_v9, %s5226_s4  ;;  %8706 = vst [vmem:[#allocation67_spill] sm:$0xff] %v7377_v26  ;;  %v7388_v51 = vsel %vm8708_vm15, %v7312_v52, %v7330_v18  ;;  %v4863_v9 = vpack.i.bf16 %v2733_v31, %v2732_v47  ;;  %vm8710_vm4 = vmmov %vm8707_vm9  ;;  %vm8711_vm9 = vcmp.lt.s32.totalorder %v5590_v8, 1  ;;  %v2734_v52 = vsel %vm6110_vm14, %v7365_v38, 0.0  ;;  %v8714_v31 = vld [vmem:[#allocation39_spill] sm:$0xff]  ;;  %4387 = vmatpush3.bf16.msra.mxu0 %v5030_v36 }
 0x36b   :  { %8709 = vst [vmem:[#allocation68_spill] sm:$0xff] %v7388_v51  ;;  %v2764_v39 = vsel %vm8710_vm4, %v7269_v1, %v7340_v61  ;;  %v7399_v7 = vsel %vm8711_vm9, %v2609_v50, %v2610_v27  ;;  %vm8713_vm15 = vnez %v8417_v22  ;;  %v2656_v47 = vrot.slane %v7166_v14, 1  ;;  %v8718_v22 = vld [vmem:[#allocation43_spill] sm:$0xff]  ;;  %8722 = vst [vmem:[#allocation42_spill] sm:$0xff] %v7431_v15 }
 0x36c   :  { %8712 = vst [vmem:[#allocation69_spill] sm:$0xff] %v7399_v7  ;;  %v2735_v25 = vsel %vm8713_vm15, %v7360_v44, 0.0  ;;  %vm8715_vm4 = vnez %v8714_v31  ;;  %v2736_v50 = vsel %vm6255_vm11, %v7377_v26, 0.0  ;;  %vm8717_vm9 = vnez %v8716_v0  ;;  %v5031_v36 = vld [vmem:[%s8089_s7 + $0xf0] sm:$0xff]  }
 0x36d   :  { %4864 = vrot.lane.b32.xlu0 %v4863_v9, %s5226_s4  ;;  %v2779_v57 = vsel %vm8715_vm4, %v2763_v35, 0.0  ;;  %v2780_v1 = vsel %vm8717_vm9, %v7388_v51, 0.0  ;;  %vm8719_vm15 = vnez %v8718_v22  ;;  %v2737_v9 = vsel %vm6283_vm6, %v7399_v7, 0.0  ;;  %v8723_v7 = vld [vmem:[#allocation38_spill] sm:$0xff]  ;;  %4388 = vmatprep.subr.bf16.mxu0 %v5031_v36 }
 0x36e   :  { %v2781_v44 = vsel %vm8719_vm15, %v7382_v10, 0.0  ;;  %4929 = vrot.lane.b32.xlu1 %v4928_v23, %s5226_s4  ;;  %vm8720_vm14 = vcmp.lt.s32.totalorder %v5590_v8, 1  ;;  %v2755_v14 = vrot.slane %v7125_v41, 1  ;;  %v5032_v23 = vld [vmem:[%s8089_s7 + $0xb0] sm:$0xff]   ;;  %v4873_v51 = vpack.i.bf16 %v2735_v25, %v2734_v52  ;;  %v5033_v25 = vld [vmem:[%s8089_s7 + $0xf8] sm:$0xff]  }
 0x36f   :  { %v7428_v35 = vsel %vm8720_vm14, %v2610_v27, %v7391_v55  ;;  %vm8724_vm6 = vnez %v8723_v7  ;;  %v7446_v27 = vsel %vm8720_vm14, %v7391_v55, %v7151_v32  ;;  %vm8726_vm11 = vcmp.lt.s32.totalorder %v5590_v8, 7  ;;  %4389 = vmatpush3.bf16.msra.mxu0 %v5032_v23 }
 0x370   :  { %8721 = vst [vmem:[#allocation39_spill] sm:$0xff] %v7428_v35  ;;  %v2778_v45 = vsel %vm8724_vm6, %v2764_v39, 0.0  ;;  %8725 = vst [vmem:[#allocation43_spill] sm:$0xff] %v7446_v27  ;;  %v7451_v13 = vsel %vm8726_vm11, %v2656_v47, %v2657_v34  ;;  %v2889_v52 = vsel %vm8701_vm5, %v2764_v39, 0.0  ;;  %v4883_v5 = vpack.i.bf16 %v2737_v9, %v2736_v50  ;;  %4390 = vmatprep.subr.bf16.mxu0 %v5033_v25  ;;  %v8733_v50 = vld [vmem:[#allocation46_spill] sm:$0xff]  ;;  %v8735_v9 = vld [vmem:[#allocation47_spill] sm:$0xff] }
 0x371   :  { %v4938_v26 = vpack.i.bf16 %v2779_v57, %v2778_v45  ;;  %vm8727_vm1 = vmmov %vm8726_vm11  ;;  %4874 = vrot.lane.b32.xlu0 %v4873_v51, %s5226_s4  ;;  %v4948_v45 = vpack.i.bf16 %v2781_v44, %v2780_v1  ;;  %v8728_v57 = vld [vmem:[#allocation20_spill] sm:$0xff]  ;;  %vm8732_vm14 = vcmp.lt.s32.totalorder %v5590_v8, 7  ;;  %v2884_v1 = vsel %vm8680_vm0, %v7208_v33, 0.0  ;;  %v8798_v28 = vld [vmem:[#allocation67_spill] sm:$0xff] }
 0x372   :  { %v7455_v38 = vsel %vm8727_vm1, %v2655_v16, %v2656_v47  ;;  %vm8729_vm11 = vnez %v8728_v57  ;;  %v5034_v16 = vld [vmem:[%s8089_s7 + $0xb8] sm:$0xff]   ;;  %v2756_v39 = vsel %vm8732_vm14, %v7431_v15, %v2755_v14  ;;  %v2885_v44 = vsel %vm8682_vm12, %v7279_v3, 0.0 }
 0x373   :  { %v2738_v32 = vsel %vm8729_vm11, %v7428_v35, 0.0  ;;  %4939 = vrot.lane.b32.xlu1 %v4938_v26, %s5226_s4  ;;  %v8730_v47 = vld [vmem:[#allocation36_spill] sm:$0xff]  ;;  %vm8734_vm5 = vnez %v8733_v50  ;;  %v7491_v23 = vsel %vm8732_vm14, %v2658_v17, %v7431_v15  ;;  %v7493_v25 = vpack.c.bf16 %v2885_v44, %v2884_v1  ;;  %vm8738_vm11 = vmmov %vm8732_vm14  ;;  %v8742_v1 = vld [vmem:[#allocation51_spill] sm:$0xff]  ;;  %4391 = vmatpush3.bf16.msra.mxu0 %v5034_v16 }
 0x374   :  { %vm8731_vm1 = vnez %v8730_v47  ;;  %v2782_v26 = vsel %vm8734_vm5, %v7455_v38, 0.0  ;;  %v8739_v47 = vld [vmem:[#allocation14_spill] sm:$0xff]  ;;  %vm8740_vm0 = vmmov %vm8738_vm11  ;;  %vm8743_vm12 = vnez %v8742_v1 }
 0x375   :  { %v2739_v51 = vsel %vm8731_vm1, %v7446_v27, 0.0  ;;  %vm8736_vm1 = vnez %v8735_v9  ;;  %8737 = vst [vmem:[#allocation38_spill] sm:$0xff] %v7493_v25  ;;  %v7497_v27 = vsel %vm8738_vm11, %v2657_v34, %v2658_v17  ;;  %v2875_v35 = vsel %vm8740_vm0, %v8739_v47, %v7330_v18  ;;  %vm8741_vm14 = vmmov %vm8740_vm0  ;;  %4884 = vrot.lane.b32.xlu0 %v4883_v5, %s5226_s4 }
 0x376   :  { %v2783_v36 = vsel %vm8736_vm1, %v7451_v13, 0.0  ;;  %v2876_v15 = vsel %vm8741_vm14, %v7340_v61, %v8739_v47  ;;  %v2897_v17 = vsel %vm8743_vm12, %v2756_v39, 0.0  ;;  %v7513_v34 = vpack.c.bf16 %v2889_v52, %v2888_v60  ;;  %vm8751_vm14 = vmmov %vm8738_vm11 }
 0x377   :  { %v2890_v44 = vsel %vm8724_vm6, %v2876_v15, 0.0  ;;  %v2891_v25 = vsel %vm8715_vm4, %v2875_v35, 0.0  ;;  %4949 = vrot.lane.b32.xlu1 %v4948_v45, %s5226_s4  ;;  %v2892_v5 = vsel %vm8717_vm9, %v7382_v10, 0.0  ;;  %v2893_v61 = vsel %vm8719_vm15, %v7455_v38, 0.0  ;;  %v8747_v45 = vld [vmem:[#allocation50_spill] sm:$0xff] }
 0x378   :  { %8744 = vst [vmem:[#allocation20_spill] sm:$0xff] %v7513_v34  ;;  %v7520_v18 = vpack.c.bf16 %v2891_v25, %v2890_v44  ;;  %v2894_v60 = vsel %vm8734_vm5, %v7451_v13, 0.0  ;;  %v4898_v15 = vpack.i.bf16 %v2739_v51, %v2738_v32  ;;  %v7531_v52 = vpack.c.bf16 %v2893_v61, %v2892_v5  ;;  %v8754_v61 = vld [vmem:[#allocation55_spill] sm:$0xff] }
 0x379   :  { %v2895_v35 = vsel %vm8736_vm1, %v7497_v27, 0.0  ;;  %vm8748_vm0 = vnez %v8747_v45  ;;  %v4958_v25 = vpack.i.bf16 %v2783_v36, %v2782_v26  ;;  %v2868_v34 = vsel %vm8738_vm11, %v2755_v14, %v8739_v47  ;;  %v8752_v36 = vld [vmem:[#allocation54_spill] sm:$0xff] }
 0x37a   :  { %8745 = vst [vmem:[#allocation46_spill] sm:$0xff] %v7520_v18  ;;  %8746 = vst [vmem:[#allocation47_spill] sm:$0xff] %v7531_v52  ;;  %v2896_v16 = vsel %vm8748_vm0, %v7491_v23, 0.0  ;;  %v7539_v44 = vpack.c.bf16 %v2895_v35, %v2894_v60  ;;  %4899 = vrot.lane.b32.xlu0 %v4898_v15, %s5226_s4  ;;  %v2784_v32 = vsel %vm8748_vm0, %v7497_v27, 0.0  ;;  %v2785_v51 = vsel %vm8743_vm12, %v7491_v23, 0.0 }
 0x37b   :  { %v7541_v18 = vpack.c.bf16 %v2897_v17, %v2896_v16  ;;  %v2883_v26 = vsel %vm8751_vm14, %v8739_v47, %v7157_v63  ;;  %vm8753_vm1 = vnez %v8752_v36  ;;  %4959 = vrot.lane.b32.xlu1 %v4958_v25, %s5226_s4  ;;  %v2771_v5 = vsel %vm8738_vm11, %v2755_v14, %v7154_v24 }
 0x37c   :  { %8749 = vst [vmem:[#allocation14_spill] sm:$0xff] %v7539_v44  ;;  %v2898_v17 = vsel %vm8753_vm1, %v2868_v34, 0.0  ;;  %vm8755_vm0 = vnez %v8754_v61  ;;  %v4968_v35 = vpack.i.bf16 %v2785_v51, %v2784_v32  ;;  %v2786_v63 = vsel %vm8753_vm1, %v2756_v39, 0.0 }
 0x37d   :  { %8750 = vst [vmem:[#allocation51_spill] sm:$0xff] %v7541_v18  ;;  %v2899_v60 = vsel %vm8755_vm0, %v2883_v26, 0.0  ;;  %v2787_v34 = vsel %vm8755_vm0, %v2771_v5, 0.0  ;;  %vm8757_vm14 = vcmp.lt.s32.totalorder %v5590_v8, 1  ;;  %vm8759_vm0 = vcmask 523264  }
 0x37e   :  { %v7565_v15 = vpack.c.bf16 %v2899_v60, %v2898_v17  ;;  %4904 = vrot.lane.b32.xlu0 %v6991_v2, %s5226_s4  ;;  %v4978_v16 = vpack.i.bf16 %v2787_v34, %v2786_v63  ;;  %v4933_v2 = vpack.i.bf16 %v8485_v46, %v7169_v37  ;;  %vm8758_vm11 = vmmov %vm8757_vm14  ;;  %v8783_v37 = vld [vmem:[#allocation65_spill] sm:$0xff] }
 0x37f   :  { %4969 = vrot.lane.b32.xlu1 %v4968_v35, %s5226_s4  ;;  %vm8760_vm1 = vmmov %vm8759_vm0 }
 0x380   :  { %8756 = vst [vmem:[#allocation50_spill] sm:$0xff] %v7565_v15 }
 0x382   :  { %4914 = vrot.lane.b32.xlu0 %v7015_v4, %s5226_s4  ;;  %v4973_v4 = vpack.i.bf16 %v8485_v46, %v7125_v41 }
 0x383   :  { %4979 = vrot.lane.b32.xlu1 %v4978_v16, %s5226_s4 }
 0x386   :  { %4924 = vrot.lane.b32.xlu0 %v7043_v49, %s5226_s4  ;;  %v2627_v49 = vsel %vm8757_vm14, %v7391_v55, %v8478_v6  ;;  %vm8761_vm14 = vnez %v8513_v19  ;;  %v8859_v19 = vld [vmem:[#allocation7_spill] sm:$0xff] }
 0x387   :  { %v2630_v17 = vsel %vm8761_vm14, %v7131_v54, 0.0  ;;  %v2632_v54 = vsel %vm8677_vm8, %v7141_v62, 0.0  ;;  %v2838_v43 = vsel %vm8761_vm14, %v7141_v62, 0.0 }
 0x38a   :  { %4934 = vrot.lane.b32.xlu0 %v4933_v2, %s5226_s4 }
 0x38e   :  { %4944 = vrot.lane.b32.xlu0 %v7163_v21, %s5226_s4  ;;  %v2626_v21 = vsel %vm8758_vm11, %v8478_v6, %v7103_v48  ;;  %vm8762_vm11 = vnez %v8516_v42 }
 0x38f   :  { %v2629_v46 = vsel %vm8661_vm13, %v2626_v21, 0.0  ;;  %v2631_v5 = vsel %vm8762_vm11, %v7146_v53, 0.0  ;;  %vm8763_vm13 = vmmov %vm8759_vm0  ;;  %v8766_v21 = vld [vmem:[#allocation33_spill] sm:$0xff] }
 0x390   :  { %vm8768_vm11 = vmmov %vm8759_vm0 }
 0x392   :  { %4954 = vrot.lane.b32.xlu0 %v7218_v56, %s5226_s4 }
 0x396   :  { %4964 = vrot.lane.b32.xlu0 %v7255_v20, %s5226_s4  ;;  %v2628_v20 = vsel %vm8664_vm10, %v2627_v49, 0.0  ;;  %v8765_v49 = vld [vmem:[#allocation18_spill] sm:$0xff] }
 0x39a   :  { %4974 = vrot.lane.b32.xlu0 %v4973_v4, %s5226_s4  ;;  %v8764_v4 = vld [vmem:[#allocation32_spill] sm:$0xff] }
 0x3a7   :  { %v4830_v14 = vpop.permute.xlu1 %4829 }
 0x3a8   :  { %v4832_v56 = vunpack.i.h.bf16 %v4830_v14  ;;  %v4831_v39 = vunpack.i.l.bf16 %v4830_v14 }
 0x3aa   :  { %v7604_v25 = vsel %vm8759_vm0, %v2628_v20, %v4831_v39  ;;  %v7607_v32 = vsel %vm8760_vm1, %v2629_v46, %v4832_v56  ;;  %vm8767_vm1 = vnez %v8766_v21  ;;  %v8776_v46 = vld [vmem:[#allocation58_spill] sm:$0xff]  ;;  %v8799_v21 = vld [vmem:[#allocation53_spill] sm:$0xff] }
 0x3ab   :  { %v4840_v51 = vpop.permute.xlu1 %4839  ;;  %v2633_v14 = vsel %vm8767_vm1, %v8765_v49, 0.0 }
 0x3ac   :  { %v4842_v48 = vunpack.i.h.bf16 %v4840_v51  ;;  %v4841_v26 = vunpack.i.l.bf16 %v4840_v51 }
 0x3ae   :  { %v7618_v60 = vsel %vm8763_vm13, %v2630_v17, %v4841_v26  ;;  %v7621_v35 = vsel %vm8759_vm0, %v2631_v5, %v4842_v48  ;;  %vm8769_vm13 = vmmov %vm8759_vm0  ;;  %v8770_v26 = vld [vmem:[#allocation17_spill] sm:$0xff]  ;;  %v8771_v5 = vld [vmem:[#allocation19_spill] sm:$0xff] }
 0x3af   :  { %v4850_v63 = vpop.permute.xlu1 %4849  ;;  %v2634_v17 = vsel %vm5942_vm2, %v8770_v26, 0.0  ;;  %v2635_v34 = vsel %vm5965_vm3, %v8771_v5, 0.0  ;;  %vm8781_vm3 = vcmask 523264  }
 0x3b0   :  { %v4852_v16 = vunpack.i.h.bf16 %v4850_v63  ;;  %v4851_v2 = vunpack.i.l.bf16 %v4850_v63  ;;  %vm8782_vm1 = vmmov %vm8781_vm3 }
 0x3b1   :  { %vm8803_vm8 = vmmov %vm8782_vm1 }
 0x3b2   :  { %v7632_v56 = vsel %vm8768_vm11, %v2632_v54, %v4851_v2  ;;  %v7635_v39 = vsel %vm8769_vm13, %v2633_v14, %v4852_v16  ;;  %vm8773_vm11 = vmmov %vm8759_vm0  ;;  %v8774_v14 = vld [vmem:[#allocation62_spill] sm:$0xff]  ;;  %vm8775_vm13 = vcmp.lt.s32.totalorder %v5590_v8, 1 }
 0x3b3   :  { %v4860_v20 = vpop.permute.xlu1 %4859  ;;  %vm8777_vm2 = vmmov %vm8775_vm13  ;;  %v8835_v0 = vpack.c.bf16 %v7635_v39, %v7632_v56  ;;  %v8840_v39 = vld [vmem:[#allocation42_spill] sm:$0xff] }
 0x3b4   :  { %v4862_v51 = vunpack.i.h.bf16 %v4860_v20  ;;  %v4861_v48 = vunpack.i.l.bf16 %v4860_v20  ;;  %v2618_v20 = vsel %vm8775_vm13, %v8478_v6, %v8774_v14  ;;  %v2619_v55 = vsel %vm8777_vm2, %v8776_v46, %v8478_v6 }
 0x3b5   :  { %vm8784_vm2 = vnez %v8420_v12  ;;  %vm8785_vm13 = vcmp.lt.s32.totalorder %v5590_v8, 7 }
 0x3b6   :  { %v7646_v2 = vsel %vm8759_vm0, %v2634_v17, %v4861_v48  ;;  %v7649_v16 = vsel %vm8773_vm11, %v2635_v34, %v4862_v51  ;;  %vm8778_vm0 = vnez %v8398_v40  ;;  %v8779_v51 = vld [vmem:[#allocation45_spill] sm:$0xff]  ;;  %v8791_v40 = vld [vmem:[#allocation56_spill] sm:$0xff] }
 0x3b7   :  { %v2636_v34 = vsel %vm8778_vm0, %v2619_v55, 0.0  ;;  %vm8780_vm11 = vnez %v8779_v51  ;;  %v2674_v55 = vsel %vm8785_vm13, %v8739_v47, %v7154_v24  ;;  %vm8792_vm13 = vnez %v8681_v30 }
 0x3b8   :  { %v2637_v17 = vsel %vm8780_vm11, %v2618_v20, 0.0  ;;  %v8786_v20 = vld [vmem:[#allocation66_spill] sm:$0xff]  ;;  %vm8790_vm11 = vmmov %vm8782_vm1  ;;  %v2677_v24 = vsel %vm8792_vm13, %v8791_v40, 0.0  ;;  %vm8800_vm0 = vnez %v8799_v21 }
 0x3b9   :  { %vm8801_vm13 = vmmov %vm8782_vm1 }
 0x3c8   :  { %v4870_v15 = vpop.permute.xlu1 %4869 }
 0x3c9   :  { %v4872_v41 = vunpack.i.h.bf16 %v4870_v15  ;;  %v4871_v48 = vunpack.i.l.bf16 %v4870_v15  ;;  %v2638_v15 = vsel %vm8784_vm2, %v8783_v37, 0.0  ;;  %vm8794_vm2 = vmmov %vm8782_vm1  ;;  %v2641_v37 = vsel %vm8800_vm0, %v8798_v28, 0.0 }
 0x3cb   :  { %v7666_v54 = vsel %vm8781_vm3, %v2636_v34, %v4871_v48  ;;  %v7669_v18 = vsel %vm8782_vm1, %v2637_v17, %v4872_v41  ;;  %v8787_v48 = vld [vmem:[#allocation48_spill] sm:$0xff] }
 0x3cc   :  { %v4880_v14 = vpop.permute.xlu1 %4879  ;;  %vm8788_vm3 = vnez %v8787_v48 }
 0x3cd   :  { %v4882_v46 = vunpack.i.h.bf16 %v4880_v14  ;;  %v4881_v52 = vunpack.i.l.bf16 %v4880_v14  ;;  %v2639_v41 = vsel %vm8788_vm3, %v8786_v20, 0.0  ;;  %vm8793_vm3 = vnez %v8679_v59 }
 0x3ce   :  { %v2676_v20 = vsel %vm8793_vm3, %v2674_v55, 0.0  ;;  %vm8809_vm3 = vmmov %vm8782_vm1 }
 0x3cf   :  { %v4825_v34 = vpop.permute.xlu0 %4824  ;;  %v7684_v17 = vsel %vm8782_vm1, %v2638_v15, %v4881_v52  ;;  %v7687_v44 = vsel %vm8790_vm11, %v2639_v41, %v4882_v46  ;;  %v8795_v15 = vld [vmem:[#allocation27_spill] sm:$0xff]  ;;  %v8796_v41 = vld [vmem:[#allocation52_spill] sm:$0xff] }
 0x3d0   :  { %8789 = vst [vmem:[#allocation54_spill] sm:$0xff] %v7684_v17  ;;  %v4827_v14 = vunpack.i.h.bf16 %v4825_v34  ;;  %v4826_v51 = vunpack.i.l.bf16 %v4825_v34  ;;  %v4890_v12 = vpop.permute.xlu1 %4889  ;;  %vm8797_vm11 = vnez %v8796_v41  ;;  %v8813_v41 = vld [vmem:[#allocation36_spill] sm:$0xff] }
 0x3d1   :  { %v4892_v63 = vunpack.i.h.bf16 %v4890_v12  ;;  %v4891_v48 = vunpack.i.l.bf16 %v4890_v12  ;;  %v2640_v34 = vsel %vm8797_vm11, %v8795_v15, 0.0  ;;  %vm8814_vm0 = vnez %v8813_v41 }
 0x3d2   :  { %v3172_v52 = vsel %vm8782_vm1, %v2676_v20, %v4826_v51  ;;  %v3173_v46 = vsel %vm8794_vm2, %v2677_v24, %v4827_v14  ;;  %v5026_v20 = vld [vmem:[%s8089_s7 + $0x108] sm:$0xff]   ;;  %v8810_v14 = vld [vmem:[#allocation69_spill] sm:$0xff] }
 0x3d3   :  { %v4835_v17 = vpop.permute.xlu0 %4834  ;;  %v3293_v30 = vpack.c.bf16 %v3173_v46, %v3172_v52  ;;  %v7705_v40 = vsel %vm8801_vm13, %v2640_v34, %v4891_v48  ;;  %v7708_v12 = vsel %vm8803_vm8, %v2641_v37, %v4892_v63  ;;  %v8804_v52 = vld [vmem:[#allocation22_spill] sm:$0xff]  ;;  %v8806_v63 = vld [vmem:[#allocation23_spill] sm:$0xff]  ;;  %vm8811_vm13 = vnez %v8728_v57 }
 0x3d4   :  { %8802 = vst [vmem:[#allocation55_spill] sm:$0xff] %v7705_v40  ;;  %v4837_v59 = vunpack.i.h.bf16 %v4835_v17  ;;  %v4836_v51 = vunpack.i.l.bf16 %v4835_v17  ;;  %v4895_v55 = vpop.permute.xlu1 %4894  ;;  %vm8805_vm2 = vnez %v8804_v52  ;;  %vm8807_vm8 = vnez %v8806_v63  ;;  %v8815_v52 = vld [vmem:[#allocation12_spill] sm:$0xff] }
 0x3d5   :  { %3604 = vmatprep.mubr.bf16.mxu1 %v3293_v30  ;;  %v4897_v24 = vunpack.i.h.bf16 %v4895_v55  ;;  %v4896_v21 = vunpack.i.l.bf16 %v4895_v55  ;;  %v2678_v48 = vsel %vm8805_vm2, %v7208_v33, 0.0  ;;  %v2679_v37 = vsel %vm8807_vm8, %v7279_v3, 0.0  ;;  %v8812_v55 = vld [vmem:[#allocation39_spill] sm:$0xff]  ;;  %vm8816_vm2 = vmmov %vm8782_vm1 }
 0x3d6   :  { %v8808_v17 = vpack.c.bf16 %v7607_v32, %v7604_v25  ;;  %v3174_v46 = vsel %vm8809_vm3, %v2678_v48, %v4836_v51  ;;  %v3175_v34 = vsel %vm8782_vm1, %v2679_v37, %v4837_v59  ;;  %v2642_v30 = vsel %vm8811_vm13, %v8810_v14, 0.0  ;;  %vm8818_vm8 = vmmov %vm8782_vm1  ;;  %v5035_v51 = vld [vmem:[%s8089_s7 + $0x110] sm:$0xff]  }
 0x3d7   :  { %v2643_v33 = vsel %vm8814_vm0, %v8812_v55, 0.0  ;;  %v4845_v63 = vpop.permute.xlu0 %4844  ;;  %v3298_v3 = vpack.c.bf16 %v3175_v34, %v3174_v46  ;;  %v7734_v40 = vsel %vm8816_vm2, %v2642_v30, %v4896_v21  ;;  %v8819_v37 = vld [vmem:[#allocation35_spill] sm:$0xff]  ;;  %v8820_v21 = vld [vmem:[#allocation24_spill] sm:$0xff]  ;;  %v8821_v46 = vld [vmem:[#allocation30_spill] sm:$0xff] }
 0x3d8   :  { %3605 = vmatmul.mubr.bf16.vlgmr.msra.gmra.mrb[16].mxu1 %v8808_v17  ;;  %8817 = vst [vmem:[#allocation32_spill] sm:$0xff] %v7734_v40  ;;  %v7737_v25 = vsel %vm8818_vm8, %v2643_v33, %v4897_v24  ;;  %v4847_v32 = vunpack.i.h.bf16 %v4845_v63  ;;  %v4846_v59 = vunpack.i.l.bf16 %v4845_v63  ;;  %v2680_v17 = vsel %vm8699_vm7, %v8819_v37, 0.0  ;;  %vm8823_vm2 = vmmov %vm8782_vm1  ;;  %v8824_v33 = vld [vmem:[#allocation61_spill] sm:$0xff]  ;;  %v4910_v50 = vpop.permute.xlu1 %4909 }
 0x3d9   :  { %4483 = vmatpush3.bf16.msra.mxu1 %v8815_v52  ;;  %3612 = vmatprep.mubr.bf16.mxu1 %v3298_v3  ;;  %vm8822_vm3 = vnez %v8821_v46  ;;  %vm8825_vm8 = vcmp.lt.s32.totalorder %v5590_v8, 7  ;;  %v8826_v37 = vpack.c.bf16 %v7621_v35, %v7618_v60  ;;  %vm8827_vm7 = vmmov %vm8782_vm1  ;;  %v7776_v60 = vld [vmem:[%s8091_s9] sm:$0xff]   ;;  %v8831_v35 = vld [vmem:[#allocation68_spill] sm:$0xff]  ;;  %v4912_v1 = vunpack.i.h.bf16 %v4910_v50 }
 0x3da   :  { %4484 = vmatprep.subr.bf16.mxu1 %v5026_v20  ;;  %v2681_v24 = vsel %vm8822_vm3, %v8820_v21, 0.0  ;;  %v3176_v34 = vsel %vm8782_vm1, %v2680_v17, %v4846_v59  ;;  %v2667_v52 = vsel %vm8825_vm8, %v8824_v33, %v8739_v47  ;;  %v2682_v59 = vsel %vm8724_vm6, %v7309_v29, 0.0  ;;  %vm8828_vm3 = vmmov %vm8782_vm1  ;;  %v8829_v21 = vld [vmem:[#allocation64_spill] sm:$0xff] }
 0x3db   :  { %v3177_v30 = vsel %vm8823_vm2, %v2681_v24, %v4847_v32  ;;  %v4855_v63 = vpop.permute.xlu0 %4854  ;;  %v2683_v32 = vsel %vm8715_vm4, %v2667_v52, 0.0  ;;  %vm8830_vm1 = vmmov %vm8825_vm8 }
 0x3dc   :  { %v3303_v48 = vpack.c.bf16 %v3177_v30, %v3176_v34  ;;  %v4857_v3 = vunpack.i.h.bf16 %v4855_v63  ;;  %v4856_v40 = vunpack.i.l.bf16 %v4855_v63  ;;  %v2666_v46 = vsel %vm8830_vm1, %v8739_v47, %v8829_v21  ;;  %vm8832_vm6 = vmmov %vm8823_vm2 }
 0x3dd   :  { %4485 = vmatpush3.bf16.msra.mxu1 %v5026_v20  ;;  %v2684_v34 = vsel %vm8717_vm9, %v2666_v46, 0.0  ;;  %vm8833_vm4 = vmmov %vm8823_vm2 }
 0x3de   :  { %4486 = vmatprep.subr.bf16.mxu1 %v5035_v51  ;;  %v3178_v20 = vsel %vm8827_vm7, %v2682_v59, %v4856_v40  ;;  %v3179_v17 = vsel %vm8828_vm3, %v2683_v32, %v4857_v3  ;;  %v2685_v40 = vsel %vm8719_vm15, %v8831_v35, 0.0  ;;  %v2686_v3 = vsel %vm8734_vm5, %v7382_v10, 0.0  ;;  %vm8836_vm9 = vmmov %vm8823_vm2 }
 0x3df   :  { %v4865_v24 = vpop.permute.xlu0 %4864  ;;  %v3308_v7 = vpack.c.bf16 %v3179_v17, %v3178_v20  ;;  %vm8834_vm15 = vnez %v8735_v9  ;;  %vm8837_vm5 = vnez %v8747_v45  ;;  %vm8838_vm8 = vmmov %vm8823_vm2 }
 0x3e0   :  { %3613 = vmatmul.mubr.bf16.gmra.mrb[20].mxu1 %v8826_v37  ;;  %v4867_v29 = vunpack.i.h.bf16 %v4865_v24  ;;  %v4866_v31 = vunpack.i.l.bf16 %v4865_v24  ;;  %v2687_v22 = vsel %vm8834_vm15, %v7455_v38, 0.0  ;;  %v2688_v10 = vsel %vm8837_vm5, %v7451_v13, 0.0  ;;  %vm8839_vm7 = vmmov %vm8823_vm2 }
 0x3e1   :  { %3620 = vmatprep.mubr.bf16.mxu1 %v3303_v48  ;;  %4487 = vmatpush3.bf16.msra.mxu1 %v5035_v51  ;;  %v2689_v38 = vsel %vm8743_vm12, %v7497_v27, 0.0  ;;  %vm8841_vm3 = vmmov %vm8830_vm1  ;;  %v4911_v27 = vunpack.i.l.bf16 %v4910_v50  ;;  %vm8842_vm12 = vnez %v8752_v36  ;;  %vm8843_vm1 = vnez %v8754_v61 }
 0x3e2   :  { %4488 = vmatprep.subr.bf16.mxu1 %v5036_v11  ;;  %v3180_v30 = vsel %vm8832_vm6, %v2684_v34, %v4866_v31  ;;  %v3181_v48 = vsel %vm8833_vm4, %v2685_v40, %v4867_v29  ;;  %v2675_v21 = vsel %vm8841_vm3, %v8840_v39, %v8739_v47  ;;  %v8844_v31 = vpack.c.bf16 %v7649_v16, %v7646_v2  ;;  %v8845_v47 = vld [vmem:[#allocation25_spill] sm:$0xff]  ;;  %vm8847_vm4 = vmmov %vm8823_vm2  ;;  %v8849_v2 = vld [vmem:[#allocation16_spill] sm:$0xff] }
 0x3e3   :  { %v4875_v51 = vpop.permute.xlu0 %4874  ;;  %v3313_v33 = vpack.c.bf16 %v3181_v48, %v3180_v30  ;;  %v2691_v29 = vsel %vm8843_vm1, %v2675_v21, 0.0  ;;  %vm8846_vm6 = vcmp.lt.s32.totalorder %v5590_v8, 1  ;;  %vm8848_vm15 = vmmov %vm8823_vm2  ;;  %v8851_v48 = vld [vmem:[#allocation13_spill] sm:$0xff]  ;;  %vm8852_vm5 = vnez %v8660_v58 }
 0x3e4   :  { %v4877_v52 = vunpack.i.h.bf16 %v4875_v51  ;;  %v4876_v63 = vunpack.i.l.bf16 %v4875_v51  ;;  %v2835_v35 = vsel %vm8846_vm6, %v8478_v6, %v8845_v47  ;;  %v3188_v51 = vsel %vm8823_vm2, %v8851_v48, %v4911_v27  ;;  %vm8857_vm3 = vmmov %vm8823_vm2 }
 0x3e5   :  { %4489 = vmatpush3.bf16.msra.mxu1 %v5036_v11  ;;  %v8856_v58 = vpack.c.bf16 %v7669_v18, %v7666_v54  ;;  %vm8860_vm14 = vmmov %vm8823_vm2  ;;  %vm8863_vm6 = vnez %v8764_v4  ;;  %v8864_v54 = vld [vmem:[#allocation33_spill] sm:$0xff] }
 0x3e6   :  { %4506 = vmatprep.subr.bf16.mxu1 %v7776_v60  ;;  %v3182_v59 = vsel %vm8836_vm9, %v2686_v3, %v4876_v63  ;;  %v3183_v11 = vsel %vm8823_vm2, %v2687_v22, %v4877_v52  ;;  %vm8850_vm9 = vmmov %vm8823_vm2  ;;  %v2836_v52 = vsel %vm8664_vm10, %v2835_v35, 0.0  ;;  %v2837_v63 = vsel %vm8852_vm5, %v7146_v53, 0.0  ;;  %v4920_v3 = vpop.permute.xlu1 %4919 }
 0x3e7   :  { %v4885_v32 = vpop.permute.xlu0 %4884  ;;  %v3318_v37 = vpack.c.bf16 %v3183_v11, %v3182_v59  ;;  %v3189_v16 = vsel %vm8850_vm9, %v8849_v2, %v4912_v1  ;;  %vm8855_vm10 = vnez %v8516_v42  ;;  %v8861_v42 = vld [vmem:[#allocation5_spill] sm:$0xff]  ;;  %vm8862_vm1 = vmmov %vm8823_vm2  ;;  %v2840_v18 = vsel %vm8863_vm6, %v8770_v26, 0.0 }
 0x3e8   :  { %3621 = vmatmul.mubr.bf16.gmra.mrb[24].mxu1 %v8835_v0  ;;  %v4887_v20 = vunpack.i.h.bf16 %v4885_v32  ;;  %v4886_v17 = vunpack.i.l.bf16 %v4885_v32  ;;  %v3294_v11 = vpack.c.bf16 %v3189_v16, %v3188_v51  ;;  %v2839_v53 = vsel %vm8855_vm10, %v8765_v49, 0.0  ;;  %vm8867_vm9 = vmmov %vm8862_vm1  ;;  %v8870_v26 = vld [vmem:[#allocation21_spill] sm:$0xff]  ;;  %v8875_v51 = vld [vmem:[#allocation54_spill] sm:$0xff] }
 0x3e9   :  { %3628 = vmatprep.mubr.bf16.mxu1 %v3308_v7  ;;  %v2690_v7 = vsel %vm8842_vm12, %v7491_v23, 0.0  ;;  %vm8858_vm12 = vmmov %vm8823_vm2  ;;  %v8873_v16 = vld [vmem:[#allocation41_spill] sm:$0xff] }
 0x3ea   :  { %v7804_v9 = vsel %vm8838_vm8, %v2688_v10, %v4886_v17  ;;  %v7807_v56 = vsel %vm8839_vm7, %v2689_v38, %v4887_v20  ;;  %vm8853_vm8 = vmmov %vm8823_vm2  ;;  %v4922_v17 = vunpack.i.h.bf16 %v4920_v3  ;;  %v4921_v10 = vunpack.i.l.bf16 %v4920_v3  ;;  %v4930_v1 = vpop.permute.xlu1 %4929 }
 0x3eb   :  { %v3323_v13 = vpack.c.bf16 %v7807_v56, %v7804_v9  ;;  %vm8854_vm7 = vmmov %vm8823_vm2  ;;  %vm8869_vm2 = vcmp.lt.s32.totalorder %v5590_v8, 1  ;;  %v4931_v2 = vunpack.i.l.bf16 %v4930_v1 }
 0x3ec   :  { %v4900_v46 = vpop.permute.xlu0 %4899  ;;  %v3190_v62 = vsel %vm8860_vm14, %v8859_v19, %v4921_v10  ;;  %v3191_v49 = vsel %vm8862_vm1, %v8861_v42, %v4922_v17  ;;  %vm8878_vm10 = vmmov %vm8862_vm1  ;;  %v8883_v17 = vld [vmem:[#allocation8_spill] sm:$0xff] }
 0x3ed   :  { %v4902_v45 = vunpack.i.h.bf16 %v4900_v46  ;;  %v4901_v24 = vunpack.i.l.bf16 %v4900_v46  ;;  %v3299_v4 = vpack.c.bf16 %v3191_v49, %v3190_v62  ;;  %vm8884_vm14 = vmmov %vm8862_vm1  ;;  %v8892_v49 = vld [vmem:[#allocation49_spill] sm:$0xff] }
 0x3ef   :  { %v7828_v40 = vsel %vm8847_vm4, %v2690_v7, %v4901_v24  ;;  %v7831_v34 = vsel %vm8848_vm15, %v2691_v29, %v4902_v45  ;;  %vm8865_vm4 = vnez %v8864_v54  ;;  %vm8866_vm15 = vmmov %vm8862_vm1  ;;  %v8868_v7 = vld [vmem:[#allocation59_spill] sm:$0xff]  ;;  %v8894_v54 = vld [vmem:[#allocation48_spill] sm:$0xff] }
 0x3f0   :  { %3629 = vmatmul.mubr.bf16.gmra.mrb[28].mxu1 %v8844_v31  ;;  %v4905_v36 = vpop.permute.xlu0 %4904  ;;  %v3328_v23 = vpack.c.bf16 %v7831_v34, %v7828_v40  ;;  %v2841_v24 = vsel %vm8865_vm4, %v8771_v5, 0.0  ;;  %v2828_v29 = vsel %vm8869_vm2, %v8868_v7, %v8478_v6  ;;  %v4932_v5 = vunpack.i.h.bf16 %v4930_v1  ;;  %v8896_v1 = vld [vmem:[#allocation55_spill] sm:$0xff] }
 0x3f1   :  { %3636 = vmatprep.mubr.bf16.mxu1 %v3313_v33  ;;  %v4907_v61 = vunpack.i.h.bf16 %v4905_v36  ;;  %v4906_v30 = vunpack.i.l.bf16 %v4905_v36 }
 0x3f2   :  { %v3193_v10 = vsel %vm8884_vm14, %v8883_v17, %v4932_v5  ;;  %v8909_v5 = vld [vmem:[#allocation11_spill] sm:$0xff] }
 0x3f3   :  { %v3204_v33 = vsel %vm8853_vm8, %v2836_v52, %v4906_v30  ;;  %v3205_v22 = vsel %vm8854_vm7, %v2837_v63, %v4907_v61  ;;  %v8871_v61 = vld [vmem:[#allocation40_spill] sm:$0xff]  ;;  %vm8874_vm8 = vnez %v8873_v16  ;;  %v8876_v52 = vpack.c.bf16 %v7687_v44, %v8875_v51  ;;  %vm8877_vm7 = vmmov %vm8862_vm1 }
 0x3f4   :  { %v4915_v0 = vpop.permute.xlu0 %4914  ;;  %v3295_v59 = vpack.c.bf16 %v3205_v22, %v3204_v33  ;;  %vm8872_vm5 = vnez %v8871_v61  ;;  %v2843_v48 = vsel %vm8874_vm8, %v2828_v29, 0.0  ;;  %v8879_v33 = vld [vmem:[#allocation63_spill] sm:$0xff]  ;;  %vm8890_vm4 = vmmov %vm8877_vm7  ;;  %v8905_v61 = vld [vmem:[#allocation53_spill] sm:$0xff] }
 0x3f5   :  { %v4917_v32 = vunpack.i.h.bf16 %v4915_v0  ;;  %v4916_v20 = vunpack.i.l.bf16 %v4915_v0  ;;  %v2842_v30 = vsel %vm8872_vm5, %v8870_v26, 0.0  ;;  %vm8898_vm5 = vmmov %vm8890_vm4  ;;  %v2848_v26 = vsel %vm8797_vm11, %v8810_v14, 0.0  ;;  %v8911_v14 = vld [vmem:[#allocation43_spill] sm:$0xff] }
 0x3f6   :  { %3701 = vmatprep.mubr.bf16.mxu0 %v3295_v59  ;;  %vm8899_vm8 = vmmov %vm8890_vm4 }
 0x3f7   :  { %3702 = vmatmul.mubr.bf16.vlgmr.msra.gmra.mrb[32].mxu0 %v3294_v11  ;;  %v3206_v38 = vsel %vm8857_vm3, %v2838_v43, %v4916_v20  ;;  %v3207_v50 = vsel %vm8858_vm12, %v2839_v53, %v4917_v32  ;;  %vm8880_vm3 = vmmov %vm8869_vm2  ;;  %v8881_v32 = vld [vmem:[#allocation31_spill] sm:$0xff]  ;;  %v8885_v43 = vld [vmem:[#allocation44_spill] sm:$0xff]  ;;  %vm8895_vm2 = vnez %v8894_v54 }
 0x3f8   :  { %3637 = vmatmul.mubr.bf16.gmra.mrb[32].mxu1 %v8856_v58  ;;  %v4925_v39 = vpop.permute.xlu0 %4924  ;;  %v3300_v21 = vpack.c.bf16 %v3207_v50, %v3206_v38  ;;  %v2827_v22 = vsel %vm8880_vm3, %v8478_v6, %v8879_v33  ;;  %vm8882_vm12 = vmmov %vm8862_vm1  ;;  %vm8886_vm1 = vnez %v8885_v43  ;;  %v8887_v58 = vld [vmem:[#allocation66_spill] sm:$0xff]  ;;  %v8888_v38 = vld [vmem:[#allocation45_spill] sm:$0xff]  ;;  %vm8906_vm3 = vnez %v8905_v61 }
 0x3f9   :  { %3644 = vmatprep.mubr.bf16.mxu1 %v3318_v37  ;;  %v4927_v46 = vunpack.i.h.bf16 %v4925_v39  ;;  %v4926_v45 = vunpack.i.l.bf16 %v4925_v39  ;;  %v3192_v20 = vsel %vm8882_vm12, %v8881_v32, %v4931_v2  ;;  %v2844_v53 = vsel %vm8886_vm1, %v2827_v22, 0.0  ;;  %v4940_v39 = vpop.permute.xlu1 %4939  ;;  %vm8907_vm12 = vmmov %vm8890_vm4  ;;  %v5195_v61 = vld [vmem:[%s8082_s0 + $0x20] sm:$0xff]  }
 0x3fa   :  { %3709 = vmatprep.mubr.bf16.mxu0 %v3300_v21  ;;  %vm8889_vm6 = vnez %v8888_v38  ;;  %v3304_v19 = vpack.c.bf16 %v3193_v10, %v3192_v20  ;;  %v4942_v62 = vunpack.i.h.bf16 %v4940_v39  ;;  %v4941_v42 = vunpack.i.l.bf16 %v4940_v39  ;;  %vm8908_vm14 = vmmov %vm8890_vm4  ;;  %v8919_v20 = vld [vmem:[#allocation9_spill] sm:$0xff]  ;;  %v8923_v38 = vld [vmem:[#allocation20_spill] sm:$0xff] }
 0x3fb   :  { %v3208_v37 = vsel %vm8866_vm15, %v2840_v18, %v4926_v45  ;;  %v3209_v27 = vsel %vm8867_vm9, %v2841_v24, %v4927_v46  ;;  %v2845_v50 = vsel %vm8889_vm6, %v8887_v58, 0.0  ;;  %vm8891_vm15 = vmmov %vm8890_vm4  ;;  %vm8893_vm9 = vnez %v8892_v49  ;;  %v8921_v58 = vld [vmem:[#allocation26_spill] sm:$0xff]  ;;  %v8935_v49 = vld [vmem:[#allocation57_spill] sm:$0xff] }
 0x3fc   :  { %v4935_v31 = vpop.permute.xlu0 %4934  ;;  %v3305_v47 = vpack.c.bf16 %v3209_v27, %v3208_v37  ;;  %v2846_v18 = vsel %vm8893_vm9, %v8795_v15, 0.0  ;;  %v2847_v24 = vsel %vm8895_vm2, %v8798_v28, 0.0  ;;  %v8897_v37 = vpack.c.bf16 %v7708_v12, %v8896_v1  ;;  %vm8914_vm11 = vmmov %vm8890_vm4 }
 0x3fd   :  { %v4937_v35 = vunpack.i.h.bf16 %v4935_v31  ;;  %v4936_v36 = vunpack.i.l.bf16 %v4935_v31  ;;  %v4950_v40 = vpop.permute.xlu1 %4949  ;;  %vm8910_vm1 = vcmp.lt.s32.totalorder %v5590_v8, 1  ;;  %vm8915_vm6 = vmmov %vm8890_vm4 }
 0x3fe   :  { %v2820_v2 = vsel %vm8910_vm1, %v8909_v5, %v8478_v6  ;;  %v4951_v33 = vunpack.i.l.bf16 %v4950_v40 }
 0x3ff   :  { %3710 = vmatmul.mubr.bf16.gmra.mrb[36].mxu0 %v3299_v4  ;;  %v3210_v63 = vsel %vm8877_vm7, %v2842_v30, %v4936_v36  ;;  %v3211_v3 = vsel %vm8878_vm10, %v2843_v48, %v4937_v35  ;;  %v8900_v35 = vld [vmem:[#allocation6_spill] sm:$0xff]  ;;  %vm8901_vm7 = vmmov %vm8890_vm4  ;;  %v8902_v36 = vld [vmem:[#allocation15_spill] sm:$0xff]  ;;  %v2849_v30 = vsel %vm8906_vm3, %v8812_v55, 0.0  ;;  %v4952_v55 = vunpack.i.h.bf16 %v4950_v40 }
 0x400   :  { %3645 = vmatmul.mubr.bf16.gmra.mrb[36].mxu1 %v8876_v52  ;;  %v4945_v0 = vpop.permute.xlu0 %4944  ;;  %3717 = vmatprep.mubr.bf16.mxu0 %v3305_v47  ;;  %v3310_v59 = vpack.c.bf16 %v3211_v3, %v3210_v63  ;;  %v3194_v28 = vsel %vm8901_vm7, %v8900_v35, %v4941_v42  ;;  %vm8903_vm10 = vmmov %vm8890_vm4  ;;  %v2850_v3 = vsel %vm8811_vm13, %v8911_v14, 0.0  ;;  %v2851_v22 = vsel %vm8814_vm0, %v2820_v2, 0.0  ;;  %v5191_v35 = vld [vmem:[%s8082_s0] sm:$0xff]   ;;  %v5193_v4 = vld [vmem:[%s8082_s0 + $0x10] sm:$0xff]  }
 0x401   :  { %3652 = vmatprep.mubr.bf16.mxu1 %v3323_v13  ;;  %v4947_v11 = vunpack.i.h.bf16 %v4945_v0  ;;  %v4946_v44 = vunpack.i.l.bf16 %v4945_v0  ;;  %v3195_v12 = vsel %vm8903_vm10, %v8902_v36, %v4942_v62  ;;  %v8912_v0 = vld [vmem:[#allocation32_spill] sm:$0xff]  ;;  %vm8918_vm13 = vmmov %vm8890_vm4  ;;  %v4960_v17 = vpop.permute.xlu1 %4959  ;;  %v8933_v62 = vld [vmem:[#allocation34_spill] sm:$0xff] }
 0x402   :  { %v3309_v63 = vpack.c.bf16 %v3195_v12, %v3194_v28  ;;  %v4962_v43 = vunpack.i.h.bf16 %v4960_v17  ;;  %vm8922_vm0 = vmmov %vm8890_vm4  ;;  %v8945_v36 = vld [vmem:[#allocation50_spill] sm:$0xff]  ;;  %v5197_v40 = vld [vmem:[%s8082_s0 + $0x30] sm:$0xff]  }
 0x403   :  { %v3212_v9 = vsel %vm8890_vm4, %v2844_v53, %v4946_v44  ;;  %v3213_v56 = vsel %vm8891_vm15, %v2845_v50, %v4947_v11  ;;  %v8916_v11 = vld [vmem:[#allocation38_spill] sm:$0xff]  ;;  %vm8920_vm15 = vmmov %vm8890_vm4  ;;  %v4961_v53 = vunpack.i.l.bf16 %v4960_v17  ;;  %v8925_v50 = vld [vmem:[#allocation29_spill] sm:$0xff] }
 0x404   :  { %v4955_v13 = vpop.permute.xlu0 %4954  ;;  %v3315_v21 = vpack.c.bf16 %v3213_v56, %v3212_v9  ;;  %v8917_v44 = vld [vmem:[#allocation10_spill] sm:$0xff]  ;;  %v3197_v41 = vsel %vm8920_vm15, %v8919_v20, %v4952_v55  ;;  %vm8924_vm9 = vmmov %vm8922_vm0  ;;  %v8927_v9 = vld [vmem:[#allocation37_spill] sm:$0xff] }
 0x405   :  { %v4957_v46 = vunpack.i.h.bf16 %v4955_v13  ;;  %v4956_v45 = vunpack.i.l.bf16 %v4955_v13  ;;  %v3196_v32 = vsel %vm8918_vm13, %v8917_v44, %v4951_v33  ;;  %vm8926_vm2 = vmmov %vm8922_vm0  ;;  %v4970_v13 = vpop.permute.xlu1 %4969  ;;  %v5192_v12 = vld [vmem:[%s8082_s0 + $0x8] sm:$0xff]  }
 0x406   :  { %v3314_v10 = vpack.c.bf16 %v3197_v41, %v3196_v32  ;;  %v3198_v39 = vsel %vm8926_vm2, %v8925_v50, %v4961_v53  ;;  %vm8932_vm7 = vmmov %vm8922_vm0 }
 0x407   :  { %3718 = vmatmul.mubr.bf16.gmra.mrb[40].mxu0 %v3304_v19  ;;  %v3214_v27 = vsel %vm8898_vm5, %v2846_v18, %v4956_v45  ;;  %v3215_v7 = vsel %vm8899_vm8, %v2847_v24, %v4957_v46  ;;  %vm8928_vm5 = vmmov %vm8922_vm0  ;;  %v4972_v46 = vunpack.i.h.bf16 %v4970_v13  ;;  %v4971_v45 = vunpack.i.l.bf16 %v4970_v13  ;;  %v8929_v19 = vld [vmem:[#allocation46_spill] sm:$0xff] }
 0x408   :  { %3653 = vmatmul.mubr.bf16.gmra.mrb[40].mxu1 %v8897_v37  ;;  %v4965_v29 = vpop.permute.xlu0 %4964  ;;  %3725 = vmatprep.mubr.bf16.mxu0 %v3310_v59  ;;  %v3320_v15 = vpack.c.bf16 %v3215_v7, %v3214_v27  ;;  %v8913_v59 = vpack.c.bf16 %v7737_v25, %v8912_v0  ;;  %v5038_v25 = vld [vmem:[%s8091_s9 + $0x8] sm:$0xff]   ;;  %v3199_v56 = vsel %vm8928_vm5, %v8927_v9, %v4962_v43  ;;  %vm8930_vm8 = vmmov %vm8922_vm0  ;;  %v8939_v7 = vld [vmem:[#allocation51_spill] sm:$0xff] }
 0x409   :  { %3660 = vmatprep.mubr.bf16.mxu1 %v3328_v23  ;;  %v4967_v31 = vunpack.i.h.bf16 %v4965_v29  ;;  %v4966_v47 = vunpack.i.l.bf16 %v4965_v29  ;;  %vm8934_vm10 = vmmov %vm8922_vm0  ;;  %v4980_v54 = vpop.permute.xlu1 %4979  ;;  %v8937_v27 = vld [vmem:[#allocation14_spill] sm:$0xff]  ;;  %v8941_v29 = vld [vmem:[#allocation60_spill] sm:$0xff] }
 0x40a   :  { %v3200_v42 = vsel %vm8934_vm10, %v8933_v62, %v4971_v45  ;;  %vm8936_vm3 = vmmov %vm8922_vm0  ;;  %v4982_v1 = vunpack.i.h.bf16 %v4980_v54  ;;  %v4981_v37 = vunpack.i.l.bf16 %v4980_v54 }
 0x40b   :  { %v3216_v34 = vsel %vm8907_vm12, %v2848_v26, %v4966_v47  ;;  %v3217_v23 = vsel %vm8908_vm14, %v2849_v30, %v4967_v31  ;;  %v3201_v18 = vsel %vm8936_vm3, %v8935_v49, %v4972_v46  ;;  %vm8938_vm12 = vmmov %vm8922_vm0  ;;  %v8943_v31 = vld [vmem:[#allocation28_spill] sm:$0xff]  ;;  %v5196_v30 = vld [vmem:[%s8082_s0 + $0x28] sm:$0xff]  }
 0x40c   :  { %v4975_v16 = vpop.permute.xlu0 %4974  ;;  %v3325_v48 = vpack.c.bf16 %v3217_v23, %v3216_v34  ;;  %v3324_v24 = vpack.c.bf16 %v3201_v18, %v3200_v42  ;;  %vm8940_vm14 = vmmov %vm8922_vm0  ;;  %v5194_v26 = vld [vmem:[%s8082_s0 + $0x18] sm:$0xff]  }
 0x40d   :  { %v4977_v51 = vunpack.i.h.bf16 %v4975_v16  ;;  %v4976_v52 = vunpack.i.l.bf16 %v4975_v16  ;;  %vm8942_vm1 = vmmov %vm8922_vm0  ;;  %v5198_v34 = vld [vmem:[%s8082_s0 + $0x38] sm:$0xff]  }
 0x40e   :  { %vm8956_vm10 = vmmov %vm8942_vm1 }
 0x40f   :  { %3726 = vmatmul.mubr.bf16.gmra.mrb[44].mxu0 %v3309_v63  ;;  %v3218_v8 = vsel %vm8914_vm11, %v2850_v3, %v4976_v52  ;;  %v3219_v6 = vsel %vm8915_vm6, %v2851_v22, %v4977_v51  ;;  %vm8944_vm11 = vmmov %vm8922_vm0 }
 0x410   :  { %3661 = vmatmul.mubr.bf16.gmra.mrb[44].mxu1 %v8913_v59  ;;  %3733 = vmatprep.mubr.bf16.mxu0 %v3315_v21  ;;  %v3330_v57 = vpack.c.bf16 %v3219_v6, %v3218_v8  ;;  %v3319_v21 = vpack.c.bf16 %v3199_v56, %v3198_v39  ;;  %v3203_v47 = vsel %vm8944_vm11, %v8943_v31, %v4982_v1  ;;  %vm8946_vm6 = vmmov %vm8922_vm0 }
 0x411   :  { %4490 = vmatprep.mubr.msk.bf16.mxu1 %vm8890_vm4, %v8916_v11  ;;  %vm8947_vm4 = vcmask 261120   ;;  %vm8957_vm3 = vmmov %vm8942_vm1 }
 0x412   :  { %vm8948_vm13 = vmmov %vm8947_vm4 }
 0x413   :  { %vm8949_vm15 = vmmov %vm8947_vm4 }
 0x414   :  { %vm8960_vm11 = vmmov %vm8942_vm1 }
 0x417   :  { %3734 = vmatmul.mubr.bf16.gmra.mrb[48].mxu0 %v3314_v10 }
 0x418   :  { %4491 = vmatmul.mubr.msk.bf16.vlgmr.msra.gmra.mrb[48].mxu1 %vm8922_vm0, %v8921_v58  ;;  %3741 = vmatprep.mubr.bf16.mxu0 %v3320_v15  ;;  %v3202_v15 = vsel %vm8942_vm1, %v8941_v29, %v4981_v37  ;;  %vm8950_vm0 = vmmov %vm8947_vm4 }
 0x419   :  { %4507 = vmatpush3.bf16.msra.mxu1 %v7776_v60  ;;  %4494 = vmatprep.mubr.msk.bf16.mxu1 %vm8924_vm9, %v8923_v38  ;;  %v8931_v60 = vld [vmem:[#allocation47_spill] sm:$0xff]  ;;  %v3329_v28 = vpack.c.bf16 %v3203_v47, %v3202_v15  ;;  %vm8951_vm9 = vmmov %vm8950_vm0 }
 0x41a   :  { %4508 = vmatprep.subr.bf16.mxu1 %v5038_v25  ;;  %vm8952_vm2 = vmmov %vm8950_vm0 }
 0x41b   :  { %vm8953_vm5 = vmmov %vm8950_vm0 }
 0x41d   :  { %4509 = vmatpush3.bf16.msra.mxu1 %v5038_v25 }
 0x41f   :  { %3742 = vmatmul.mubr.bf16.gmra.mrb[52].mxu0 %v3319_v21 }
 0x420   :  { %4495 = vmatmul.mubr.msk.bf16.gmra.mrb[52].mxu1 %vm8930_vm8, %v8929_v19  ;;  %3749 = vmatprep.mubr.bf16.mxu0 %v3325_v48  ;;  %vm8954_vm8 = vmmov %vm8950_vm0 }
 0x421   :  { %4498 = vmatprep.mubr.msk.bf16.mxu1 %vm8932_vm7, %v8931_v60  ;;  %vm8955_vm7 = vmmov %vm8942_vm1 }
 0x427   :  { %3750 = vmatmul.mubr.bf16.gmra.mrb[56].mxu0 %v3324_v24 }
 0x428   :  { %4499 = vmatmul.mubr.msk.bf16.gmra.mrb[56].mxu1 %vm8938_vm12, %v8937_v27  ;;  %3757 = vmatprep.mubr.bf16.mxu0 %v3330_v57  ;;  %vm8958_vm12 = vmmov %vm8942_vm1 }
 0x429   :  { %4502 = vmatprep.mubr.msk.bf16.mxu1 %vm8940_vm14, %v8939_v7  ;;  %vm8959_vm14 = vmmov %vm8942_vm1 }
 0x42f   :  { %3758 = vmatmul.mubr.bf16.gmra.mrb[60].mxu0 %v3329_v28 }
 0x430   :  { %4503 = vmatmul.mubr.msk.bf16.gmra.mrb[60].mxu1 %vm8946_vm6, %v8945_v36  ;;  %vm8961_vm6 = vmmov %vm8942_vm1 }
 0x431   :  { %4510 = vmatprep.mubr.msk.bf16.mxu1 %vm8947_vm4, %v5191_v35  ;;  %vm8962_vm4 = vmmov %vm8942_vm1 }
 0x438   :  { %4511 = vmatmul.mubr.msk.bf16.vlgmr.msra.gmra.mrb[48].mxu1 %vm8948_vm13, %v5192_v12  ;;  %vm8963_vm13 = vmmov %vm8942_vm1 }
 0x439   :  { %4514 = vmatprep.mubr.msk.bf16.mxu1 %vm8949_vm15, %v5193_v4  ;;  %vm8964_vm15 = vmmov %vm8942_vm1 }
 0x440   :  { %4515 = vmatmul.mubr.msk.bf16.gmra.mrb[52].mxu1 %vm8950_vm0, %v5194_v26  ;;  %vm8965_vm0 = vmmov %vm8942_vm1 }
 0x441   :  { %4518 = vmatprep.mubr.msk.bf16.mxu1 %vm8951_vm9, %v5195_v61  ;;  %vm8966_vm9 = vmmov %vm8965_vm0 }
 0x448   :  { %4519 = vmatmul.mubr.msk.bf16.gmra.mrb[56].mxu1 %vm8952_vm2, %v5196_v30  ;;  %vm8967_vm2 = vmmov %vm8965_vm0 }
 0x449   :  { %4522 = vmatprep.mubr.msk.bf16.mxu1 %vm8953_vm5, %v5197_v40  ;;  %vm8968_vm5 = vmmov %vm8965_vm0 }
 0x450   :  { %4523 = vmatmul.mubr.msk.bf16.gmra.mrb[60].mxu1 %vm8954_vm8, %v5198_v34  ;;  %vm8969_vm8 = vmmov %vm8965_vm0 }
 0x4ab   :  { %v4328_v23 = vpop.f32.mrb[16].mxu1 }
 0x4ac   :  { %v4329_v5 = vpop.f32.mrb[17].mxu1 }
 0x4ad   :  { %v4330_v2 = vadd.f32 %v4329_v5, %v4328_v23  ;;  %v4331_v16 = vpop.f32.mrb[18].mxu1 }
 0x4ae   :  { %v4332_v48 = vpop.f32.mrb[19].mxu1 }
 0x4af   :  { %v4333_v51 = vadd.f32 %v4332_v48, %v4331_v16 }
 0x4b3   :  { %v4334_v52 = vpop.f32.mrb[20].mxu1 }
 0x4b4   :  { %v4335_v63 = vpop.f32.mrb[21].mxu1 }
 0x4b5   :  { %v4336_v14 = vadd.f32 %v4335_v63, %v4334_v52  ;;  %v4337_v3 = vpop.f32.mrb[22].mxu1 }
 0x4b6   :  { %v4338_v55 = vpop.f32.mrb[23].mxu1 }
 0x4b7   :  { %v4339_v33 = vadd.f32 %v4338_v55, %v4337_v3 }
 0x4bb   :  { %v4340_v22 = vpop.f32.mrb[24].mxu1 }
 0x4bc   :  { %v4341_v0 = vpop.f32.mrb[25].mxu1 }
 0x4bd   :  { %v4342_v59 = vadd.f32 %v4341_v0, %v4340_v22  ;;  %v4343_v8 = vpop.f32.mrb[26].mxu1 }
 0x4be   :  { %v4344_v6 = vpop.f32.mrb[27].mxu1 }
 0x4bf   :  { %v4345_v11 = vadd.f32 %v4344_v6, %v4343_v8 }
 0x4c3   :  { %v4346_v57 = vpop.f32.mrb[28].mxu1 }
 0x4c4   :  { %v4347_v44 = vpop.f32.mrb[29].mxu1 }
 0x4c5   :  { %v4348_v32 = vadd.f32 %v4347_v44, %v4346_v57  ;;  %v4349_v20 = vpop.f32.mrb[30].mxu1 }
 0x4c6   :  { %v4350_v41 = vpop.f32.mrb[31].mxu1 }
 0x4c7   :  { %v4351_v17 = vadd.f32 %v4350_v41, %v4349_v20 }
 0x4ca   :  { %v4392_v25 = vpop.f32.mrb[32].mxu0 }
 0x4cb   :  { %v4352_v10 = vpop.f32.mrb[32].mxu1  ;;  %v4393_v53 = vpop.f32.mrb[33].mxu0 }
 0x4cc   :  { %v4353_v43 = vpop.f32.mrb[33].mxu1  ;;  %v4394_v38 = vadd.f32 %v4393_v53, %v4392_v25  ;;  %v4395_v39 = vpop.f32.mrb[34].mxu0 }
 0x4cd   :  { %v4354_v58 = vadd.f32 %v4353_v43, %v4352_v10  ;;  %v4355_v50 = vpop.f32.mrb[34].mxu1  ;;  %v4396_v56 = vpop.f32.mrb[35].mxu0 }
 0x4ce   :  { %v4356_v9 = vpop.f32.mrb[35].mxu1  ;;  %v4397_v21 = vadd.f32 %v4396_v56, %v4395_v39  ;;  %v8009_v46 = vadd.f32 %v4394_v38, %v4330_v2 }
 0x4cf   :  { %v4357_v13 = vadd.f32 %v4356_v9, %v4355_v50 }
 0x4d0   :  { %v8011_v45 = vadd.f32 %v4397_v21, %v4333_v51 }
 0x4d2   :  { %v4398_v60 = vpop.f32.mrb[36].mxu0 }
 0x4d3   :  { %v4358_v19 = vpop.f32.mrb[36].mxu1  ;;  %v4399_v42 = vpop.f32.mrb[37].mxu0 }
 0x4d4   :  { %v4359_v62 = vpop.f32.mrb[37].mxu1  ;;  %v4400_v18 = vadd.f32 %v4399_v42, %v4398_v60  ;;  %v4401_v24 = vpop.f32.mrb[38].mxu0 }
 0x4d5   :  { %v4360_v49 = vadd.f32 %v4359_v62, %v4358_v19  ;;  %v4361_v54 = vpop.f32.mrb[38].mxu1  ;;  %v4402_v37 = vpop.f32.mrb[39].mxu0 }
 0x4d6   :  { %v4362_v1 = vpop.f32.mrb[39].mxu1  ;;  %v4403_v7 = vadd.f32 %v4402_v37, %v4401_v24  ;;  %v8013_v29 = vadd.f32 %v4400_v18, %v4336_v14 }
 0x4d7   :  { %v4363_v27 = vadd.f32 %v4362_v1, %v4361_v54 }
 0x4d8   :  { %v8015_v15 = vadd.f32 %v4403_v7, %v4339_v33 }
 0x4da   :  { %v4404_v47 = vpop.f32.mrb[40].mxu0 }
 0x4db   :  { %v4364_v31 = vpop.f32.mrb[40].mxu1  ;;  %v4405_v28 = vpop.f32.mrb[41].mxu0 }
 0x4dc   :  { %v4365_v35 = vpop.f32.mrb[41].mxu1  ;;  %v4406_v12 = vadd.f32 %v4405_v28, %v4404_v47  ;;  %v4407_v26 = vpop.f32.mrb[42].mxu0 }
 0x4dd   :  { %v4366_v36 = vadd.f32 %v4365_v35, %v4364_v31  ;;  %v4367_v4 = vpop.f32.mrb[42].mxu1  ;;  %v4408_v30 = vpop.f32.mrb[43].mxu0 }
 0x4de   :  { %v4368_v61 = vpop.f32.mrb[43].mxu1  ;;  %v4409_v34 = vadd.f32 %v4408_v30, %v4407_v26  ;;  %v8017_v23 = vadd.f32 %v4406_v12, %v4342_v59 }
 0x4df   :  { %v4369_v40 = vadd.f32 %v4368_v61, %v4367_v4 }
 0x4e0   :  { %v8019_v5 = vadd.f32 %v4409_v34, %v4345_v11 }
 0x4e2   :  { %v4410_v16 = vpop.f32.mrb[44].mxu0 }
 0x4e3   :  { %v4370_v2 = vpop.f32.mrb[44].mxu1  ;;  %v4411_v51 = vpop.f32.mrb[45].mxu0 }
 0x4e4   :  { %v4371_v48 = vpop.f32.mrb[45].mxu1  ;;  %v4412_v63 = vadd.f32 %v4411_v51, %v4410_v16  ;;  %v4413_v3 = vpop.f32.mrb[46].mxu0 }
 0x4e5   :  { %v4372_v52 = vadd.f32 %v4371_v48, %v4370_v2  ;;  %v4373_v14 = vpop.f32.mrb[46].mxu1  ;;  %v4414_v33 = vpop.f32.mrb[47].mxu0 }
 0x4e6   :  { %v4374_v55 = vpop.f32.mrb[47].mxu1  ;;  %v4415_v0 = vadd.f32 %v4414_v33, %v4413_v3  ;;  %v3728_v8 = vadd.f32 %v4412_v63, %v4348_v32 }
 0x4e7   :  { %v4375_v22 = vadd.f32 %v4374_v55, %v4373_v14 }
 0x4e8   :  { %v3731_v6 = vadd.f32 %v4415_v0, %v4351_v17 }
 0x4ea   :  { %v4416_v57 = vpop.f32.mrb[48].mxu0 }
 0x4eb   :  { %v4417_v44 = vpop.f32.mrb[49].mxu0 }
 0x4ec   :  { %v4418_v59 = vadd.f32 %v4417_v44, %v4416_v57  ;;  %v4419_v20 = vpop.f32.mrb[50].mxu0 }
 0x4ed   :  { %v4420_v11 = vpop.f32.mrb[51].mxu0 }
 0x4ee   :  { %v4421_v41 = vadd.f32 %v4420_v11, %v4419_v20  ;;  %v3736_v10 = vadd.f32 %v4418_v59, %v4354_v58 }
 0x4f0   :  { %v8021_v25 = vadd.f32 %v4421_v41, %v4357_v13 }
 0x4f2   :  { %v4422_v43 = vpop.f32.mrb[52].mxu0 }
 0x4f3   :  { %v4423_v53 = vpop.f32.mrb[53].mxu0 }
 0x4f4   :  { %v4424_v38 = vadd.f32 %v4423_v53, %v4422_v43  ;;  %v4425_v50 = vpop.f32.mrb[54].mxu0 }
 0x4f5   :  { %v4426_v39 = vpop.f32.mrb[55].mxu0 }
 0x4f6   :  { %v4427_v9 = vadd.f32 %v4426_v39, %v4425_v50  ;;  %v3744_v56 = vadd.f32 %v4424_v38, %v4360_v49  ;;  %v8028_v49 = vld [vmem:[%s8090_s8] ss:$0 sm:$0xff]  ;;  %s5229_s8 = smov [#allocation2]  }
 0x4f7   :  { %s4100_s15 = sshll.u32 %s5229_s8, 4  ;;  %s4101_s15 = int_to_ptr.vmem [resolvable:$true] %s4100_s15 }
 0x4f8   :  { %v3747_v21 = vadd.f32 %v4427_v9, %v4363_v27  ;;  %s5199_s4 = scalar_lea.vmem %s4101_s15, 2048  ;;  %p5204_p1 = scmp.lt.s32.totalorder %s4101_s15, %s4101_s15 }
 0x4f9   :  { %p5200_p0 = scmp.ne.s32.totalorder %s4101_s15, %s5199_s4  ;;  %p5205_p2 = scmp.lt.s32.totalorder %s5199_s4, %s5199_s4 }
 0x4fa   :  { %v4428_v19 = vpop.f32.mrb[56].mxu0 }
 0x4fb   :  { %v4429_v32 = vpop.f32.mrb[57].mxu0  ;;  %p5206_p3 = por %p5205_p2, %p5204_p1 }
 0x4fc   :  { %v4430_v17 = vadd.f32 %v4429_v32, %v4428_v19  ;;  %v4431_v60 = vpop.f32.mrb[58].mxu0 }
 0x4fd   :  { %v4432_v62 = vpop.f32.mrb[59].mxu0  ;;  %p5207_p4 = pnand %p5206_p3, %p5200_p0 }
 0x4fe   :  { %v4433_v42 = vadd.f32 %v4432_v62, %v4431_v60  ;;  %v3752_v18 = vadd.f32 %v4430_v17, %v4366_v36 }
 0x500   :  { %v8023_v54 = vadd.f32 %v4433_v42, %v4369_v40 }
 0x502   :  { %v4434_v58 = vpop.f32.mrb[60].mxu0 }
 0x503   :  { %v4435_v13 = vpop.f32.mrb[61].mxu0 }
 0x504   :  { %v4436_v24 = vadd.f32 %v4435_v13, %v4434_v58  ;;  %v4437_v1 = vpop.f32.mrb[62].mxu0 }
 0x505   :  { %v4438_v37 = vpop.f32.mrb[63].mxu0 }
 0x506   :  { %v4439_v7 = vadd.f32 %v4438_v37, %v4437_v1  ;;  %v3760_v31 = vadd.f32 %v4436_v24, %v4372_v52 }
 0x508   :  { %v3763_v47 = vadd.f32 %v4439_v7, %v4375_v22 }
 0x50b   :  { %v4512_v35 = vpop.f32.mrb[48].mxu1 }
 0x50c   :  { %v4526_v27 = vadd.f32 %v4512_v35, %v8013_v29  ;;  %v3977_v28 = vpop.f32.mrb[49].mxu1 }
 0x50d   :  { %v4528_v36 = vadd.f32 %v3977_v28, %v8009_v46  ;;  %v4513_v12 = vpop.f32.mrb[50].mxu1 }
 0x50e   :  { %v4527_v4 = vadd.f32 %v4526_v27, %v8028_v49  ;;  %v4530_v26 = vadd.f32 %v4513_v12, %v8015_v15  ;;  %v3980_v61 = vpop.f32.mrb[51].mxu1 }
 0x50f   :  { %v4529_v30 = vadd.f32 %v4528_v36, %v8028_v49  ;;  %v4532_v40 = vadd.f32 %v3980_v61, %v8011_v45 }
 0x510   :  { %4081 = vst.msk [vmem:[#allocation2 + $0x10] sm:$0xff] %vm8955_vm7, %v4527_v4  ;;  %v4531_v34 = vadd.f32 %v4530_v26, %v8028_v49 }
 0x511   :  { %4079 = vst.msk [vmem:[#allocation2] sm:$0xff] %vm8956_vm10, %v4529_v30  ;;  %v4533_v29 = vadd.f32 %v4532_v40, %v8028_v49 }
 0x512   :  { %4082 = vst.msk [vmem:[#allocation2 + $0x18] sm:$0xff] %vm8957_vm3, %v4531_v34 }
 0x513   :  { %4080 = vst.msk [vmem:[#allocation2 + $0x8] sm:$0xff] %vm8958_vm12, %v4533_v29  ;;  %v4516_v46 = vpop.f32.mrb[52].mxu1 }
 0x514   :  { %v4534_v2 = vadd.f32 %v4516_v46, %v3728_v8  ;;  %v3993_v15 = vpop.f32.mrb[53].mxu1 }
 0x515   :  { %v4536_v16 = vadd.f32 %v3993_v15, %v8017_v23  ;;  %v4517_v48 = vpop.f32.mrb[54].mxu1 }
 0x516   :  { %v4535_v45 = vadd.f32 %v4534_v2, %v8028_v49  ;;  %v4538_v51 = vadd.f32 %v4517_v48, %v3731_v6  ;;  %v3996_v52 = vpop.f32.mrb[55].mxu1 }
 0x517   :  { %v4537_v63 = vadd.f32 %v4536_v16, %v8028_v49  ;;  %v4540_v14 = vadd.f32 %v3996_v52, %v8019_v5 }
 0x518   :  { %4085 = vst.msk [vmem:[#allocation2 + $0x30] sm:$0xff] %vm8959_vm14, %v4535_v45  ;;  %v4539_v3 = vadd.f32 %v4538_v51, %v8028_v49 }
 0x519   :  { %4083 = vst.msk [vmem:[#allocation2 + $0x20] sm:$0xff] %vm8942_vm1, %v4537_v63  ;;  %v4541_v55 = vadd.f32 %v4540_v14, %v8028_v49 }
 0x51a   :  { %4086 = vst.msk [vmem:[#allocation2 + $0x38] sm:$0xff] %vm8960_vm11, %v4539_v3 }
 0x51b   :  { %4084 = vst.msk [vmem:[#allocation2 + $0x28] sm:$0xff] %vm8961_vm6, %v4541_v55  ;;  %v4520_v23 = vpop.f32.mrb[56].mxu1 }
 0x51c   :  { %v4542_v33 = vadd.f32 %v4520_v23, %v3744_v56  ;;  %v4009_v22 = vpop.f32.mrb[57].mxu1 }
 0x51d   :  { %v4544_v0 = vadd.f32 %v4009_v22, %v3736_v10  ;;  %v4521_v8 = vpop.f32.mrb[58].mxu1 }
 0x51e   :  { %v4543_v6 = vadd.f32 %v4542_v33, %v8028_v49  ;;  %v4546_v5 = vadd.f32 %v4521_v8, %v3747_v21  ;;  %v4012_v57 = vpop.f32.mrb[59].mxu1 }
 0x51f   :  { %v4545_v44 = vadd.f32 %v4544_v0, %v8028_v49  ;;  %v4548_v59 = vadd.f32 %v4012_v57, %v8021_v25 }
 0x520   :  { %4089 = vst.msk [vmem:[#allocation2 + $0x50] sm:$0xff] %vm8962_vm4, %v4543_v6  ;;  %v4547_v20 = vadd.f32 %v4546_v5, %v8028_v49 }
 0x521   :  { %4087 = vst.msk [vmem:[#allocation2 + $0x40] sm:$0xff] %vm8963_vm13, %v4545_v44  ;;  %v4549_v11 = vadd.f32 %v4548_v59, %v8028_v49 }
 0x522   :  { %4090 = vst.msk [vmem:[#allocation2 + $0x58] sm:$0xff] %vm8964_vm15, %v4547_v20 }
 0x523   :  { %4088 = vst.msk [vmem:[#allocation2 + $0x48] sm:$0xff] %vm8965_vm0, %v4549_v11  ;;  %v4524_v41 = vpop.f32.mrb[60].mxu1 }
 0x524   :  { %v4550_v10 = vadd.f32 %v4524_v41, %v3760_v31  ;;  %v4025_v43 = vpop.f32.mrb[61].mxu1 }
 0x525   :  { %v4552_v53 = vadd.f32 %v4025_v43, %v3752_v18  ;;  %v4525_v38 = vpop.f32.mrb[62].mxu1 }
 0x526   :  { %v4551_v50 = vadd.f32 %v4550_v10, %v8028_v49  ;;  %v4554_v25 = vadd.f32 %v4525_v38, %v3763_v47  ;;  %v4028_v39 = vpop.f32.mrb[63].mxu1 }
 0x527   :  { %v4553_v9 = vadd.f32 %v4552_v53, %v8028_v49  ;;  %v4556_v56 = vadd.f32 %v4028_v39, %v8023_v54 }
 0x528   :  { %4093 = vst.msk [vmem:[#allocation2 + $0x70] sm:$0xff] %vm8966_vm9, %v4551_v50  ;;  %v4555_v21 = vadd.f32 %v4554_v25, %v8028_v49 }
 0x529   :  { %4091 = vst.msk [vmem:[#allocation2 + $0x60] sm:$0xff] %vm8967_vm2, %v4553_v9  ;;  %v4557_v19 = vadd.f32 %v4556_v56, %v8028_v49 }
 0x52a   :  { %4094 = vst.msk [vmem:[#allocation2 + $0x78] sm:$0xff] %vm8968_vm5, %v4555_v21 }
 0x52b   :  { %4092 = vst.msk [vmem:[#allocation2 + $0x68] sm:$0xff] %vm8969_vm8, %v4557_v19 }
 0x52c   :  { %5210 = shalt.err (!%p5207_p4)
}
 0x52d   :  { %s5211_s30 = scalar_lea.hbm %s8092_s10, 2048 }
 0x52e   :  { %p5212_p5 = scmp.ne.s32.totalorder %s8092_s10, %s5211_s30  ;;  %p5215_p6 = scmp.lt.u32.totalorder %s5211_s30, %s8092_s10 }
 0x530   :  { %p5217_p7 = pnand %p5215_p6, %p5212_p5 }
 0x532   :  { %5220 = shalt.err (!%p5217_p7)
}
 0x533   :  { %s5230_s2 = smov 128   ;;  %s5231_s3 = smov 8  }
 0x534   :  { %4106 = dma.vmem_to_hbm [thread:$0]  %s4101_s15, 2048, %s8092_s10, [#allocation3], %s5230_s2, %s5230_s2, %s5231_s3  }
 0x535   :  { %5221 = dma.done.wait [#allocation3], 2048  }
 0x536   :  { %5222 = vsyncadd [#allocation3], 4294965248 }
 0x537   :  { %4110 = vsyncpa [#allocation3], 1 }

</bundles_post_ra>
